<compile_context>
chip_gen: v7x
topology: tpu7x:2x2x1
jax: 0.10.0
libtpu: 0.0.40
codegen_flags: <defaults>
</compile_context>

<pallas_src>
import functools
import math

import jax
import jax.numpy as jnp
from jax.experimental import pallas as pl
from jax.experimental.pallas import tpu as pltpu


def transformer_block_kernel(
    x_ref,                 # (1, S, D)   f32  -- full sequence (for K/V)
    xq_ref,                # (1, TQ, D)  f32  -- this step's query rows (residual path)
    wqkv_ref, bqkv_ref,    # (D, 3P) bf16, (1, 3P) f32
    wp_ref, bp_ref,        # (P, D)  bf16, (1, D)  f32
    w1_ref, b1_ref,        # (D, F)  bf16, (1, F)  f32
    w2_ref, b2_ref,        # (F, D)  bf16, (1, D)  f32
    g1_ref, be1_ref,       # (1, D) f32   LayerNorm 1
    g2_ref, be2_ref,       # (1, D) f32   LayerNorm 2
    o_ref,                 # (1, TQ, D)
    *, n_heads: int, scale: float, eps: float,
):
    P = wp_ref.shape[0]
    D = wp_ref.shape[1]
    hd = P // n_heads
    tq = xq_ref.shape[1]

    xq = xq_ref[0]                                  # (TQ, D) f32 residual path
    xq_bf = xq.astype(jnp.bfloat16)
    x_full_bf = x_ref[0].astype(jnp.bfloat16)       # (S, D) bf16 matmul operand

    # ---- fused QKV projection (bf16 operands, f32 accumulation on the MXU) ----
    # Q only needs this tile's rows; K/V need the whole sequence.
    # Softmax scale is folded into q (O(TQ*P) instead of O(TQ*S) VALU work).
    q = (jnp.dot(xq_bf, wqkv_ref[:, 0:P],
                 preferred_element_type=jnp.float32) + bqkv_ref[:, 0:P]) * scale
    kv = (jnp.dot(x_full_bf, wqkv_ref[:, P:3 * P],
                  preferred_element_type=jnp.float32) + bqkv_ref[:, P:3 * P])
    k = kv[:, 0:P]                                  # (S, P) f32
    v = kv[:, P:2 * P]                              # (S, P) f32

    # ---- per-head attention, accumulated directly into the output projection ----
    # Static unroll; scores via dot_general contracting the last dims (no XLU
    # transpose of K); no concatenate of head outputs.
    y = jnp.zeros((tq, D), jnp.float32)
    for h in range(n_heads):
        lo = h * hd
        qh = q[:, lo:lo + hd].astype(jnp.bfloat16)  # (TQ, hd)
        kh = k[:, lo:lo + hd].astype(jnp.bfloat16)  # (S, hd)
        vh = v[:, lo:lo + hd].astype(jnp.bfloat16)  # (S, hd)

        s = jax.lax.dot_general(
            qh, kh, (((1,), (1,)), ((), ())),
            preferred_element_type=jnp.float32)     # (TQ, S) f32
        s = s - jnp.max(s, axis=-1, keepdims=True)
        e = jnp.exp(s)
        att = e * pl.reciprocal(jnp.sum(e, axis=-1, keepdims=True), approx=True)

        yh = jnp.dot(att.astype(jnp.bfloat16), vh,
                     preferred_element_type=jnp.float32)           # (TQ, hd)
        y = y + jnp.dot(yh.astype(jnp.bfloat16), wp_ref[lo:lo + hd, :],
                        preferred_element_type=jnp.float32)        # (TQ, D)
    y = y + bp_ref[...]

    # ---- residual + LayerNorm 1 (f32) ----
    z = xq + y
    mu = jnp.mean(z, axis=-1, keepdims=True)
    var = jnp.mean((z - mu) ** 2, axis=-1, keepdims=True)
    z = (z - mu) * jax.lax.rsqrt(var + eps) * g1_ref[...] + be1_ref[...]

    # ---- feed-forward: Linear -> GELU (exact, erf) -> Linear ----
    hdd = (jnp.dot(z.astype(jnp.bfloat16), w1_ref[...],
                   preferred_element_type=jnp.float32) + b1_ref[...])
    hdd = 0.5 * hdd * (1.0 + jax.lax.erf(hdd * (1.0 / math.sqrt(2.0))))
    f = (jnp.dot(hdd.astype(jnp.bfloat16), w2_ref[...],
                 preferred_element_type=jnp.float32) + b2_ref[...])

    # ---- residual + LayerNorm 2 (f32) ----
    z2 = z + f
    mu2 = jnp.mean(z2, axis=-1, keepdims=True)
    var2 = jnp.mean((z2 - mu2) ** 2, axis=-1, keepdims=True)
    out = (z2 - mu2) * jax.lax.rsqrt(var2 + eps) * g2_ref[...] + be2_ref[...]

    o_ref[0] = out.astype(o_ref.dtype)


def transformer_block(x, params, *, n_heads: int, q_tile: int = 128):
    B, S, D = x.shape
    (wq, bq, wk, bk, wv, bv, wp, bp, w1, b1, w2, b2, g1, be1, g2, be2) = params
    P = wq.shape[1]
    F = w1.shape[1]
    scale = 1.0 / math.sqrt(P // n_heads)

    tq = min(q_tile, S)
    assert S % tq == 0, "sequence length must be divisible by the query tile"
    nq = S // tq

    # Fuse QKV weights/biases; store matmul weights as bf16 (halves HBM/VMEM traffic).
    wqkv = jnp.concatenate([wq, wk, wv], axis=1).astype(jnp.bfloat16)   # (D, 3P)
    bqkv = jnp.concatenate([bq, bk, bv], axis=1)                        # (1, 3P) f32
    wp_b = wp.astype(jnp.bfloat16)
    w1_b = w1.astype(jnp.bfloat16)
    w2_b = w2.astype(jnp.bfloat16)

    kernel = functools.partial(
        transformer_block_kernel, n_heads=n_heads, scale=scale, eps=1e-5)

    def full2d(shape):
        return pl.BlockSpec(shape, lambda b, qi: (0, 0))

    return pl.pallas_call(
        kernel,
        out_shape=jax.ShapeDtypeStruct((B, S, D), x.dtype),
        grid_spec=pltpu.PrefetchScalarGridSpec(
            num_scalar_prefetch=0,
            grid=(B, nq),
            in_specs=[
                pl.BlockSpec((1, S, D), lambda b, qi: (b, 0, 0)),    # x, full sequence
                pl.BlockSpec((1, tq, D), lambda b, qi: (b, qi, 0)),  # x, query tile
                full2d((D, 3 * P)), full2d((1, 3 * P)),              # fused qkv
                full2d((P, D)), full2d((1, D)),                      # output proj
                full2d((D, F)), full2d((1, F)),                      # ffn linear 1
                full2d((F, D)), full2d((1, D)),                      # ffn linear 2
                full2d((1, D)), full2d((1, D)),                      # ln1 gamma/beta
                full2d((1, D)), full2d((1, D)),                      # ln2 gamma/beta
            ],
            out_specs=pl.BlockSpec((1, tq, D), lambda b, qi: (b, qi, 0)),
        ),
        compiler_params=pltpu.CompilerParams(
            dimension_semantics=("parallel", "parallel"),
            vmem_limit_bytes=48 * 1024 * 1024,
        ),
    )(x, x, wqkv, bqkv, wp_b, bp, w1_b, b1, w2_b, b2, g1, be1, g2, be2)


def reference_transformer_block(x, params, *, n_heads: int):
    """Pure-JAX f32 reference mirroring the PyTorch forward exactly."""
    (wq, bq, wk, bk, wv, bv, wp, bp, w1, b1, w2, b2, g1, be1, g2, be2) = params
    B, S, D = x.shape
    P = wq.shape[1]
    h = P // n_heads
    scale = 1.0 / math.sqrt(h)

    def heads(t):  # (B,S,P) -> (B,n,S,h)
        return t.reshape(B, S, n_heads, h).transpose(0, 2, 1, 3)

    q = heads(x @ wq + bq)
    k = heads(x @ wk + bk)
    v = heads(x @ wv + bv)
    att = jax.nn.softmax(jnp.einsum("bnsh,bnth->bnst", q, k) * scale, axis=-1)
    y = jnp.einsum("bnst,bnth->bnsh", att, v).transpose(0, 2, 1, 3).reshape(B, S, P)
    y = y @ wp + bp

    def ln(t, g, be):
        mu = jnp.mean(t, axis=-1, keepdims=True)
        var = jnp.mean((t - mu) ** 2, axis=-1, keepdims=True)
        return (t - mu) * jax.lax.rsqrt(var + 1e-5) * g + be

    z = ln(x + y, g1, be1)
    hdd = z @ w1 + b1
    hdd = 0.5 * hdd * (1.0 + jax.lax.erf(hdd / math.sqrt(2.0)))
    f = hdd @ w2 + b2
    return ln(z + f, g2, be2)


if __name__ == "__main__":
    # Lane-dense small test: D, P, head_dim, F all multiples of 128.
    B, S, D = 2, 128, 256
    n_heads = 2
    proj_dim = D            # head_dim = 128
    ffn = 4 * D             # 1024

    key = jax.random.PRNGKey(0)
    ks = jax.random.split(key, 16)

    def init_w(k, shape):
        return (jax.random.normal(k, shape, jnp.float32) * 0.05).astype(jnp.float32)

    params = (
        init_w(ks[0], (D, proj_dim)), init_w(ks[1], (1, proj_dim)),     # query
        init_w(ks[2], (D, proj_dim)), init_w(ks[3], (1, proj_dim)),     # key
        init_w(ks[4], (D, proj_dim)), init_w(ks[5], (1, proj_dim)),     # value
        init_w(ks[6], (proj_dim, D)), init_w(ks[7], (1, D)),            # proj
        init_w(ks[8], (D, ffn)),      init_w(ks[9], (1, ffn)),          # ffn linear 1
        init_w(ks[10], (ffn, D)),     init_w(ks[11], (1, D)),           # ffn linear 2
        jnp.ones((1, D), jnp.float32), jnp.zeros((1, D), jnp.float32),  # layer_norm_1
        jnp.ones((1, D), jnp.float32), jnp.zeros((1, D), jnp.float32),  # layer_norm_2
    )

    x = jax.random.normal(ks[12], (B, S, D), jnp.float32)

    out = transformer_block(x, params, n_heads=n_heads)
    out = jax.block_until_ready(out)

    ref = reference_transformer_block(x, params, n_heads=n_heads)
    assert out.shape == (B, S, D)
    max_err = float(jnp.max(jnp.abs(out - ref)))
    # bf16 matmuls + approx reciprocal -> looser tolerance than the f32 reference.
    assert jnp.allclose(out, ref, atol=3e-2, rtol=3e-2), (
        f"mismatch vs. JAX reference (max abs err {max_err:.4f})")

    print("KERNEL_OK")
</pallas_src>

<mosaic_0001>
module attributes {stable_mosaic.version = 11 : i64} {
  func.func @transformer_block_kernel(%arg0: i32, %arg1: i32, %arg2: memref<1x128x256xf32, #tpu.memory_space<vmem>>, %arg3: memref<1x128x256xf32, #tpu.memory_space<vmem>>, %arg4: memref<256x768xbf16, #tpu.memory_space<vmem>>, %arg5: memref<1x768xf32, #tpu.memory_space<vmem>>, %arg6: memref<256x256xbf16, #tpu.memory_space<vmem>>, %arg7: memref<1x256xf32, #tpu.memory_space<vmem>>, %arg8: memref<256x1024xbf16, #tpu.memory_space<vmem>>, %arg9: memref<1x1024xf32, #tpu.memory_space<vmem>>, %arg10: memref<1024x256xbf16, #tpu.memory_space<vmem>>, %arg11: memref<1x256xf32, #tpu.memory_space<vmem>>, %arg12: memref<1x256xf32, #tpu.memory_space<vmem>>, %arg13: memref<1x256xf32, #tpu.memory_space<vmem>>, %arg14: memref<1x256xf32, #tpu.memory_space<vmem>>, %arg15: memref<1x256xf32, #tpu.memory_space<vmem>>, %arg16: memref<1x128x256xf32, #tpu.memory_space<vmem>>) attributes {dimension_semantics = [#tpu.dimension_semantics<parallel>, #tpu.dimension_semantics<parallel>], iteration_bounds = array<i64: 2, 1>, scalar_prefetch = 0 : i64, scratch_operands = 0 : i64, tpu.core_type = #tpu.core_type<tc>, window_params = [{transform_indices = @transform_0, window_bounds = array<i64: 1, 128, 256>}, {transform_indices = @transform_1, window_bounds = array<i64: 1, 128, 256>}, {pipeline_mode = #tpu.pipeline_mode<synchronous>, transform_indices = @transform_2, window_bounds = array<i64: 256, 768>}, {pipeline_mode = #tpu.pipeline_mode<synchronous>, transform_indices = @transform_3, window_bounds = array<i64: 1, 768>}, {pipeline_mode = #tpu.pipeline_mode<synchronous>, transform_indices = @transform_4, window_bounds = array<i64: 256, 256>}, {pipeline_mode = #tpu.pipeline_mode<synchronous>, transform_indices = @transform_5, window_bounds = array<i64: 1, 256>}, {pipeline_mode = #tpu.pipeline_mode<synchronous>, transform_indices = @transform_6, window_bounds = array<i64: 256, 1024>}, {pipeline_mode = #tpu.pipeline_mode<synchronous>, transform_indices = @transform_7, window_bounds = array<i64: 1, 1024>}, {pipeline_mode = #tpu.pipeline_mode<synchronous>, transform_indices = @transform_8, window_bounds = array<i64: 1024, 256>}, {pipeline_mode = #tpu.pipeline_mode<synchronous>, transform_indices = @transform_9, window_bounds = array<i64: 1, 256>}, {pipeline_mode = #tpu.pipeline_mode<synchronous>, transform_indices = @transform_10, window_bounds = array<i64: 1, 256>}, {pipeline_mode = #tpu.pipeline_mode<synchronous>, transform_indices = @transform_11, window_bounds = array<i64: 1, 256>}, {pipeline_mode = #tpu.pipeline_mode<synchronous>, transform_indices = @transform_12, window_bounds = array<i64: 1, 256>}, {pipeline_mode = #tpu.pipeline_mode<synchronous>, transform_indices = @transform_13, window_bounds = array<i64: 1, 256>}, {transform_indices = @transform_14, window_bounds = array<i64: 1, 128, 256>}]} {
    %c0 = arith.constant 0 : index
    %c0_0 = arith.constant 0 : index
    %c0_1 = arith.constant 0 : index
    %0 = vector.load %arg3[%c0, %c0_0, %c0_1] : memref<1x128x256xf32, #tpu.memory_space<vmem>>, vector<1x128x256xf32>
    %1 = vector.shape_cast %0 : vector<1x128x256xf32> to vector<128x256xf32>
    %2 = arith.truncf %1 : vector<128x256xf32> to vector<128x256xbf16>
    %c0_2 = arith.constant 0 : index
    %c0_3 = arith.constant 0 : index
    %c0_4 = arith.constant 0 : index
    %3 = vector.load %arg2[%c0_2, %c0_3, %c0_4] : memref<1x128x256xf32, #tpu.memory_space<vmem>>, vector<1x128x256xf32>
    %4 = vector.shape_cast %3 : vector<1x128x256xf32> to vector<128x256xf32>
    %5 = arith.truncf %4 : vector<128x256xf32> to vector<128x256xbf16>
    %c0_5 = arith.constant 0 : index
    %c0_6 = arith.constant 0 : index
    %6 = vector.load %arg4[%c0_5, %c0_6] : memref<256x768xbf16, #tpu.memory_space<vmem>>, vector<256x256xbf16>
    %cst = arith.constant dense<0.000000e+00> : vector<128x256xf32>
    %7 = tpu.matmul %2, %6, %cst {dimension_numbers = #tpu.dot_dimension_numbers<[1], [0], [0], [1], [0, 0, 1, 1], [], []>} : vector<128x256xbf16>, vector<256x256xbf16>, vector<128x256xf32> -> vector<128x256xf32>
    %c0_7 = arith.constant 0 : index
    %c0_8 = arith.constant 0 : index
    %8 = vector.load %arg5[%c0_7, %c0_8] : memref<1x768xf32, #tpu.memory_space<vmem>>, vector<1x256xf32>
    %9 = vector.broadcast %8 : vector<1x256xf32> to vector<128x256xf32>
    %10 = arith.addf %7, %9 : vector<128x256xf32>
    %cst_9 = arith.constant 0.0883883461 : f32
    %11 = vector.broadcast %cst_9 : f32 to vector<128x256xf32>
    %12 = arith.mulf %10, %11 : vector<128x256xf32>
    %c0_10 = arith.constant 0 : index
    %c256 = arith.constant 256 : index
    %13 = vector.load %arg4[%c0_10, %c256] : memref<256x768xbf16, #tpu.memory_space<vmem>>, vector<256x512xbf16>
    %cst_11 = arith.constant dense<0.000000e+00> : vector<128x512xf32>
    %14 = tpu.matmul %5, %13, %cst_11 {dimension_numbers = #tpu.dot_dimension_numbers<[1], [0], [0], [1], [0, 0, 1, 1], [], []>} : vector<128x256xbf16>, vector<256x512xbf16>, vector<128x512xf32> -> vector<128x512xf32>
    %c0_12 = arith.constant 0 : index
    %c256_13 = arith.constant 256 : index
    %15 = vector.load %arg5[%c0_12, %c256_13] : memref<1x768xf32, #tpu.memory_space<vmem>>, vector<1x512xf32>
    %16 = vector.broadcast %15 : vector<1x512xf32> to vector<128x512xf32>
    %17 = arith.addf %14, %16 : vector<128x512xf32>
    %18 = vector.extract_strided_slice %17 {offsets = [0, 0], sizes = [128, 256], strides = [1, 1]} : vector<128x512xf32> to vector<128x256xf32>
    %19 = vector.extract_strided_slice %17 {offsets = [0, 256], sizes = [128, 256], strides = [1, 1]} : vector<128x512xf32> to vector<128x256xf32>
    %cst_14 = arith.constant 0.000000e+00 : f32
    %20 = vector.broadcast %cst_14 : f32 to vector<128x256xf32>
    %21 = vector.extract_strided_slice %12 {offsets = [0, 0], sizes = [128, 128], strides = [1, 1]} : vector<128x256xf32> to vector<128x128xf32>
    %22 = arith.truncf %21 : vector<128x128xf32> to vector<128x128xbf16>
    %23 = vector.extract_strided_slice %18 {offsets = [0, 0], sizes = [128, 128], strides = [1, 1]} : vector<128x256xf32> to vector<128x128xf32>
    %24 = arith.truncf %23 : vector<128x128xf32> to vector<128x128xbf16>
    %25 = vector.extract_strided_slice %19 {offsets = [0, 0], sizes = [128, 128], strides = [1, 1]} : vector<128x256xf32> to vector<128x128xf32>
    %26 = arith.truncf %25 : vector<128x128xf32> to vector<128x128xbf16>
    %cst_15 = arith.constant dense<0.000000e+00> : vector<128x128xf32>
    %27 = tpu.matmul %22, %24, %cst_15 {dimension_numbers = #tpu.dot_dimension_numbers<[1], [1], [0], [0], [0, 0, 1, 0], [], []>} : vector<128x128xbf16>, vector<128x128xbf16>, vector<128x128xf32> -> vector<128x128xf32>
    %cst_16 = arith.constant dense<0xFF800000> : vector<128xf32>
    %28 = vector.multi_reduction <maximumf>, %27, %cst_16 [1] : vector<128x128xf32> to vector<128xf32>
    %29 = vector.shape_cast %28 : vector<128xf32> to vector<128x1xf32>
    %30 = vector.broadcast %29 : vector<128x1xf32> to vector<128x128xf32>
    %31 = arith.subf %27, %30 : vector<128x128xf32>
    %32 = math.exp %31 : vector<128x128xf32>
    %cst_17 = arith.constant dense<0.000000e+00> : vector<128xf32>
    %33 = vector.multi_reduction <add>, %32, %cst_17 [1] : vector<128x128xf32> to vector<128xf32>
    %34 = vector.shape_cast %33 : vector<128xf32> to vector<128x1xf32>
    %35 = tpu.reciprocal %34 {approx = true} : vector<128x1xf32> -> vector<128x1xf32>
    %36 = vector.broadcast %35 : vector<128x1xf32> to vector<128x128xf32>
    %37 = arith.mulf %32, %36 : vector<128x128xf32>
    %38 = arith.truncf %37 : vector<128x128xf32> to vector<128x128xbf16>
    %cst_18 = arith.constant dense<0.000000e+00> : vector<128x128xf32>
    %39 = tpu.matmul %38, %26, %cst_18 {dimension_numbers = #tpu.dot_dimension_numbers<[1], [0], [0], [1], [0, 0, 1, 1], [], []>} : vector<128x128xbf16>, vector<128x128xbf16>, vector<128x128xf32> -> vector<128x128xf32>
    %40 = arith.truncf %39 : vector<128x128xf32> to vector<128x128xbf16>
    %c0_19 = arith.constant 0 : index
    %c0_20 = arith.constant 0 : index
    %41 = vector.load %arg6[%c0_19, %c0_20] : memref<256x256xbf16, #tpu.memory_space<vmem>>, vector<128x256xbf16>
    %cst_21 = arith.constant dense<0.000000e+00> : vector<128x256xf32>
    %42 = tpu.matmul %40, %41, %cst_21 {dimension_numbers = #tpu.dot_dimension_numbers<[1], [0], [0], [1], [0, 0, 1, 1], [], []>} : vector<128x128xbf16>, vector<128x256xbf16>, vector<128x256xf32> -> vector<128x256xf32>
    %43 = arith.addf %20, %42 : vector<128x256xf32>
    %44 = vector.extract_strided_slice %12 {offsets = [0, 128], sizes = [128, 128], strides = [1, 1]} : vector<128x256xf32> to vector<128x128xf32>
    %45 = arith.truncf %44 : vector<128x128xf32> to vector<128x128xbf16>
    %46 = vector.extract_strided_slice %18 {offsets = [0, 128], sizes = [128, 128], strides = [1, 1]} : vector<128x256xf32> to vector<128x128xf32>
    %47 = arith.truncf %46 : vector<128x128xf32> to vector<128x128xbf16>
    %48 = vector.extract_strided_slice %19 {offsets = [0, 128], sizes = [128, 128], strides = [1, 1]} : vector<128x256xf32> to vector<128x128xf32>
    %49 = arith.truncf %48 : vector<128x128xf32> to vector<128x128xbf16>
    %cst_22 = arith.constant dense<0.000000e+00> : vector<128x128xf32>
    %50 = tpu.matmul %45, %47, %cst_22 {dimension_numbers = #tpu.dot_dimension_numbers<[1], [1], [0], [0], [0, 0, 1, 0], [], []>} : vector<128x128xbf16>, vector<128x128xbf16>, vector<128x128xf32> -> vector<128x128xf32>
    %cst_23 = arith.constant dense<0xFF800000> : vector<128xf32>
    %51 = vector.multi_reduction <maximumf>, %50, %cst_23 [1] : vector<128x128xf32> to vector<128xf32>
    %52 = vector.shape_cast %51 : vector<128xf32> to vector<128x1xf32>
    %53 = vector.broadcast %52 : vector<128x1xf32> to vector<128x128xf32>
    %54 = arith.subf %50, %53 : vector<128x128xf32>
    %55 = math.exp %54 : vector<128x128xf32>
    %cst_24 = arith.constant dense<0.000000e+00> : vector<128xf32>
    %56 = vector.multi_reduction <add>, %55, %cst_24 [1] : vector<128x128xf32> to vector<128xf32>
    %57 = vector.shape_cast %56 : vector<128xf32> to vector<128x1xf32>
    %58 = tpu.reciprocal %57 {approx = true} : vector<128x1xf32> -> vector<128x1xf32>
    %59 = vector.broadcast %58 : vector<128x1xf32> to vector<128x128xf32>
    %60 = arith.mulf %55, %59 : vector<128x128xf32>
    %61 = arith.truncf %60 : vector<128x128xf32> to vector<128x128xbf16>
    %cst_25 = arith.constant dense<0.000000e+00> : vector<128x128xf32>
    %62 = tpu.matmul %61, %49, %cst_25 {dimension_numbers = #tpu.dot_dimension_numbers<[1], [0], [0], [1], [0, 0, 1, 1], [], []>} : vector<128x128xbf16>, vector<128x128xbf16>, vector<128x128xf32> -> vector<128x128xf32>
    %63 = arith.truncf %62 : vector<128x128xf32> to vector<128x128xbf16>
    %c128 = arith.constant 128 : index
    %c0_26 = arith.constant 0 : index
    %64 = vector.load %arg6[%c128, %c0_26] : memref<256x256xbf16, #tpu.memory_space<vmem>>, vector<128x256xbf16>
    %cst_27 = arith.constant dense<0.000000e+00> : vector<128x256xf32>
    %65 = tpu.matmul %63, %64, %cst_27 {dimension_numbers = #tpu.dot_dimension_numbers<[1], [0], [0], [1], [0, 0, 1, 1], [], []>} : vector<128x128xbf16>, vector<128x256xbf16>, vector<128x256xf32> -> vector<128x256xf32>
    %66 = arith.addf %43, %65 : vector<128x256xf32>
    %c0_28 = arith.constant 0 : index
    %c0_29 = arith.constant 0 : index
    %67 = vector.load %arg7[%c0_28, %c0_29] : memref<1x256xf32, #tpu.memory_space<vmem>>, vector<1x256xf32>
    %68 = vector.broadcast %67 : vector<1x256xf32> to vector<128x256xf32>
    %69 = arith.addf %66, %68 : vector<128x256xf32>
    %70 = arith.addf %1, %69 : vector<128x256xf32>
    %cst_30 = arith.constant dense<0.000000e+00> : vector<128xf32>
    %71 = vector.multi_reduction <add>, %70, %cst_30 [1] : vector<128x256xf32> to vector<128xf32>
    %72 = vector.shape_cast %71 : vector<128xf32> to vector<128x1xf32>
    %cst_31 = arith.constant 2.560000e+02 : f32
    %73 = vector.broadcast %cst_31 : f32 to vector<128x1xf32>
    %74 = arith.divf %72, %73 : vector<128x1xf32>
    %75 = vector.broadcast %74 : vector<128x1xf32> to vector<128x256xf32>
    %76 = arith.subf %70, %75 : vector<128x256xf32>
    %77 = arith.mulf %76, %76 : vector<128x256xf32>
    %cst_32 = arith.constant dense<0.000000e+00> : vector<128xf32>
    %78 = vector.multi_reduction <add>, %77, %cst_32 [1] : vector<128x256xf32> to vector<128xf32>
    %79 = vector.shape_cast %78 : vector<128xf32> to vector<128x1xf32>
    %cst_33 = arith.constant 2.560000e+02 : f32
    %80 = vector.broadcast %cst_33 : f32 to vector<128x1xf32>
    %81 = arith.divf %79, %80 : vector<128x1xf32>
    %82 = vector.broadcast %74 : vector<128x1xf32> to vector<128x256xf32>
    %83 = arith.subf %70, %82 : vector<128x256xf32>
    %cst_34 = arith.constant 9.99999974E-6 : f32
    %84 = vector.broadcast %cst_34 : f32 to vector<128x1xf32>
    %85 = arith.addf %81, %84 : vector<128x1xf32>
    %86 = math.rsqrt %85 : vector<128x1xf32>
    %87 = vector.broadcast %86 : vector<128x1xf32> to vector<128x256xf32>
    %88 = arith.mulf %83, %87 : vector<128x256xf32>
    %c0_35 = arith.constant 0 : index
    %c0_36 = arith.constant 0 : index
    %89 = vector.load %arg12[%c0_35, %c0_36] : memref<1x256xf32, #tpu.memory_space<vmem>>, vector<1x256xf32>
    %90 = vector.broadcast %89 : vector<1x256xf32> to vector<128x256xf32>
    %91 = arith.mulf %88, %90 : vector<128x256xf32>
    %c0_37 = arith.constant 0 : index
    %c0_38 = arith.constant 0 : index
    %92 = vector.load %arg13[%c0_37, %c0_38] : memref<1x256xf32, #tpu.memory_space<vmem>>, vector<1x256xf32>
    %93 = vector.broadcast %92 : vector<1x256xf32> to vector<128x256xf32>
    %94 = arith.addf %91, %93 : vector<128x256xf32>
    %95 = arith.truncf %94 : vector<128x256xf32> to vector<128x256xbf16>
    %c0_39 = arith.constant 0 : index
    %c0_40 = arith.constant 0 : index
    %96 = vector.load %arg8[%c0_39, %c0_40] : memref<256x1024xbf16, #tpu.memory_space<vmem>>, vector<256x1024xbf16>
    %cst_41 = arith.constant dense<0.000000e+00> : vector<128x1024xf32>
    %97 = tpu.matmul %95, %96, %cst_41 {dimension_numbers = #tpu.dot_dimension_numbers<[1], [0], [0], [1], [0, 0, 1, 1], [], []>} : vector<128x256xbf16>, vector<256x1024xbf16>, vector<128x1024xf32> -> vector<128x1024xf32>
    %c0_42 = arith.constant 0 : index
    %c0_43 = arith.constant 0 : index
    %98 = vector.load %arg9[%c0_42, %c0_43] : memref<1x1024xf32, #tpu.memory_space<vmem>>, vector<1x1024xf32>
    %99 = vector.broadcast %98 : vector<1x1024xf32> to vector<128x1024xf32>
    %100 = arith.addf %97, %99 : vector<128x1024xf32>
    %cst_44 = arith.constant 5.000000e-01 : f32
    %101 = vector.broadcast %cst_44 : f32 to vector<128x1024xf32>
    %102 = arith.mulf %101, %100 : vector<128x1024xf32>
    %cst_45 = arith.constant 0.707106769 : f32
    %103 = vector.broadcast %cst_45 : f32 to vector<128x1024xf32>
    %104 = arith.mulf %100, %103 : vector<128x1024xf32>
    %105 = math.erf %104 : vector<128x1024xf32>
    %cst_46 = arith.constant 1.000000e+00 : f32
    %106 = vector.broadcast %cst_46 : f32 to vector<128x1024xf32>
    %107 = arith.addf %106, %105 : vector<128x1024xf32>
    %108 = arith.mulf %102, %107 : vector<128x1024xf32>
    %109 = arith.truncf %108 : vector<128x1024xf32> to vector<128x1024xbf16>
    %c0_47 = arith.constant 0 : index
    %c0_48 = arith.constant 0 : index
    %110 = vector.load %arg10[%c0_47, %c0_48] : memref<1024x256xbf16, #tpu.memory_space<vmem>>, vector<1024x256xbf16>
    %cst_49 = arith.constant dense<0.000000e+00> : vector<128x256xf32>
    %111 = tpu.matmul %109, %110, %cst_49 {dimension_numbers = #tpu.dot_dimension_numbers<[1], [0], [0], [1], [0, 0, 1, 1], [], []>} : vector<128x1024xbf16>, vector<1024x256xbf16>, vector<128x256xf32> -> vector<128x256xf32>
    %c0_50 = arith.constant 0 : index
    %c0_51 = arith.constant 0 : index
    %112 = vector.load %arg11[%c0_50, %c0_51] : memref<1x256xf32, #tpu.memory_space<vmem>>, vector<1x256xf32>
    %113 = vector.broadcast %112 : vector<1x256xf32> to vector<128x256xf32>
    %114 = arith.addf %111, %113 : vector<128x256xf32>
    %115 = arith.addf %94, %114 : vector<128x256xf32>
    %cst_52 = arith.constant dense<0.000000e+00> : vector<128xf32>
    %116 = vector.multi_reduction <add>, %115, %cst_52 [1] : vector<128x256xf32> to vector<128xf32>
    %117 = vector.shape_cast %116 : vector<128xf32> to vector<128x1xf32>
    %cst_53 = arith.constant 2.560000e+02 : f32
    %118 = vector.broadcast %cst_53 : f32 to vector<128x1xf32>
    %119 = arith.divf %117, %118 : vector<128x1xf32>
    %120 = vector.broadcast %119 : vector<128x1xf32> to vector<128x256xf32>
    %121 = arith.subf %115, %120 : vector<128x256xf32>
    %122 = arith.mulf %121, %121 : vector<128x256xf32>
    %cst_54 = arith.constant dense<0.000000e+00> : vector<128xf32>
    %123 = vector.multi_reduction <add>, %122, %cst_54 [1] : vector<128x256xf32> to vector<128xf32>
    %124 = vector.shape_cast %123 : vector<128xf32> to vector<128x1xf32>
    %cst_55 = arith.constant 2.560000e+02 : f32
    %125 = vector.broadcast %cst_55 : f32 to vector<128x1xf32>
    %126 = arith.divf %124, %125 : vector<128x1xf32>
    %127 = vector.broadcast %119 : vector<128x1xf32> to vector<128x256xf32>
    %128 = arith.subf %115, %127 : vector<128x256xf32>
    %cst_56 = arith.constant 9.99999974E-6 : f32
    %129 = vector.broadcast %cst_56 : f32 to vector<128x1xf32>
    %130 = arith.addf %126, %129 : vector<128x1xf32>
    %131 = math.rsqrt %130 : vector<128x1xf32>
    %132 = vector.broadcast %131 : vector<128x1xf32> to vector<128x256xf32>
    %133 = arith.mulf %128, %132 : vector<128x256xf32>
    %c0_57 = arith.constant 0 : index
    %c0_58 = arith.constant 0 : index
    %134 = vector.load %arg14[%c0_57, %c0_58] : memref<1x256xf32, #tpu.memory_space<vmem>>, vector<1x256xf32>
    %135 = vector.broadcast %134 : vector<1x256xf32> to vector<128x256xf32>
    %136 = arith.mulf %133, %135 : vector<128x256xf32>
    %c0_59 = arith.constant 0 : index
    %c0_60 = arith.constant 0 : index
    %137 = vector.load %arg15[%c0_59, %c0_60] : memref<1x256xf32, #tpu.memory_space<vmem>>, vector<1x256xf32>
    %138 = vector.broadcast %137 : vector<1x256xf32> to vector<128x256xf32>
    %139 = arith.addf %136, %138 : vector<128x256xf32>
    %c0_61 = arith.constant 0 : index
    %c0_62 = arith.constant 0 : index
    %c0_63 = arith.constant 0 : index
    %140 = vector.load %arg16[%c0_61, %c0_62, %c0_63] : memref<1x128x256xf32, #tpu.memory_space<vmem>>, vector<1x128x256xf32>
    %141 = vector.shape_cast %140 : vector<1x128x256xf32> to vector<128x256xf32>
    %142 = vector.shape_cast %139 : vector<128x256xf32> to vector<1x128x256xf32>
    tpu.vector_store %arg16[%c0_61, %c0_62, %c0_63], %142 {strides = array<i32>} : memref<1x128x256xf32, #tpu.memory_space<vmem>>, vector<1x128x256xf32>,
    return
  }
  func.func @transform_0(%arg0: i32, %arg1: i32) -> (i32, i32, i32) {
    %c0_i32 = arith.constant 0 : i32
    %c0_i32_0 = arith.constant 0 : i32
    %c0_i32_1 = arith.constant 0 : i32
    return %arg0, %c0_i32, %c0_i32_0 : i32, i32, i32
  }
  func.func @transform_1(%arg0: i32, %arg1: i32) -> (i32, i32, i32) {
    %c0_i32 = arith.constant 0 : i32
    %c0_i32_0 = arith.constant 0 : i32
    return %arg0, %arg1, %c0_i32 : i32, i32, i32
  }
  func.func @transform_2(%arg0: i32, %arg1: i32) -> (i32, i32) {
    %c0_i32 = arith.constant 0 : i32
    %c0_i32_0 = arith.constant 0 : i32
    %c0_i32_1 = arith.constant 0 : i32
    return %c0_i32, %c0_i32_0 : i32, i32
  }
  func.func @transform_3(%arg0: i32, %arg1: i32) -> (i32, i32) {
    %c0_i32 = arith.constant 0 : i32
    %c0_i32_0 = arith.constant 0 : i32
    %c0_i32_1 = arith.constant 0 : i32
    return %c0_i32, %c0_i32_0 : i32, i32
  }
  func.func @transform_4(%arg0: i32, %arg1: i32) -> (i32, i32) {
    %c0_i32 = arith.constant 0 : i32
    %c0_i32_0 = arith.constant 0 : i32
    %c0_i32_1 = arith.constant 0 : i32
    return %c0_i32, %c0_i32_0 : i32, i32
  }
  func.func @transform_5(%arg0: i32, %arg1: i32) -> (i32, i32) {
    %c0_i32 = arith.constant 0 : i32
    %c0_i32_0 = arith.constant 0 : i32
    %c0_i32_1 = arith.constant 0 : i32
    return %c0_i32, %c0_i32_0 : i32, i32
  }
  func.func @transform_6(%arg0: i32, %arg1: i32) -> (i32, i32) {
    %c0_i32 = arith.constant 0 : i32
    %c0_i32_0 = arith.constant 0 : i32
    %c0_i32_1 = arith.constant 0 : i32
    return %c0_i32, %c0_i32_0 : i32, i32
  }
  func.func @transform_7(%arg0: i32, %arg1: i32) -> (i32, i32) {
    %c0_i32 = arith.constant 0 : i32
    %c0_i32_0 = arith.constant 0 : i32
    %c0_i32_1 = arith.constant 0 : i32
    return %c0_i32, %c0_i32_0 : i32, i32
  }
  func.func @transform_8(%arg0: i32, %arg1: i32) -> (i32, i32) {
    %c0_i32 = arith.constant 0 : i32
    %c0_i32_0 = arith.constant 0 : i32
    %c0_i32_1 = arith.constant 0 : i32
    return %c0_i32, %c0_i32_0 : i32, i32
  }
  func.func @transform_9(%arg0: i32, %arg1: i32) -> (i32, i32) {
    %c0_i32 = arith.constant 0 : i32
    %c0_i32_0 = arith.constant 0 : i32
    %c0_i32_1 = arith.constant 0 : i32
    return %c0_i32, %c0_i32_0 : i32, i32
  }
  func.func @transform_10(%arg0: i32, %arg1: i32) -> (i32, i32) {
    %c0_i32 = arith.constant 0 : i32
    %c0_i32_0 = arith.constant 0 : i32
    %c0_i32_1 = arith.constant 0 : i32
    return %c0_i32, %c0_i32_0 : i32, i32
  }
  func.func @transform_11(%arg0: i32, %arg1: i32) -> (i32, i32) {
    %c0_i32 = arith.constant 0 : i32
    %c0_i32_0 = arith.constant 0 : i32
    %c0_i32_1 = arith.constant 0 : i32
    return %c0_i32, %c0_i32_0 : i32, i32
  }
  func.func @transform_12(%arg0: i32, %arg1: i32) -> (i32, i32) {
    %c0_i32 = arith.constant 0 : i32
    %c0_i32_0 = arith.constant 0 : i32
    %c0_i32_1 = arith.constant 0 : i32
    return %c0_i32, %c0_i32_0 : i32, i32
  }
  func.func @transform_13(%arg0: i32, %arg1: i32) -> (i32, i32) {
    %c0_i32 = arith.constant 0 : i32
    %c0_i32_0 = arith.constant 0 : i32
    %c0_i32_1 = arith.constant 0 : i32
    return %c0_i32, %c0_i32_0 : i32, i32
  }
  func.func @transform_14(%arg0: i32, %arg1: i32) -> (i32, i32, i32) {
    %c0_i32 = arith.constant 0 : i32
    %c0_i32_0 = arith.constant 0 : i32
    return %arg0, %arg1, %c0_i32 : i32, i32, i32
  }
}

</mosaic_0001>

<bundles_post_ra>
// kernel: tpu_custom_call.1
= control target key start
LH: loop header
LB: loop body
LE: loop exit
PB: predicated region body
PF: predicated region fallthrough
CT: control target
= control target key end

     0   :  { %s12654_s0 = inlined_call_operand.hbm [shape: f32[2,128,256], index: 0, kind: input, shape index: {}]   ;;  %s12655_s1 = inlined_call_operand.hbm [shape: f32[2,128,256], index: 1, kind: input, shape index: {}]   ;;  %s12656_s2 = inlined_call_operand.hbm [shape: bf16[256,768], index: 2, kind: input, shape index: {}]   ;;  %s12657_s3 = inlined_call_operand.vmem [shape: f32[1,768], index: 3, kind: input, shape index: {}]   ;;  %s12658_s4 = inlined_call_operand.hbm [shape: bf16[256,256], index: 4, kind: input, shape index: {}]   ;;  %s12659_s5 = inlined_call_operand.vmem [shape: f32[1,256], index: 5, kind: input, shape index: {}]   ;;  %s12660_s6 = inlined_call_operand.hbm [shape: bf16[256,1024], index: 6, kind: input, shape index: {}]   ;;  %s12661_s7 = inlined_call_operand.vmem [shape: f32[1,1024], index: 7, kind: input, shape index: {}]   ;;  %s12662_s8 = inlined_call_operand.hbm [shape: bf16[1024,256], index: 8, kind: input, shape index: {}]   ;;  %s12663_s9 = inlined_call_operand.vmem [shape: f32[1,256], index: 9, kind: input, shape index: {}]   ;;  %s12664_s10 = inlined_call_operand.vmem [shape: f32[1,256], index: 10, kind: input, shape index: {}]   ;;  %s12665_s11 = inlined_call_operand.vmem [shape: f32[1,256], index: 11, kind: input, shape index: {}]   ;;  %s12666_s12 = inlined_call_operand.vmem [shape: f32[1,256], index: 12, kind: input, shape index: {}]   ;;  %s12667_s13 = inlined_call_operand.vmem [shape: f32[1,256], index: 13, kind: input, shape index: {}]   ;;  %s12668_s14 = inlined_call_operand.hbm [shape: f32[2,128,256], index: 14, kind: output, shape index: {}]  }
   0x1   :  { %12753 = sst [smem:[#allocation81_spill]] %s12654_s0 }
   0x2   :  { %12754 = sst [smem:[#allocation82_spill]] %s12656_s2 }
   0x3   :  { %12755 = sst [smem:[#allocation83_spill]] %s12658_s4 }
   0x4   :  { %12756 = sst [smem:[#allocation84_spill]] %s12660_s6 }
   0x5   :  { %12757 = sst [smem:[#allocation85_spill]] %s12661_s7 }
   0x6   :  { %12758 = sst [smem:[#allocation86_spill]] %s12663_s9 }
   0x7   :  { %12759 = sst [smem:[#allocation87_spill]] %s12665_s11 }
   0x8   :  { %12760 = sst [smem:[#allocation88_spill]] %s12666_s12 }
   0x9   :  { %12761 = sst [smem:[#allocation89_spill]] %s12667_s13 }
   0xa   :  { %12762 = sst [smem:[#allocation90_spill]] %s12668_s14 }
   0xb   :  { %19 = vsyncpa [#allocation3], 0 }
   0xc   :  { %21 = vsyncpa [#allocation3 + $0x1], 0 }
   0xd   :  { %22 = vsyncpa [#allocation6], 0 }
   0xe   :  { %24 = vsyncpa [#allocation6 + $0x1], 0 }
   0xf   :  { %25 = vsyncpa [#allocation9], 0 }
  0x10   :  { %26 = vsyncpa [#allocation12], 0 }
  0x11   :  { %27 = vsyncpa [#allocation4], 0 }
  0x12   :  { %29 = vsyncpa [#allocation4 + $0x1], 0  ;;  %s9180_s29 = smov 0   ;;  %s9182_s30 = smov 0  }
  0x13   :  { %s9184_s15 = smov 0   ;;  %s9186_s16 = smov 0  }
  0x14   :  { %s9188_s17 = smov 0   ;;  %s9190_s18 = smov 0  }
  0x15 LB: > { %12763 = sst [smem:[#allocation20_spill]] %s9065_s29  ;;  %s9211_s19 = sadd.s32 4294967295, %s9085_s18   ;;  %s9085_s18 = sphi %s9190_s18, %s35_s18   ;;  %s9081_s17 = sphi %s9188_s17, %s12995_s17   ;;  %s9077_s16 = sphi %s9186_s16, %s12994_s16   ;;  %s9073_s15 = sphi %s9184_s15, %s12993_s15   ;;  %s9069_s30 = sphi %s9182_s30, %s12992_s30   ;;  %s9065_s29 = sphi %s9180_s29, %s12991_s29  }
  0x16   : > { %12764 = sst [smem:[#allocation21_spill]] %s9077_s16  ;;  %s7066_s20 = sadd.s32 4294967294, %s9085_s18  }
  0x17   : > { %p67_p0 = scmp.ne.s32.totalorder %s9069_s30, %s9065_s29  ;;  %p12672_p1 = scmp.eq.s32.totalorder %s9211_s19, 0 }
  0x18   : > { %p379_p3 = scmp.eq.s32.totalorder %s7066_s20, 1  ;;  %p7067_p5 = scmp.ge.s32.totalorder %s9085_s18, 1 }
  0x19   : > { %p9220_p4 = por %p12672_p1, %p67_p0  ;;  %p386_p7 = scmp.lt.s32.totalorder %s9085_s18, 3 }
  0x1a   : > { %p9225_p6 = por %p379_p3, %p67_p0  ;;  %s9087_s24 = smov [#allocation7]  }
  0x1b   : > { %s12765_s21 = scalar_select %p9220_p4, 1, 0 }
  0x1c   : > { %s12766_s22 = scalar_select %p9225_p6, 1, 0 }
  0x1d   : > { %p9230_p8 = pnand %p7067_p5, %p386_p7  ;;  %s398_s25 = sshll.u32 %s9087_s24, 4  ;;  %s9234_s25 = int_to_ptr.vmem [resolvable:$true] %s398_s25 }
  0x1e   : > { %12767 = sst [smem:[#allocation22_spill]] %s12766_s22  ;;  %s9088_s27 = smov [#allocation8]  }
  0x1f   : > { %s12768_s23 = scalar_select %p9230_p8, 1, 0 }
  0x20   : > { %p7853_p9 = pneg %p9230_p8  ;;  %s414_s28 = sshll.u32 %s9088_s27, 4  ;;  %s9245_s28 = int_to_ptr.vmem [resolvable:$true] %s414_s28 }
  0x21   : > { %s12770_s2 = sld [smem:[#allocation82_spill]] }
  0x22   : > { %p9241_p11 = pnand %p7853_p9, %p12672_p1 }
  0x24   : > { %p9255_p13 = pneg %p9241_p11 }
  0x27   : > { %s8815_s29 = scalar_lea.hbm %s12770_s2, 12288 }
  0x28   : > { %p8816_p12 = scmp.ne.s32.totalorder %s12770_s2, %s8815_s29  ;;  %p8822_p5 = scmp.lt.u32.totalorder %s8815_s29, %s12770_s2 }
  0x2a   : > { %p8818_p0 = pnand %p9255_p13, %p8816_p12 }
  0x2c   : > { %p8819_p3 = pneg %p8818_p0 }
  0x2e   : > { %p8824_p7 = pnand %p8822_p5, %p8819_p3 }
  0x30   : > { %8827 = shalt.err (!%p8824_p7)
}
  0x31   : > { %s8828_s14 = scalar_lea.vmem %s9234_s25, 12288  ;;  %p8836_p2 = scmp.lt.s32.totalorder %s9234_s25, %s9234_s25 }
  0x32   : > { %p8829_p9 = scmp.ne.s32.totalorder %s9234_s25, %s8828_s14  ;;  %p8837_p6 = scmp.lt.s32.totalorder %s8828_s14, %s8828_s14 }
  0x34   : > { %p8831_p10 = pnand %p8829_p9, %p9255_p13  ;;  %p8838_p12 = por %p8837_p6, %p8836_p2 }
  0x36   : > { %p8832_p1 = pneg %p8831_p10 }
  0x38   : > { %p8839_p0 = pnand %p8838_p12, %p8832_p1 }
  0x3a   : > { %8842 = shalt.err (!%p8839_p0)
}
  0x3b   : > { %s9089_s22 = smov 384   ;;  %s9090_s13 = smov 24  }
  0x3c   : > { %7856 = dma.hbm_to_vmem [thread:$0]  (!%p9241_p11), %s12770_s2, 12288, %s9234_s25, [#allocation6], %s9089_s22, %s9089_s22, %s9090_s13  }
  0x3d   : > { %s12772_s4 = sld [smem:[#allocation83_spill]] }
  0x43   : > { %s8843_s12 = scalar_lea.hbm %s12772_s4, 4096 }
  0x44   : > { %p8844_p2 = scmp.ne.s32.totalorder %s12772_s4, %s8843_s12  ;;  %p8850_p10 = scmp.lt.u32.totalorder %s8843_s12, %s12772_s4 }
  0x46   : > { %p8846_p1 = pnand %p8844_p2, %p9255_p13 }
  0x48   : > { %p8847_p6 = pneg %p8846_p1 }
  0x4a   : > { %p8852_p3 = pnand %p8850_p10, %p8847_p6 }
  0x4c   : > { %8855 = shalt.err (!%p8852_p3)
}
  0x4d   : > { %s8856_s25 = scalar_lea.vmem %s9245_s28, 4096  ;;  %p8864_p12 = scmp.lt.s32.totalorder %s9245_s28, %s9245_s28 }
  0x4e   : > { %p8857_p5 = scmp.ne.s32.totalorder %s9245_s28, %s8856_s25  ;;  %p8865_p0 = scmp.lt.s32.totalorder %s8856_s25, %s8856_s25 }
  0x50   : > { %p8859_p7 = pnand %p8857_p5, %p9255_p13  ;;  %p8866_p2 = por %p8865_p0, %p8864_p12 }
  0x52   : > { %p8860_p9 = pneg %p8859_p7 }
  0x54   : > { %p8867_p1 = pnand %p8866_p2, %p8860_p9 }
  0x56   : > { %8870 = shalt.err (!%p8867_p1)
}
  0x57   : > { %s12676_s7 = smov 128   ;;  %s12677_s9 = smov 8  }
  0x58   : > { %7859 = dma.hbm_to_vmem [thread:$0]  (!%p9241_p11), %s12772_s4, 4096, %s9245_s28, [#allocation9], %s12676_s7, %s12676_s7, %s12677_s9  }
  0x59   : > { %s9093_s22 = smov [#allocation10]   ;;  %s12773_s6 = sld [smem:[#allocation84_spill]] }
  0x5a   : > { %s430_s13 = sshll.u32 %s9093_s22, 4  ;;  %s431_s13 = int_to_ptr.vmem [resolvable:$true] %s430_s13 }
  0x5f   : > { %s8871_s24 = scalar_lea.hbm %s12773_s6, 16384 }
  0x60   : > { %p8872_p6 = scmp.ne.s32.totalorder %s12773_s6, %s8871_s24  ;;  %p8878_p5 = scmp.lt.u32.totalorder %s8871_s24, %s12773_s6 }
  0x62   : > { %p8874_p10 = pnand %p8872_p6, %p9255_p13 }
  0x64   : > { %p8875_p3 = pneg %p8874_p10 }
  0x66   : > { %p8880_p7 = pnand %p8878_p5, %p8875_p3 }
  0x68   : > { %8883 = shalt.err (!%p8880_p7)
}
  0x69   : > { %s8884_s28 = scalar_lea.vmem %s431_s13, 16384  ;;  %p8892_p2 = scmp.lt.s32.totalorder %s431_s13, %s431_s13 }
  0x6a   : > { %p8885_p9 = scmp.ne.s32.totalorder %s431_s13, %s8884_s28  ;;  %p8893_p1 = scmp.lt.s32.totalorder %s8884_s28, %s8884_s28 }
  0x6c   : > { %p8887_p12 = pnand %p8885_p9, %p9255_p13  ;;  %p8894_p4 = por %p8893_p1, %p8892_p2 }
  0x6e   : > { %p8888_p0 = pneg %p8887_p12 }
  0x70   : > { %p8895_p8 = pnand %p8894_p4, %p8888_p0 }
  0x72   : > { %8898 = shalt.err (!%p8895_p8)
}
  0x73   : > { %s9094_s11 = smov 512   ;;  %s9095_s12 = smov 32  }
  0x74   : > { %7862 = dma.hbm_to_vmem [thread:$0]  (!%p9241_p11), %s12773_s6, 16384, %s431_s13, [#allocation9], %s9094_s11, %s9094_s11, %s9095_s12  }
  0x75   : > { %s9096_s29 = smov [#allocation11]   ;;  %s8899_s14 = scalar_lea.hbm %s12662_s8, 16384 }
  0x76   : > { %s446_s20 = sshll.u32 %s9096_s29, 4  ;;  %p8900_p4 = scmp.ne.s32.totalorder %s12662_s8, %s8899_s14  ;;  %s447_s20 = int_to_ptr.vmem [resolvable:$true] %s446_s20 }
  0x77   : > { %p8906_p10 = scmp.lt.u32.totalorder %s8899_s14, %s12662_s8 }
  0x78   : > { %p8902_p8 = pnand %p8900_p4, %p9255_p13 }
  0x7a   : > { %p8903_p6 = pneg %p8902_p8 }
  0x7c   : > { %p8908_p3 = pnand %p8906_p10, %p8903_p6 }
  0x7e   : > { %8911 = shalt.err (!%p8908_p3)
}
  0x7f   : > { %s8912_s13 = scalar_lea.vmem %s447_s20, 16384  ;;  %p8920_p12 = scmp.lt.s32.totalorder %s447_s20, %s447_s20 }
  0x80   : > { %p8913_p5 = scmp.ne.s32.totalorder %s447_s20, %s8912_s13  ;;  %p8921_p0 = scmp.lt.s32.totalorder %s8912_s13, %s8912_s13 }
  0x82   : > { %p8915_p7 = pnand %p8913_p5, %p9255_p13  ;;  %p8922_p2 = por %p8921_p0, %p8920_p12 }
  0x84   : > { %p8916_p9 = pneg %p8915_p7 }
  0x86   : > { %p8923_p1 = pnand %p8922_p2, %p8916_p9 }
  0x88   : > { %8926 = shalt.err (!%p8923_p1)
}
  0x89   : > { %s12774_s11 = smov 8   ;;  %s12775_s12 = smov 128  }
  0x8a   : > { %7865 = dma.hbm_to_vmem [thread:$0]  (!%p9241_p11), %s12662_s8, 16384, %s447_s20, [#allocation12], %s12775_s12, %s12775_s12, %s12774_s11  }
  0x8b   : > { %s47_s16 = sadd.s32 1, %s9081_s17  ;;  %s54_s26 = sadd.s32 1, %s9073_s15 }
  0x8c   : > { %p49_p13 = scmp.ge.s32.totalorder %s47_s16, 2  ;;  %p61_p4 = scmp.ne.s32.totalorder %s9073_s15, %s9069_s30 }
  0x8d   : > { %p62_p8 = scmp.eq.s32.totalorder %s9085_s18, 0  ;;  %p7881_p6 = scmp.lt.s32.totalorder %s9085_s18, 2 }
  0x8e   : > { %s12997_s16 = smov (%p49_p13, %s47_s16), 0  ;;  %p12776_p3 = scmp.eq.s32.totalorder %s9211_s19, 1 }
  0x8f   : > { %p63_p10 = por %p62_p8, %p61_p4  ;;  %s51_s22 = ssub.s32 %s9081_s17, %s12997_s16 }
  0x90   : > { %p9351_p5 = por %p12776_p3, %p61_p4  ;;  %s475_s29 = sand.u32 1, %s9073_s15  }
  0x91   : > { %p52_p11 = scmp.eq.s32.totalorder %s51_s22, 0  ;;  %s9358_s20 = sshll.u32 %s475_s29, 8 }
  0x92   : > { %s7476_s24 = sshll.u32 %s9081_s17, 12  ;;  %s12778_s0 = sld [smem:[#allocation81_spill]] }
  0x93   : > { %s9362_s27 = scalar_select %p52_p11, %s9073_s15, %s54_s26  }
  0x94   : > { %s479_s13 = scalar_lea.vmem [#allocation2], %s9358_s20  ;;  %p9374_p7 = pnand %p7881_p6, %p63_p10 }
  0x95   : > { %s486_s11 = sshll.u32 %s479_s13, 4  ;;  %s9380_s7 = scalar_lea.sflag [#allocation3], %s475_s29  ;;  %s9378_s11 = int_to_ptr.vmem [resolvable:$true] %s486_s11 }
  0x96   : > { %p8929_p12 = pneg %p9374_p7 }
  0x98   : > { %s9369_s28 = scalar_lea.hbm %s12778_s0, %s7476_s24  ;;  %s8932_s14 = scalar_lea.hbm %s12778_s0, 8192 }
  0x99   : > { %s8927_s9 = scalar_lea.hbm %s9369_s28, 4096  ;;  %p8933_p1 = scmp.lt.u32.totalorder %s9369_s28, %s12778_s0 }
  0x9a   : > { %p8928_p9 = scmp.ne.s32.totalorder %s9369_s28, %s8927_s9  ;;  %p8934_p13 = scmp.lt.u32.totalorder %s8932_s14, %s8927_s9 }
  0x9b   : > { %p8936_p8 = scmp.lt.u32.totalorder %s8927_s9, %s9369_s28 }
  0x9c   : > { %p8930_p0 = pnand %p8929_p12, %p8928_p9  ;;  %p8935_p4 = por %p8934_p13, %p8933_p1 }
  0x9e   : > { %p8931_p2 = pneg %p8930_p0  ;;  %p8937_p6 = por %p8936_p8, %p8935_p4 }
  0xa0   : > { %p8938_p10 = pnand %p8937_p6, %p8931_p2 }
  0xa2   : > { %8941 = shalt.err (!%p8938_p10)
}
  0xa3   : > { %s8942_s29 = scalar_lea.vmem %s9378_s11, 4096  ;;  %s9097_s26 = smov [#allocation2]  }
  0xa4   : > { %p8943_p3 = scmp.ne.s32.totalorder %s9378_s11, %s8942_s29  ;;  %s8947_s22 = sshll.u32 %s9097_s26, 4  ;;  %s8948_s22 = int_to_ptr.vmem [resolvable:$false] %s8947_s22 }
  0xa5   : > { %s8949_s25 = scalar_lea.vmem %s8948_s22, 8192  ;;  %p8950_p0 = scmp.lt.s32.totalorder %s9378_s11, %s8948_s22 }
  0xa6   : > { %p8945_p11 = pnand %p8943_p3, %p8929_p12  ;;  %p8951_p1 = scmp.lt.s32.totalorder %s8949_s25, %s8942_s29 }
  0xa8   : > { %p8946_p9 = pneg %p8945_p11  ;;  %p8952_p13 = por %p8951_p1, %p8950_p0 }
  0xaa   : > { %p8953_p4 = pnand %p8952_p13, %p8946_p9 }
  0xac   : > { %8956 = shalt.err (!%p8953_p4)
}
  0xad   : > { %s9098_s9 = smov 256   ;;  %s9099_s14 = smov 16  }
  0xae   : > { %7869 = dma.hbm_to_vmem [thread:$0]  (!%p9374_p7), %s9369_s28, 4096, %s9378_s11, %s9380_s7, %s9098_s9, %s9098_s9, %s9099_s14  }
  0xaf   : > { %s9416_s26 = scalar_lea.hbm %s12655_s1, %s7476_s24  ;;  %s500_s22 = scalar_lea.vmem [#allocation5], %s9358_s20 }
  0xb0   : > { %s510_s25 = sshll.u32 %s500_s22, 4  ;;  %s496_s0 = sand.u32 1, %s9085_s18   ;;  %s9420_s25 = int_to_ptr.vmem [resolvable:$true] %s510_s25 }
  0xb1   : > { %s9422_s4 = scalar_lea.sflag [#allocation6], %s496_s0  ;;  %s8957_s6 = scalar_lea.hbm %s9416_s26, 4096 }
  0xb2   : > { %p8958_p2 = scmp.ne.s32.totalorder %s9416_s26, %s8957_s6  ;;  %s8962_s11 = scalar_lea.hbm %s12655_s1, 8192 }
  0xb3   : > { %p8963_p10 = scmp.lt.u32.totalorder %s9416_s26, %s12655_s1  ;;  %p8964_p3 = scmp.lt.u32.totalorder %s8962_s11, %s8957_s6 }
  0xb4   : > { %p8960_p8 = pnand %p8958_p2, %p8929_p12  ;;  %p8966_p9 = scmp.lt.u32.totalorder %s8957_s6, %s9416_s26 }
  0xb5   : > { %p8965_p11 = por %p8964_p3, %p8963_p10 }
  0xb6   : > { %p8961_p6 = pneg %p8960_p8 }
  0xb7   : > { %p8967_p0 = por %p8966_p9, %p8965_p11 }
  0xb9   : > { %p8968_p1 = pnand %p8967_p0, %p8961_p6 }
  0xbb   : > { %8971 = shalt.err (!%p8968_p1)
}
  0xbc   : > { %s8972_s0 = scalar_lea.vmem %s9420_s25, 4096  ;;  %s9100_s20 = smov [#allocation5]  }
  0xbd   : > { %p8973_p13 = scmp.ne.s32.totalorder %s9420_s25, %s8972_s0  ;;  %s8977_s29 = sshll.u32 %s9100_s20, 4  ;;  %s8978_s29 = int_to_ptr.vmem [resolvable:$false] %s8977_s29 }
  0xbe   : > { %s8979_s22 = scalar_lea.vmem %s8978_s29, 8192  ;;  %p8980_p8 = scmp.lt.s32.totalorder %s9420_s25, %s8978_s29 }
  0xbf   : > { %p8975_p4 = pnand %p8973_p13, %p8929_p12  ;;  %p8981_p10 = scmp.lt.s32.totalorder %s8979_s22, %s8972_s0 }
  0xc1   : > { %p8976_p2 = pneg %p8975_p4  ;;  %p8982_p3 = por %p8981_p10, %p8980_p8 }
  0xc3   : > { %p8983_p11 = pnand %p8982_p3, %p8976_p2 }
  0xc5   : > { %8986 = shalt.err (!%p8983_p11)
}
  0xc6   : > { %7872 = dma.hbm_to_vmem [thread:$0]  (!%p9374_p7), %s9416_s26, 4096, %s9420_s25, %s9422_s4, %s9098_s9, %s9098_s9, %s9099_s14  }
  0xc7   : > { %p12780_p12 = scmp.ne.s32.totalorder %s12768_s23, 0 }
  0xc9   : > { %522 = sbr.rel (%p12780_p12) target bundleno = 3027 (0xbd3), region = 76 }
  0xd0   : > { %s9454_s6 = sand.u32 1, %s9069_s30   ;;  %p12781_p6 = scmp.ne.s32.totalorder %s12765_s21, 0 }
  0xd1   : > { %s9457_s28 = sshll.u32 %s9454_s6, 8  ;;  %s525_s12 = scalar_lea.sflag [#allocation3], %s9454_s6 }
  0xd2   : > { %s9461_s24 = scalar_lea.vmem [#allocation2], %s9457_s28 }
  0xd3   : > { %9040 = dma.done.wait (%p12781_p6), %s525_s12, 4096  }
  0xd4   : > { %9042 = vsyncadd (%p12781_p6), %s525_s12, 4294963200  ;;  %s533_s4 = sand.u32 1, %s9211_s19   ;;  %s9469_s9 = scalar_lea.vmem [#allocation5], %s9457_s28 }
  0xd5   : > { %s534_s23 = scalar_lea.sflag [#allocation6], %s533_s4 }
  0xd6   : > { %9044 = dma.done.wait (%p12781_p6), %s534_s23, 4096  }
  0xd7   : > { %9046 = vsyncadd (%p12781_p6), %s534_s23, 4294963200  ;;  %p12782_p7 = scmp.eq.s32.totalorder %s9211_s19, 0 }
  0xd9   : > { %9048 = dma.done.wait (%p12782_p7), [#allocation6], 12288   ;;  %p12783_p9 = pmov %p12782_p7 }
  0xda   : > { %p12784_p0 = pmov %p12782_p7 }
  0xdb   : > { %9050 = vsyncadd (%p12783_p9), [#allocation6], 4294955008 }
  0xdc   : > { %9052 = dma.done.wait (%p12784_p0), [#allocation9], 20480   ;;  %p12785_p1 = pmov %p12784_p0 }
  0xdd   : > { %p12786_p13 = pmov %p12784_p0 }
  0xde   : > { %9054 = vsyncadd (%p12785_p1), [#allocation9], 4294946816 }
  0xdf   : > { %9056 = dma.done.wait (%p12786_p13), [#allocation12], 16384   ;;  %p12787_p4 = pmov %p12784_p0 }
  0xe0   : > { %v7950_v0 = vld [vmem:[#allocation7 + $0x4] ss:$24 sps:$4 sm:$0xff]   ;;  %v7952_v1 = vld [vmem:[#allocation7] ss:$24 sps:$4 sm:$0xff]   ;;  %v7953_v2 = vld [vmem:[#allocation7 + $0x34] ss:$24 sps:$4 sm:$0xff]  }
  0xe1   : > { %9058 = vsyncadd (%p12787_p4), [#allocation12], 4294950912  ;;  %906 = vmatprep.subr.bf16.mxu1 %v7950_v0  ;;  %v7955_v3 = vld [vmem:[#allocation7 + $0x30] ss:$24 sps:$4 sm:$0xff]   ;;  %v7956_v4 = vld [vmem:[#allocation7 + $0x64] ss:$24 sps:$4 sm:$0xff]  }
  0xe2   : > { %907 = vmatpush1.bf16.msra.mxu1 %v7952_v1  ;;  %v7958_v5 = vld [vmem:[#allocation7 + $0x60] ss:$24 sps:$4 sm:$0xff]   ;;  %v7959_v6 = vld [vmem:[#allocation7 + $0x94] ss:$24 sps:$4 sm:$0xff]   ;;  %v7961_v7 = vld [vmem:[#allocation7 + $0x90] ss:$24 sps:$4 sm:$0xff]  }
  0xe3   : > { %908 = vmatprep.subr.bf16.mxu1 %v7953_v2  ;;  %v7962_v8 = vld [vmem:[#allocation7 + $0xc4] ss:$24 sps:$4 sm:$0xff]   ;;  %v7964_v9 = vld [vmem:[#allocation7 + $0xc0] ss:$24 sps:$4 sm:$0xff]   ;;  %v7965_v10 = vld [vmem:[#allocation7 + $0xf4] ss:$24 sps:$4 sm:$0xff]  }
  0xe4   : > { %v7967_v11 = vld [vmem:[#allocation7 + $0xf0] ss:$24 sps:$4 sm:$0xff]   ;;  %v7968_v12 = vld [vmem:[#allocation7 + $0x124] ss:$24 sps:$4 sm:$0xff]   ;;  %v7970_v16 = vld [vmem:[#allocation7 + $0x120] ss:$24 sps:$4 sm:$0xff]  }
  0xe5   : > { %v607_v13 = vld [vmem:[%s9469_s9 + $0x8] sm:$0xff]  ;;  %v609_v14 = vld [vmem:[%s9469_s9 + $0x18] sm:$0xff]  ;;  %v606_v38 = vld [vmem:[%s9469_s9] sm:$0xff]  ;;  %s12807_s29 = sld [smem:[#allocation87_spill]]  ;;  %s12947_s21 = sld [smem:[#allocation86_spill]] }
  0xe6   : > { %909 = vmatpush1.bf16.msra.mxu1 %v7955_v3  ;;  %v639_v15 = vpack.c.bf16 %v609_v14, %v607_v13  ;;  %v7971_v17 = vld [vmem:[#allocation7 + $0x154] ss:$24 sps:$4 sm:$0xff]   ;;  %v7973_v18 = vld [vmem:[#allocation7 + $0x150] ss:$24 sps:$4 sm:$0xff]   ;;  %v7974_v19 = vld [vmem:[#allocation7 + $0x184] ss:$24 sps:$4 sm:$0xff]  }
  0xe7   : > { %910 = vmatprep.subr.bf16.mxu1 %v7956_v4  ;;  %v7976_v20 = vld [vmem:[#allocation7 + $0x180] ss:$24 sps:$4 sm:$0xff]   ;;  %v7977_v21 = vld [vmem:[#allocation7 + $0x1b4] ss:$24 sps:$4 sm:$0xff]   ;;  %v7979_v22 = vld [vmem:[#allocation7 + $0x1b0] ss:$24 sps:$4 sm:$0xff]  }
  0xe8   : > { %938 = vmatprep.mubr.bf16.mxu1 %v639_v15  ;;  %v7980_v23 = vld [vmem:[#allocation7 + $0x1e4] ss:$24 sps:$4 sm:$0xff]   ;;  %v7982_v24 = vld [vmem:[#allocation7 + $0x1e0] ss:$24 sps:$4 sm:$0xff]   ;;  %v7983_v25 = vld [vmem:[#allocation7 + $0x214] ss:$24 sps:$4 sm:$0xff]  }
  0xe9   : > { %v7985_v26 = vld [vmem:[#allocation7 + $0x210] ss:$24 sps:$4 sm:$0xff]   ;;  %v7986_v27 = vld [vmem:[#allocation7 + $0x244] ss:$24 sps:$4 sm:$0xff]   ;;  %v7988_v28 = vld [vmem:[#allocation7 + $0x240] ss:$24 sps:$4 sm:$0xff]  }
  0xea   : > { %911 = vmatpush1.bf16.msra.mxu1 %v7958_v5  ;;  %v7989_v29 = vld [vmem:[#allocation7 + $0x274] ss:$24 sps:$4 sm:$0xff]   ;;  %v7991_v30 = vld [vmem:[#allocation7 + $0x270] ss:$24 sps:$4 sm:$0xff]   ;;  %v7992_v31 = vld [vmem:[#allocation7 + $0x2a4] ss:$24 sps:$4 sm:$0xff]  }
  0xeb   : > { %912 = vmatprep.subr.bf16.mxu1 %v7959_v6  ;;  %v655_v32 = vld [vmem:[%s9461_s24 + $0x8] sm:$0xff]  ;;  %v657_v33 = vld [vmem:[%s9461_s24 + $0x18] sm:$0xff]  ;;  %v608_v39 = vld [vmem:[%s9469_s9 + $0x10] sm:$0xff]  ;;  %s12982_s25 = sld [smem:[#allocation88_spill]]  ;;  %s12983_s13 = sld [smem:[#allocation89_spill]] }
  0xec   : > { %v9491_v34 = vpack.c.bf16 %v657_v33, %v655_v32  ;;  %v7994_v35 = vld [vmem:[#allocation7 + $0x2a0] ss:$24 sps:$4 sm:$0xff]   ;;  %v7995_v36 = vld [vmem:[#allocation7 + $0x2d4] ss:$24 sps:$4 sm:$0xff]   ;;  %v7997_v37 = vld [vmem:[#allocation7 + $0x2d0] ss:$24 sps:$4 sm:$0xff]   ;;  %v638_v45 = vpack.c.bf16 %v608_v39, %v606_v38 }
  0xed   : > { %v8000_v40 = vld [vmem:[#allocation7 + $0xc] ss:$24 sps:$4 sm:$0xff]   ;;  %v613_v42 = vld [vmem:[%s9469_s9 + $0x38] sm:$0xff]  ;;  %v8048_v44 = vld [vmem:[#allocation7 + $0x10] ss:$24 sps:$4 sm:$0xff]   ;;  %s12478_s0 = scalar_lea.vmem [#allocation13], %s9457_s28 }
  0xee   : > { %913 = vmatpush1.bf16.msra.mxu1 %v7961_v7  ;;  %1602 = vmatprep.mubr.bf16.mxu0 %v9491_v34  ;;  %v611_v41 = vld [vmem:[%s9469_s9 + $0x28] sm:$0xff]  ;;  %v8003_v47 = vld [vmem:[#allocation7 + $0x3c] ss:$24 sps:$4 sm:$0xff]   ;;  %v8051_v50 = vld [vmem:[#allocation7 + $0x40] ss:$24 sps:$4 sm:$0xff]   ;;  %s12984_s28 = sld [smem:[#allocation21_spill]] }
  0xef   : > { %914 = vmatprep.subr.bf16.mxu1 %v7962_v8  ;;  %v8046_v43 = vld [vmem:[#allocation7 + $0x14] ss:$24 sps:$4 sm:$0xff]   ;;  %v7998_v46 = vld [vmem:[#allocation7 + $0x8] ss:$24 sps:$4 sm:$0xff]   ;;  %v641_v48 = vpack.c.bf16 %v613_v42, %v611_v41  ;;  %v8049_v49 = vld [vmem:[#allocation7 + $0x44] ss:$24 sps:$4 sm:$0xff]  }
  0xf0   : > { %1570 = vmatprep.subr.bf16.mxu0 %v8046_v43  ;;  %v8001_v51 = vld [vmem:[#allocation7 + $0x38] ss:$24 sps:$4 sm:$0xff]   ;;  %v610_v52 = vld [vmem:[%s9469_s9 + $0x20] sm:$0xff]  ;;  %v8052_v53 = vld [vmem:[#allocation7 + $0x74] ss:$24 sps:$4 sm:$0xff]   ;;  %s12985_s4 = sld [smem:[#allocation90_spill]] }
  0xf1   : > { %1571 = vmatpush1.bf16.msra.mxu0 %v8048_v44  ;;  %v612_v54 = vld [vmem:[%s9469_s9 + $0x30] sm:$0xff]  ;;  %v8006_v55 = vld [vmem:[#allocation7 + $0x6c] ss:$24 sps:$4 sm:$0xff]   ;;  %v617_v57 = vld [vmem:[%s9469_s9 + $0x58] sm:$0xff] }
  0xf2   : > { %915 = vmatpush1.bf16.msra.mxu1 %v7964_v9  ;;  %1572 = vmatprep.subr.bf16.mxu0 %v8049_v49  ;;  %v615_v56 = vld [vmem:[%s9469_s9 + $0x48] sm:$0xff]  ;;  %v8055_v59 = vld [vmem:[#allocation7 + $0xa4] ss:$24 sps:$4 sm:$0xff]   ;;  %v640_v60 = vpack.c.bf16 %v612_v54, %v610_v52  ;;  %v8057_v0 = vld [vmem:[#allocation7 + $0xa0] ss:$24 sps:$4 sm:$0xff]  }
  0xf3   : > { %916 = vmatprep.subr.bf16.mxu1 %v7965_v10  ;;  %v8054_v58 = vld [vmem:[#allocation7 + $0x70] ss:$24 sps:$4 sm:$0xff]   ;;  %v8009_v62 = vld [vmem:[#allocation7 + $0x9c] ss:$24 sps:$4 sm:$0xff]   ;;  %v643_v63 = vpack.c.bf16 %v617_v57, %v615_v56  ;;  %v614_v2 = vld [vmem:[%s9469_s9 + $0x40] sm:$0xff] }
  0xf4   : > { %v8004_v61 = vld [vmem:[#allocation7 + $0x68] ss:$24 sps:$4 sm:$0xff]   ;;  %v8007_v1 = vld [vmem:[#allocation7 + $0x98] ss:$24 sps:$4 sm:$0xff]   ;;  %v8058_v3 = vld [vmem:[#allocation7 + $0xd4] ss:$24 sps:$4 sm:$0xff]  }
  0xf5   : > { %1573 = vmatpush1.bf16.msra.mxu0 %v8051_v50  ;;  %v616_v4 = vld [vmem:[%s9469_s9 + $0x50] sm:$0xff]  ;;  %v8012_v5 = vld [vmem:[#allocation7 + $0xcc] ss:$24 sps:$4 sm:$0xff]   ;;  %v621_v7 = vld [vmem:[%s9469_s9 + $0x78] sm:$0xff]  ;;  %s7478_s20 = sshll.u32 %s12984_s28, 12 }
  0xf6   : > { %917 = vmatpush1.bf16.msra.mxu1 %v7967_v11  ;;  %1574 = vmatprep.subr.bf16.mxu0 %v8052_v53  ;;  %v619_v6 = vld [vmem:[%s9469_s9 + $0x68] sm:$0xff]  ;;  %v8061_v9 = vld [vmem:[#allocation7 + $0x104] ss:$24 sps:$4 sm:$0xff]   ;;  %v642_v10 = vpack.c.bf16 %v616_v4, %v614_v2  ;;  %v8063_v14 = vld [vmem:[#allocation7 + $0x100] ss:$24 sps:$4 sm:$0xff]   ;;  %s12597_s23 = scalar_lea.hbm %s12985_s4, %s7478_s20 }
  0xf7   : > { %918 = vmatprep.subr.bf16.mxu1 %v7968_v12  ;;  %v8060_v8 = vld [vmem:[#allocation7 + $0xd0] ss:$24 sps:$4 sm:$0xff]   ;;  %v8015_v12 = vld [vmem:[#allocation7 + $0xfc] ss:$24 sps:$4 sm:$0xff]   ;;  %v645_v13 = vpack.c.bf16 %v621_v7, %v619_v6  ;;  %v8024_v33 = vld [vmem:[#allocation7 + $0x18c] ss:$24 sps:$4 sm:$0xff]  }
  0xf8   : > { %v8010_v11 = vld [vmem:[#allocation7 + $0xc8] ss:$24 sps:$4 sm:$0xff]   ;;  %v8013_v15 = vld [vmem:[#allocation7 + $0xf8] ss:$24 sps:$4 sm:$0xff]   ;;  %v8073_v38 = vld [vmem:[#allocation7 + $0x1c4] ss:$24 sps:$4 sm:$0xff]  }
  0xf9   : > { %1575 = vmatpush1.bf16.msra.mxu0 %v8054_v58  ;;  %v624_v32 = vld [vmem:[%s9469_s9 + $0x90] sm:$0xff]  ;;  %v8022_v39 = vld [vmem:[#allocation7 + $0x188] ss:$24 sps:$4 sm:$0xff]   ;;  %v633_v50 = vld [vmem:[%s9469_s9 + $0xd8] sm:$0xff] }
  0xfa   : > { %919 = vmatpush1.bf16.msra.mxu1 %v7970_v16  ;;  %1576 = vmatprep.subr.bf16.mxu0 %v8055_v59  ;;  %v618_v16 = vld [vmem:[%s9469_s9 + $0x60] sm:$0xff]  ;;  %v8027_v41 = vld [vmem:[#allocation7 + $0x1bc] ss:$24 sps:$4 sm:$0xff]   ;;  %v631_v49 = vld [vmem:[%s9469_s9 + $0xc8] sm:$0xff] }
  0xfb   : > { %920 = vmatprep.subr.bf16.mxu1 %v7971_v17  ;;  %v8064_v17 = vld [vmem:[#allocation7 + $0x134] ss:$24 sps:$4 sm:$0xff]   ;;  %v8075_v42 = vld [vmem:[#allocation7 + $0x1c0] ss:$24 sps:$4 sm:$0xff]   ;;  %v8079_v52 = vld [vmem:[#allocation7 + $0x224] ss:$24 sps:$4 sm:$0xff]   ;;  %v651_v57 = vpack.c.bf16 %v633_v50, %v631_v49 }
  0xfc   : > { %v8076_v44 = vld [vmem:[#allocation7 + $0x1f4] ss:$24 sps:$4 sm:$0xff]   ;;  %v8028_v53 = vld [vmem:[#allocation7 + $0x1e8] ss:$24 sps:$4 sm:$0xff]   ;;  %v8031_v59 = vld [vmem:[#allocation7 + $0x218] ss:$24 sps:$4 sm:$0xff]  }
  0xfd   : > { %1577 = vmatpush1.bf16.msra.mxu0 %v8057_v0  ;;  %v8081_v56 = vld [vmem:[#allocation7 + $0x220] ss:$24 sps:$4 sm:$0xff]   ;;  %v8082_v58 = vld [vmem:[#allocation7 + $0x254] ss:$24 sps:$4 sm:$0xff]   ;;  %v8085_v2 = vld [vmem:[#allocation7 + $0x284] ss:$24 sps:$4 sm:$0xff]  }
  0xfe   : > { %921 = vmatpush1.bf16.msra.mxu1 %v7973_v18  ;;  %1578 = vmatprep.subr.bf16.mxu0 %v8058_v3  ;;  %v620_v18 = vld [vmem:[%s9469_s9 + $0x70] sm:$0xff]  ;;  %v637_v0 = vld [vmem:[%s9469_s9 + $0xf8] sm:$0xff]  ;;  %v8034_v3 = vld [vmem:[#allocation7 + $0x248] ss:$24 sps:$4 sm:$0xff]  }
  0xff   : > { %922 = vmatprep.subr.bf16.mxu1 %v7974_v19  ;;  %v8018_v19 = vld [vmem:[#allocation7 + $0x12c] ss:$24 sps:$4 sm:$0xff]   ;;  %v8087_v6 = vld [vmem:[#allocation7 + $0x280] ss:$24 sps:$4 sm:$0xff]  }
 0x100   : > { %v674_v50 = vld [vmem:[%s9461_s24 + $0xa0] sm:$0xff] }
 0x101   : > { %1579 = vmatpush1.bf16.msra.mxu0 %v8060_v8  ;;  %v8088_v8 = vld [vmem:[#allocation7 + $0x2b4] ss:$24 sps:$4 sm:$0xff]  }
 0x102   : > { %923 = vmatpush1.bf16.msra.mxu1 %v7976_v20  ;;  %1580 = vmatprep.subr.bf16.mxu0 %v8061_v9  ;;  %v623_v20 = vld [vmem:[%s9469_s9 + $0x88] sm:$0xff]  ;;  %v8037_v9 = vld [vmem:[#allocation7 + $0x278] ss:$24 sps:$4 sm:$0xff]  }
 0x103   : > { %924 = vmatprep.subr.bf16.mxu1 %v7977_v21  ;;  %v625_v21 = vld [vmem:[%s9469_s9 + $0x98] sm:$0xff] }
 0x105   : > { %1581 = vmatpush1.bf16.msra.mxu0 %v8063_v14  ;;  %v8091_v14 = vld [vmem:[#allocation7 + $0x2e4] ss:$24 sps:$4 sm:$0xff]  }
 0x106   : > { %925 = vmatpush1.bf16.msra.mxu1 %v7979_v22  ;;  %v8066_v22 = vld [vmem:[#allocation7 + $0x130] ss:$24 sps:$4 sm:$0xff]   ;;  %1582 = vmatprep.subr.bf16.mxu0 %v8064_v17  ;;  %v8045_v17 = vld [vmem:[#allocation7 + $0x2dc] ss:$24 sps:$4 sm:$0xff]  }
 0x107   : > { %926 = vmatprep.subr.bf16.mxu1 %v7980_v23  ;;  %v8016_v23 = vld [vmem:[#allocation7 + $0x128] ss:$24 sps:$4 sm:$0xff]  }
 0x109   : > { %1583 = vmatpush1.bf16.msra.mxu0 %v8066_v22  ;;  %v659_v22 = vld [vmem:[%s9461_s24 + $0x28] sm:$0xff] }
 0x10a   : > { %927 = vmatpush1.bf16.msra.mxu1 %v7982_v24  ;;  %v8067_v24 = vld [vmem:[#allocation7 + $0x164] ss:$24 sps:$4 sm:$0xff]  }
 0x10b   : > { %928 = vmatprep.subr.bf16.mxu1 %v7983_v25  ;;  %v644_v25 = vpack.c.bf16 %v620_v18, %v618_v16  ;;  %1584 = vmatprep.subr.bf16.mxu0 %v8067_v24  ;;  %v8093_v18 = vld [vmem:[#allocation7 + $0x2e0] ss:$24 sps:$4 sm:$0xff]  }
 0x10e   : > { %929 = vmatpush1.bf16.msra.mxu1 %v7985_v26  ;;  %v8021_v26 = vld [vmem:[#allocation7 + $0x15c] ss:$24 sps:$4 sm:$0xff]  }
 0x10f   : > { %930 = vmatprep.subr.bf16.mxu1 %v7986_v27  ;;  %v8069_v27 = vld [vmem:[#allocation7 + $0x160] ss:$24 sps:$4 sm:$0xff]  }
 0x110   : > { %1585 = vmatpush1.bf16.msra.mxu0 %v8069_v27  ;;  %v660_v27 = vld [vmem:[%s9461_s24 + $0x30] sm:$0xff] }
 0x112   : > { %931 = vmatpush1.bf16.msra.mxu1 %v7988_v28  ;;  %v647_v28 = vpack.c.bf16 %v625_v21, %v623_v20  ;;  %v656_v20 = vld [vmem:[%s9461_s24 + $0x10] sm:$0xff] }
 0x113   : > { %932 = vmatprep.subr.bf16.mxu1 %v7989_v29  ;;  %v8070_v29 = vld [vmem:[#allocation7 + $0x194] ss:$24 sps:$4 sm:$0xff]   ;;  %v8043_v21 = vld [vmem:[#allocation7 + $0x2d8] ss:$24 sps:$4 sm:$0xff]  }
 0x114   : > { %1586 = vmatprep.subr.bf16.mxu0 %v8070_v29  ;;  %v665_v29 = vld [vmem:[%s9461_s24 + $0x58] sm:$0xff] }
 0x116   : > { %933 = vmatpush1.bf16.msra.mxu1 %v7991_v30  ;;  %v8019_v30 = vld [vmem:[#allocation7 + $0x158] ss:$24 sps:$4 sm:$0xff]  }
 0x117   : > { %934 = vmatprep.subr.bf16.mxu1 %v7992_v31  ;;  %v622_v31 = vld [vmem:[%s9469_s9 + $0x80] sm:$0xff] }
 0x11a   : > { %935 = vmatpush1.bf16.msra.mxu1 %v7994_v35  ;;  %v627_v35 = vld [vmem:[%s9469_s9 + $0xa8] sm:$0xff] }
 0x11b   : > { %936 = vmatprep.subr.bf16.mxu1 %v7995_v36  ;;  %v629_v36 = vld [vmem:[%s9469_s9 + $0xb8] sm:$0xff] }
 0x11c   : > { %v649_v43 = vpack.c.bf16 %v629_v36, %v627_v35  ;;  %v669_v35 = vld [vmem:[%s9461_s24 + $0x78] sm:$0xff] }
 0x11e   : > { %937 = vmatpush1.bf16.msra.mxu1 %v7997_v37  ;;  %v8072_v37 = vld [vmem:[#allocation7 + $0x190] ss:$24 sps:$4 sm:$0xff]  }
 0x11f   : > { %1457 = vmatprep.subr.bf16.mxu1 %v8000_v40  ;;  %v646_v40 = vpack.c.bf16 %v624_v32, %v622_v31  ;;  %1587 = vmatpush1.bf16.msra.mxu0 %v8072_v37  ;;  %v662_v31 = vld [vmem:[%s9461_s24 + $0x40] sm:$0xff]  ;;  %v664_v32 = vld [vmem:[%s9461_s24 + $0x50] sm:$0xff] }
 0x120   : > { %1588 = vmatprep.subr.bf16.mxu0 %v8073_v38  ;;  %v690_v36 = vpack.c.bf16 %v664_v32, %v662_v31  ;;  %v666_v38 = vld [vmem:[%s9461_s24 + $0x60] sm:$0xff] }
 0x121   : > { %939 = vmatmul.mubr.bf16.vlgmr.msra.gmra.mrb[0].mxu1 %v638_v45  ;;  %v8025_v45 = vld [vmem:[#allocation7 + $0x1b8] ss:$24 sps:$4 sm:$0xff]  }
 0x122   : > { %1458 = vmatpush1.bf16.msra.mxu1 %v7998_v46  ;;  %948 = vmatprep.mubr.bf16.mxu1 %v641_v48  ;;  %v626_v46 = vld [vmem:[%s9469_s9 + $0xa0] sm:$0xff] }
 0x123   : > { %1459 = vmatprep.subr.bf16.mxu1 %v8003_v47  ;;  %v628_v47 = vld [vmem:[%s9469_s9 + $0xb0] sm:$0xff]  ;;  %v8030_v48 = vld [vmem:[#allocation7 + $0x1ec] ss:$24 sps:$4 sm:$0xff]   ;;  %1589 = vmatpush1.bf16.msra.mxu0 %v8075_v42 }
 0x124   : > { %1590 = vmatprep.subr.bf16.mxu0 %v8076_v44  ;;  %v648_v54 = vpack.c.bf16 %v628_v47, %v626_v46  ;;  %v670_v44 = vld [vmem:[%s9461_s24 + $0x80] sm:$0xff]  ;;  %v675_v46 = vld [vmem:[%s9461_s24 + $0xa8] sm:$0xff]  ;;  %v677_v47 = vld [vmem:[%s9461_s24 + $0xb8] sm:$0xff] }
 0x125   : > { %v697_v49 = vpack.c.bf16 %v677_v47, %v675_v46 }
 0x126   : > { %1460 = vmatpush1.bf16.msra.mxu1 %v8001_v51  ;;  %v8078_v51 = vld [vmem:[#allocation7 + $0x1f0] ss:$24 sps:$4 sm:$0xff]  }
 0x127   : > { %1461 = vmatprep.subr.bf16.mxu1 %v8006_v55  ;;  %v8033_v55 = vld [vmem:[#allocation7 + $0x21c] ss:$24 sps:$4 sm:$0xff]   ;;  %1591 = vmatpush1.bf16.msra.mxu0 %v8078_v51 }
 0x128   : > { %1592 = vmatprep.subr.bf16.mxu0 %v8079_v52  ;;  %v676_v51 = vld [vmem:[%s9461_s24 + $0xb0] sm:$0xff]  ;;  %v679_v52 = vld [vmem:[%s9461_s24 + $0xc8] sm:$0xff] }
 0x129   : > { %949 = vmatmul.mubr.bf16.gmra.mrb[4].mxu1 %v640_v60  ;;  %v630_v60 = vld [vmem:[%s9469_s9 + $0xc0] sm:$0xff] }
 0x12a   : > { %1462 = vmatpush1.bf16.msra.mxu1 %v8004_v61  ;;  %958 = vmatprep.mubr.bf16.mxu1 %v643_v63  ;;  %v632_v61 = vld [vmem:[%s9469_s9 + $0xd0] sm:$0xff]  ;;  %v635_v63 = vld [vmem:[%s9469_s9 + $0xe8] sm:$0xff] }
 0x12b   : > { %1463 = vmatprep.subr.bf16.mxu1 %v8009_v62  ;;  %v8036_v62 = vld [vmem:[#allocation7 + $0x24c] ss:$24 sps:$4 sm:$0xff]   ;;  %1593 = vmatpush1.bf16.msra.mxu0 %v8081_v56  ;;  %v650_v4 = vpack.c.bf16 %v632_v61, %v630_v60  ;;  %v653_v7 = vpack.c.bf16 %v637_v0, %v635_v63  ;;  %v684_v63 = vld [vmem:[%s9461_s24 + $0xf0] sm:$0xff] }
 0x12c   : > { %1594 = vmatprep.subr.bf16.mxu0 %v8082_v58  ;;  %v678_v56 = vld [vmem:[%s9461_s24 + $0xc0] sm:$0xff]  ;;  %v683_v58 = vld [vmem:[%s9461_s24 + $0xe8] sm:$0xff] }
 0x12e   : > { %1464 = vmatpush1.bf16.msra.mxu1 %v8007_v1  ;;  %v8084_v1 = vld [vmem:[#allocation7 + $0x250] ss:$24 sps:$4 sm:$0xff]  }
 0x12f   : > { %1465 = vmatprep.subr.bf16.mxu1 %v8012_v5  ;;  %v8039_v5 = vld [vmem:[#allocation7 + $0x27c] ss:$24 sps:$4 sm:$0xff]   ;;  %1595 = vmatpush1.bf16.msra.mxu0 %v8084_v1  ;;  %v736_v1 = vlaneseq }
 0x130   : > { %1596 = vmatprep.subr.bf16.mxu0 %v8085_v2 }
 0x131   : > { %959 = vmatmul.mubr.bf16.gmra.mrb[8].mxu1 %v642_v10  ;;  %v634_v10 = vld [vmem:[%s9469_s9 + $0xe0] sm:$0xff]  ;;  %v9555_v2 = vshrl.u32 %v736_v1, 7 }
 0x132   : > { %1466 = vmatpush1.bf16.msra.mxu1 %v8010_v11  ;;  %968 = vmatprep.mubr.bf16.mxu1 %v645_v13  ;;  %v636_v11 = vld [vmem:[%s9469_s9 + $0xf0] sm:$0xff] }
 0x133   : > { %1467 = vmatprep.subr.bf16.mxu1 %v8015_v12  ;;  %v8042_v12 = vld [vmem:[#allocation7 + $0x2ac] ss:$24 sps:$4 sm:$0xff]   ;;  %v8090_v13 = vld [vmem:[#allocation7 + $0x2b0] ss:$24 sps:$4 sm:$0xff]   ;;  %1597 = vmatpush1.bf16.msra.mxu0 %v8087_v6  ;;  %v652_v16 = vpack.c.bf16 %v636_v11, %v634_v10  ;;  %12788 = vst [vmem:[#allocation23_spill] sm:$0xff] %v9555_v2 }
 0x134   : > { %1598 = vmatprep.subr.bf16.mxu0 %v8088_v8 }
 0x136   : > { %1468 = vmatpush1.bf16.msra.mxu1 %v8013_v15  ;;  %v8040_v15 = vld [vmem:[#allocation7 + $0x2a8] ss:$24 sps:$4 sm:$0xff]  }
 0x137   : > { %1469 = vmatprep.subr.bf16.mxu1 %v8018_v19  ;;  %v654_v19 = vld [vmem:[%s9461_s24] sm:$0xff]  ;;  %1599 = vmatpush1.bf16.msra.mxu0 %v8090_v13 }
 0x138   : > { %1600 = vmatprep.subr.bf16.mxu0 %v8091_v14  ;;  %v686_v24 = vpack.c.bf16 %v656_v20, %v654_v19 }
 0x139   : > { %969 = vmatmul.mubr.bf16.gmra.mrb[12].mxu1 %v644_v25 }
 0x13a   : > { %1470 = vmatpush1.bf16.msra.mxu1 %v8016_v23  ;;  %978 = vmatprep.mubr.bf16.mxu1 %v647_v28  ;;  %v661_v23 = vld [vmem:[%s9461_s24 + $0x38] sm:$0xff]  ;;  %v663_v28 = vld [vmem:[%s9461_s24 + $0x48] sm:$0xff] }
 0x13b   : > { %1471 = vmatprep.subr.bf16.mxu1 %v8021_v26  ;;  %1601 = vmatpush1.bf16.msra.mxu0 %v8093_v18  ;;  %v689_v25 = vpack.c.bf16 %v661_v23, %v659_v22  ;;  %v658_v26 = vld [vmem:[%s9461_s24 + $0x20] sm:$0xff] }
 0x13e   : > { %1472 = vmatpush1.bf16.msra.mxu1 %v8019_v30  ;;  %1603 = vmatmul.mubr.bf16.vlgmr.msra.gmra.mrb[0].mxu0 %v686_v24  ;;  %v688_v30 = vpack.c.bf16 %v660_v27, %v658_v26 }
 0x13f   : > { %1473 = vmatprep.subr.bf16.mxu1 %v8024_v33  ;;  %1612 = vmatprep.mubr.bf16.mxu0 %v689_v25  ;;  %v667_v33 = vld [vmem:[%s9461_s24 + $0x68] sm:$0xff] }
 0x140   : > { %v693_v37 = vpack.c.bf16 %v669_v35, %v667_v33 }
 0x141   : > { %979 = vmatmul.mubr.bf16.gmra.mrb[16].mxu1 %v646_v40  ;;  %v671_v40 = vld [vmem:[%s9461_s24 + $0x88] sm:$0xff] }
 0x142   : > { %1474 = vmatpush1.bf16.msra.mxu1 %v8022_v39  ;;  %988 = vmatprep.mubr.bf16.mxu1 %v649_v43  ;;  %v668_v39 = vld [vmem:[%s9461_s24 + $0x70] sm:$0xff] }
 0x143   : > { %1475 = vmatprep.subr.bf16.mxu1 %v8027_v41  ;;  %v673_v41 = vld [vmem:[%s9461_s24 + $0x98] sm:$0xff]  ;;  %v692_v42 = vpack.c.bf16 %v668_v39, %v666_v38 }
 0x144   : > { %v695_v43 = vpack.c.bf16 %v673_v41, %v671_v40 }
 0x146   : > { %1476 = vmatpush1.bf16.msra.mxu1 %v8025_v45  ;;  %1613 = vmatmul.mubr.bf16.gmra.mrb[4].mxu0 %v688_v30  ;;  %v672_v45 = vld [vmem:[%s9461_s24 + $0x90] sm:$0xff] }
 0x147   : > { %1477 = vmatprep.subr.bf16.mxu1 %v8030_v48  ;;  %v694_v48 = vpack.c.bf16 %v672_v45, %v670_v44 }
 0x149   : > { %989 = vmatmul.mubr.bf16.gmra.mrb[20].mxu1 %v648_v54  ;;  %v696_v54 = vpack.c.bf16 %v676_v51, %v674_v50 }
 0x14a   : > { %1478 = vmatpush1.bf16.msra.mxu1 %v8028_v53  ;;  %998 = vmatprep.mubr.bf16.mxu1 %v651_v57  ;;  %v681_v53 = vld [vmem:[%s9461_s24 + $0xd8] sm:$0xff]  ;;  %v680_v57 = vld [vmem:[%s9461_s24 + $0xd0] sm:$0xff] }
 0x14b   : > { %1479 = vmatprep.subr.bf16.mxu1 %v8033_v55  ;;  %v699_v55 = vpack.c.bf16 %v681_v53, %v679_v52  ;;  %v698_v60 = vpack.c.bf16 %v680_v57, %v678_v56 }
 0x14e   : > { %1480 = vmatpush1.bf16.msra.mxu1 %v8031_v59  ;;  %v685_v59 = vld [vmem:[%s9461_s24 + $0xf8] sm:$0xff] }
 0x14f   : > { %1481 = vmatprep.subr.bf16.mxu1 %v8036_v62  ;;  %v701_v61 = vpack.c.bf16 %v685_v59, %v683_v58  ;;  %v682_v62 = vld [vmem:[%s9461_s24 + $0xe0] sm:$0xff]  ;;  %s12841_s24 = sld [smem:[#allocation85_spill]] }
 0x150   : > { %v700_v0 = vpack.c.bf16 %v684_v63, %v682_v62 }
 0x151   : > { %999 = vmatmul.mubr.bf16.gmra.mrb[24].mxu1 %v650_v4  ;;  %v734_v4 = vld [vmem:[%s12657_s3] sm:$0x3] }
 0x152   : > { %1482 = vmatpush1.bf16.msra.mxu1 %v8034_v3  ;;  %1008 = vmatprep.mubr.bf16.mxu1 %v653_v7  ;;  %v9558_v3 = vsub.s32 0, %v9555_v2 }
 0x153   : > { %1483 = vmatprep.subr.bf16.mxu1 %v8039_v5  ;;  %v9564_v5 = vsub.s32 1, %v9555_v2 }
 0x154   : > { %12789 = vst [vmem:[#allocation24_spill] sm:$0xff] %v9558_v3  ;;  %v9567_v6 = vrot.slane %v734_v4, %v9558_v3 }
 0x155   : > { %12790 = vst [vmem:[#allocation25_spill] sm:$0xff] %v9564_v5  ;;  %v9570_v7 = vrot.slane %v734_v4, %v9564_v5 }
 0x156   : > { %1484 = vmatpush1.bf16.msra.mxu1 %v8037_v9 }
 0x157   : > { %1485 = vmatprep.subr.bf16.mxu1 %v8042_v12 }
 0x159   : > { %1009 = vmatmul.mubr.bf16.gmra.mrb[28].mxu1 %v652_v16 }
 0x15a   : > { %1486 = vmatpush1.bf16.msra.mxu1 %v8040_v15  ;;  %1489 = vmatprep.mubr.bf16.mxu1 %v9491_v34  ;;  %v691_v34 = vpack.c.bf16 %v665_v29, %v663_v28 }
 0x15b   : > { %1487 = vmatprep.subr.bf16.mxu1 %v8045_v17 }
 0x15c   : > { %1622 = vmatprep.mubr.bf16.mxu0 %v691_v34 }
 0x15d   : > { %1623 = vmatmul.mubr.bf16.gmra.mrb[8].mxu0 %v690_v36 }
 0x15e   : > { %1488 = vmatpush1.bf16.msra.mxu1 %v8043_v21  ;;  %1632 = vmatprep.mubr.bf16.mxu0 %v693_v37 }
 0x161   : > { %1490 = vmatmul.mubr.bf16.vlgmr.msra.gmra.mrb[32].mxu1 %v686_v24 }
 0x162   : > { %1499 = vmatprep.mubr.bf16.mxu1 %v689_v25 }
 0x165   : > { %1633 = vmatmul.mubr.bf16.gmra.mrb[12].mxu0 %v692_v42 }
 0x166   : > { %1642 = vmatprep.mubr.bf16.mxu0 %v695_v43 }
 0x169   : > { %1500 = vmatmul.mubr.bf16.gmra.mrb[36].mxu1 %v688_v30 }
 0x16a   : > { %1509 = vmatprep.mubr.bf16.mxu1 %v691_v34 }
 0x16d   : > { %1643 = vmatmul.mubr.bf16.gmra.mrb[16].mxu0 %v694_v48 }
 0x16e   : > { %1652 = vmatprep.mubr.bf16.mxu0 %v697_v49 }
 0x171   : > { %1510 = vmatmul.mubr.bf16.gmra.mrb[40].mxu1 %v690_v36 }
 0x172   : > { %1519 = vmatprep.mubr.bf16.mxu1 %v693_v37 }
 0x175   : > { %1653 = vmatmul.mubr.bf16.gmra.mrb[20].mxu0 %v696_v54 }
 0x176   : > { %1662 = vmatprep.mubr.bf16.mxu0 %v699_v55 }
 0x179   : > { %1520 = vmatmul.mubr.bf16.gmra.mrb[44].mxu1 %v692_v42 }
 0x17a   : > { %1529 = vmatprep.mubr.bf16.mxu1 %v695_v43 }
 0x17d   : > { %1663 = vmatmul.mubr.bf16.gmra.mrb[24].mxu0 %v698_v60 }
 0x17e   : > { %1672 = vmatprep.mubr.bf16.mxu0 %v701_v61 }
 0x181   : > { %1530 = vmatmul.mubr.bf16.gmra.mrb[48].mxu1 %v694_v48 }
 0x182   : > { %1539 = vmatprep.mubr.bf16.mxu1 %v697_v49 }
 0x185   : > { %1673 = vmatmul.mubr.bf16.gmra.mrb[28].mxu0 %v700_v0 }
 0x189   : > { %1540 = vmatmul.mubr.bf16.gmra.mrb[52].mxu1 %v696_v54 }
 0x18a   : > { %1549 = vmatprep.mubr.bf16.mxu1 %v699_v55 }
 0x191   : > { %1550 = vmatmul.mubr.bf16.gmra.mrb[56].mxu1 %v698_v60 }
 0x192   : > { %1559 = vmatprep.mubr.bf16.mxu1 %v701_v61 }
 0x199   : > { %1560 = vmatmul.mubr.bf16.gmra.mrb[60].mxu1 %v700_v0 }
 0x1f4   : > { %v940_v8 = vpop.f32.mrb[0].mxu1 }
 0x1f5   : > { %v941_v9 = vadd.f32 %v940_v8, %v9567_v6  ;;  %v942_v10 = vpop.f32.mrb[1].mxu1 }
 0x1f6   : > { %v943_v11 = vadd.f32 %v942_v10, %v9570_v7  ;;  %v944_v12 = vpop.f32.mrb[2].mxu1 }
 0x1f7   : > { %v945_v13 = vadd.f32 %v944_v12, %v9567_v6  ;;  %v946_v14 = vpop.f32.mrb[3].mxu1  ;;  %v1019_v16 = vmul.f32 0.088388346, %v941_v9 }
 0x1f8   : > { %v947_v15 = vadd.f32 %v946_v14, %v9570_v7  ;;  %v1020_v18 = vmul.f32 0.088388346, %v943_v11 }
 0x1f9   : > { %v1021_v17 = vmul.f32 0.088388346, %v945_v13 }
 0x1fa   : > { %v1022_v19 = vmul.f32 0.088388346, %v947_v15 }
 0x1fb   : > { %v1683_v20 = vpack.c.bf16 %v1021_v17, %v1019_v16 }
 0x1fc   : > { %v2077_v21 = vpack.c.bf16 %v1022_v19, %v1020_v18  ;;  %v950_v22 = vpop.f32.mrb[4].mxu1 }
 0x1fd   : > { %v951_v23 = vadd.f32 %v950_v22, %v9567_v6  ;;  %v952_v24 = vpop.f32.mrb[5].mxu1  ;;  %7559 = vmatprep.mubr.bf16.mxu1 %v1683_v20 }
 0x1fe   : > { %v953_v25 = vadd.f32 %v952_v24, %v9570_v7  ;;  %v954_v26 = vpop.f32.mrb[6].mxu1  ;;  %7623 = vmatprep.mubr.bf16.mxu0 %v2077_v21 }
 0x1ff   : > { %v955_v27 = vadd.f32 %v954_v26, %v9567_v6  ;;  %v956_v28 = vpop.f32.mrb[7].mxu1  ;;  %v9580_v30 = vmul.f32 0.088388346, %v951_v23 }
 0x200   : > { %v957_v29 = vadd.f32 %v956_v28, %v9570_v7  ;;  %v9584_v31 = vmul.f32 0.088388346, %v953_v25 }
 0x201   : > { %v9582_v34 = vmul.f32 0.088388346, %v955_v27 }
 0x202   : > { %v9586_v32 = vmul.f32 0.088388346, %v957_v29 }
 0x204   : > { %v960_v36 = vpop.f32.mrb[8].mxu1 }
 0x205   : > { %v961_v37 = vadd.f32 %v960_v36, %v9567_v6  ;;  %v962_v38 = vpop.f32.mrb[9].mxu1 }
 0x206   : > { %v963_v39 = vadd.f32 %v962_v38, %v9570_v7  ;;  %v964_v40 = vpop.f32.mrb[10].mxu1 }
 0x207   : > { %v965_v41 = vadd.f32 %v964_v40, %v9567_v6  ;;  %v966_v42 = vpop.f32.mrb[11].mxu1  ;;  %v9596_v44 = vmul.f32 0.088388346, %v961_v37 }
 0x208   : > { %v967_v43 = vadd.f32 %v966_v42, %v9570_v7  ;;  %v9600_v46 = vmul.f32 0.088388346, %v963_v39 }
 0x209   : > { %v9598_v45 = vmul.f32 0.088388346, %v965_v41 }
 0x20a   : > { %v9602_v47 = vmul.f32 0.088388346, %v967_v43 }
 0x20c   : > { %v970_v50 = vpop.f32.mrb[12].mxu1 }
 0x20d   : > { %v971_v51 = vadd.f32 %v970_v50, %v9567_v6  ;;  %v972_v52 = vpop.f32.mrb[13].mxu1 }
 0x20e   : > { %v973_v53 = vadd.f32 %v972_v52, %v9570_v7  ;;  %v974_v54 = vpop.f32.mrb[14].mxu1 }
 0x20f   : > { %v975_v55 = vadd.f32 %v974_v54, %v9567_v6  ;;  %v976_v56 = vpop.f32.mrb[15].mxu1  ;;  %v9612_v58 = vmul.f32 0.088388346, %v971_v51 }
 0x210   : > { %v977_v57 = vadd.f32 %v976_v56, %v9570_v7  ;;  %v9616_v60 = vmul.f32 0.088388346, %v973_v53 }
 0x211   : > { %v9614_v59 = vmul.f32 0.088388346, %v975_v55 }
 0x212   : > { %v9618_v61 = vmul.f32 0.088388346, %v977_v57  ;;  %v12679_v57 = vsub.s32 2, %v9555_v2 }
 0x214   : > { %v980_v0 = vpop.f32.mrb[16].mxu1 }
 0x215   : > { %v981_v1 = vadd.f32 %v980_v0, %v9567_v6  ;;  %v982_v4 = vpop.f32.mrb[17].mxu1 }
 0x216   : > { %v983_v8 = vadd.f32 %v982_v4, %v9570_v7  ;;  %v984_v9 = vpop.f32.mrb[18].mxu1 }
 0x217   : > { %v985_v10 = vadd.f32 %v984_v9, %v9567_v6  ;;  %v986_v11 = vpop.f32.mrb[19].mxu1  ;;  %v9628_v13 = vmul.f32 0.088388346, %v981_v1  ;;  %v12678_v1 = vsub.s32 3, %v9555_v2 }
 0x218   : > { %v987_v12 = vadd.f32 %v986_v11, %v9570_v7  ;;  %v9632_v15 = vmul.f32 0.088388346, %v983_v8  ;;  %v1115_v11 = vld [vmem:[%s12657_s3 + $0x2] sm:$0xf] }
 0x219   : > { %v9630_v14 = vmul.f32 0.088388346, %v985_v10 }
 0x21a   : > { %v9634_v16 = vmul.f32 0.088388346, %v987_v12 }
 0x21c   : > { %v990_v19 = vpop.f32.mrb[20].mxu1 }
 0x21d   : > { %v991_v20 = vadd.f32 %v990_v19, %v9567_v6  ;;  %v992_v21 = vpop.f32.mrb[21].mxu1 }
 0x21e   : > { %v993_v22 = vadd.f32 %v992_v21, %v9570_v7  ;;  %v994_v23 = vpop.f32.mrb[22].mxu1 }
 0x21f   : > { %v995_v24 = vadd.f32 %v994_v23, %v9567_v6  ;;  %v996_v25 = vpop.f32.mrb[23].mxu1  ;;  %v9644_v27 = vmul.f32 0.088388346, %v991_v20  ;;  %v9681_v20 = vrot.slane %v1115_v11, %v12679_v57  ;;  %v9686_v23 = vrot.slane %v1115_v11, %v12678_v1 }
 0x220   : > { %v997_v26 = vadd.f32 %v996_v25, %v9570_v7  ;;  %v9648_v29 = vmul.f32 0.088388346, %v993_v22 }
 0x221   : > { %v9646_v28 = vmul.f32 0.088388346, %v995_v24 }
 0x222   : > { %v9650_v36 = vmul.f32 0.088388346, %v997_v26 }
 0x224   : > { %v1000_v39 = vpop.f32.mrb[24].mxu1 }
 0x225   : > { %v1001_v40 = vadd.f32 %v1000_v39, %v9567_v6  ;;  %v1002_v41 = vpop.f32.mrb[25].mxu1  ;;  %v1604_v39 = vpop.f32.mrb[0].mxu0 }
 0x226   : > { %v1003_v42 = vadd.f32 %v1002_v41, %v9570_v7  ;;  %v1004_v43 = vpop.f32.mrb[26].mxu1 }
 0x227   : > { %v1005_v50 = vadd.f32 %v1004_v43, %v9567_v6  ;;  %v1006_v51 = vpop.f32.mrb[27].mxu1  ;;  %v9660_v53 = vmul.f32 0.088388346, %v1001_v40  ;;  %v1606_v43 = vpop.f32.mrb[1].mxu0 }
 0x228   : > { %v1007_v52 = vadd.f32 %v1006_v51, %v9570_v7  ;;  %v9664_v55 = vmul.f32 0.088388346, %v1003_v42  ;;  %v1605_v42 = vadd.f32 %v1604_v39, %v9681_v20  ;;  %v1608_v51 = vpop.f32.mrb[2].mxu0 }
 0x229   : > { %v9662_v54 = vmul.f32 0.088388346, %v1005_v50  ;;  %v9701_v50 = vrot.slane %v1115_v11, %v9558_v3 }
 0x22a   : > { %v9666_v56 = vmul.f32 0.088388346, %v1007_v52 }
 0x22c   : > { %v1010_v8 = vpop.f32.mrb[28].mxu1 }
 0x22d   : > { %v1011_v9 = vadd.f32 %v1010_v8, %v9567_v6  ;;  %v1012_v10 = vpop.f32.mrb[29].mxu1 }
 0x22e   : > { %v1013_v12 = vadd.f32 %v1012_v10, %v9570_v7  ;;  %v1014_v19 = vpop.f32.mrb[30].mxu1  ;;  %v1609_v10 = vadd.f32 %v1608_v51, %v9681_v20 }
 0x22f   : > { %v1015_v21 = vadd.f32 %v1014_v19, %v9567_v6  ;;  %v1016_v22 = vpop.f32.mrb[31].mxu1  ;;  %v9689_v25 = vmul.f32 0.088388346, %v1011_v9  ;;  %v9707_v9 = vrot.slane %v1115_v11, %v9564_v5 }
 0x230   : > { %v1017_v24 = vadd.f32 %v1016_v22, %v9570_v7  ;;  %v9693_v40 = vmul.f32 0.088388346, %v1013_v12  ;;  %v1607_v7 = vadd.f32 %v1606_v43, %v9686_v23  ;;  %v1610_v12 = vpop.f32.mrb[3].mxu0 }
 0x231   : > { %v9691_v26 = vmul.f32 0.088388346, %v1015_v21  ;;  %v1611_v21 = vadd.f32 %v1610_v12, %v9686_v23  ;;  %v1614_v51 = vpop.f32.mrb[4].mxu0 }
 0x232   : > { %v9695_v41 = vmul.f32 0.088388346, %v1017_v24  ;;  %v9711_v24 = vpack.c.bf16 %v1609_v10, %v1605_v42  ;;  %v1615_v38 = vadd.f32 %v1614_v51, %v9681_v20  ;;  %v1616_v12 = vpop.f32.mrb[5].mxu0 }
 0x233   : > { %v9715_v57 = vpack.c.bf16 %v1611_v21, %v1607_v7  ;;  %v1617_v42 = vadd.f32 %v1616_v12, %v9686_v23  ;;  %v1618_v10 = vpop.f32.mrb[6].mxu0 }
 0x234   : > { %v1491_v8 = vpop.f32.mrb[32].mxu1  ;;  %v1619_v7 = vadd.f32 %v1618_v10, %v9681_v20  ;;  %v1620_v21 = vpop.f32.mrb[7].mxu0 }
 0x235   : > { %v1493_v19 = vpop.f32.mrb[33].mxu1  ;;  %v1492_v39 = vadd.f32 %v1491_v8, %v9701_v50  ;;  %v1624_v0 = vpop.f32.mrb[8].mxu0 }
 0x236   : > { %v1495_v22 = vpop.f32.mrb[34].mxu1  ;;  %v1494_v52 = vadd.f32 %v1493_v19, %v9707_v9 }
 0x237   : > { %v1496_v43 = vadd.f32 %v1495_v22, %v9701_v50  ;;  %v1497_v1 = vpop.f32.mrb[35].mxu1 }
 0x238   : > { %v1498_v11 = vadd.f32 %v1497_v1, %v9707_v9  ;;  %v1621_v1 = vadd.f32 %v1620_v21, %v9686_v23  ;;  %v1626_v21 = vpop.f32.mrb[9].mxu0 }
 0x239   : > { %v1691_v6 = vpack.c.bf16 %v1496_v43, %v1492_v39  ;;  %v9723_v39 = vpack.c.bf16 %v1619_v7, %v1615_v38  ;;  %v1627_v38 = vadd.f32 %v1626_v21, %v9686_v23  ;;  %v1628_v7 = vpop.f32.mrb[10].mxu0 }
 0x23a   : > { %v2085_v4 = vpack.c.bf16 %v1498_v11, %v1494_v52  ;;  %v9727_v51 = vpack.c.bf16 %v1621_v1, %v1617_v42  ;;  %v1629_v42 = vadd.f32 %v1628_v7, %v9681_v20  ;;  %v1630_v1 = vpop.f32.mrb[11].mxu0 }
 0x23b   : > { %7543 = vmatprep.subr.bf16.mxu1 %v1691_v6  ;;  %v1634_v18 = vpop.f32.mrb[12].mxu0 }
 0x23c   : > { %v1501_v8 = vpop.f32.mrb[36].mxu1  ;;  %7544 = vmatpush3.bf16.xpose.msra.mxu1 %v1691_v6  ;;  %7607 = vmatprep.subr.bf16.mxu0 %v2085_v4 }
 0x23d   : > { %v1503_v22 = vpop.f32.mrb[37].mxu1  ;;  %7608 = vmatpush3.bf16.xpose.msra.mxu0 %v2085_v4  ;;  %v1502_v52 = vadd.f32 %v1501_v8, %v9701_v50  ;;  %v1625_v4 = vadd.f32 %v1624_v0, %v9681_v20 }
 0x23e   : > { %v1505_v19 = vpop.f32.mrb[38].mxu1  ;;  %v1504_v6 = vadd.f32 %v1503_v22, %v9707_v9  ;;  %v1631_v22 = vadd.f32 %v1630_v1, %v9686_v23  ;;  %v1636_v1 = vpop.f32.mrb[13].mxu0 }
 0x23f   : > { %v1506_v43 = vadd.f32 %v1505_v19, %v9701_v50  ;;  %v1507_v11 = vpop.f32.mrb[39].mxu1 }
 0x240   : > { %v1508_v12 = vadd.f32 %v1507_v11, %v9707_v9 }
 0x241   : > { %v1692_v10 = vpack.c.bf16 %v1506_v43, %v1502_v52  ;;  %v9735_v43 = vpack.c.bf16 %v1629_v42, %v1625_v4  ;;  %v1637_v4 = vadd.f32 %v1636_v1, %v9686_v23  ;;  %v1638_v42 = vpop.f32.mrb[14].mxu0 }
 0x242   : > { %v2086_v37 = vpack.c.bf16 %v1508_v12, %v1504_v6  ;;  %v9739_v12 = vpack.c.bf16 %v1631_v22, %v1627_v38  ;;  %v1639_v38 = vadd.f32 %v1638_v42, %v9681_v20  ;;  %v1640_v22 = vpop.f32.mrb[15].mxu0 }
 0x243   : > { %7545 = vmatprep.subr.bf16.mxu1 %v1692_v10  ;;  %v1644_v17 = vpop.f32.mrb[16].mxu0 }
 0x244   : > { %v1511_v8 = vpop.f32.mrb[40].mxu1  ;;  %7546 = vmatpush3.bf16.xpose.msra.mxu1 %v1692_v10  ;;  %7609 = vmatprep.subr.bf16.mxu0 %v2086_v37 }
 0x245   : > { %v1513_v19 = vpop.f32.mrb[41].mxu1  ;;  %7610 = vmatpush3.bf16.xpose.msra.mxu0 %v2086_v37  ;;  %v1512_v0 = vadd.f32 %v1511_v8, %v9701_v50  ;;  %v1635_v37 = vadd.f32 %v1634_v18, %v9681_v20 }
 0x246   : > { %v1515_v52 = vpop.f32.mrb[42].mxu1  ;;  %v1514_v10 = vadd.f32 %v1513_v19, %v9707_v9  ;;  %v1641_v19 = vadd.f32 %v1640_v22, %v9686_v23  ;;  %v1646_v22 = vpop.f32.mrb[17].mxu0 }
 0x247   : > { %v1516_v11 = vadd.f32 %v1515_v52, %v9701_v50  ;;  %v1517_v6 = vpop.f32.mrb[43].mxu1 }
 0x248   : > { %v1518_v21 = vadd.f32 %v1517_v6, %v9707_v9 }
 0x249   : > { %v1693_v7 = vpack.c.bf16 %v1516_v11, %v1512_v0  ;;  %v9747_v11 = vpack.c.bf16 %v1639_v38, %v1635_v37  ;;  %v1647_v37 = vadd.f32 %v1646_v22, %v9686_v23  ;;  %v1648_v38 = vpop.f32.mrb[18].mxu0 }
 0x24a   : > { %v2087_v63 = vpack.c.bf16 %v1518_v21, %v1514_v10  ;;  %v9751_v21 = vpack.c.bf16 %v1641_v19, %v1637_v4  ;;  %v1649_v4 = vadd.f32 %v1648_v38, %v9681_v20  ;;  %v1650_v19 = vpop.f32.mrb[19].mxu0 }
 0x24b   : > { %7547 = vmatprep.subr.bf16.mxu1 %v1693_v7  ;;  %v1654_v49 = vpop.f32.mrb[20].mxu0 }
 0x24c   : > { %v1521_v8 = vpop.f32.mrb[44].mxu1  ;;  %7548 = vmatpush3.bf16.xpose.msra.mxu1 %v1693_v7  ;;  %7611 = vmatprep.subr.bf16.mxu0 %v2087_v63 }
 0x24d   : > { %v1523_v52 = vpop.f32.mrb[45].mxu1  ;;  %7612 = vmatpush3.bf16.xpose.msra.mxu0 %v2087_v63  ;;  %v1522_v18 = vadd.f32 %v1521_v8, %v9701_v50  ;;  %v1645_v63 = vadd.f32 %v1644_v17, %v9681_v20 }
 0x24e   : > { %v1525_v0 = vpop.f32.mrb[46].mxu1  ;;  %v1524_v7 = vadd.f32 %v1523_v52, %v9707_v9  ;;  %v1651_v52 = vadd.f32 %v1650_v19, %v9686_v23  ;;  %v1656_v19 = vpop.f32.mrb[21].mxu0 }
 0x24f   : > { %v1526_v6 = vadd.f32 %v1525_v0, %v9701_v50  ;;  %v1527_v10 = vpop.f32.mrb[47].mxu1 }
 0x250   : > { %v1528_v1 = vadd.f32 %v1527_v10, %v9707_v9 }
 0x251   : > { %v1694_v42 = vpack.c.bf16 %v1526_v6, %v1522_v18  ;;  %v9759_v6 = vpack.c.bf16 %v1649_v4, %v1645_v63  ;;  %v1657_v63 = vadd.f32 %v1656_v19, %v9686_v23  ;;  %v1658_v4 = vpop.f32.mrb[22].mxu0 }
 0x252   : > { %v2088_v62 = vpack.c.bf16 %v1528_v1, %v1524_v7  ;;  %v9763_v1 = vpack.c.bf16 %v1651_v52, %v1647_v37  ;;  %v1659_v37 = vadd.f32 %v1658_v4, %v9681_v20  ;;  %v1660_v52 = vpop.f32.mrb[23].mxu0 }
 0x253   : > { %7549 = vmatprep.subr.bf16.mxu1 %v1694_v42  ;;  %v1664_v48 = vpop.f32.mrb[24].mxu0 }
 0x254   : > { %v1531_v8 = vpop.f32.mrb[48].mxu1  ;;  %7550 = vmatpush3.bf16.xpose.msra.mxu1 %v1694_v42  ;;  %7613 = vmatprep.subr.bf16.mxu0 %v2088_v62 }
 0x255   : > { %v1533_v0 = vpop.f32.mrb[49].mxu1  ;;  %7614 = vmatpush3.bf16.xpose.msra.mxu0 %v2088_v62  ;;  %v1532_v17 = vadd.f32 %v1531_v8, %v9701_v50  ;;  %v1655_v62 = vadd.f32 %v1654_v49, %v9681_v20 }
 0x256   : > { %v1535_v18 = vpop.f32.mrb[50].mxu1  ;;  %v1534_v42 = vadd.f32 %v1533_v0, %v9707_v9  ;;  %v1661_v0 = vadd.f32 %v1660_v52, %v9686_v23  ;;  %v1666_v52 = vpop.f32.mrb[25].mxu0 }
 0x257   : > { %v1536_v10 = vadd.f32 %v1535_v18, %v9701_v50  ;;  %v1537_v7 = vpop.f32.mrb[51].mxu1 }
 0x258   : > { %v1538_v22 = vadd.f32 %v1537_v7, %v9707_v9 }
 0x259   : > { %v1695_v38 = vpack.c.bf16 %v1536_v10, %v1532_v17  ;;  %v9771_v10 = vpack.c.bf16 %v1659_v37, %v1655_v62  ;;  %v1667_v62 = vadd.f32 %v1666_v52, %v9686_v23  ;;  %v1668_v37 = vpop.f32.mrb[26].mxu0 }
 0x25a   : > { %v2089_v35 = vpack.c.bf16 %v1538_v22, %v1534_v42  ;;  %v9775_v22 = vpack.c.bf16 %v1661_v0, %v1657_v63  ;;  %v1669_v63 = vadd.f32 %v1668_v37, %v9681_v20  ;;  %v1670_v0 = vpop.f32.mrb[27].mxu0 }
 0x25b   : > { %7551 = vmatprep.subr.bf16.mxu1 %v1695_v38  ;;  %v1674_v2 = vpop.f32.mrb[28].mxu0 }
 0x25c   : > { %v1541_v8 = vpop.f32.mrb[52].mxu1  ;;  %7552 = vmatpush3.bf16.xpose.msra.mxu1 %v1695_v38  ;;  %7615 = vmatprep.subr.bf16.mxu0 %v2089_v35 }
 0x25d   : > { %v1543_v18 = vpop.f32.mrb[53].mxu1  ;;  %7616 = vmatpush3.bf16.xpose.msra.mxu0 %v2089_v35  ;;  %v1542_v49 = vadd.f32 %v1541_v8, %v9701_v50  ;;  %v1665_v35 = vadd.f32 %v1664_v48, %v9681_v20 }
 0x25e   : > { %v1545_v17 = vpop.f32.mrb[54].mxu1  ;;  %v1544_v38 = vadd.f32 %v1543_v18, %v9707_v9  ;;  %v1671_v18 = vadd.f32 %v1670_v0, %v9686_v23  ;;  %v1676_v0 = vpop.f32.mrb[29].mxu0 }
 0x25f   : > { %v1546_v7 = vadd.f32 %v1545_v17, %v9701_v50  ;;  %v1547_v42 = vpop.f32.mrb[55].mxu1 }
 0x260   : > { %v1548_v19 = vadd.f32 %v1547_v42, %v9707_v9 }
 0x261   : > { %v1696_v4 = vpack.c.bf16 %v1546_v7, %v1542_v49  ;;  %v9783_v7 = vpack.c.bf16 %v1669_v63, %v1665_v35  ;;  %v1677_v35 = vadd.f32 %v1676_v0, %v9686_v23  ;;  %v1678_v63 = vpop.f32.mrb[30].mxu0 }
 0x262   : > { %v2090_v33 = vpack.c.bf16 %v1548_v19, %v1544_v38  ;;  %v9787_v19 = vpack.c.bf16 %v1671_v18, %v1667_v62  ;;  %v1679_v62 = vadd.f32 %v1678_v63, %v9681_v20  ;;  %v1680_v18 = vpop.f32.mrb[31].mxu0 }
 0x263   : > { %7553 = vmatprep.subr.bf16.mxu1 %v1696_v4 }
 0x264   : > { %v1551_v8 = vpop.f32.mrb[56].mxu1  ;;  %7554 = vmatpush3.bf16.xpose.msra.mxu1 %v1696_v4  ;;  %7617 = vmatprep.subr.bf16.mxu0 %v2090_v33 }
 0x265   : > { %v1553_v17 = vpop.f32.mrb[57].mxu1  ;;  %7618 = vmatpush3.bf16.xpose.msra.mxu0 %v2090_v33  ;;  %v1552_v48 = vadd.f32 %v1551_v8, %v9701_v50  ;;  %v1675_v33 = vadd.f32 %v1674_v2, %v9681_v20 }
 0x266   : > { %v1555_v49 = vpop.f32.mrb[58].mxu1  ;;  %v1554_v4 = vadd.f32 %v1553_v17, %v9707_v9  ;;  %v1681_v17 = vadd.f32 %v1680_v18, %v9686_v23  ;;  %v12792_v23 = vpack.c.bf16 %v9598_v45, %v9596_v44  ;;  %v12800_v44 = vpack.c.bf16 %v9662_v54, %v9660_v53 }
 0x267   : > { %v1556_v42 = vadd.f32 %v1555_v49, %v9701_v50  ;;  %v1557_v38 = vpop.f32.mrb[59].mxu1  ;;  %v12801_v45 = vpack.c.bf16 %v9650_v36, %v9648_v29 }
 0x268   : > { %v1558_v52 = vadd.f32 %v1557_v38, %v9707_v9 }
 0x269   : > { %v1697_v37 = vpack.c.bf16 %v1556_v42, %v1552_v48  ;;  %v1706_v42 = vpack.c.bf16 %v1679_v62, %v1675_v33 }
 0x26a   : > { %v2091_v5 = vpack.c.bf16 %v1558_v52, %v1554_v4  ;;  %v9797_v52 = vpack.c.bf16 %v1681_v17, %v1677_v35 }
 0x26b   : > { %7555 = vmatprep.subr.bf16.mxu1 %v1697_v37 }
 0x26c   : > { %v1561_v8 = vpop.f32.mrb[60].mxu1  ;;  %7556 = vmatpush3.bf16.xpose.msra.mxu1 %v1697_v37  ;;  %7619 = vmatprep.subr.bf16.mxu0 %v2091_v5 }
 0x26d   : > { %v1563_v49 = vpop.f32.mrb[61].mxu1  ;;  %7620 = vmatpush3.bf16.xpose.msra.mxu0 %v2091_v5  ;;  %v1562_v38 = vadd.f32 %v1561_v8, %v9701_v50  ;;  %v12791_v5 = vpack.c.bf16 %v9582_v34, %v9580_v30  ;;  %v12796_v30 = vpack.c.bf16 %v9630_v14, %v9628_v13  ;;  %v12797_v34 = vpack.c.bf16 %v9618_v61, %v9616_v60 }
 0x26e   : > { %v1565_v48 = vpop.f32.mrb[62].mxu1  ;;  %v1564_v0 = vadd.f32 %v1563_v49, %v9707_v9 }
 0x26f   : > { %v1566_v2 = vadd.f32 %v1565_v48, %v9701_v50  ;;  %v1567_v4 = vpop.f32.mrb[63].mxu1  ;;  %v12793_v50 = vpack.c.bf16 %v9586_v32, %v9584_v31  ;;  %v12798_v31 = vpack.c.bf16 %v9634_v16, %v9632_v15  ;;  %v12799_v32 = vpack.c.bf16 %v9646_v28, %v9644_v27 }
 0x270   : > { %v1568_v37 = vadd.f32 %v1567_v4, %v9707_v9  ;;  %v12794_v9 = vpack.c.bf16 %v9602_v47, %v9600_v46  ;;  %v12802_v46 = vpack.c.bf16 %v9666_v56, %v9664_v55  ;;  %v12803_v47 = vpack.c.bf16 %v9691_v26, %v9689_v25 }
 0x271   : > { %v1698_v3 = vpack.c.bf16 %v1566_v2, %v1562_v38 }
 0x272   : > { %v2092_v20 = vpack.c.bf16 %v1568_v37, %v1564_v0 }
 0x273   : > { %7557 = vmatprep.subr.bf16.mxu1 %v1698_v3 }
 0x274   : > { %7558 = vmatpush3.bf16.xpose.msra.mxu1 %v1698_v3  ;;  %7621 = vmatprep.subr.bf16.mxu0 %v2092_v20  ;;  %v12795_v3 = vpack.c.bf16 %v9614_v59, %v9612_v58  ;;  %v12804_v58 = vpack.c.bf16 %v9695_v41, %v9693_v40 }
 0x275   : > { %7622 = vmatpush3.bf16.xpose.msra.mxu0 %v2092_v20  ;;  %7575 = vmatprep.subr.bf16.mxu1 %v9711_v24 }
 0x27b   : > { %7560 = vmatmul.mubr.bf16.vlgmr.msra.gmra.mrb[64].mxu1 %v12791_v5 }
 0x27c   : > { %7563 = vmatprep.mubr.bf16.mxu1 %v12792_v23  ;;  %7624 = vmatmul.mubr.bf16.vlgmr.msra.gmra.mrb[32].mxu0 %v12793_v50 }
 0x27d   : > { %7627 = vmatprep.mubr.bf16.mxu0 %v12794_v9  ;;  %7576 = vmatpush3.bf16.msra.mxu1 %v9711_v24 }
 0x27e   : > { %7577 = vmatprep.subr.bf16.mxu1 %v9723_v39 }
 0x281   : > { %7578 = vmatpush3.bf16.msra.mxu1 %v9723_v39 }
 0x282   : > { %7579 = vmatprep.subr.bf16.mxu1 %v9735_v43 }
 0x283   : > { %7564 = vmatmul.mubr.bf16.gmra.mrb[68].mxu1 %v12795_v3 }
 0x284   : > { %7567 = vmatprep.mubr.bf16.mxu1 %v12796_v30  ;;  %7628 = vmatmul.mubr.bf16.gmra.mrb[36].mxu0 %v12797_v34 }
 0x285   : > { %7631 = vmatprep.mubr.bf16.mxu0 %v12798_v31  ;;  %7580 = vmatpush3.bf16.msra.mxu1 %v9735_v43 }
 0x286   : > { %7581 = vmatprep.subr.bf16.mxu1 %v9747_v11 }
 0x289   : > { %7582 = vmatpush3.bf16.msra.mxu1 %v9747_v11 }
 0x28a   : > { %7583 = vmatprep.subr.bf16.mxu1 %v9759_v6 }
 0x28b   : > { %7568 = vmatmul.mubr.bf16.gmra.mrb[72].mxu1 %v12799_v32 }
 0x28c   : > { %7571 = vmatprep.mubr.bf16.mxu1 %v12800_v44  ;;  %7632 = vmatmul.mubr.bf16.gmra.mrb[40].mxu0 %v12801_v45 }
 0x28d   : > { %7635 = vmatprep.mubr.bf16.mxu0 %v12802_v46  ;;  %7584 = vmatpush3.bf16.msra.mxu1 %v9759_v6 }
 0x28e   : > { %7585 = vmatprep.subr.bf16.mxu1 %v9771_v10 }
 0x291   : > { %7586 = vmatpush3.bf16.msra.mxu1 %v9771_v10 }
 0x292   : > { %7587 = vmatprep.subr.bf16.mxu1 %v9783_v7 }
 0x293   : > { %7572 = vmatmul.mubr.bf16.gmra.mrb[76].mxu1 %v12803_v47 }
 0x294   : > { %7636 = vmatmul.mubr.bf16.gmra.mrb[44].mxu0 %v12804_v58 }
 0x295   : > { %7588 = vmatpush3.bf16.msra.mxu1 %v9783_v7 }
 0x296   : > { %7589 = vmatprep.subr.bf16.mxu1 %v1706_v42 }
 0x299   : > { %7590 = vmatpush3.bf16.msra.mxu1 %v1706_v42 }
 0x29a   : > { %7639 = vmatprep.subr.bf16.mxu1 %v9715_v57 }
 0x34e   : > { %v9858_v59 = vpop.f32.mrb[64].mxu1 }
 0x34f   : > { %v9860_v60 = vpop.f32.mrb[32].mxu0  ;;  %1808 = vmax.xlane.f32.xlu1 %v9858_v59  ;;  %v9863_v61 = vpop.f32.mrb[65].mxu1 }
 0x350   : > { %v9865_v13 = vpop.f32.mrb[33].mxu0  ;;  %1804 = vmax.xlane.f32.xlu0 %v9863_v61  ;;  %v9868_v14 = vpop.f32.mrb[66].mxu1 }
 0x351   : > { %v9870_v15 = vpop.f32.mrb[67].mxu1  ;;  %v9872_v16 = vpop.f32.mrb[34].mxu0 }
 0x352   : > { %v9874_v27 = vpop.f32.mrb[35].mxu0 }
 0x353   : > { %1810 = vmax.xlane.f32.xlu1 %v9868_v14 }
 0x354   : > { %1806 = vmax.xlane.f32.xlu0 %v9870_v15 }
 0x356   : > { %v9878_v28 = vpop.f32.mrb[68].mxu1 }
 0x357   : > { %v9880_v29 = vpop.f32.mrb[69].mxu1  ;;  %v9882_v36 = vpop.f32.mrb[36].mxu0 }
 0x358   : > { %v9884_v53 = vpop.f32.mrb[37].mxu0  ;;  %1812 = vmax.xlane.f32.xlu0 %v9880_v29  ;;  %v9887_v54 = vpop.f32.mrb[70].mxu1 }
 0x359   : > { %v9889_v55 = vpop.f32.mrb[71].mxu1  ;;  %v9891_v56 = vpop.f32.mrb[38].mxu0 }
 0x35a   : > { %v9893_v25 = vpop.f32.mrb[39].mxu0  ;;  %1814 = vmax.xlane.f32.xlu1 %v9889_v55 }
 0x35c   : > { %1816 = vmax.xlane.f32.xlu0 %v9878_v28 }
 0x35e   : > { %1818 = vmax.xlane.f32.xlu1 %v9887_v54  ;;  %v9898_v26 = vpop.f32.mrb[72].mxu1 }
 0x35f   : > { %v9900_v40 = vpop.f32.mrb[73].mxu1  ;;  %v9902_v41 = vpop.f32.mrb[40].mxu0 }
 0x360   : > { %v9904_v24 = vpop.f32.mrb[41].mxu0  ;;  %1820 = vmax.xlane.f32.xlu0 %v9900_v40  ;;  %v9907_v39 = vpop.f32.mrb[74].mxu1 }
 0x361   : > { %v9909_v43 = vpop.f32.mrb[75].mxu1  ;;  %v9911_v11 = vpop.f32.mrb[42].mxu0 }
 0x362   : > { %v9913_v6 = vpop.f32.mrb[43].mxu0  ;;  %1822 = vmax.xlane.f32.xlu1 %v9909_v43 }
 0x364   : > { %1824 = vmax.xlane.f32.xlu0 %v9898_v26 }
 0x366   : > { %1826 = vmax.xlane.f32.xlu1 %v9907_v39  ;;  %v9918_v10 = vpop.f32.mrb[76].mxu1 }
 0x367   : > { %v9920_v7 = vpop.f32.mrb[77].mxu1  ;;  %v9922_v33 = vpop.f32.mrb[44].mxu0 }
 0x368   : > { %v9924_v35 = vpop.f32.mrb[45].mxu0  ;;  %1828 = vmax.xlane.f32.xlu0 %v9920_v7  ;;  %v9927_v63 = vpop.f32.mrb[78].mxu1 }
 0x369   : > { %v9929_v8 = vpop.f32.mrb[79].mxu1  ;;  %v9931_v62 = vpop.f32.mrb[46].mxu0 }
 0x36a   : > { %v9933_v18 = vpop.f32.mrb[47].mxu0  ;;  %1830 = vmax.xlane.f32.xlu1 %v9929_v8 }
 0x36c   : > { %1832 = vmax.xlane.f32.xlu0 %v9918_v10 }
 0x36e   : > { %1834 = vmax.xlane.f32.xlu1 %v9927_v63 }
 0x370   : > { %2198 = vmax.xlane.f32.xlu0 %v9865_v13 }
 0x372   : > { %2200 = vmax.xlane.f32.xlu1 %v9874_v27 }
 0x374   : > { %2202 = vmax.xlane.f32.xlu0 %v9860_v60 }
 0x376   : > { %2204 = vmax.xlane.f32.xlu1 %v9872_v16 }
 0x378   : > { %2206 = vmax.xlane.f32.xlu0 %v9884_v53 }
 0x37a   : > { %2208 = vmax.xlane.f32.xlu1 %v9893_v25 }
 0x37c   : > { %2210 = vmax.xlane.f32.xlu0 %v9882_v36 }
 0x37e   : > { %2212 = vmax.xlane.f32.xlu1 %v9891_v56 }
 0x380   : > { %2214 = vmax.xlane.f32.xlu0 %v9904_v24 }
 0x382   : > { %2216 = vmax.xlane.f32.xlu1 %v9913_v6 }
 0x384   : > { %2218 = vmax.xlane.f32.xlu0 %v9902_v41 }
 0x386   : > { %2220 = vmax.xlane.f32.xlu1 %v9911_v11 }
 0x388   : > { %2222 = vmax.xlane.f32.xlu0 %v9924_v35 }
 0x38a   : > { %2228 = vmax.xlane.f32.xlu1 %v9931_v62 }
 0x38c   : > { %2226 = vmax.xlane.f32.xlu0 %v9922_v33 }
 0x38e   : > { %2224 = vmax.xlane.f32.xlu1 %v9933_v18 }
 0x3dc   : > { %v1809_v49 = vpop.xlane.xlu1 %1808 }
 0x3dd   : > { %v1838_v17 = vsub.f32 %v9858_v59, %v1809_v49  ;;  %v1805_v48 = vpop.xlane.xlu0 %1804 }
 0x3de   : > { %v1836_v42 = vsub.f32 %v9863_v61, %v1805_v48 }
 0x3df   : > { %v1856_v4 = vmul.f32 1.442695, %v1838_v17 }
 0x3e0   : > { %v1852_v38 = vmul.f32 1.442695, %v1836_v42  ;;  %v1811_v2 = vpop.xlane.xlu1 %1810 }
 0x3e1   : > { %v1839_v0 = vsub.f32 %v9868_v14, %v1811_v2  ;;  %v1807_v37 = vpop.xlane.xlu0 %1806 }
 0x3e2   : > { %8334 = vpow2.f32 %v1852_v38  ;;  %v1837_v20 = vsub.f32 %v9870_v15, %v1807_v37 }
 0x3e3   : > { %8336 = vpow2.f32 %v1856_v4  ;;  %v1858_v23 = vmul.f32 1.442695, %v1839_v0 }
 0x3e4   : > { %v1854_v5 = vmul.f32 1.442695, %v1837_v20 }
 0x3e5   : > { %v1813_v50 = vpop.xlane.xlu0 %1812 }
 0x3e6   : > { %8338 = vpow2.f32 %v1854_v5  ;;  %v1840_v9 = vsub.f32 %v9880_v29, %v1813_v50 }
 0x3e7   : > { %v1815_v3 = vpop.xlane.xlu1 %1814  ;;  %8340 = vpow2.f32 %v1858_v23 }
 0x3e8   : > { %v1860_v30 = vmul.f32 1.442695, %v1840_v9  ;;  %v1841_v34 = vsub.f32 %v9889_v55, %v1815_v3 }
 0x3e9   : > { %v1817_v31 = vpop.xlane.xlu0 %1816 }
 0x3ea   : > { %8342 = vpow2.f32 %v1860_v30  ;;  %v1862_v32 = vmul.f32 1.442695, %v1841_v34  ;;  %v1842_v44 = vsub.f32 %v9878_v28, %v1817_v31 }
 0x3eb   : > { %v1819_v45 = vpop.xlane.xlu1 %1818 }
 0x3ec   : > { %v9961_v46 = vpop.eup %8334  ;;  %v1864_v47 = vmul.f32 1.442695, %v1842_v44  ;;  %v1843_v58 = vsub.f32 %v9887_v54, %v1819_v45  ;;  %8344 = vpow2.f32 %v1862_v32 }
 0x3ed   : > { %v1821_v59 = vpop.xlane.xlu0 %1820  ;;  %1884 = vadd.xlane.f32.xlu0 %v9961_v46  ;;  %v9966_v15 = vpop.eup %8336 }
 0x3ee   : > { %8346 = vpow2.f32 %v1864_v47  ;;  %v1866_v61 = vmul.f32 1.442695, %v1843_v58  ;;  %v1844_v14 = vsub.f32 %v9900_v40, %v1821_v59 }
 0x3ef   : > { %v1823_v29 = vpop.xlane.xlu1 %1822 }
 0x3f0   : > { %v9968_v55 = vpop.eup %8338  ;;  %v1868_v28 = vmul.f32 1.442695, %v1844_v14  ;;  %v1845_v49 = vsub.f32 %v9909_v43, %v1823_v29  ;;  %8348 = vpow2.f32 %v1866_v61 }
 0x3f1   : > { %v1825_v17 = vpop.xlane.xlu0 %1824  ;;  %1888 = vadd.xlane.f32.xlu0 %v9966_v15  ;;  %1886 = vadd.xlane.f32.xlu1 %v9968_v55  ;;  %v9974_v42 = vpop.eup %8340 }
 0x3f2   : > { %8350 = vpow2.f32 %v1868_v28  ;;  %v1870_v54 = vmul.f32 1.442695, %v1845_v49  ;;  %v1846_v48 = vsub.f32 %v9898_v26, %v1825_v17 }
 0x3f3   : > { %v1827_v40 = vpop.xlane.xlu1 %1826 }
 0x3f4   : > { %v9976_v38 = vpop.eup %8342  ;;  %v1872_v2 = vmul.f32 1.442695, %v1846_v48  ;;  %v1847_v4 = vsub.f32 %v9907_v39, %v1827_v40  ;;  %8352 = vpow2.f32 %v1870_v54 }
 0x3f5   : > { %1892 = vadd.xlane.f32.xlu0 %v9976_v38  ;;  %v1829_v43 = vpop.xlane.xlu0 %1828  ;;  %1890 = vadd.xlane.f32.xlu1 %v9974_v42 }
 0x3f6   : > { %8354 = vpow2.f32 %v1872_v2  ;;  %v1874_v0 = vmul.f32 1.442695, %v1847_v4  ;;  %v1848_v37 = vsub.f32 %v9920_v7, %v1829_v43  ;;  %v9982_v20 = vpop.eup %8344 }
 0x3f7   : > { %v1831_v26 = vpop.xlane.xlu1 %1830 }
 0x3f8   : > { %v9984_v5 = vpop.eup %8346  ;;  %v1876_v23 = vmul.f32 1.442695, %v1848_v37  ;;  %v1849_v50 = vsub.f32 %v9929_v8, %v1831_v26  ;;  %8356 = vpow2.f32 %v1874_v0 }
 0x3f9   : > { %1896 = vadd.xlane.f32.xlu0 %v9984_v5  ;;  %v1833_v39 = vpop.xlane.xlu0 %1832  ;;  %1894 = vadd.xlane.f32.xlu1 %v9982_v20 }
 0x3fa   : > { %8358 = vpow2.f32 %v1876_v23  ;;  %v1878_v9 = vmul.f32 1.442695, %v1849_v50  ;;  %v1850_v3 = vsub.f32 %v9918_v10, %v1833_v39  ;;  %v9990_v30 = vpop.eup %8348 }
 0x3fb   : > { %v1835_v7 = vpop.xlane.xlu1 %1834 }
 0x3fc   : > { %v9992_v34 = vpop.eup %8350  ;;  %v1880_v31 = vmul.f32 1.442695, %v1850_v3  ;;  %v1851_v32 = vsub.f32 %v9927_v63, %v1835_v7  ;;  %8360 = vpow2.f32 %v1878_v9 }
 0x3fd   : > { %1900 = vadd.xlane.f32.xlu0 %v9992_v34  ;;  %v2199_v8 = vpop.xlane.xlu0 %2198  ;;  %1898 = vadd.xlane.f32.xlu1 %v9990_v30 }
 0x3fe   : > { %8362 = vpow2.f32 %v1880_v31  ;;  %v1882_v44 = vmul.f32 1.442695, %v1851_v32  ;;  %v2230_v45 = vsub.f32 %v9865_v13, %v2199_v8  ;;  %v9998_v47 = vpop.eup %8352 }
 0x3ff   : > { %v2201_v10 = vpop.xlane.xlu1 %2200 }
 0x400   : > { %v10000_v58 = vpop.eup %8354  ;;  %v2246_v59 = vmul.f32 1.442695, %v2230_v45  ;;  %v2231_v61 = vsub.f32 %v9874_v27, %v2201_v10  ;;  %8364 = vpow2.f32 %v1882_v44 }
 0x401   : > { %1904 = vadd.xlane.f32.xlu0 %v10000_v58  ;;  %v2203_v63 = vpop.xlane.xlu0 %2202  ;;  %1902 = vadd.xlane.f32.xlu1 %v9998_v47 }
 0x402   : > { %8366 = vpow2.f32 %v2246_v59  ;;  %v2248_v14 = vmul.f32 1.442695, %v2231_v61  ;;  %v2232_v29 = vsub.f32 %v9860_v60, %v2203_v63  ;;  %v10006_v28 = vpop.eup %8356 }
 0x403   : > { %v2205_v13 = vpop.xlane.xlu1 %2204 }
 0x404   : > { %v10008_v49 = vpop.eup %8358  ;;  %v2250_v17 = vmul.f32 1.442695, %v2232_v29  ;;  %v2233_v54 = vsub.f32 %v9872_v16, %v2205_v13  ;;  %8368 = vpow2.f32 %v2248_v14 }
 0x405   : > { %1908 = vadd.xlane.f32.xlu0 %v10008_v49  ;;  %v2207_v27 = vpop.xlane.xlu0 %2206  ;;  %1906 = vadd.xlane.f32.xlu1 %v10006_v28 }
 0x406   : > { %8370 = vpow2.f32 %v2250_v17  ;;  %v2252_v48 = vmul.f32 1.442695, %v2233_v54  ;;  %v2234_v40 = vsub.f32 %v9884_v53, %v2207_v27  ;;  %v10014_v2 = vpop.eup %8360 }
 0x407   : > { %v2209_v60 = vpop.xlane.xlu1 %2208 }
 0x408   : > { %v10016_v4 = vpop.eup %8362  ;;  %v2254_v43 = vmul.f32 1.442695, %v2234_v40  ;;  %v2235_v0 = vsub.f32 %v9893_v25, %v2209_v60  ;;  %8372 = vpow2.f32 %v2252_v48 }
 0x409   : > { %1912 = vadd.xlane.f32.xlu0 %v10016_v4  ;;  %v2211_v16 = vpop.xlane.xlu0 %2210  ;;  %1910 = vadd.xlane.f32.xlu1 %v10014_v2 }
 0x40a   : > { %8374 = vpow2.f32 %v2254_v43  ;;  %v2256_v37 = vmul.f32 1.442695, %v2235_v0  ;;  %v2236_v26 = vsub.f32 %v9882_v36, %v2211_v16  ;;  %v10022_v23 = vpop.eup %8364 }
 0x40b   : > { %v2213_v53 = vpop.xlane.xlu1 %2212 }
 0x40c   : > { %v10024_v50 = vpop.eup %8366  ;;  %v2258_v39 = vmul.f32 1.442695, %v2236_v26  ;;  %v2237_v9 = vsub.f32 %v9891_v56, %v2213_v53  ;;  %8376 = vpow2.f32 %v2256_v37 }
 0x40d   : > { %2278 = vadd.xlane.f32.xlu0 %v10024_v50  ;;  %v2215_v25 = vpop.xlane.xlu0 %2214  ;;  %1914 = vadd.xlane.f32.xlu1 %v10022_v23 }
 0x40e   : > { %8378 = vpow2.f32 %v2258_v39  ;;  %v2260_v3 = vmul.f32 1.442695, %v2237_v9  ;;  %v2238_v7 = vsub.f32 %v9904_v24, %v2215_v25  ;;  %v10030_v31 = vpop.eup %8368 }
 0x40f   : > { %v2217_v36 = vpop.xlane.xlu1 %2216 }
 0x410   : > { %v10032_v32 = vpop.eup %8370  ;;  %v2262_v8 = vmul.f32 1.442695, %v2238_v7  ;;  %v2239_v44 = vsub.f32 %v9913_v6, %v2217_v36  ;;  %8380 = vpow2.f32 %v2260_v3  ;;  %v8094_v3 = vld [vmem:[#allocation8] ss:$8 sps:$4 sm:$0xff]   ;;  %v8096_v7 = vld [vmem:[#allocation8 + $0x4] ss:$8 sps:$4 sm:$0xff]  }
 0x411   : > { %2282 = vadd.xlane.f32.xlu0 %v10032_v32  ;;  %v2219_v56 = vpop.xlane.xlu0 %2218  ;;  %2280 = vadd.xlane.f32.xlu1 %v10030_v31  ;;  %v8099_v36 = vld [vmem:[#allocation8 + $0x14] ss:$8 sps:$4 sm:$0xff]  }
 0x412   : > { %8382 = vpow2.f32 %v2262_v8  ;;  %v2264_v45 = vmul.f32 1.442695, %v2239_v44  ;;  %v2240_v10 = vsub.f32 %v9902_v41, %v2219_v56  ;;  %v10038_v59 = vpop.eup %8372  ;;  %2744 = vmatprep.subr.bf16.mxu0 %v8096_v7  ;;  %v8097_v8 = vld [vmem:[#allocation8 + $0x10] ss:$8 sps:$4 sm:$0xff]   ;;  %v8102_v44 = vld [vmem:[#allocation8 + $0x24] ss:$8 sps:$4 sm:$0xff]  }
 0x413   : > { %v2221_v24 = vpop.xlane.xlu1 %2220  ;;  %2745 = vmatpush1.bf16.msra.mxu0 %v8094_v3  ;;  %v8100_v56 = vld [vmem:[#allocation8 + $0x20] ss:$8 sps:$4 sm:$0xff]  }
 0x414   : > { %v10040_v61 = vpop.eup %8374  ;;  %v2266_v63 = vmul.f32 1.442695, %v2240_v10  ;;  %v2241_v14 = vsub.f32 %v9911_v11, %v2221_v24  ;;  %8384 = vpow2.f32 %v2264_v45  ;;  %2746 = vmatprep.subr.bf16.mxu0 %v8099_v36  ;;  %v8105_v45 = vld [vmem:[#allocation8 + $0x34] ss:$8 sps:$4 sm:$0xff]   ;;  %v8103_v10 = vld [vmem:[#allocation8 + $0x30] ss:$8 sps:$4 sm:$0xff]  }
 0x415   : > { %2286 = vadd.xlane.f32.xlu0 %v10040_v61  ;;  %v2223_v6 = vpop.xlane.xlu0 %2222  ;;  %2284 = vadd.xlane.f32.xlu1 %v10038_v59  ;;  %v8108_v24 = vld [vmem:[#allocation8 + $0x44] ss:$8 sps:$4 sm:$0xff]  }
 0x416   : > { %8386 = vpow2.f32 %v2266_v63  ;;  %v2268_v29 = vmul.f32 1.442695, %v2241_v14  ;;  %v2242_v13 = vsub.f32 %v9924_v35, %v2223_v6  ;;  %v10046_v17 = vpop.eup %8376  ;;  %v8106_v63 = vld [vmem:[#allocation8 + $0x40] ss:$8 sps:$4 sm:$0xff]   ;;  %v8111_v14 = vld [vmem:[#allocation8 + $0x54] ss:$8 sps:$4 sm:$0xff]  }
 0x417   : > { %v2229_v41 = vpop.xlane.xlu1 %2228  ;;  %2747 = vmatpush1.bf16.msra.mxu0 %v8097_v8  ;;  %v8109_v6 = vld [vmem:[#allocation8 + $0x50] ss:$8 sps:$4 sm:$0xff]  }
 0x418   : > { %v10048_v54 = vpop.eup %8378  ;;  %v2270_v27 = vmul.f32 1.442695, %v2242_v13  ;;  %8388 = vpow2.f32 %v2268_v29  ;;  %v2245_v35 = vsub.f32 %v9931_v62, %v2229_v41  ;;  %2748 = vmatprep.subr.bf16.mxu0 %v8102_v44  ;;  %v8114_v29 = vld [vmem:[#allocation8 + $0x64] ss:$8 sps:$4 sm:$0xff]   ;;  %v8112_v13 = vld [vmem:[#allocation8 + $0x60] ss:$8 sps:$4 sm:$0xff]  }
 0x419   : > { %2290 = vadd.xlane.f32.xlu0 %v10048_v54  ;;  %v2227_v11 = vpop.xlane.xlu0 %2226  ;;  %2288 = vadd.xlane.f32.xlu1 %v10046_v17 }
 0x41a   : > { %8390 = vpow2.f32 %v2270_v27  ;;  %v2244_v48 = vsub.f32 %v9922_v33, %v2227_v11  ;;  %v10053_v40 = vpop.eup %8380  ;;  %v2276_v33 = vmul.f32 1.442695, %v2245_v35 }
 0x41b   : > { %v2225_v60 = vpop.xlane.xlu1 %2224  ;;  %2749 = vmatpush1.bf16.msra.mxu0 %v8100_v56 }
 0x41c   : > { %v10055_v43 = vpop.eup %8382  ;;  %v2274_v0 = vmul.f32 1.442695, %v2244_v48  ;;  %v2243_v16 = vsub.f32 %v9933_v18, %v2225_v60  ;;  %2750 = vmatprep.subr.bf16.mxu0 %v8105_v45 }
 0x41d   : > { %2294 = vadd.xlane.f32.xlu0 %v10055_v43  ;;  %2292 = vadd.xlane.f32.xlu1 %v10053_v40 }
 0x41e   : > { %8392 = vpow2.f32 %v2274_v0  ;;  %v2272_v37 = vmul.f32 1.442695, %v2243_v16  ;;  %v10061_v26 = vpop.eup %8384 }
 0x41f   : > { %2751 = vmatpush1.bf16.msra.mxu0 %v8103_v10 }
 0x420   : > { %v10063_v53 = vpop.eup %8386  ;;  %8394 = vpow2.f32 %v2272_v37  ;;  %2752 = vmatprep.subr.bf16.mxu0 %v8108_v24 }
 0x421   : > { %2298 = vadd.xlane.f32.xlu0 %v10063_v53  ;;  %2296 = vadd.xlane.f32.xlu1 %v10061_v26  ;;  %8396 = vpow2.f32 %v2276_v33 }
 0x422   : > { %v10067_v62 = vpop.eup %8388 }
 0x423   : > { %2753 = vmatpush1.bf16.msra.mxu0 %v8106_v63 }
 0x424   : > { %v10069_v39 = vpop.eup %8390  ;;  %2754 = vmatprep.subr.bf16.mxu0 %v8111_v14 }
 0x425   : > { %2302 = vadd.xlane.f32.xlu0 %v10069_v39  ;;  %2300 = vadd.xlane.f32.xlu1 %v10067_v62 }
 0x427   : > { %2755 = vmatpush1.bf16.msra.mxu0 %v8109_v6 }
 0x428   : > { %v10073_v18 = vpop.eup %8392  ;;  %2756 = vmatprep.subr.bf16.mxu0 %v8114_v29 }
 0x429   : > { %2306 = vadd.xlane.f32.xlu0 %v10073_v18 }
 0x42a   : > { %v10076_v9 = vpop.eup %8394 }
 0x42b   : > { %2304 = vadd.xlane.f32.xlu1 %v10076_v9  ;;  %v10079_v25 = vpop.eup %8396  ;;  %2757 = vmatpush1.bf16.msra.mxu0 %v8112_v13 }
 0x42f   : > { %2308 = vadd.xlane.f32.xlu1 %v10079_v25 }
 0x47a   : > { %v1885_v41 = vpop.xlane.xlu0 %1884 }
 0x47b   : > { %8398 = vrcp.f32 %v1885_v41 }
 0x47e   : > { %v1889_v27 = vpop.xlane.xlu0 %1888  ;;  %v1887_v11 = vpop.xlane.xlu1 %1886 }
 0x47f   : > { %8400 = vrcp.f32 %v1887_v11 }
 0x480   : > { %8402 = vrcp.f32 %v1889_v27 }
 0x482   : > { %v1893_v48 = vpop.xlane.xlu0 %1892  ;;  %v1891_v60 = vpop.xlane.xlu1 %1890 }
 0x483   : > { %8404 = vrcp.f32 %v1891_v60 }
 0x484   : > { %8406 = vrcp.f32 %v1893_v48 }
 0x485   : > { %v8399_v16 = vpop.eup %8398 }
 0x486   : > { %v1897_v35 = vpop.xlane.xlu0 %1896  ;;  %v1895_v0 = vpop.xlane.xlu1 %1894  ;;  %v1932_v7 = vmul.f32 %v8399_v16, %v9961_v46 }
 0x487   : > { %8408 = vrcp.f32 %v1895_v0 }
 0x488   : > { %8410 = vrcp.f32 %v1897_v35 }
 0x489   : > { %v8401_v37 = vpop.eup %8400 }
 0x48a   : > { %v1901_v33 = vpop.xlane.xlu0 %1900  ;;  %v1899_v3 = vpop.xlane.xlu1 %1898  ;;  %v1933_v36 = vmul.f32 %v8401_v37, %v9968_v55 }
 0x48b   : > { %v8403_v8 = vpop.eup %8402  ;;  %8412 = vrcp.f32 %v1899_v3 }
 0x48c   : > { %v1948_v44 = vpack.c.bf16 %v1933_v36, %v1932_v7  ;;  %8414 = vrcp.f32 %v1901_v33  ;;  %v1934_v24 = vmul.f32 %v8403_v8, %v9966_v15 }
 0x48d   : > { %v8405_v56 = vpop.eup %8404 }
 0x48e   : > { %v1905_v45 = vpop.xlane.xlu0 %1904  ;;  %v1903_v10 = vpop.xlane.xlu1 %1902  ;;  %v1935_v63 = vmul.f32 %v8405_v56, %v9974_v42  ;;  %7591 = vmatprep.mubr.bf16.mxu1 %v1948_v44 }
 0x48f   : > { %v8407_v14 = vpop.eup %8406  ;;  %8416 = vrcp.f32 %v1903_v10 }
 0x490   : > { %v1949_v6 = vpack.c.bf16 %v1935_v63, %v1934_v24  ;;  %8418 = vrcp.f32 %v1905_v45  ;;  %v1936_v55 = vmul.f32 %v8407_v14, %v9976_v38 }
 0x491   : > { %v8409_v29 = vpop.eup %8408 }
 0x492   : > { %v1909_v46 = vpop.xlane.xlu0 %1908  ;;  %v1907_v13 = vpop.xlane.xlu1 %1906  ;;  %7592 = vmatmul.mubr.bf16.vlgmr.msra.gmra.mrb[80].mxu1 %v1949_v6  ;;  %v1937_v41 = vmul.f32 %v8409_v29, %v9982_v20 }
 0x493   : > { %v8411_v27 = vpop.eup %8410  ;;  %7640 = vmatpush3.bf16.msra.mxu1 %v9715_v57  ;;  %8420 = vrcp.f32 %v1907_v13 }
 0x494   : > { %7641 = vmatprep.subr.bf16.mxu1 %v9727_v51  ;;  %v1950_v15 = vpack.c.bf16 %v1937_v41, %v1936_v55  ;;  %8422 = vrcp.f32 %v1909_v46  ;;  %v1938_v60 = vmul.f32 %v8411_v27, %v9984_v5 }
 0x495   : > { %v8413_v42 = vpop.eup %8412 }
 0x496   : > { %v1913_v11 = vpop.xlane.xlu0 %1912  ;;  %v1911_v48 = vpop.xlane.xlu1 %1910  ;;  %7595 = vmatprep.mubr.bf16.mxu1 %v1950_v15  ;;  %v1939_v35 = vmul.f32 %v8413_v42, %v9990_v30 }
 0x497   : > { %v8415_v0 = vpop.eup %8414  ;;  %7642 = vmatpush3.bf16.msra.mxu1 %v9727_v51  ;;  %8424 = vrcp.f32 %v1911_v48 }
 0x498   : > { %7643 = vmatprep.subr.bf16.mxu1 %v9739_v12  ;;  %v1951_v57 = vpack.c.bf16 %v1939_v35, %v1938_v60  ;;  %8426 = vrcp.f32 %v1913_v11  ;;  %v1940_v37 = vmul.f32 %v8415_v0, %v9992_v34 }
 0x499   : > { %v8417_v38 = vpop.eup %8416 }
 0x49a   : > { %v2279_v20 = vpop.xlane.xlu0 %2278  ;;  %v1915_v16 = vpop.xlane.xlu1 %1914  ;;  %7596 = vmatmul.mubr.bf16.gmra.mrb[84].mxu1 %v1951_v57  ;;  %v1941_v33 = vmul.f32 %v8417_v38, %v9998_v47 }
 0x49b   : > { %v8419_v3 = vpop.eup %8418  ;;  %7644 = vmatpush3.bf16.msra.mxu1 %v9739_v12  ;;  %8428 = vrcp.f32 %v1915_v16 }
 0x49c   : > { %7645 = vmatprep.subr.bf16.mxu1 %v9751_v21  ;;  %v1952_v51 = vpack.c.bf16 %v1941_v33, %v1940_v37  ;;  %8430 = vrcp.f32 %v2279_v20  ;;  %v1942_v36 = vmul.f32 %v8419_v3, %v10000_v58 }
 0x49d   : > { %v8421_v5 = vpop.eup %8420 }
 0x49e   : > { %v2283_v30 = vpop.xlane.xlu0 %2282  ;;  %v2281_v7 = vpop.xlane.xlu1 %2280  ;;  %7599 = vmatprep.mubr.bf16.mxu1 %v1952_v51  ;;  %v1943_v8 = vmul.f32 %v8421_v5, %v10006_v28 }
 0x49f   : > { %v8423_v44 = vpop.eup %8422  ;;  %7646 = vmatpush3.bf16.msra.mxu1 %v9751_v21  ;;  %8432 = vrcp.f32 %v2281_v7 }
 0x4a0   : > { %7647 = vmatprep.subr.bf16.mxu1 %v9763_v1  ;;  %v1953_v12 = vpack.c.bf16 %v1943_v8, %v1942_v36  ;;  %8434 = vrcp.f32 %v2283_v30  ;;  %v1944_v45 = vmul.f32 %v8423_v44, %v10008_v49 }
 0x4a1   : > { %v8425_v34 = vpop.eup %8424 }
 0x4a2   : > { %v2287_v47 = vpop.xlane.xlu0 %2286  ;;  %v2285_v56 = vpop.xlane.xlu1 %2284  ;;  %7600 = vmatmul.mubr.bf16.gmra.mrb[88].mxu1 %v1953_v12  ;;  %v1945_v10 = vmul.f32 %v8425_v34, %v10014_v2 }
 0x4a3   : > { %v8427_v24 = vpop.eup %8426  ;;  %7648 = vmatpush3.bf16.msra.mxu1 %v9763_v1  ;;  %8436 = vrcp.f32 %v2285_v56 }
 0x4a4   : > { %7649 = vmatprep.subr.bf16.mxu1 %v9775_v22  ;;  %v1954_v21 = vpack.c.bf16 %v1945_v10, %v1944_v45  ;;  %8438 = vrcp.f32 %v2287_v47  ;;  %v1946_v14 = vmul.f32 %v8427_v24, %v10016_v4  ;;  %v8118_v10 = vld [vmem:[#allocation8 + $0x80] ss:$8 sps:$4 sm:$0xff]   ;;  %v8120_v24 = vld [vmem:[#allocation8 + $0x84] ss:$8 sps:$4 sm:$0xff]  }
 0x4a5   : > { %v8429_v58 = vpop.eup %8428 }
 0x4a6   : > { %v2291_v28 = vpop.xlane.xlu0 %2290  ;;  %v2289_v63 = vpop.xlane.xlu1 %2288  ;;  %7603 = vmatprep.mubr.bf16.mxu1 %v1954_v21  ;;  %v1947_v6 = vmul.f32 %v8429_v58, %v10022_v23  ;;  %v9101_v21 = vmov 0   ;;  %v8129_v58 = vld [vmem:[#allocation8 + $0xb4] ss:$8 sps:$4 sm:$0xff]  }
 0x4a7   : > { %v8431_v29 = vpop.eup %8430  ;;  %7650 = vmatpush3.bf16.msra.mxu1 %v9775_v22  ;;  %8440 = vrcp.f32 %v2289_v63  ;;  %2776 = vmatprep.mubr.bf16.mxu0 %v9101_v21  ;;  %v8130_v63 = vld [vmem:[#allocation8 + $0xc0] ss:$8 sps:$4 sm:$0xff]  }
 0x4a8   : > { %7651 = vmatprep.subr.bf16.mxu1 %v9787_v19  ;;  %v1955_v1 = vpack.c.bf16 %v1947_v6, %v1946_v14  ;;  %8442 = vrcp.f32 %v2291_v28  ;;  %v2326_v13 = vmul.f32 %v8431_v29, %v10024_v50  ;;  %v8127_v28 = vld [vmem:[#allocation8 + $0xb0] ss:$8 sps:$4 sm:$0xff]   ;;  %v8132_v14 = vld [vmem:[#allocation8 + $0xc4] ss:$8 sps:$4 sm:$0xff]   ;;  %v8135_v6 = vld [vmem:[#allocation8 + $0xd4] ss:$8 sps:$4 sm:$0xff]  }
 0x4a9   : > { %v8433_v49 = vpop.eup %8432  ;;  %v8133_v29 = vld [vmem:[#allocation8 + $0xd0] ss:$8 sps:$4 sm:$0xff]  }
 0x4aa   : > { %v2295_v2 = vpop.xlane.xlu0 %2294  ;;  %v2293_v46 = vpop.xlane.xlu1 %2292  ;;  %7604 = vmatmul.mubr.bf16.gmra.mrb[92].mxu1 %v1955_v1  ;;  %v2327_v55 = vmul.f32 %v8433_v49, %v10030_v31  ;;  %v8136_v1 = vld [vmem:[#allocation8 + $0xe0] ss:$8 sps:$4 sm:$0xff]   ;;  %v8138_v49 = vld [vmem:[#allocation8 + $0xe4] ss:$8 sps:$4 sm:$0xff]  }
 0x4ab   : > { %v8435_v41 = vpop.eup %8434  ;;  %7652 = vmatpush3.bf16.msra.mxu1 %v9787_v19  ;;  %8444 = vrcp.f32 %v2293_v46  ;;  %v8139_v46 = vld [vmem:[#allocation8 + $0xf0] ss:$8 sps:$4 sm:$0xff]  }
 0x4ac   : > { %7653 = vmatprep.subr.bf16.mxu1 %v9797_v52  ;;  %v2342_v22 = vpack.c.bf16 %v2327_v55, %v2326_v13  ;;  %8446 = vrcp.f32 %v2295_v2  ;;  %v2328_v15 = vmul.f32 %v8435_v41, %v10032_v32  ;;  %v8141_v2 = vld [vmem:[#allocation8 + $0xf4] ss:$8 sps:$4 sm:$0xff]  }
 0x4ad   : > { %v8437_v4 = vpop.eup %8436 }
 0x4ae   : > { %v2299_v23 = vpop.xlane.xlu0 %2298  ;;  %v2297_v27 = vpop.xlane.xlu1 %2296  ;;  %v2329_v42 = vmul.f32 %v8437_v4, %v10038_v59  ;;  %7655 = vmatprep.mubr.bf16.mxu1 %v2342_v22 }
 0x4af   : > { %v8439_v11 = vpop.eup %8438  ;;  %7654 = vmatpush3.bf16.msra.mxu1 %v9797_v52  ;;  %8448 = vrcp.f32 %v2297_v27 }
 0x4b0   : > { %v2343_v50 = vpack.c.bf16 %v2329_v42, %v2328_v15  ;;  %8450 = vrcp.f32 %v2299_v23  ;;  %v2330_v60 = vmul.f32 %v8439_v11, %v10040_v61  ;;  %2551 = vmatprep.subr.bf16.mxu1 %v8120_v24 }
 0x4b1   : > { %v8441_v31 = vpop.eup %8440 }
 0x4b2   : > { %v2303_v19 = vpop.xlane.xlu0 %2302  ;;  %v2301_v48 = vpop.xlane.xlu1 %2300  ;;  %7656 = vmatmul.mubr.bf16.vlgmr.msra.gmra.mrb[96].mxu1 %v2343_v50  ;;  %v2331_v35 = vmul.f32 %v8441_v31, %v10046_v17 }
 0x4b3   : > { %v8443_v0 = vpop.eup %8442  ;;  %8452 = vrcp.f32 %v2301_v48  ;;  %2552 = vmatpush1.bf16.msra.mxu1 %v8118_v10 }
 0x4b4   : > { %v2344_v32 = vpack.c.bf16 %v2331_v35, %v2330_v60  ;;  %8454 = vrcp.f32 %v2303_v19  ;;  %v2332_v59 = vmul.f32 %v8443_v0, %v10048_v54 }
 0x4b5   : > { %v8445_v57 = vpop.eup %8444 }
 0x4b6   : > { %7659 = vmatprep.mubr.bf16.mxu1 %v2344_v32  ;;  %v2333_v52 = vmul.f32 %v8445_v57, %v10053_v40  ;;  %v8447_v38 = vpop.eup %8446  ;;  %v2307_v20 = vpop.xlane.xlu0 %2306 }
 0x4b7   : > { %v2334_v61 = vmul.f32 %v8447_v38, %v10055_v43 }
 0x4b8   : > { %v2305_v16 = vpop.xlane.xlu1 %2304  ;;  %v2345_v37 = vpack.c.bf16 %v2333_v52, %v2332_v59 }
 0x4b9   : > { %8456 = vrcp.f32 %v2305_v16  ;;  %v8449_v33 = vpop.eup %8448 }
 0x4ba   : > { %8458 = vrcp.f32 %v2307_v20  ;;  %7660 = vmatmul.mubr.bf16.gmra.mrb[100].mxu1 %v2345_v37  ;;  %v2335_v17 = vmul.f32 %v8449_v33, %v10061_v26  ;;  %v8451_v3 = vpop.eup %8450 }
 0x4bb   : > { %v2336_v54 = vmul.f32 %v8451_v3, %v10063_v53  ;;  %v8117_v53 = vld [vmem:[#allocation8 + $0x74] ss:$8 sps:$4 sm:$0xff]  }
 0x4bc   : > { %v2309_v51 = vpop.xlane.xlu1 %2308  ;;  %v2346_v5 = vpack.c.bf16 %v2335_v17, %v2334_v61  ;;  %2758 = vmatprep.subr.bf16.mxu0 %v8117_v53 }
 0x4bd   : > { %8460 = vrcp.f32 %v2309_v51  ;;  %v8453_v30 = vpop.eup %8452 }
 0x4be   : > { %7663 = vmatprep.mubr.bf16.mxu1 %v2346_v5  ;;  %v2337_v40 = vmul.f32 %v8453_v30, %v10067_v62  ;;  %v8455_v7 = vpop.eup %8454  ;;  %v8115_v62 = vld [vmem:[#allocation8 + $0x70] ss:$8 sps:$4 sm:$0xff]  }
 0x4bf   : > { %v2338_v44 = vmul.f32 %v8455_v7, %v10069_v39  ;;  %2759 = vmatpush1.bf16.msra.mxu0 %v8115_v62  ;;  %v8123_v39 = vld [vmem:[#allocation8 + $0x94] ss:$8 sps:$4 sm:$0xff]  }
 0x4c0   : > { %v2347_v36 = vpack.c.bf16 %v2337_v40, %v2336_v54  ;;  %2553 = vmatprep.subr.bf16.mxu1 %v8123_v39 }
 0x4c2   : > { %7664 = vmatmul.mubr.bf16.gmra.mrb[104].mxu1 %v2347_v36 }
 0x4c3   : > { %v8457_v8 = vpop.eup %8456 }
 0x4c4   : > { %v2339_v43 = vmul.f32 %v8457_v8, %v10076_v9  ;;  %v8459_v12 = vpop.eup %8458  ;;  %v8121_v9 = vld [vmem:[#allocation8 + $0x90] ss:$8 sps:$4 sm:$0xff]  }
 0x4c5   : > { %v2340_v47 = vmul.f32 %v8459_v12, %v10073_v18  ;;  %2554 = vmatpush1.bf16.msra.mxu1 %v8121_v9  ;;  %v8124_v18 = vld [vmem:[#allocation8 + $0xa0] ss:$8 sps:$4 sm:$0xff]  }
 0x4c6   : > { %v2348_v26 = vpack.c.bf16 %v2339_v43, %v2338_v44 }
 0x4c7   : > { %v8461_v34 = vpop.eup %8460 }
 0x4c8   : > { %7667 = vmatprep.mubr.bf16.mxu1 %v2348_v26  ;;  %v2341_v56 = vmul.f32 %v8461_v34, %v10079_v25  ;;  %v8126_v25 = vld [vmem:[#allocation8 + $0xa4] ss:$8 sps:$4 sm:$0xff]  }
 0x4c9   : > { %2555 = vmatprep.subr.bf16.mxu1 %v8126_v25 }
 0x4ca   : > { %v2349_v45 = vpack.c.bf16 %v2341_v56, %v2340_v47  ;;  %2556 = vmatpush1.bf16.msra.mxu1 %v8124_v18 }
 0x4cb   : > { %2557 = vmatprep.subr.bf16.mxu1 %v8129_v58 }
 0x4cc   : > { %7668 = vmatmul.mubr.bf16.gmra.mrb[108].mxu1 %v2349_v45 }
 0x4cd   : > { %2583 = vmatprep.mubr.bf16.mxu1 %v9101_v21 }
 0x4ce   : > { %2558 = vmatpush1.bf16.msra.mxu1 %v8127_v28 }
 0x4cf   : > { %2559 = vmatprep.subr.bf16.mxu1 %v8132_v14 }
 0x4d2   : > { %2560 = vmatpush1.bf16.msra.mxu1 %v8130_v63 }
 0x4d3   : > { %2561 = vmatprep.subr.bf16.mxu1 %v8135_v6 }
 0x4d6   : > { %2562 = vmatpush1.bf16.msra.mxu1 %v8133_v29 }
 0x4d7   : > { %2563 = vmatprep.subr.bf16.mxu1 %v8138_v49 }
 0x4da   : > { %2564 = vmatpush1.bf16.msra.mxu1 %v8136_v1 }
 0x4db   : > { %2565 = vmatprep.subr.bf16.mxu1 %v8141_v2 }
 0x4de   : > { %2566 = vmatpush1.bf16.msra.mxu1 %v8139_v46 }
 0x565   : > { %v7593_v13 = vpop.f32.mrb[80].mxu1 }
 0x566   : > { %v1990_v55 = vpop.f32.mrb[81].mxu1 }
 0x567   : > { %v7594_v41 = vpop.f32.mrb[82].mxu1 }
 0x568   : > { %v2054_v22 = vpack.c.bf16 %v7594_v41, %v7593_v13  ;;  %v1993_v4 = vpop.f32.mrb[83].mxu1  ;;  %v2857_v13 = vld [vmem:[%s12659_s5] sm:$0x3] }
 0x569   : > { %v2053_v23 = vpack.c.bf16 %v1993_v4, %v1990_v55  ;;  %v12805_v55 = vld [vmem:[#allocation24_spill] sm:$0xff] }
 0x56a   : > { %v10165_v41 = vrot.slane %v2857_v13, %v12805_v55 }
 0x56b   : > { %2777 = vmatmul.mubr.bf16.vlgmr.msra.gmra.mrb[48].mxu0 %v2053_v23  ;;  %v12806_v23 = vld [vmem:[#allocation25_spill] sm:$0xff] }
 0x56c   : > { %2786 = vmatprep.mubr.bf16.mxu0 %v9101_v21 }
 0x56d   : > { %v7597_v27 = vpop.f32.mrb[84].mxu1 }
 0x56e   : > { %v2006_v15 = vpop.f32.mrb[85].mxu1 }
 0x56f   : > { %v7598_v42 = vpop.f32.mrb[86].mxu1 }
 0x570   : > { %v2056_v11 = vpack.c.bf16 %v7598_v42, %v7597_v27  ;;  %v2009_v50 = vpop.f32.mrb[87].mxu1  ;;  %v10170_v27 = vrot.slane %v2857_v13, %v12806_v23  ;;  %v8789_v13 = vld [vmem:[%s9469_s9 + $0x38] sm:$0xff] }
 0x571   : > { %v2055_v31 = vpack.c.bf16 %v2009_v50, %v2006_v15 }
 0x573   : > { %2787 = vmatmul.mubr.bf16.gmra.mrb[52].mxu0 %v2054_v22 }
 0x574   : > { %2796 = vmatprep.mubr.bf16.mxu0 %v9101_v21 }
 0x575   : > { %v7601_v19 = vpop.f32.mrb[88].mxu1 }
 0x576   : > { %v2022_v48 = vpop.f32.mrb[89].mxu1 }
 0x577   : > { %v7602_v60 = vpop.f32.mrb[90].mxu1 }
 0x578   : > { %v2058_v35 = vpack.c.bf16 %v7602_v60, %v7601_v19  ;;  %v2025_v0 = vpop.f32.mrb[91].mxu1 }
 0x579   : > { %v2057_v32 = vpack.c.bf16 %v2025_v0, %v2022_v48 }
 0x57b   : > { %2797 = vmatmul.mubr.bf16.gmra.mrb[56].mxu0 %v2055_v31 }
 0x57c   : > { %2806 = vmatprep.mubr.bf16.mxu0 %v9101_v21 }
 0x57d   : > { %v7605_v57 = vpop.f32.mrb[92].mxu1 }
 0x57e   : > { %v2038_v59 = vpop.f32.mrb[93].mxu1 }
 0x57f   : > { %v7606_v52 = vpop.f32.mrb[94].mxu1 }
 0x580   : > { %v2060_v38 = vpack.c.bf16 %v7606_v52, %v7605_v57  ;;  %v2041_v20 = vpop.f32.mrb[95].mxu1  ;;  %v8782_v52 = vld [vmem:[%s9469_s9] sm:$0xff] }
 0x581   : > { %v2059_v16 = vpack.c.bf16 %v2041_v20, %v2038_v59 }
 0x583   : > { %2807 = vmatmul.mubr.bf16.gmra.mrb[60].mxu0 %v2056_v11 }
 0x584   : > { %2816 = vmatprep.mubr.bf16.mxu0 %v9101_v21 }
 0x585   : > { %v7657_v37 = vpop.f32.mrb[96].mxu1 }
 0x586   : > { %v2384_v33 = vpop.f32.mrb[97].mxu1 }
 0x587   : > { %v7658_v61 = vpop.f32.mrb[98].mxu1 }
 0x588   : > { %v2448_v17 = vpack.c.bf16 %v7658_v61, %v7657_v37  ;;  %v2387_v3 = vpop.f32.mrb[99].mxu1 }
 0x589   : > { %v2447_v51 = vpack.c.bf16 %v2387_v3, %v2384_v33  ;;  %v8784_v33 = vld [vmem:[%s9469_s9 + $0x10] sm:$0xff] }
 0x58b   : > { %2584 = vmatmul.mubr.bf16.vlgmr.msra.gmra.mrb[112].mxu1 %v2447_v51  ;;  %2817 = vmatmul.mubr.bf16.gmra.mrb[64].mxu0 %v2057_v32 }
 0x58c   : > { %2593 = vmatprep.mubr.bf16.mxu1 %v9101_v21  ;;  %2826 = vmatprep.mubr.bf16.mxu0 %v9101_v21 }
 0x58d   : > { %v7661_v5 = vpop.f32.mrb[100].mxu1 }
 0x58e   : > { %v2400_v30 = vpop.f32.mrb[101].mxu1 }
 0x58f   : > { %v7662_v54 = vpop.f32.mrb[102].mxu1 }
 0x590   : > { %v2450_v40 = vpack.c.bf16 %v7662_v54, %v7661_v5  ;;  %v2403_v7 = vpop.f32.mrb[103].mxu1  ;;  %v8785_v5 = vld [vmem:[%s9469_s9 + $0x18] sm:$0xff] }
 0x591   : > { %v2449_v36 = vpack.c.bf16 %v2403_v7, %v2400_v30 }
 0x593   : > { %2594 = vmatmul.mubr.bf16.gmra.mrb[116].mxu1 %v2448_v17  ;;  %2827 = vmatmul.mubr.bf16.gmra.mrb[68].mxu0 %v2058_v35 }
 0x594   : > { %2603 = vmatprep.mubr.bf16.mxu1 %v9101_v21  ;;  %2836 = vmatprep.mubr.bf16.mxu0 %v9101_v21 }
 0x595   : > { %v7665_v8 = vpop.f32.mrb[104].mxu1 }
 0x596   : > { %v2416_v44 = vpop.f32.mrb[105].mxu1 }
 0x597   : > { %v7666_v43 = vpop.f32.mrb[106].mxu1 }
 0x598   : > { %v2452_v12 = vpack.c.bf16 %v7666_v43, %v7665_v8  ;;  %v2419_v26 = vpop.f32.mrb[107].mxu1 }
 0x599   : > { %v2451_v34 = vpack.c.bf16 %v2419_v26, %v2416_v44 }
 0x59b   : > { %2604 = vmatmul.mubr.bf16.gmra.mrb[120].mxu1 %v2449_v36  ;;  %2837 = vmatmul.mubr.bf16.gmra.mrb[72].mxu0 %v2059_v16  ;;  %v8783_v16 = vld [vmem:[%s9469_s9 + $0x8] sm:$0xff] }
 0x59c   : > { %2613 = vmatprep.mubr.bf16.mxu1 %v9101_v21  ;;  %2846 = vmatprep.mubr.bf16.mxu0 %v9101_v21 }
 0x59f   : > { %v7669_v47 = vpop.f32.mrb[108].mxu1 }
 0x5a0   : > { %v2432_v56 = vpop.f32.mrb[109].mxu1 }
 0x5a1   : > { %v7670_v45 = vpop.f32.mrb[110].mxu1 }
 0x5a2   : > { %v2454_v53 = vpack.c.bf16 %v7670_v45, %v7669_v47  ;;  %v2435_v62 = vpop.f32.mrb[111].mxu1 }
 0x5a3   : > { %v2453_v10 = vpack.c.bf16 %v2435_v62, %v2432_v56  ;;  %2614 = vmatmul.mubr.bf16.gmra.mrb[124].mxu1 %v2450_v40  ;;  %2847 = vmatmul.mubr.bf16.gmra.mrb[76].mxu0 %v2060_v38  ;;  %v8786_v62 = vld [vmem:[%s9469_s9 + $0x20] sm:$0xff] }
 0x5a4   : > { %2623 = vmatprep.mubr.bf16.mxu1 %v9101_v21 }
 0x5ab   : > { %2624 = vmatmul.mubr.bf16.gmra.mrb[128].mxu1 %v2451_v34 }
 0x5ac   : > { %2633 = vmatprep.mubr.bf16.mxu1 %v9101_v21 }
 0x5b3   : > { %2634 = vmatmul.mubr.bf16.gmra.mrb[132].mxu1 %v2452_v12 }
 0x5b4   : > { %2643 = vmatprep.mubr.bf16.mxu1 %v9101_v21 }
 0x5bb   : > { %2644 = vmatmul.mubr.bf16.gmra.mrb[136].mxu1 %v2453_v10 }
 0x5bc   : > { %2653 = vmatprep.mubr.bf16.mxu1 %v9101_v21 }
 0x5c3   : > { %2654 = vmatmul.mubr.bf16.gmra.mrb[140].mxu1 %v2454_v53 }
 0x63e   : > { %v2778_v24 = vpop.f32.mrb[48].mxu0 }
 0x63f   : > { %v2780_v39 = vpop.f32.mrb[49].mxu0 }
 0x640   : > { %v2782_v9 = vpop.f32.mrb[50].mxu0 }
 0x641   : > { %v2784_v18 = vpop.f32.mrb[51].mxu0 }
 0x646   : > { %v2788_v25 = vpop.f32.mrb[52].mxu0 }
 0x647   : > { %v2790_v58 = vpop.f32.mrb[53].mxu0 }
 0x648   : > { %v2792_v28 = vpop.f32.mrb[54].mxu0 }
 0x649   : > { %v2794_v63 = vpop.f32.mrb[55].mxu0 }
 0x64e   : > { %v10145_v14 = vpop.f32.mrb[56].mxu0 }
 0x64f   : > { %v10147_v6 = vpop.f32.mrb[57].mxu0 }
 0x650   : > { %v10149_v29 = vpop.f32.mrb[58].mxu0 }
 0x651   : > { %v10151_v1 = vpop.f32.mrb[59].mxu0 }
 0x656   : > { %v10153_v49 = vpop.f32.mrb[60].mxu0 }
 0x657   : > { %v10155_v21 = vpop.f32.mrb[61].mxu0 }
 0x658   : > { %v10157_v2 = vpop.f32.mrb[62].mxu0 }
 0x659   : > { %v10159_v46 = vpop.f32.mrb[63].mxu0 }
 0x65e   : > { %v2585_v22 = vpop.f32.mrb[112].mxu1  ;;  %v10167_v4 = vpop.f32.mrb[64].mxu0 }
 0x65f   : > { %v2779_v15 = vadd.f32 %v2778_v24, %v2585_v22  ;;  %v2587_v42 = vpop.f32.mrb[113].mxu1  ;;  %v10172_v11 = vpop.f32.mrb[65].mxu0 }
 0x660   : > { %v2781_v50 = vadd.f32 %v2780_v39, %v2587_v42  ;;  %v2589_v31 = vpop.f32.mrb[114].mxu1  ;;  %v10174_v19 = vpop.f32.mrb[66].mxu0  ;;  %v8787_v39 = vld [vmem:[%s9469_s9 + $0x28] sm:$0xff] }
 0x661   : > { %v2869_v48 = vadd.f32 %v10165_v41, %v2779_v15  ;;  %v2783_v60 = vadd.f32 %v2782_v9, %v2589_v31  ;;  %v2591_v35 = vpop.f32.mrb[115].mxu1  ;;  %v10177_v0 = vpop.f32.mrb[67].mxu0 }
 0x662   : > { %v2870_v32 = vadd.f32 %v10170_v27, %v2781_v50  ;;  %v2785_v57 = vadd.f32 %v2784_v18, %v2591_v35  ;;  %v8788_v18 = vld [vmem:[%s9469_s9 + $0x30] sm:$0xff] }
 0x663   : > { %v2871_v59 = vadd.f32 %v10165_v41, %v2783_v60  ;;  %v10182_v38 = vadd.f32 %v8782_v52, %v2869_v48 }
 0x664   : > { %v2872_v20 = vadd.f32 %v10170_v27, %v2785_v57  ;;  %v10186_v37 = vadd.f32 %v8783_v16, %v2870_v32  ;;  %v8790_v16 = vld [vmem:[%s9469_s9 + $0x40] sm:$0xff] }
 0x665   : > { %v10189_v61 = vadd.f32 %v8784_v33, %v2871_v59 }
 0x666   : > { %v2595_v17 = vpop.f32.mrb[116].mxu1  ;;  %v10191_v3 = vpop.f32.mrb[68].mxu0  ;;  %v2933_v51 = vadd.f32 %v10186_v37, %v10182_v38  ;;  %v10196_v30 = vadd.f32 %v8785_v5, %v2872_v20 }
 0x667   : > { %v2789_v54 = vadd.f32 %v2788_v25, %v2595_v17  ;;  %v2597_v40 = vpop.f32.mrb[117].mxu1  ;;  %v10198_v7 = vpop.f32.mrb[69].mxu0 }
 0x668   : > { %v2791_v36 = vadd.f32 %v2790_v58, %v2597_v40  ;;  %v10200_v8 = vpop.f32.mrb[70].mxu0  ;;  %2934 = vadd.xlane.f32.xlu0 %v2933_v51  ;;  %v2599_v44 = vpop.f32.mrb[118].mxu1  ;;  %v2936_v43 = vadd.f32 %v10196_v30, %v10189_v61  ;;  %v8791_v51 = vld [vmem:[%s9469_s9 + $0x48] sm:$0xff] }
 0x669   : > { %v2873_v12 = vadd.f32 %v10165_v41, %v2789_v54  ;;  %v2793_v26 = vadd.f32 %v2792_v28, %v2599_v44  ;;  %v2601_v34 = vpop.f32.mrb[119].mxu1  ;;  %v10205_v47 = vpop.f32.mrb[71].mxu0  ;;  %v8793_v44 = vld [vmem:[%s9469_s9 + $0x58] sm:$0xff] }
 0x66a   : > { %v2874_v56 = vadd.f32 %v10170_v27, %v2791_v36  ;;  %v2795_v45 = vadd.f32 %v2794_v63, %v2601_v34  ;;  %2937 = vadd.xlane.f32.xlu1 %v2936_v43 }
 0x66b   : > { %v2875_v53 = vadd.f32 %v10165_v41, %v2793_v26  ;;  %v10210_v10 = vadd.f32 %v8786_v62, %v2873_v12 }
 0x66c   : > { %v2876_v24 = vadd.f32 %v10170_v27, %v2795_v45  ;;  %v10214_v9 = vadd.f32 %v8787_v39, %v2874_v56 }
 0x66d   : > { %v10217_v25 = vadd.f32 %v8788_v18, %v2875_v53 }
 0x66e   : > { %v2605_v58 = vpop.f32.mrb[120].mxu1  ;;  %v10219_v28 = vpop.f32.mrb[72].mxu0  ;;  %v2939_v63 = vadd.f32 %v10214_v9, %v10210_v10  ;;  %v10224_v22 = vadd.f32 %v8789_v13, %v2876_v24  ;;  %v8794_v13 = vld [vmem:[%s9469_s9 + $0x60] sm:$0xff] }
 0x66f   : > { %v2799_v15 = vadd.f32 %v10145_v14, %v2605_v58  ;;  %v2607_v42 = vpop.f32.mrb[121].mxu1  ;;  %v10227_v50 = vpop.f32.mrb[73].mxu0 }
 0x670   : > { %v2801_v31 = vadd.f32 %v10147_v6, %v2607_v42  ;;  %v10230_v48 = vpop.f32.mrb[74].mxu0  ;;  %2940 = vadd.xlane.f32.xlu0 %v2939_v63  ;;  %v2609_v60 = vpop.f32.mrb[122].mxu1  ;;  %v2942_v35 = vadd.f32 %v10224_v22, %v10217_v25 }
 0x671   : > { %v2877_v32 = vadd.f32 %v10165_v41, %v2799_v15  ;;  %v2803_v57 = vadd.f32 %v10149_v29, %v2609_v60  ;;  %v2611_v14 = vpop.f32.mrb[123].mxu1  ;;  %v10236_v59 = vpop.f32.mrb[75].mxu0  ;;  %v8792_v29 = vld [vmem:[%s9469_s9 + $0x50] sm:$0xff] }
 0x672   : > { %v2878_v52 = vadd.f32 %v10170_v27, %v2801_v31  ;;  %v2805_v6 = vadd.f32 %v10151_v1, %v2611_v14  ;;  %2943 = vadd.xlane.f32.xlu1 %v2942_v35  ;;  %v8795_v31 = vld [vmem:[%s9469_s9 + $0x68] sm:$0xff] }
 0x673   : > { %v2879_v20 = vadd.f32 %v10165_v41, %v2803_v57  ;;  %v10242_v33 = vadd.f32 %v8790_v16, %v2877_v32 }
 0x674   : > { %v2880_v17 = vadd.f32 %v10170_v27, %v2805_v6  ;;  %v10246_v5 = vadd.f32 %v8791_v51, %v2878_v52 }
 0x675   : > { %v10249_v54 = vadd.f32 %v8792_v29, %v2879_v20 }
 0x676   : > { %v2615_v40 = vpop.f32.mrb[124].mxu1  ;;  %v10251_v36 = vpop.f32.mrb[76].mxu0  ;;  %v2945_v1 = vadd.f32 %v10246_v5, %v10242_v33  ;;  %v10256_v43 = vadd.f32 %v8793_v44, %v2880_v17 }
 0x677   : > { %v2809_v12 = vadd.f32 %v10153_v49, %v2615_v40  ;;  %v2617_v26 = vpop.f32.mrb[125].mxu1  ;;  %v10259_v34 = vpop.f32.mrb[77].mxu0 }
 0x678   : > { %v2811_v56 = vadd.f32 %v10155_v21, %v2617_v26  ;;  %v10262_v45 = vpop.f32.mrb[78].mxu0  ;;  %2946 = vadd.xlane.f32.xlu0 %v2945_v1  ;;  %v2619_v53 = vpop.f32.mrb[126].mxu1  ;;  %v2948_v62 = vadd.f32 %v10256_v43, %v10249_v54 }
 0x679   : > { %v2881_v24 = vadd.f32 %v10165_v41, %v2809_v12  ;;  %v2813_v39 = vadd.f32 %v10157_v2, %v2619_v53  ;;  %v2621_v49 = vpop.f32.mrb[127].mxu1  ;;  %v10268_v18 = vpop.f32.mrb[79].mxu0  ;;  %v8796_v2 = vld [vmem:[%s9469_s9 + $0x70] sm:$0xff] }
 0x67a   : > { %v2882_v58 = vadd.f32 %v10170_v27, %v2811_v56  ;;  %v2815_v21 = vadd.f32 %v10159_v46, %v2621_v49  ;;  %2949 = vadd.xlane.f32.xlu1 %v2948_v62  ;;  %v8797_v46 = vld [vmem:[%s9469_s9 + $0x78] sm:$0xff]  ;;  %v8799_v56 = vld [vmem:[%s9469_s9 + $0x88] sm:$0xff]  ;;  %v8800_v62 = vld [vmem:[%s9469_s9 + $0x90] sm:$0xff] }
 0x67b   : > { %v2883_v63 = vadd.f32 %v10165_v41, %v2813_v39  ;;  %v10274_v15 = vadd.f32 %v8794_v13, %v2881_v24 }
 0x67c   : > { %v2884_v42 = vadd.f32 %v10170_v27, %v2815_v21  ;;  %v10278_v60 = vadd.f32 %v8795_v31, %v2882_v58 }
 0x67d   : > { %v10281_v35 = vadd.f32 %v8796_v2, %v2883_v63 }
 0x67e   : > { %v2625_v32 = vpop.f32.mrb[128].mxu1  ;;  %v2951_v57 = vadd.f32 %v10278_v60, %v10274_v15  ;;  %v10286_v14 = vadd.f32 %v8797_v46, %v2884_v42 }
 0x67f   : > { %v2819_v52 = vadd.f32 %v10167_v4, %v2625_v32  ;;  %v2627_v6 = vpop.f32.mrb[129].mxu1 }
 0x680   : > { %v2821_v20 = vadd.f32 %v10172_v11, %v2627_v6  ;;  %2952 = vadd.xlane.f32.xlu0 %v2951_v57  ;;  %v2629_v16 = vpop.f32.mrb[130].mxu1  ;;  %v2954_v17 = vadd.f32 %v10286_v14, %v10281_v35  ;;  %v8798_v11 = vld [vmem:[%s9469_s9 + $0x80] sm:$0xff] }
 0x681   : > { %v2885_v51 = vadd.f32 %v10165_v41, %v2819_v52  ;;  %v2823_v29 = vadd.f32 %v10174_v19, %v2629_v16  ;;  %v2631_v40 = vpop.f32.mrb[131].mxu1 }
 0x682   : > { %v2886_v1 = vadd.f32 %v10170_v27, %v2821_v20  ;;  %v2825_v4 = vadd.f32 %v10177_v0, %v2631_v40  ;;  %2955 = vadd.xlane.f32.xlu1 %v2954_v17  ;;  %v8801_v0 = vld [vmem:[%s9469_s9 + $0x98] sm:$0xff]  ;;  %v8803_v20 = vld [vmem:[%s9469_s9 + $0xa8] sm:$0xff]  ;;  %v8804_v17 = vld [vmem:[%s9469_s9 + $0xb0] sm:$0xff] }
 0x683   : > { %v2887_v44 = vadd.f32 %v10165_v41, %v2823_v29  ;;  %v10298_v12 = vadd.f32 %v8798_v11, %v2885_v51 }
 0x684   : > { %v2888_v26 = vadd.f32 %v10170_v27, %v2825_v4  ;;  %v10302_v53 = vadd.f32 %v8799_v56, %v2886_v1 }
 0x685   : > { %v10305_v24 = vadd.f32 %v8800_v62, %v2887_v44 }
 0x686   : > { %v2635_v19 = vpop.f32.mrb[132].mxu1  ;;  %v2957_v39 = vadd.f32 %v10302_v53, %v10298_v12  ;;  %v10310_v49 = vadd.f32 %v8801_v0, %v2888_v26 }
 0x687   : > { %v2829_v58 = vadd.f32 %v10191_v3, %v2635_v19  ;;  %v2637_v21 = vpop.f32.mrb[133].mxu1 }
 0x688   : > { %v2831_v63 = vadd.f32 %v10198_v7, %v2637_v21  ;;  %2958 = vadd.xlane.f32.xlu0 %v2957_v39  ;;  %v2639_v13 = vpop.f32.mrb[134].mxu1  ;;  %v2960_v42 = vadd.f32 %v10310_v49, %v10305_v24  ;;  %v8802_v7 = vld [vmem:[%s9469_s9 + $0xa0] sm:$0xff] }
 0x689   : > { %v2889_v31 = vadd.f32 %v10165_v41, %v2829_v58  ;;  %v2833_v2 = vadd.f32 %v10200_v8, %v2639_v13  ;;  %v2641_v32 = vpop.f32.mrb[135].mxu1 }
 0x68a   : > { %v2890_v57 = vadd.f32 %v10170_v27, %v2831_v63  ;;  %v2835_v3 = vadd.f32 %v10205_v47, %v2641_v32  ;;  %2961 = vadd.xlane.f32.xlu1 %v2960_v42  ;;  %v8805_v47 = vld [vmem:[%s9469_s9 + $0xb8] sm:$0xff]  ;;  %v8807_v63 = vld [vmem:[%s9469_s9 + $0xc8] sm:$0xff]  ;;  %v8808_v42 = vld [vmem:[%s9469_s9 + $0xd0] sm:$0xff] }
 0x68b   : > { %v2891_v46 = vadd.f32 %v10165_v41, %v2833_v2  ;;  %v10322_v52 = vadd.f32 %v8802_v7, %v2889_v31 }
 0x68c   : > { %v2892_v6 = vadd.f32 %v10170_v27, %v2835_v3  ;;  %v10326_v16 = vadd.f32 %v8803_v20, %v2890_v57 }
 0x68d   : > { %v10329_v51 = vadd.f32 %v8804_v17, %v2891_v46 }
 0x68e   : > { %v2645_v8 = vpop.f32.mrb[136].mxu1  ;;  %v2963_v29 = vadd.f32 %v10326_v16, %v10322_v52  ;;  %v10334_v40 = vadd.f32 %v8805_v47, %v2892_v6 }
 0x68f   : > { %v2839_v1 = vadd.f32 %v10219_v28, %v2645_v8  ;;  %v2647_v4 = vpop.f32.mrb[137].mxu1 }
 0x690   : > { %v2841_v44 = vadd.f32 %v10227_v50, %v2647_v4  ;;  %2964 = vadd.xlane.f32.xlu0 %v2963_v29  ;;  %v2649_v11 = vpop.f32.mrb[138].mxu1  ;;  %v2966_v26 = vadd.f32 %v10334_v40, %v10329_v51  ;;  %v8806_v50 = vld [vmem:[%s9469_s9 + $0xc0] sm:$0xff] }
 0x691   : > { %v2893_v56 = vadd.f32 %v10165_v41, %v2839_v1  ;;  %v2843_v62 = vadd.f32 %v10230_v48, %v2649_v11  ;;  %v2651_v19 = vpop.f32.mrb[139].mxu1 }
 0x692   : > { %v2894_v39 = vadd.f32 %v10170_v27, %v2841_v44  ;;  %v2845_v28 = vadd.f32 %v10236_v59, %v2651_v19  ;;  %2967 = vadd.xlane.f32.xlu1 %v2966_v26  ;;  %v8809_v59 = vld [vmem:[%s9469_s9 + $0xd8] sm:$0xff]  ;;  %v8811_v44 = vld [vmem:[%s9469_s9 + $0xe8] sm:$0xff]  ;;  %v8812_v26 = vld [vmem:[%s9469_s9 + $0xf0] sm:$0xff] }
 0x693   : > { %v2895_v0 = vadd.f32 %v10165_v41, %v2843_v62  ;;  %v10346_v58 = vadd.f32 %v8806_v50, %v2893_v56  ;;  %v8813_v62 = vld [vmem:[%s9469_s9 + $0xf8] sm:$0xff]  ;;  %v3300_v50 = vld [vmem:[#allocation10 + $0x30] sm:$0xff] }
 0x694   : > { %v2896_v21 = vadd.f32 %v10170_v27, %v2845_v28  ;;  %v10350_v13 = vadd.f32 %v8807_v63, %v2894_v39  ;;  %v3298_v39 = vld [vmem:[#allocation10 + $0x20] sm:$0xff] }
 0x695   : > { %v10353_v31 = vadd.f32 %v8808_v42, %v2895_v0  ;;  %v3306_v63 = vld [vmem:[#allocation10 + $0x60] sm:$0xff] }
 0x696   : > { %v2655_v48 = vpop.f32.mrb[140].mxu1  ;;  %v2969_v2 = vadd.f32 %v10350_v13, %v10346_v58  ;;  %v10358_v32 = vadd.f32 %v8809_v59, %v2896_v21  ;;  %v3302_v21 = vld [vmem:[#allocation10 + $0x40] sm:$0xff]  ;;  %v3304_v59 = vld [vmem:[#allocation10 + $0x50] sm:$0xff] }
 0x697   : > { %v2849_v57 = vadd.f32 %v10251_v36, %v2655_v48  ;;  %v2657_v3 = vpop.f32.mrb[141].mxu1 }
 0x698   : > { %v2851_v46 = vadd.f32 %v10259_v34, %v2657_v3  ;;  %2970 = vadd.xlane.f32.xlu0 %v2969_v2  ;;  %v2659_v7 = vpop.f32.mrb[142].mxu1  ;;  %v2972_v6 = vadd.f32 %v10358_v32, %v10353_v31  ;;  %v8810_v34 = vld [vmem:[%s9469_s9 + $0xe0] sm:$0xff]  ;;  %v7224_v2 = vcombine.high %v3302_v21, %v3306_v63  ;;  %s6901_s9 = scalar_lea.sflag [#allocation4], %s9454_s6 }
 0x699   : > { %v2897_v20 = vadd.f32 %v10165_v41, %v2849_v57  ;;  %v2853_v17 = vadd.f32 %v10262_v45, %v2659_v7  ;;  %v2661_v8 = vpop.f32.mrb[143].mxu1  ;;  %v3308_v57 = vld [vmem:[#allocation10 + $0x70] sm:$0xff]  ;;  %v3310_v3 = vld [vmem:[#allocation10 + $0x80] sm:$0xff] }
 0x69a   : > { %v2898_v29 = vadd.f32 %v10170_v27, %v2851_v46  ;;  %v2855_v36 = vadd.f32 %v10268_v18, %v2661_v8  ;;  %2973 = vadd.xlane.f32.xlu1 %v2972_v6  ;;  %v3294_v18 = vld [vmem:[#allocation10] sm:$0xff]  ;;  %v7228_v46 = vcombine.high %v3304_v59, %v3308_v57  ;;  %v3312_v6 = vld [vmem:[#allocation10 + $0x90] sm:$0xff]  ;;  %v7227_v8 = vcombine.low %v3304_v59, %v3308_v57 }
 0x69b   : > { %v2899_v47 = vadd.f32 %v10165_v41, %v2853_v17  ;;  %v10370_v1 = vadd.f32 %v8810_v34, %v2897_v20  ;;  %v7215_v28 = vcombine.low %v3294_v18, %v3298_v39  ;;  %v7216_v0 = vcombine.high %v3294_v18, %v3298_v39  ;;  %v3314_v7 = vld [vmem:[#allocation10 + $0xa0] sm:$0xff]  ;;  %v3316_v20 = vld [vmem:[#allocation10 + $0xb0] sm:$0xff] }
 0x69c   : > { %v2900_v4 = vadd.f32 %v10170_v27, %v2855_v36  ;;  %v10374_v11 = vadd.f32 %v8811_v44, %v2898_v29  ;;  %v3296_v27 = vld [vmem:[#allocation10 + $0x10] sm:$0xff]  ;;  %v7223_v17 = vcombine.low %v3302_v21, %v3306_v63  ;;  %v7232_v29 = vcombine.high %v3310_v3, %v3314_v7  ;;  %v3322_v34 = vld [vmem:[#allocation10 + $0xe0] sm:$0xff] }
 0x69d   : > { %v10377_v56 = vadd.f32 %v8812_v26, %v2899_v47  ;;  %v7219_v42 = vcombine.low %v3296_v27, %v3300_v50  ;;  %v7220_v48 = vcombine.high %v3296_v27, %v3300_v50  ;;  %4104 = vmatprep.subr.bf16.mxu1 %v7216_v0  ;;  %v7236_v36 = vcombine.high %v3312_v6, %v3316_v20  ;;  %v3318_v47 = vld [vmem:[#allocation10 + $0xc0] sm:$0xff]  ;;  %v3324_v44 = vld [vmem:[#allocation10 + $0xf0] sm:$0xff] }
 0x69e   : > { %v2975_v45 = vadd.f32 %v10374_v11, %v10370_v1  ;;  %v10382_v19 = vadd.f32 %v8813_v62, %v2900_v4  ;;  %4105 = vmatpush1.bf16.msra.mxu1 %v7215_v28  ;;  %v3320_v4 = vld [vmem:[#allocation10 + $0xd0] sm:$0xff]  ;;  %v7231_v26 = vcombine.low %v3310_v3, %v3314_v7  ;;  %v7240_v62 = vcombine.high %v3318_v47, %v3322_v34  ;;  %v3326_v18 = vld [vmem:[#allocation10 + $0x100] sm:$0xff] }
 0x69f   : > { %4330 = vmatprep.subr.bf16.mxu0 %v7220_v48  ;;  %4106 = vmatprep.subr.bf16.mxu1 %v7224_v2  ;;  %v3330_v39 = vld [vmem:[#allocation10 + $0x120] sm:$0xff]  ;;  %v3328_v27 = vld [vmem:[#allocation10 + $0x110] sm:$0xff]  ;;  %v7239_v0 = vcombine.low %v3318_v47, %v3322_v34  ;;  %v7243_v50 = vcombine.low %v3320_v4, %v3324_v44 }
 0x6a0   : > { %2976 = vadd.xlane.f32.xlu0 %v2975_v45  ;;  %v2978_v41 = vadd.f32 %v10382_v19, %v10377_v56  ;;  %4331 = vmatpush1.bf16.msra.mxu0 %v7219_v42  ;;  %v7235_v45 = vcombine.low %v3312_v6, %v3316_v20  ;;  %v3332_v28 = vld [vmem:[#allocation10 + $0x130] sm:$0xff]  ;;  %v7248_v21 = vcombine.high %v3326_v18, %v3330_v39  ;;  %v3334_v42 = vld [vmem:[#allocation10 + $0x140] sm:$0xff] }
 0x6a1   : > { %4332 = vmatprep.subr.bf16.mxu0 %v7228_v46  ;;  %v7252_v63 = vcombine.high %v3328_v27, %v3332_v28  ;;  %v3338_v48 = vld [vmem:[#allocation10 + $0x160] sm:$0xff]  ;;  %v3336_v2 = vld [vmem:[#allocation10 + $0x150] sm:$0xff]  ;;  %v7247_v57 = vcombine.low %v3326_v18, %v3330_v39  ;;  %v7251_v3 = vcombine.low %v3328_v27, %v3332_v28 }
 0x6a2   : > { %2979 = vadd.xlane.f32.xlu1 %v2978_v41  ;;  %4107 = vmatpush1.bf16.msra.mxu1 %v7223_v17  ;;  %v7244_v41 = vcombine.high %v3320_v4, %v3324_v44  ;;  %v3340_v59 = vld [vmem:[#allocation10 + $0x170] sm:$0xff]  ;;  %v7256_v46 = vcombine.high %v3334_v42, %v3338_v48  ;;  %v3342_v6 = vld [vmem:[#allocation10 + $0x180] sm:$0xff] }
 0x6a3   : > { %4108 = vmatprep.subr.bf16.mxu1 %v7232_v29  ;;  %v7260_v7 = vcombine.high %v3336_v2, %v3340_v59  ;;  %v3346_v20 = vld [vmem:[#allocation10 + $0x1a0] sm:$0xff]  ;;  %v3344_v17 = vld [vmem:[#allocation10 + $0x190] sm:$0xff]  ;;  %v7255_v29 = vcombine.low %v3334_v42, %v3338_v48 }
 0x6a4   : > { %4333 = vmatpush1.bf16.msra.mxu0 %v7227_v8  ;;  %v3348_v8 = vld [vmem:[#allocation10 + $0x1b0] sm:$0xff]  ;;  %v7264_v47 = vcombine.high %v3342_v6, %v3346_v20  ;;  %v3350_v4 = vld [vmem:[#allocation10 + $0x1c0] sm:$0xff] }
 0x6a5   : > { %4334 = vmatprep.subr.bf16.mxu0 %v7236_v36  ;;  %v7259_v36 = vcombine.low %v3336_v2, %v3340_v59  ;;  %v7268_v34 = vcombine.high %v3344_v17, %v3348_v8  ;;  %v3354_v44 = vld [vmem:[#allocation10 + $0x1e0] sm:$0xff] }
 0x6a6   : > { %4109 = vmatpush1.bf16.msra.mxu1 %v7231_v26  ;;  %v3352_v26 = vld [vmem:[#allocation10 + $0x1d0] sm:$0xff]  ;;  %v7272_v18 = vcombine.high %v3350_v4, %v3354_v44  ;;  %v3358_v27 = vld [vmem:[#allocation10 + $0x200] sm:$0xff] }
 0x6a7   : > { %4110 = vmatprep.subr.bf16.mxu1 %v7240_v62  ;;  %v7263_v62 = vcombine.low %v3342_v6, %v3346_v20  ;;  %v3362_v28 = vld [vmem:[#allocation10 + $0x220] sm:$0xff] }
 0x6a8   : > { %4335 = vmatpush1.bf16.msra.mxu0 %v7235_v45  ;;  %v3356_v45 = vld [vmem:[#allocation10 + $0x1f0] sm:$0xff]  ;;  %v7280_v42 = vcombine.high %v3358_v27, %v3362_v28  ;;  %v3366_v2 = vld [vmem:[#allocation10 + $0x240] sm:$0xff] }
 0x6a9   : > { %4336 = vmatprep.subr.bf16.mxu0 %v7244_v41  ;;  %v7267_v41 = vcombine.low %v3344_v17, %v3348_v8  ;;  %v7276_v39 = vcombine.high %v3352_v26, %v3356_v45  ;;  %v3370_v59 = vld [vmem:[#allocation10 + $0x260] sm:$0xff] }
 0x6aa   : > { %4111 = vmatpush1.bf16.msra.mxu1 %v7239_v0  ;;  %v3360_v0 = vld [vmem:[#allocation10 + $0x210] sm:$0xff]  ;;  %v7288_v6 = vcombine.high %v3366_v2, %v3370_v59  ;;  %v7287_v17 = vcombine.low %v3366_v2, %v3370_v59 }
 0x6ab   : > { %4112 = vmatprep.subr.bf16.mxu1 %v7248_v21  ;;  %v7271_v21 = vcombine.low %v3350_v4, %v3354_v44 }
 0x6ac   : > { %4337 = vmatpush1.bf16.msra.mxu0 %v7243_v50  ;;  %v3364_v50 = vld [vmem:[#allocation10 + $0x230] sm:$0xff] }
 0x6ad   : > { %4338 = vmatprep.subr.bf16.mxu0 %v7252_v63  ;;  %v7275_v63 = vcombine.low %v3352_v26, %v3356_v45  ;;  %v7284_v48 = vcombine.high %v3360_v0, %v3364_v50 }
 0x6ae   : > { %4113 = vmatpush1.bf16.msra.mxu1 %v7247_v57  ;;  %v3368_v57 = vld [vmem:[#allocation10 + $0x250] sm:$0xff] }
 0x6af   : > { %4114 = vmatprep.subr.bf16.mxu1 %v7256_v46  ;;  %v7279_v46 = vcombine.low %v3358_v27, %v3362_v28 }
 0x6b0   : > { %4339 = vmatpush1.bf16.msra.mxu0 %v7251_v3  ;;  %v3372_v3 = vld [vmem:[#allocation10 + $0x270] sm:$0xff] }
 0x6b1   : > { %4340 = vmatprep.subr.bf16.mxu0 %v7260_v7  ;;  %v7283_v7 = vcombine.low %v3360_v0, %v3364_v50  ;;  %v7292_v20 = vcombine.high %v3368_v57, %v3372_v3  ;;  %v7291_v8 = vcombine.low %v3368_v57, %v3372_v3 }
 0x6b2   : > { %4115 = vmatpush1.bf16.msra.mxu1 %v7255_v29 }
 0x6b3   : > { %4116 = vmatprep.subr.bf16.mxu1 %v7264_v47 }
 0x6b4   : > { %4341 = vmatpush1.bf16.msra.mxu0 %v7259_v36 }
 0x6b5   : > { %4342 = vmatprep.subr.bf16.mxu0 %v7268_v34 }
 0x6b6   : > { %4117 = vmatpush1.bf16.msra.mxu1 %v7263_v62 }
 0x6b7   : > { %4118 = vmatprep.subr.bf16.mxu1 %v7272_v18 }
 0x6b8   : > { %4343 = vmatpush1.bf16.msra.mxu0 %v7267_v41 }
 0x6b9   : > { %4344 = vmatprep.subr.bf16.mxu0 %v7276_v39 }
 0x6ba   : > { %4119 = vmatpush1.bf16.msra.mxu1 %v7271_v21 }
 0x6bb   : > { %4120 = vmatprep.subr.bf16.mxu1 %v7280_v42 }
 0x6bc   : > { %4345 = vmatpush1.bf16.msra.mxu0 %v7275_v63 }
 0x6bd   : > { %4346 = vmatprep.subr.bf16.mxu0 %v7284_v48 }
 0x6be   : > { %4121 = vmatpush1.bf16.msra.mxu1 %v7279_v46 }
 0x6bf   : > { %4122 = vmatprep.subr.bf16.mxu1 %v7288_v6 }
 0x6c0   : > { %4347 = vmatpush1.bf16.msra.mxu0 %v7283_v7 }
 0x6c1   : > { %4348 = vmatprep.subr.bf16.mxu0 %v7292_v20 }
 0x6c2   : > { %4123 = vmatpush1.bf16.msra.mxu1 %v7287_v17 }
 0x6c4   : > { %4349 = vmatpush1.bf16.msra.mxu0 %v7291_v8 }
 0x6f5   : > { %v2935_v29 = vpop.xlane.xlu0 %2934 }
 0x6f6   : > { %v2982_v36 = vmul.f32 0.00390625, %v2935_v29 }
 0x6f7   : > { %v2938_v47 = vpop.xlane.xlu1 %2937 }
 0x6f8   : > { %v10387_v34 = vsub.f32 %v10182_v38, %v2982_v36  ;;  %v10390_v4 = vsub.f32 %v10186_v37, %v2982_v36  ;;  %v2983_v44 = vmul.f32 0.00390625, %v2938_v47  ;;  %v3374_v36 = vld [vmem:[#allocation10 + $0x280] sm:$0xff] }
 0x6f9   : > { %v3378_v47 = vld [vmem:[#allocation10 + $0x2a0] sm:$0xff] }
 0x6fa   : > { %v10393_v26 = vsub.f32 %v10189_v61, %v2983_v44  ;;  %v10396_v45 = vsub.f32 %v10196_v30, %v2983_v44  ;;  %v3030_v62 = vmul.f32 %v10387_v34, %v10387_v34  ;;  %v3031_v41 = vmul.f32 %v10390_v4, %v10390_v4 }
 0x6fc   : > { %v3062_v18 = vadd.f32 %v3031_v41, %v3030_v62  ;;  %v3032_v38 = vmul.f32 %v10393_v26, %v10393_v26  ;;  %v3033_v37 = vmul.f32 %v10396_v45, %v10396_v45  ;;  %v7296_v62 = vcombine.high %v3374_v36, %v3378_v47 }
 0x6fd   : > { %v2941_v39 = vpop.xlane.xlu0 %2940 }
 0x6fe   : > { %v2984_v27 = vmul.f32 0.00390625, %v2941_v39  ;;  %3063 = vadd.xlane.f32.xlu0 %v3062_v18  ;;  %v3065_v61 = vadd.f32 %v3033_v37, %v3032_v38  ;;  %v7295_v38 = vcombine.low %v3374_v36, %v3378_v47  ;;  %4124 = vmatprep.subr.bf16.mxu1 %v7296_v62  ;;  %v3396_v47 = vld [vmem:[#allocation10 + $0x330] sm:$0xff] }
 0x6ff   : > { %v2944_v28 = vpop.xlane.xlu1 %2943 }
 0x700   : > { %v10407_v30 = vsub.f32 %v10210_v10, %v2984_v27  ;;  %v10410_v0 = vsub.f32 %v10214_v9, %v2984_v27  ;;  %v2985_v50 = vmul.f32 0.00390625, %v2944_v28  ;;  %3066 = vadd.xlane.f32.xlu1 %v3065_v61  ;;  %4125 = vmatpush1.bf16.msra.mxu1 %v7295_v38 }
 0x702   : > { %v10413_v21 = vsub.f32 %v10217_v25, %v2985_v50  ;;  %v10416_v63 = vsub.f32 %v10224_v22, %v2985_v50  ;;  %v3034_v42 = vmul.f32 %v10407_v30, %v10407_v30  ;;  %v3035_v48 = vmul.f32 %v10410_v0, %v10410_v0 }
 0x704   : > { %v3068_v2 = vadd.f32 %v3035_v48, %v3034_v42  ;;  %v3036_v10 = vmul.f32 %v10413_v21, %v10413_v21  ;;  %v3037_v9 = vmul.f32 %v10416_v63, %v10416_v63  ;;  %v3382_v42 = vld [vmem:[#allocation10 + $0x2c0] sm:$0xff] }
 0x705   : > { %v2947_v59 = vpop.xlane.xlu0 %2946  ;;  %v3386_v48 = vld [vmem:[#allocation10 + $0x2e0] sm:$0xff] }
 0x706   : > { %v2986_v57 = vmul.f32 0.00390625, %v2947_v59  ;;  %3069 = vadd.xlane.f32.xlu0 %v3068_v2  ;;  %v3071_v25 = vadd.f32 %v3037_v9, %v3036_v10  ;;  %v3384_v2 = vld [vmem:[#allocation10 + $0x2d0] sm:$0xff]  ;;  %v7304_v10 = vcombine.high %v3382_v42, %v3386_v48 }
 0x707   : > { %v2950_v3 = vpop.xlane.xlu1 %2949  ;;  %v3388_v9 = vld [vmem:[#allocation10 + $0x2f0] sm:$0xff] }
 0x708   : > { %v10427_v22 = vsub.f32 %v10242_v33, %v2986_v57  ;;  %v10430_v46 = vsub.f32 %v10246_v5, %v2986_v57  ;;  %v2987_v7 = vmul.f32 0.00390625, %v2950_v3  ;;  %3072 = vadd.xlane.f32.xlu1 %v3071_v25  ;;  %v7303_v25 = vcombine.low %v3382_v42, %v3386_v48  ;;  %4126 = vmatprep.subr.bf16.mxu1 %v7304_v10  ;;  %v3400_v42 = vld [vmem:[#allocation10 + $0x350] sm:$0xff] }
 0x709   : > { %v7307_v3 = vcombine.low %v3384_v2, %v3388_v9 }
 0x70a   : > { %v10433_v6 = vsub.f32 %v10249_v54, %v2987_v7  ;;  %v10436_v20 = vsub.f32 %v10256_v43, %v2987_v7  ;;  %v3038_v17 = vmul.f32 %v10427_v22, %v10427_v22  ;;  %v3039_v8 = vmul.f32 %v10430_v46, %v10430_v46  ;;  %v3376_v54 = vld [vmem:[#allocation10 + $0x290] sm:$0xff]  ;;  %4127 = vmatpush1.bf16.msra.mxu1 %v7303_v25 }
 0x70b   : > { %v3380_v43 = vld [vmem:[#allocation10 + $0x2b0] sm:$0xff]  ;;  %v7308_v7 = vcombine.high %v3384_v2, %v3388_v9 }
 0x70c   : > { %v3074_v29 = vadd.f32 %v3039_v8, %v3038_v17  ;;  %v3040_v33 = vmul.f32 %v10433_v6, %v10433_v6  ;;  %v3041_v5 = vmul.f32 %v10436_v20, %v10436_v20  ;;  %v7299_v37 = vcombine.low %v3376_v54, %v3380_v43  ;;  %v3404_v2 = vld [vmem:[#allocation10 + $0x370] sm:$0xff] }
 0x70d   : > { %v2953_v44 = vpop.xlane.xlu0 %2952  ;;  %v7300_v27 = vcombine.high %v3376_v54, %v3380_v43  ;;  %v7324_v25 = vcombine.high %v3400_v42, %v3404_v2 }
 0x70e   : > { %v2988_v41 = vmul.f32 0.00390625, %v2953_v44  ;;  %3075 = vadd.xlane.f32.xlu0 %v3074_v29  ;;  %v3077_v18 = vadd.f32 %v3041_v5, %v3040_v33  ;;  %v3394_v29 = vld [vmem:[#allocation10 + $0x320] sm:$0xff]  ;;  %v3392_v33 = vld [vmem:[#allocation10 + $0x310] sm:$0xff] }
 0x70f   : > { %v2956_v39 = vpop.xlane.xlu1 %2955  ;;  %4350 = vmatprep.subr.bf16.mxu0 %v7300_v27  ;;  %v7315_v43 = vcombine.low %v3392_v33, %v3396_v47  ;;  %v3398_v27 = vld [vmem:[#allocation10 + $0x340] sm:$0xff] }
 0x710   : > { %v10447_v61 = vsub.f32 %v10274_v15, %v2988_v41  ;;  %v10450_v28 = vsub.f32 %v10278_v60, %v2988_v41  ;;  %v2989_v50 = vmul.f32 0.00390625, %v2956_v39  ;;  %3078 = vadd.xlane.f32.xlu1 %v3077_v18  ;;  %4351 = vmatpush1.bf16.msra.mxu0 %v7299_v37  ;;  %v7316_v18 = vcombine.high %v3392_v33, %v3396_v47 }
 0x711   : > { %4352 = vmatprep.subr.bf16.mxu0 %v7308_v7 }
 0x712   : > { %v10453_v59 = vsub.f32 %v10281_v35, %v2989_v50  ;;  %v10456_v57 = vsub.f32 %v10286_v14, %v2989_v50  ;;  %v3042_v15 = vmul.f32 %v10447_v61, %v10447_v61  ;;  %v3043_v60 = vmul.f32 %v10450_v28, %v10450_v28  ;;  %v3390_v14 = vld [vmem:[#allocation10 + $0x300] sm:$0xff] }
 0x713   : > { %v7312_v36 = vcombine.high %v3390_v14, %v3394_v29  ;;  %v7311_v62 = vcombine.low %v3390_v14, %v3394_v29  ;;  %v3402_v50 = vld [vmem:[#allocation10 + $0x360] sm:$0xff]  ;;  %v3412_v29 = vld [vmem:[#allocation10 + $0x3b0] sm:$0xff] }
 0x714   : > { %v3080_v17 = vadd.f32 %v3043_v60, %v3042_v15  ;;  %v3044_v8 = vmul.f32 %v10453_v59, %v10453_v59  ;;  %v3045_v35 = vmul.f32 %v10456_v57, %v10456_v57  ;;  %4353 = vmatpush1.bf16.msra.mxu0 %v7307_v3  ;;  %v7320_v48 = vcombine.high %v3398_v27, %v3402_v50 }
 0x715   : > { %v2959_v5 = vpop.xlane.xlu0 %2958  ;;  %4128 = vmatprep.subr.bf16.mxu1 %v7312_v36  ;;  %4354 = vmatprep.subr.bf16.mxu0 %v7316_v18  ;;  %v7319_v15 = vcombine.low %v3398_v27, %v3402_v50  ;;  %v7323_v60 = vcombine.low %v3400_v42, %v3404_v2  ;;  %v3414_v18 = vld [vmem:[#allocation10 + $0x3c0] sm:$0xff]  ;;  %v3416_v27 = vld [vmem:[#allocation10 + $0x3d0] sm:$0xff] }
 0x716   : > { %v2990_v54 = vmul.f32 0.00390625, %v2959_v5  ;;  %3081 = vadd.xlane.f32.xlu0 %v3080_v17  ;;  %v3083_v44 = vadd.f32 %v3045_v35, %v3044_v8  ;;  %4129 = vmatpush1.bf16.msra.mxu1 %v7311_v62  ;;  %v3410_v17 = vld [vmem:[#allocation10 + $0x3a0] sm:$0xff]  ;;  %v3408_v8 = vld [vmem:[#allocation10 + $0x390] sm:$0xff] }
 0x717   : > { %v2962_v41 = vpop.xlane.xlu1 %2961  ;;  %4130 = vmatprep.subr.bf16.mxu1 %v7320_v48  ;;  %v7331_v47 = vcombine.low %v3408_v8, %v3412_v29  ;;  %v3420_v42 = vld [vmem:[#allocation10 + $0x3f0] sm:$0xff] }
 0x718   : > { %v10467_v38 = vsub.f32 %v10298_v12, %v2990_v54  ;;  %v10470_v37 = vsub.f32 %v10302_v53, %v2990_v54  ;;  %v2991_v39 = vmul.f32 0.00390625, %v2962_v41  ;;  %3084 = vadd.xlane.f32.xlu1 %v3083_v44  ;;  %4355 = vmatpush1.bf16.msra.mxu0 %v7315_v43  ;;  %v7332_v44 = vcombine.high %v3408_v8, %v3412_v29 }
 0x719   : > { %4356 = vmatprep.subr.bf16.mxu0 %v7324_v25 }
 0x71a   : > { %v10473_v10 = vsub.f32 %v10305_v24, %v2991_v39  ;;  %v10476_v9 = vsub.f32 %v10310_v49, %v2991_v39  ;;  %v3046_v12 = vmul.f32 %v10467_v38, %v10467_v38  ;;  %v3047_v53 = vmul.f32 %v10470_v37, %v10470_v37  ;;  %v3406_v49 = vld [vmem:[#allocation10 + $0x380] sm:$0xff]  ;;  %4131 = vmatpush1.bf16.msra.mxu1 %v7319_v15 }
 0x71b   : > { %v7328_v14 = vcombine.high %v3406_v49, %v3410_v17  ;;  %v7327_v36 = vcombine.low %v3406_v49, %v3410_v17  ;;  %v3418_v39 = vld [vmem:[#allocation10 + $0x3e0] sm:$0xff]  ;;  %v7340_v15 = vcombine.high %v3416_v27, %v3420_v42 }
 0x71c   : > { %v3086_v3 = vadd.f32 %v3047_v53, %v3046_v12  ;;  %v3048_v7 = vmul.f32 %v10473_v10, %v10473_v10  ;;  %v3049_v24 = vmul.f32 %v10476_v9, %v10476_v9  ;;  %4357 = vmatpush1.bf16.msra.mxu0 %v7323_v60  ;;  %v7336_v50 = vcombine.high %v3414_v18, %v3418_v39 }
 0x71d   : > { %v2965_v35 = vpop.xlane.xlu0 %2964  ;;  %4132 = vmatprep.subr.bf16.mxu1 %v7328_v14  ;;  %4358 = vmatprep.subr.bf16.mxu0 %v7332_v44  ;;  %v7335_v12 = vcombine.low %v3414_v18, %v3418_v39  ;;  %v7339_v53 = vcombine.low %v3416_v27, %v3420_v42 }
 0x71e   : > { %v2992_v33 = vmul.f32 0.00390625, %v2965_v35  ;;  %3087 = vadd.xlane.f32.xlu0 %v3086_v3  ;;  %v3089_v5 = vadd.f32 %v3049_v24, %v3048_v7  ;;  %4133 = vmatpush1.bf16.msra.mxu1 %v7327_v36  ;;  %v10508_v3 = vld [vmem:[#allocation10 + $0x28] sm:$0xff] }
 0x71f   : > { %v2968_v54 = vpop.xlane.xlu1 %2967  ;;  %4134 = vmatprep.subr.bf16.mxu1 %v7336_v50 }
 0x720   : > { %v10487_v62 = vsub.f32 %v10322_v52, %v2992_v33  ;;  %v10490_v43 = vsub.f32 %v10326_v16, %v2992_v33  ;;  %v2993_v41 = vmul.f32 0.00390625, %v2968_v54  ;;  %3090 = vadd.xlane.f32.xlu1 %v3089_v5  ;;  %4359 = vmatpush1.bf16.msra.mxu0 %v7331_v47 }
 0x721   : > { %4360 = vmatprep.subr.bf16.mxu0 %v7340_v15 }
 0x722   : > { %v10493_v48 = vsub.f32 %v10329_v51, %v2993_v41  ;;  %v10496_v2 = vsub.f32 %v10334_v40, %v2993_v41  ;;  %v3050_v52 = vmul.f32 %v10487_v62, %v10487_v62  ;;  %v3051_v16 = vmul.f32 %v10490_v43, %v10490_v43  ;;  %v10506_v40 = vld [vmem:[#allocation10 + $0x8] sm:$0xff]  ;;  %4135 = vmatpush1.bf16.msra.mxu1 %v7335_v12 }
 0x723   : > { %v7218_v24 = vcombine.high %v10506_v40, %v10508_v3  ;;  %v7217_v8 = vcombine.low %v10506_v40, %v10508_v3  ;;  %v3319_v3 = vld [vmem:[#allocation10 + $0xc8] sm:$0xff] }
 0x724   : > { %v3092_v60 = vadd.f32 %v3051_v16, %v3050_v52  ;;  %v3052_v25 = vmul.f32 %v10493_v48, %v10493_v48  ;;  %v3053_v51 = vmul.f32 %v10496_v2, %v10496_v2  ;;  %4361 = vmatpush1.bf16.msra.mxu0 %v7339_v53 }
 0x725   : > { %v2971_v7 = vpop.xlane.xlu0 %2970  ;;  %4217 = vmatprep.subr.bf16.mxu1 %v7218_v24 }
 0x726   : > { %v2994_v49 = vmul.f32 0.00390625, %v2971_v7  ;;  %3093 = vadd.xlane.f32.xlu0 %v3092_v60  ;;  %v3095_v17 = vadd.f32 %v3053_v51, %v3052_v25 }
 0x727   : > { %v2974_v35 = vpop.xlane.xlu1 %2973 }
 0x728   : > { %v10515_v14 = vsub.f32 %v10346_v58, %v2994_v49  ;;  %v10518_v29 = vsub.f32 %v10350_v13, %v2994_v49  ;;  %v2995_v33 = vmul.f32 0.00390625, %v2974_v35  ;;  %3096 = vadd.xlane.f32.xlu1 %v3095_v17  ;;  %v3190_v35 = vld [vmem:[%s12664_s10] sm:$0x3] }
 0x72a   : > { %v10521_v5 = vsub.f32 %v10353_v31, %v2995_v33  ;;  %v10524_v36 = vsub.f32 %v10358_v32, %v2995_v33  ;;  %v3054_v47 = vmul.f32 %v10515_v14, %v10515_v14  ;;  %v3055_v54 = vmul.f32 %v10518_v29, %v10518_v29 }
 0x72c   : > { %v3098_v44 = vadd.f32 %v3055_v54, %v3054_v47  ;;  %v3056_v58 = vmul.f32 %v10521_v5, %v10521_v5  ;;  %v3057_v13 = vmul.f32 %v10524_v36, %v10524_v36 }
 0x72d   : > { %v2977_v41 = vpop.xlane.xlu0 %2976 }
 0x72e   : > { %v2996_v18 = vmul.f32 0.00390625, %v2977_v41  ;;  %3099 = vadd.xlane.f32.xlu0 %v3098_v44  ;;  %v3101_v31 = vadd.f32 %v3057_v13, %v3056_v58  ;;  %v10558_v44 = vrot.slane %v3190_v35, %v12805_v55  ;;  %v10561_v58 = vrot.slane %v3190_v35, %v12806_v23  ;;  %v3234_v13 = vld [vmem:[%s12807_s29] sm:$0x3]  ;;  %s6917_s29 = sshll.u32 %s12478_s0, 4  ;;  %s12599_s29 = int_to_ptr.vmem [resolvable:$true] %s6917_s29 }
 0x72f   : > { %v2980_v39 = vpop.xlane.xlu1 %2979  ;;  %s8987_s19 = scalar_lea.vmem %s12599_s29, 4096 }
 0x730   : > { %v10535_v32 = vsub.f32 %v10370_v1, %v2996_v18  ;;  %v10538_v27 = vsub.f32 %v10374_v11, %v2996_v18  ;;  %v2997_v50 = vmul.f32 0.00390625, %v2980_v39  ;;  %3102 = vadd.xlane.f32.xlu1 %v3101_v31  ;;  %p8988_p2 = scmp.ne.s32.totalorder %s12599_s29, %s8987_s19 }
 0x732   : > { %v10541_v42 = vsub.f32 %v10377_v56, %v2997_v50  ;;  %v10544_v52 = vsub.f32 %v10382_v19, %v2997_v50  ;;  %v3058_v16 = vmul.f32 %v10535_v32, %v10535_v32  ;;  %v3059_v12 = vmul.f32 %v10538_v27, %v10538_v27  ;;  %p8989_p8 = pnand %p8988_p2, %p9351_p5 }
 0x734   : > { %v3104_v53 = vadd.f32 %v3059_v12, %v3058_v16  ;;  %v3060_v1 = vmul.f32 %v10541_v42, %v10541_v42  ;;  %v3061_v11 = vmul.f32 %v10544_v52, %v10544_v52  ;;  %v10569_v12 = vrot.slane %v3234_v13, %v12805_v55  ;;  %p8990_p10 = pneg %p8989_p8 }
 0x736   : > { %3105 = vadd.xlane.f32.xlu0 %v3104_v53  ;;  %v3107_v15 = vadd.f32 %v3061_v11, %v3060_v1  ;;  %v10572_v53 = vrot.slane %v3234_v13, %v12806_v23 }
 0x738   : > { %3108 = vadd.xlane.f32.xlu1 %v3107_v15 }
 0x78b   : > { %v3064_v56 = vpop.xlane.xlu0 %3063 }
 0x78c   : > { %v3110_v60 = vmul.f32 0.00390625, %v3064_v56 }
 0x78d   : > { %v3067_v19 = vpop.xlane.xlu1 %3066 }
 0x78e   : > { %v3126_v25 = vadd.f32 1e-05, %v3110_v60  ;;  %v3111_v51 = vmul.f32 0.00390625, %v3067_v19 }
 0x790   : > { %8462 = vrsqrt.f32 %v3126_v25  ;;  %v3127_v7 = vadd.f32 1e-05, %v3111_v51 }
 0x792   : > { %8464 = vrsqrt.f32 %v3127_v7 }
 0x793   : > { %v3070_v24 = vpop.xlane.xlu0 %3069 }
 0x794   : > { %v3112_v49 = vmul.f32 0.00390625, %v3070_v24 }
 0x795   : > { %v3073_v17 = vpop.xlane.xlu1 %3072 }
 0x796   : > { %v3128_v33 = vadd.f32 1e-05, %v3112_v49  ;;  %v3113_v47 = vmul.f32 0.00390625, %v3073_v17  ;;  %v3303_v49 = vld [vmem:[#allocation10 + $0x48] sm:$0xff] }
 0x797   : > { %v3307_v17 = vld [vmem:[#allocation10 + $0x68] sm:$0xff] }
 0x798   : > { %8466 = vrsqrt.f32 %v3128_v33  ;;  %v3129_v54 = vadd.f32 1e-05, %v3113_v47 }
 0x79a   : > { %v8463_v41 = vpop.eup %8462  ;;  %8468 = vrsqrt.f32 %v3129_v54 }
 0x79b   : > { %v3158_v18 = vmul.f32 %v8463_v41, %v10387_v34  ;;  %v3159_v31 = vmul.f32 %v8463_v41, %v10390_v4  ;;  %v3076_v39 = vpop.xlane.xlu0 %3075 }
 0x79c   : > { %v8465_v50 = vpop.eup %8464  ;;  %v3114_v16 = vmul.f32 0.00390625, %v3076_v39  ;;  %v7226_v39 = vcombine.high %v3303_v49, %v3307_v17 }
 0x79d   : > { %v3202_v1 = vmul.f32 %v10558_v44, %v3158_v18  ;;  %v3160_v11 = vmul.f32 %v8465_v50, %v10393_v26  ;;  %v3161_v15 = vmul.f32 %v8465_v50, %v10396_v45  ;;  %v3079_v56 = vpop.xlane.xlu1 %3078  ;;  %v3203_v34 = vmul.f32 %v10561_v58, %v3159_v31 }
 0x79e   : > { %v3130_v60 = vadd.f32 1e-05, %v3114_v16  ;;  %v3115_v4 = vmul.f32 0.00390625, %v3079_v56 }
 0x79f   : > { %v3204_v19 = vmul.f32 %v10558_v44, %v3160_v11  ;;  %v3205_v25 = vmul.f32 %v10561_v58, %v3161_v15  ;;  %v10581_v7 = vadd.f32 %v10572_v53, %v3203_v34  ;;  %v10587_v26 = vadd.f32 %v10569_v12, %v3202_v1  ;;  %v3311_v1 = vld [vmem:[#allocation10 + $0x88] sm:$0xff] }
 0x7a0   : > { %8470 = vrsqrt.f32 %v3130_v60  ;;  %v3131_v51 = vadd.f32 1e-05, %v3115_v4  ;;  %v3315_v11 = vld [vmem:[#allocation10 + $0xa8] sm:$0xff] }
 0x7a1   : > { %12808 = vst [vmem:[#allocation26_spill] sm:$0xff] %v10581_v7  ;;  %v10584_v24 = vadd.f32 %v10572_v53, %v3205_v25  ;;  %12810 = vst [vmem:[#allocation28_spill] sm:$0xff] %v10587_v26  ;;  %v10590_v45 = vadd.f32 %v10569_v12, %v3204_v19  ;;  %v7234_v19 = vcombine.high %v3311_v1, %v3315_v11 }
 0x7a2   : > { %v8467_v35 = vpop.eup %8466  ;;  %8472 = vrsqrt.f32 %v3131_v51 }
 0x7a3   : > { %12809 = vst [vmem:[#allocation27_spill] sm:$0xff] %v10584_v24  ;;  %12811 = vst [vmem:[#allocation29_spill] sm:$0xff] %v10590_v45  ;;  %v3162_v33 = vmul.f32 %v8467_v35, %v10407_v30  ;;  %v3163_v47 = vmul.f32 %v8467_v35, %v10410_v0  ;;  %v3082_v54 = vpop.xlane.xlu0 %3081  ;;  %v10596_v13 = vpack.c.bf16 %v10584_v24, %v10581_v7 }
 0x7a4   : > { %v10600_v41 = vpack.c.bf16 %v10590_v45, %v10587_v26  ;;  %v8469_v18 = vpop.eup %8468  ;;  %v3116_v31 = vmul.f32 0.00390625, %v3082_v54 }
 0x7a5   : > { %v3164_v50 = vmul.f32 %v8469_v18, %v10413_v21  ;;  %v3165_v16 = vmul.f32 %v8469_v18, %v10416_v63  ;;  %4136 = vmatprep.mubr.bf16.mxu1 %v10596_v13  ;;  %4362 = vmatprep.mubr.bf16.mxu0 %v10596_v13  ;;  %v3085_v30 = vpop.xlane.xlu1 %3084  ;;  %v3207_v0 = vmul.f32 %v10561_v58, %v3163_v47 }
 0x7a6   : > { %v3132_v15 = vadd.f32 1e-05, %v3116_v31  ;;  %v3117_v56 = vmul.f32 0.00390625, %v3085_v30  ;;  %4137 = vmatmul.mubr.bf16.vlgmr.msra.gmra.mrb[144].mxu1 %v10600_v41  ;;  %4363 = vmatmul.mubr.bf16.vlgmr.msra.gmra.mrb[80].mxu0 %v10600_v41  ;;  %v3206_v34 = vmul.f32 %v10558_v44, %v3162_v33  ;;  %v7225_v21 = vcombine.low %v3303_v49, %v3307_v17 }
 0x7a7   : > { %4218 = vmatpush1.bf16.msra.mxu1 %v7217_v8  ;;  %v3209_v63 = vmul.f32 %v10561_v58, %v3165_v16  ;;  %v3208_v60 = vmul.f32 %v10558_v44, %v3164_v50  ;;  %v10616_v25 = vadd.f32 %v10572_v53, %v3207_v0  ;;  %v3323_v8 = vld [vmem:[#allocation10 + $0xe8] sm:$0xff]  ;;  %v7233_v17 = vcombine.low %v3311_v1, %v3315_v11 }
 0x7a8   : > { %8474 = vrsqrt.f32 %v3132_v15  ;;  %v3133_v4 = vadd.f32 1e-05, %v3117_v56  ;;  %4219 = vmatprep.subr.bf16.mxu1 %v7226_v39  ;;  %v10622_v35 = vadd.f32 %v10569_v12, %v3206_v34  ;;  %v7242_v16 = vcombine.high %v3319_v3, %v3323_v8  ;;  %v3327_v1 = vld [vmem:[#allocation10 + $0x108] sm:$0xff] }
 0x7a9   : > { %12812 = vst [vmem:[#allocation30_spill] sm:$0xff] %v10616_v25  ;;  %v10619_v51 = vadd.f32 %v10572_v53, %v3209_v63  ;;  %v10625_v40 = vadd.f32 %v10569_v12, %v3208_v60  ;;  %v3331_v11 = vld [vmem:[#allocation10 + $0x128] sm:$0xff] }
 0x7aa   : > { %12814 = vst [vmem:[#allocation32_spill] sm:$0xff] %v10622_v35  ;;  %v8471_v49 = vpop.eup %8470  ;;  %8476 = vrsqrt.f32 %v3133_v4  ;;  %v7250_v60 = vcombine.high %v3327_v1, %v3331_v11 }
 0x7ab   : > { %12813 = vst [vmem:[#allocation31_spill] sm:$0xff] %v10619_v51  ;;  %12815 = vst [vmem:[#allocation33_spill] sm:$0xff] %v10625_v40  ;;  %v3166_v33 = vmul.f32 %v8471_v49, %v10427_v22  ;;  %v3167_v47 = vmul.f32 %v8471_v49, %v10430_v46  ;;  %v3088_v54 = vpop.xlane.xlu0 %3087  ;;  %4220 = vmatpush1.bf16.msra.mxu1 %v7225_v21  ;;  %v10631_v18 = vpack.c.bf16 %v10619_v51, %v10616_v25 }
 0x7ac   : > { %v10635_v31 = vpack.c.bf16 %v10625_v40, %v10622_v35  ;;  %v8473_v39 = vpop.eup %8472  ;;  %v3118_v50 = vmul.f32 0.00390625, %v3088_v54  ;;  %4221 = vmatprep.subr.bf16.mxu1 %v7234_v19 }
 0x7ad   : > { %v3168_v30 = vmul.f32 %v8473_v39, %v10433_v6  ;;  %v3169_v22 = vmul.f32 %v8473_v39, %v10436_v20  ;;  %4146 = vmatprep.mubr.bf16.mxu1 %v10631_v18  ;;  %4372 = vmatprep.mubr.bf16.mxu0 %v10631_v18  ;;  %v3091_v46 = vpop.xlane.xlu1 %3090  ;;  %v3211_v0 = vmul.f32 %v10561_v58, %v3167_v47 }
 0x7ae   : > { %v3134_v15 = vadd.f32 1e-05, %v3118_v50  ;;  %v3119_v56 = vmul.f32 0.00390625, %v3091_v46  ;;  %4147 = vmatmul.mubr.bf16.gmra.mrb[148].mxu1 %v10635_v31  ;;  %4373 = vmatmul.mubr.bf16.gmra.mrb[84].mxu0 %v10635_v31  ;;  %v3210_v34 = vmul.f32 %v10558_v44, %v3166_v33  ;;  %v7241_v6 = vcombine.low %v3319_v3, %v3323_v8  ;;  %v3335_v3 = vld [vmem:[#allocation10 + $0x148] sm:$0xff] }
 0x7af   : > { %4222 = vmatpush1.bf16.msra.mxu1 %v7233_v17  ;;  %v3213_v20 = vmul.f32 %v10561_v58, %v3169_v22  ;;  %v3212_v21 = vmul.f32 %v10558_v44, %v3168_v30  ;;  %v10648_v4 = vadd.f32 %v10572_v53, %v3211_v0  ;;  %v3339_v8 = vld [vmem:[#allocation10 + $0x168] sm:$0xff]  ;;  %v7249_v47 = vcombine.low %v3327_v1, %v3331_v11 }
 0x7b0   : > { %8478 = vrsqrt.f32 %v3134_v15  ;;  %v3135_v63 = vadd.f32 1e-05, %v3119_v56  ;;  %4223 = vmatprep.subr.bf16.mxu1 %v7242_v16  ;;  %v10654_v49 = vadd.f32 %v10569_v12, %v3210_v34  ;;  %v7258_v0 = vcombine.high %v3335_v3, %v3339_v8  ;;  %v3343_v15 = vld [vmem:[#allocation10 + $0x188] sm:$0xff] }
 0x7b1   : > { %12816 = vst [vmem:[#allocation34_spill] sm:$0xff] %v10648_v4  ;;  %v10651_v19 = vadd.f32 %v10572_v53, %v3213_v20  ;;  %v10657_v17 = vadd.f32 %v10569_v12, %v3212_v21  ;;  %v3347_v56 = vld [vmem:[#allocation10 + $0x1a8] sm:$0xff] }
 0x7b2   : > { %12818 = vst [vmem:[#allocation36_spill] sm:$0xff] %v10654_v49  ;;  %v8475_v33 = vpop.eup %8474  ;;  %8480 = vrsqrt.f32 %v3135_v63 }
 0x7b3   : > { %12817 = vst [vmem:[#allocation35_spill] sm:$0xff] %v10651_v19  ;;  %12819 = vst [vmem:[#allocation37_spill] sm:$0xff] %v10657_v17  ;;  %v3170_v54 = vmul.f32 %v8475_v33, %v10447_v61  ;;  %v3171_v39 = vmul.f32 %v8475_v33, %v10450_v28  ;;  %v3094_v50 = vpop.xlane.xlu0 %3093  ;;  %4224 = vmatpush1.bf16.msra.mxu1 %v7241_v6  ;;  %v10663_v16 = vpack.c.bf16 %v10651_v19, %v10648_v4 }
 0x7b4   : > { %v10667_v30 = vpack.c.bf16 %v10657_v17, %v10654_v49  ;;  %v8477_v22 = vpop.eup %8476  ;;  %v3120_v46 = vmul.f32 0.00390625, %v3094_v50  ;;  %4225 = vmatprep.subr.bf16.mxu1 %v7250_v60  ;;  %v7266_v60 = vcombine.high %v3343_v15, %v3347_v56 }
 0x7b5   : > { %v3172_v1 = vmul.f32 %v8477_v22, %v10453_v59  ;;  %v3173_v61 = vmul.f32 %v8477_v22, %v10456_v57  ;;  %4156 = vmatprep.mubr.bf16.mxu1 %v10663_v16  ;;  %4382 = vmatprep.mubr.bf16.mxu0 %v10663_v16  ;;  %v3097_v28 = vpop.xlane.xlu1 %3096  ;;  %v3215_v11 = vmul.f32 %v10561_v58, %v3171_v39 }
 0x7b6   : > { %v3136_v34 = vadd.f32 1e-05, %v3120_v46  ;;  %v3121_v6 = vmul.f32 0.00390625, %v3097_v28  ;;  %4157 = vmatmul.mubr.bf16.gmra.mrb[152].mxu1 %v10667_v30  ;;  %4383 = vmatmul.mubr.bf16.gmra.mrb[88].mxu0 %v10667_v30  ;;  %v3214_v20 = vmul.f32 %v10558_v44, %v3170_v54  ;;  %v7257_v59 = vcombine.low %v3335_v3, %v3339_v8  ;;  %v3351_v3 = vld [vmem:[#allocation10 + $0x1c8] sm:$0xff] }
 0x7b7   : > { %4226 = vmatpush1.bf16.msra.mxu1 %v7249_v47  ;;  %v3217_v57 = vmul.f32 %v10561_v58, %v3173_v61  ;;  %v3216_v21 = vmul.f32 %v10558_v44, %v3172_v1  ;;  %v10680_v33 = vadd.f32 %v10572_v53, %v3215_v11  ;;  %v3355_v8 = vld [vmem:[#allocation10 + $0x1e8] sm:$0xff]  ;;  %v7265_v22 = vcombine.low %v3343_v15, %v3347_v56 }
 0x7b8   : > { %8482 = vrsqrt.f32 %v3136_v34  ;;  %v3137_v63 = vadd.f32 1e-05, %v3121_v6  ;;  %4227 = vmatprep.subr.bf16.mxu1 %v7258_v0  ;;  %v10686_v50 = vadd.f32 %v10569_v12, %v3214_v20  ;;  %v7274_v6 = vcombine.high %v3351_v3, %v3355_v8  ;;  %v3359_v20 = vld [vmem:[#allocation10 + $0x208] sm:$0xff] }
 0x7b9   : > { %12820 = vst [vmem:[#allocation38_spill] sm:$0xff] %v10680_v33  ;;  %v10683_v39 = vadd.f32 %v10572_v53, %v3217_v57  ;;  %v10689_v47 = vadd.f32 %v10569_v12, %v3216_v21 }
 0x7ba   : > { %12822 = vst [vmem:[#allocation40_spill] sm:$0xff] %v10686_v50  ;;  %v8479_v54 = vpop.eup %8478  ;;  %8484 = vrsqrt.f32 %v3137_v63 }
 0x7bb   : > { %12821 = vst [vmem:[#allocation39_spill] sm:$0xff] %v10683_v39  ;;  %12823 = vst [vmem:[#allocation41_spill] sm:$0xff] %v10689_v47  ;;  %v3174_v46 = vmul.f32 %v8479_v54, %v10467_v38  ;;  %v3175_v0 = vmul.f32 %v8479_v54, %v10470_v37  ;;  %v3100_v1 = vpop.xlane.xlu0 %3099  ;;  %4228 = vmatpush1.bf16.msra.mxu1 %v7257_v59  ;;  %v10695_v61 = vpack.c.bf16 %v10683_v39, %v10680_v33  ;;  %v3363_v59 = vld [vmem:[#allocation10 + $0x228] sm:$0xff] }
 0x7bc   : > { %v10699_v28 = vpack.c.bf16 %v10689_v47, %v10686_v50  ;;  %v8481_v11 = vpop.eup %8480  ;;  %v3122_v34 = vmul.f32 0.00390625, %v3100_v1  ;;  %4229 = vmatprep.subr.bf16.mxu1 %v7266_v60 }
 0x7bd   : > { %v3176_v15 = vmul.f32 %v8481_v11, %v10473_v10  ;;  %v3177_v38 = vmul.f32 %v8481_v11, %v10476_v9  ;;  %4166 = vmatprep.mubr.bf16.mxu1 %v10695_v61  ;;  %4392 = vmatprep.mubr.bf16.mxu0 %v10695_v61  ;;  %v3103_v37 = vpop.xlane.xlu1 %3102  ;;  %v3219_v56 = vmul.f32 %v10561_v58, %v3175_v0 }
 0x7be   : > { %v3138_v57 = vadd.f32 1e-05, %v3122_v34  ;;  %v3123_v21 = vmul.f32 0.00390625, %v3103_v37  ;;  %4167 = vmatmul.mubr.bf16.gmra.mrb[156].mxu1 %v10699_v28  ;;  %4393 = vmatmul.mubr.bf16.gmra.mrb[92].mxu0 %v10699_v28  ;;  %v3218_v63 = vmul.f32 %v10558_v44, %v3174_v46  ;;  %v7273_v10 = vcombine.low %v3351_v3, %v3355_v8  ;;  %v3367_v3 = vld [vmem:[#allocation10 + $0x248] sm:$0xff] }
 0x7bf   : > { %4230 = vmatpush1.bf16.msra.mxu1 %v7265_v22  ;;  %v3221_v9 = vmul.f32 %v10561_v58, %v3177_v38  ;;  %v3220_v60 = vmul.f32 %v10558_v44, %v3176_v15  ;;  %v7282_v0 = vcombine.high %v3359_v20, %v3363_v59  ;;  %v10712_v1 = vadd.f32 %v10572_v53, %v3219_v56  ;;  %v3371_v8 = vld [vmem:[#allocation10 + $0x268] sm:$0xff] }
 0x7c0   : > { %8486 = vrsqrt.f32 %v3138_v57  ;;  %v3139_v54 = vadd.f32 1e-05, %v3123_v21  ;;  %4231 = vmatprep.subr.bf16.mxu1 %v7274_v6  ;;  %v10718_v34 = vadd.f32 %v10569_v12, %v3218_v63  ;;  %v7281_v15 = vcombine.low %v3359_v20, %v3363_v59 }
 0x7c1   : > { %12824 = vst [vmem:[#allocation42_spill] sm:$0xff] %v10712_v1  ;;  %v10715_v11 = vadd.f32 %v10572_v53, %v3221_v9  ;;  %v10721_v22 = vadd.f32 %v10569_v12, %v3220_v60  ;;  %v7290_v9 = vcombine.high %v3367_v3, %v3371_v8  ;;  %v3379_v60 = vld [vmem:[#allocation10 + $0x2a8] sm:$0xff] }
 0x7c2   : > { %12826 = vst [vmem:[#allocation44_spill] sm:$0xff] %v10718_v34  ;;  %v8483_v46 = vpop.eup %8482  ;;  %8488 = vrsqrt.f32 %v3139_v54 }
 0x7c3   : > { %12825 = vst [vmem:[#allocation43_spill] sm:$0xff] %v10715_v11  ;;  %12827 = vst [vmem:[#allocation45_spill] sm:$0xff] %v10721_v22  ;;  %v3178_v6 = vmul.f32 %v8483_v46, %v10487_v62  ;;  %v3179_v38 = vmul.f32 %v8483_v46, %v10490_v43  ;;  %v3106_v37 = vpop.xlane.xlu0 %3105  ;;  %4232 = vmatpush1.bf16.msra.mxu1 %v7273_v10  ;;  %v10727_v56 = vpack.c.bf16 %v10715_v11, %v10712_v1  ;;  %v3375_v10 = vld [vmem:[#allocation10 + $0x288] sm:$0xff] }
 0x7c4   : > { %v10731_v57 = vpack.c.bf16 %v10721_v22, %v10718_v34  ;;  %v8485_v21 = vpop.eup %8484  ;;  %v3124_v63 = vmul.f32 0.00390625, %v3106_v37  ;;  %4233 = vmatprep.subr.bf16.mxu1 %v7282_v0 }
 0x7c5   : > { %v3180_v20 = vmul.f32 %v8485_v21, %v10493_v48  ;;  %v3181_v62 = vmul.f32 %v8485_v21, %v10496_v2  ;;  %4176 = vmatprep.mubr.bf16.mxu1 %v10727_v56  ;;  %4402 = vmatprep.mubr.bf16.mxu0 %v10727_v56  ;;  %v3109_v43 = vpop.xlane.xlu1 %3108  ;;  %v3223_v59 = vmul.f32 %v10561_v58, %v3179_v38 }
 0x7c6   : > { %v3140_v54 = vadd.f32 1e-05, %v3124_v63  ;;  %v3125_v46 = vmul.f32 0.00390625, %v3109_v43  ;;  %4177 = vmatmul.mubr.bf16.gmra.mrb[160].mxu1 %v10731_v57  ;;  %4403 = vmatmul.mubr.bf16.gmra.mrb[96].mxu0 %v10731_v57  ;;  %v3222_v0 = vmul.f32 %v10558_v44, %v3178_v6  ;;  %v7289_v48 = vcombine.low %v3367_v3, %v3371_v8  ;;  %v3383_v3 = vld [vmem:[#allocation10 + $0x2c8] sm:$0xff] }
 0x7c7   : > { %4234 = vmatpush1.bf16.msra.mxu1 %v7281_v15  ;;  %v3225_v2 = vmul.f32 %v10561_v58, %v3181_v62  ;;  %v3224_v37 = vmul.f32 %v10558_v44, %v3180_v20  ;;  %v7298_v38 = vcombine.high %v3375_v10, %v3379_v60  ;;  %v10744_v11 = vadd.f32 %v10572_v53, %v3223_v59  ;;  %v3387_v8 = vld [vmem:[#allocation10 + $0x2e8] sm:$0xff] }
 0x7c8   : > { %8490 = vrsqrt.f32 %v3140_v54  ;;  %v3141_v21 = vadd.f32 1e-05, %v3125_v46  ;;  %4235 = vmatprep.subr.bf16.mxu1 %v7290_v9  ;;  %v10750_v43 = vadd.f32 %v10569_v12, %v3222_v0  ;;  %v7297_v20 = vcombine.low %v3375_v10, %v3379_v60  ;;  %v3395_v60 = vld [vmem:[#allocation10 + $0x328] sm:$0xff] }
 0x7c9   : > { %12828 = vst [vmem:[#allocation46_spill] sm:$0xff] %v10744_v11  ;;  %v10747_v63 = vadd.f32 %v10572_v53, %v3225_v2  ;;  %v10753_v15 = vadd.f32 %v10569_v12, %v3224_v37  ;;  %v7306_v0 = vcombine.high %v3383_v3, %v3387_v8  ;;  %v7305_v37 = vcombine.low %v3383_v3, %v3387_v8  ;;  %v3399_v3 = vld [vmem:[#allocation10 + $0x348] sm:$0xff] }
 0x7ca   : > { %12830 = vst [vmem:[#allocation48_spill] sm:$0xff] %v10750_v43  ;;  %v8487_v6 = vpop.eup %8486  ;;  %8492 = vrsqrt.f32 %v3141_v21  ;;  %v8142_v21 = vld [vmem:[#allocation11] ss:$8 sps:$4 sm:$0xff]  }
 0x7cb   : > { %12829 = vst [vmem:[#allocation47_spill] sm:$0xff] %v10747_v63  ;;  %12831 = vst [vmem:[#allocation49_spill] sm:$0xff] %v10753_v15  ;;  %v3182_v9 = vmul.f32 %v8487_v6, %v10515_v14  ;;  %v3183_v62 = vmul.f32 %v8487_v6, %v10518_v29  ;;  %4236 = vmatpush1.bf16.msra.mxu1 %v7289_v48  ;;  %v10759_v59 = vpack.c.bf16 %v10747_v63, %v10744_v11  ;;  %v3391_v29 = vld [vmem:[#allocation10 + $0x308] sm:$0xff] }
 0x7cc   : > { %v10763_v54 = vpack.c.bf16 %v10753_v15, %v10750_v43  ;;  %v8489_v46 = vpop.eup %8488  ;;  %4237 = vmatprep.subr.bf16.mxu1 %v7298_v38  ;;  %v8144_v38 = vld [vmem:[#allocation11 + $0x4] ss:$8 sps:$4 sm:$0xff]   ;;  %v7314_v6 = vcombine.high %v3391_v29, %v3395_v60 }
 0x7cd   : > { %v3184_v2 = vmul.f32 %v8489_v46, %v10521_v5  ;;  %v3185_v10 = vmul.f32 %v8489_v46, %v10524_v36  ;;  %4186 = vmatprep.mubr.bf16.mxu1 %v10759_v59  ;;  %4412 = vmatprep.mubr.bf16.mxu0 %v10759_v59  ;;  %v3227_v14 = vmul.f32 %v10561_v58, %v3183_v62  ;;  %v3403_v8 = vld [vmem:[#allocation10 + $0x368] sm:$0xff] }
 0x7ce   : > { %4187 = vmatmul.mubr.bf16.gmra.mrb[164].mxu1 %v10763_v54  ;;  %4413 = vmatmul.mubr.bf16.gmra.mrb[100].mxu0 %v10763_v54  ;;  %v3226_v48 = vmul.f32 %v10558_v44, %v3182_v9 }
 0x7cf   : > { %4238 = vmatpush1.bf16.msra.mxu1 %v7297_v20  ;;  %v3229_v5 = vmul.f32 %v10561_v58, %v3185_v10  ;;  %v3228_v36 = vmul.f32 %v10558_v44, %v3184_v2  ;;  %v10776_v62 = vadd.f32 %v10572_v53, %v3227_v14  ;;  %6040 = vmatprep.subr.bf16.mxu0 %v8144_v38 }
 0x7d0   : > { %4239 = vmatprep.subr.bf16.mxu1 %v7306_v0  ;;  %v10782_v63 = vadd.f32 %v10569_v12, %v3226_v48  ;;  %v7313_v2 = vcombine.low %v3391_v29, %v3395_v60  ;;  %6041 = vmatpush1.bf16.msra.mxu0 %v8142_v21  ;;  %v3411_v60 = vld [vmem:[#allocation10 + $0x3a8] sm:$0xff]  ;;  %v8147_v21 = vld [vmem:[#allocation11 + $0x14] ss:$8 sps:$4 sm:$0xff]  }
 0x7d1   : > { %12832 = vst [vmem:[#allocation50_spill] sm:$0xff] %v10776_v62  ;;  %v10779_v46 = vadd.f32 %v10572_v53, %v3229_v5  ;;  %v10785_v20 = vadd.f32 %v10569_v12, %v3228_v36  ;;  %v7322_v36 = vcombine.high %v3399_v3, %v3403_v8  ;;  %6042 = vmatprep.subr.bf16.mxu0 %v8147_v21  ;;  %v3309_v21 = vld [vmem:[#allocation10 + $0x78] sm:$0xff] }
 0x7d2   : > { %12834 = vst [vmem:[#allocation52_spill] sm:$0xff] %v10782_v63  ;;  %v8491_v9 = vpop.eup %8490 }
 0x7d3   : > { %12833 = vst [vmem:[#allocation51_spill] sm:$0xff] %v10779_v46  ;;  %12835 = vst [vmem:[#allocation53_spill] sm:$0xff] %v10785_v20  ;;  %v3186_v0 = vmul.f32 %v8491_v9, %v10535_v32  ;;  %v3187_v10 = vmul.f32 %v8491_v9, %v10538_v27  ;;  %4240 = vmatpush1.bf16.msra.mxu1 %v7305_v37  ;;  %v10791_v14 = vpack.c.bf16 %v10779_v46, %v10776_v62  ;;  %v3407_v27 = vld [vmem:[#allocation10 + $0x388] sm:$0xff]  ;;  %v8145_v9 = vld [vmem:[#allocation11 + $0x10] ss:$8 sps:$4 sm:$0xff]  }
 0x7d4   : > { %v10795_v48 = vpack.c.bf16 %v10785_v20, %v10782_v63  ;;  %v8493_v5 = vpop.eup %8492  ;;  %4241 = vmatprep.subr.bf16.mxu1 %v7314_v6  ;;  %v7321_v6 = vcombine.low %v3399_v3, %v3403_v8  ;;  %v7330_v46 = vcombine.high %v3407_v27, %v3411_v60  ;;  %v3419_v8 = vld [vmem:[#allocation10 + $0x3e8] sm:$0xff]  ;;  %6043 = vmatpush1.bf16.msra.mxu0 %v8145_v9 }
 0x7d5   : > { %v3188_v38 = vmul.f32 %v8493_v5, %v10541_v42  ;;  %v3189_v29 = vmul.f32 %v8493_v5, %v10544_v52  ;;  %4196 = vmatprep.mubr.bf16.mxu1 %v10791_v14  ;;  %4422 = vmatprep.mubr.bf16.mxu0 %v10791_v14  ;;  %v3231_v32 = vmul.f32 %v10561_v58, %v3187_v10  ;;  %v8150_v5 = vld [vmem:[#allocation11 + $0x24] ss:$8 sps:$4 sm:$0xff]   ;;  %v8154_v9 = vld [vmem:[#allocation11 + $0x40] ss:$8 sps:$4 sm:$0xff]  }
 0x7d6   : > { %4197 = vmatmul.mubr.bf16.gmra.mrb[168].mxu1 %v10795_v48  ;;  %4423 = vmatmul.mubr.bf16.gmra.mrb[104].mxu0 %v10795_v48  ;;  %v3230_v37 = vmul.f32 %v10558_v44, %v3186_v0 }
 0x7d7   : > { %4242 = vmatpush1.bf16.msra.mxu1 %v7313_v2  ;;  %v3233_v42 = vmul.f32 %v10561_v58, %v3189_v29  ;;  %v3232_v52 = vmul.f32 %v10558_v44, %v3188_v38  ;;  %v10808_v10 = vadd.f32 %v10572_v53, %v3231_v32  ;;  %v3415_v58 = vld [vmem:[#allocation10 + $0x3c8] sm:$0xff]  ;;  %6044 = vmatprep.subr.bf16.mxu0 %v8150_v5  ;;  %v3301_v29 = vld [vmem:[#allocation10 + $0x38] sm:$0xff] }
 0x7d8   : > { %4243 = vmatprep.subr.bf16.mxu1 %v7322_v36  ;;  %v10814_v0 = vadd.f32 %v10569_v12, %v3230_v37  ;;  %v7338_v36 = vcombine.high %v3415_v58, %v3419_v8  ;;  %v8148_v38 = vld [vmem:[#allocation11 + $0x20] ss:$8 sps:$4 sm:$0xff]   ;;  %v8153_v32 = vld [vmem:[#allocation11 + $0x34] ss:$8 sps:$4 sm:$0xff]   ;;  %v7337_v37 = vcombine.low %v3415_v58, %v3419_v8 }
 0x7d9   : > { %12836 = vst [vmem:[#allocation54_spill] sm:$0xff] %v10808_v10  ;;  %v10811_v20 = vadd.f32 %v10572_v53, %v3233_v42  ;;  %v10817_v3 = vadd.f32 %v10569_v12, %v3232_v52  ;;  %v7329_v53 = vcombine.low %v3407_v27, %v3411_v60  ;;  %v3297_v12 = vld [vmem:[#allocation10 + $0x18] sm:$0xff]  ;;  %6045 = vmatpush1.bf16.msra.mxu0 %v8148_v38 }
 0x7da   : > { %12838 = vst [vmem:[#allocation56_spill] sm:$0xff] %v10814_v0  ;;  %v7222_v27 = vcombine.high %v3297_v12, %v3301_v29  ;;  %v3305_v60 = vld [vmem:[#allocation10 + $0x58] sm:$0xff]  ;;  %6046 = vmatprep.subr.bf16.mxu0 %v8153_v32  ;;  %v7221_v42 = vcombine.low %v3297_v12, %v3301_v29  ;;  %v8162_v29 = vld [vmem:[#allocation11 + $0x64] ss:$8 sps:$4 sm:$0xff]  }
 0x7db   : > { %12837 = vst [vmem:[#allocation55_spill] sm:$0xff] %v10811_v20  ;;  %12839 = vst [vmem:[#allocation57_spill] sm:$0xff] %v10817_v3  ;;  %4244 = vmatpush1.bf16.msra.mxu1 %v7321_v6  ;;  %v10821_v44 = vpack.c.bf16 %v10811_v20, %v10808_v10  ;;  %v10825_v2 = vpack.c.bf16 %v10817_v3, %v10814_v0  ;;  %v8156_v6 = vld [vmem:[#allocation11 + $0x44] ss:$8 sps:$4 sm:$0xff]   ;;  %v7230_v52 = vcombine.high %v3305_v60, %v3309_v21  ;;  %v3313_v5 = vld [vmem:[#allocation10 + $0x98] sm:$0xff] }
 0x7dc   : > { %4245 = vmatprep.subr.bf16.mxu1 %v7330_v46  ;;  %v8151_v46 = vld [vmem:[#allocation11 + $0x30] ss:$8 sps:$4 sm:$0xff]   ;;  %v7229_v58 = vcombine.low %v3305_v60, %v3309_v21  ;;  %v8165_v3 = vld [vmem:[#allocation11 + $0x74] ss:$8 sps:$4 sm:$0xff]  }
 0x7dd   : > { %4206 = vmatprep.mubr.bf16.mxu1 %v10821_v44  ;;  %4432 = vmatprep.mubr.bf16.mxu0 %v10821_v44  ;;  %v3317_v20 = vld [vmem:[#allocation10 + $0xb8] sm:$0xff] }
 0x7de   : > { %4207 = vmatmul.mubr.bf16.gmra.mrb[172].mxu1 %v10825_v2  ;;  %4433 = vmatmul.mubr.bf16.gmra.mrb[108].mxu0 %v10825_v2  ;;  %v7238_v8 = vcombine.high %v3313_v5, %v3317_v20  ;;  %v3321_v38 = vld [vmem:[#allocation10 + $0xd8] sm:$0xff]  ;;  %v7237_v32 = vcombine.low %v3313_v5, %v3317_v20 }
 0x7df   : > { %4246 = vmatpush1.bf16.msra.mxu1 %v7329_v53  ;;  %4249 = vmatprep.mubr.bf16.mxu1 %v10596_v13  ;;  %v8159_v53 = vld [vmem:[#allocation11 + $0x54] ss:$8 sps:$4 sm:$0xff]  }
 0x7e0   : > { %4247 = vmatprep.subr.bf16.mxu1 %v7338_v36  ;;  %6047 = vmatpush1.bf16.msra.mxu0 %v8151_v46  ;;  %v8157_v36 = vld [vmem:[#allocation11 + $0x50] ss:$8 sps:$4 sm:$0xff]  }
 0x7e1   : > { %6048 = vmatprep.subr.bf16.mxu0 %v8156_v6  ;;  %v3325_v12 = vld [vmem:[#allocation10 + $0xf8] sm:$0xff] }
 0x7e2   : > { %v3329_v46 = vld [vmem:[#allocation10 + $0x118] sm:$0xff]  ;;  %v7245_v60 = vcombine.low %v3321_v38, %v3325_v12 }
 0x7e3   : > { %4248 = vmatpush1.bf16.msra.mxu1 %v7337_v37  ;;  %v7246_v37 = vcombine.high %v3321_v38, %v3325_v12  ;;  %v3333_v6 = vld [vmem:[#allocation10 + $0x138] sm:$0xff] }
 0x7e4   : > { %4443 = vmatprep.subr.bf16.mxu1 %v7222_v27  ;;  %6049 = vmatpush1.bf16.msra.mxu0 %v8154_v9  ;;  %v8160_v27 = vld [vmem:[#allocation11 + $0x60] ss:$8 sps:$4 sm:$0xff]   ;;  %v7254_v21 = vcombine.high %v3329_v46, %v3333_v6  ;;  %v3341_v20 = vld [vmem:[#allocation10 + $0x178] sm:$0xff]  ;;  %v8168_v9 = vld [vmem:[#allocation11 + $0x84] ss:$8 sps:$4 sm:$0xff]   ;;  %v7253_v5 = vcombine.low %v3329_v46, %v3333_v6 }
 0x7e5   : > { %6050 = vmatprep.subr.bf16.mxu0 %v8159_v53  ;;  %v8174_v6 = vld [vmem:[#allocation11 + $0xa4] ss:$8 sps:$4 sm:$0xff]  }
 0x7e6   : > { %4250 = vmatmul.mubr.bf16.vlgmr.msra.gmra.mrb[176].mxu1 %v10600_v41 }
 0x7e7   : > { %4259 = vmatprep.mubr.bf16.mxu1 %v10631_v18  ;;  %4444 = vmatpush1.bf16.msra.mxu1 %v7221_v42  ;;  %v8163_v42 = vld [vmem:[#allocation11 + $0x70] ss:$8 sps:$4 sm:$0xff]  }
 0x7e8   : > { %4445 = vmatprep.subr.bf16.mxu1 %v7230_v52  ;;  %6051 = vmatpush1.bf16.msra.mxu0 %v8157_v36  ;;  %v3337_v52 = vld [vmem:[#allocation10 + $0x158] sm:$0xff] }
 0x7e9   : > { %6052 = vmatprep.subr.bf16.mxu0 %v8162_v29  ;;  %v7262_v53 = vcombine.high %v3337_v52, %v3341_v20  ;;  %v3349_v36 = vld [vmem:[#allocation10 + $0x1b8] sm:$0xff]  ;;  %v7261_v38 = vcombine.low %v3337_v52, %v3341_v20 }
 0x7ea   : > { %v8171_v29 = vld [vmem:[#allocation11 + $0x94] ss:$8 sps:$4 sm:$0xff]  }
 0x7eb   : > { %4446 = vmatpush1.bf16.msra.mxu1 %v7229_v58  ;;  %v8166_v58 = vld [vmem:[#allocation11 + $0x80] ss:$8 sps:$4 sm:$0xff]  }
 0x7ec   : > { %4447 = vmatprep.subr.bf16.mxu1 %v7238_v8  ;;  %6053 = vmatpush1.bf16.msra.mxu0 %v8160_v27  ;;  %v3345_v8 = vld [vmem:[#allocation10 + $0x198] sm:$0xff] }
 0x7ed   : > { %6054 = vmatprep.subr.bf16.mxu0 %v8165_v3  ;;  %v7270_v12 = vcombine.high %v3345_v8, %v3349_v36  ;;  %v8169_v3 = vld [vmem:[#allocation11 + $0x90] ss:$8 sps:$4 sm:$0xff]   ;;  %v7269_v27 = vcombine.low %v3345_v8, %v3349_v36 }
 0x7ee   : > { %4260 = vmatmul.mubr.bf16.gmra.mrb[180].mxu1 %v10635_v31 }
 0x7ef   : > { %4269 = vmatprep.mubr.bf16.mxu1 %v10663_v16  ;;  %4448 = vmatpush1.bf16.msra.mxu1 %v7237_v32  ;;  %v3353_v32 = vld [vmem:[#allocation10 + $0x1d8] sm:$0xff] }
 0x7f0   : > { %4449 = vmatprep.subr.bf16.mxu1 %v7246_v37  ;;  %6055 = vmatpush1.bf16.msra.mxu0 %v8163_v42  ;;  %v3357_v37 = vld [vmem:[#allocation10 + $0x1f8] sm:$0xff]  ;;  %v8172_v42 = vld [vmem:[#allocation11 + $0xa0] ss:$8 sps:$4 sm:$0xff]  }
 0x7f1   : > { %6056 = vmatprep.subr.bf16.mxu0 %v8168_v9  ;;  %v7278_v46 = vcombine.high %v3353_v32, %v3357_v37  ;;  %v7277_v52 = vcombine.low %v3353_v32, %v3357_v37  ;;  %v3369_v9 = vld [vmem:[#allocation10 + $0x258] sm:$0xff] }
 0x7f3   : > { %4450 = vmatpush1.bf16.msra.mxu1 %v7245_v60  ;;  %v3361_v60 = vld [vmem:[#allocation10 + $0x218] sm:$0xff] }
 0x7f4   : > { %4451 = vmatprep.subr.bf16.mxu1 %v7254_v21  ;;  %6057 = vmatpush1.bf16.msra.mxu0 %v8166_v58  ;;  %v3365_v21 = vld [vmem:[#allocation10 + $0x238] sm:$0xff] }
 0x7f5   : > { %6058 = vmatprep.subr.bf16.mxu0 %v8171_v29  ;;  %v7286_v20 = vcombine.high %v3361_v60, %v3365_v21  ;;  %v8175_v58 = vld [vmem:[#allocation11 + $0xb0] ss:$8 sps:$4 sm:$0xff]   ;;  %v7285_v8 = vcombine.low %v3361_v60, %v3365_v21  ;;  %v8183_v60 = vld [vmem:[#allocation11 + $0xd4] ss:$8 sps:$4 sm:$0xff]  }
 0x7f6   : > { %4270 = vmatmul.mubr.bf16.gmra.mrb[184].mxu1 %v10667_v30  ;;  %v3377_v29 = vld [vmem:[#allocation10 + $0x298] sm:$0xff] }
 0x7f7   : > { %4279 = vmatprep.mubr.bf16.mxu1 %v10695_v61  ;;  %4452 = vmatpush1.bf16.msra.mxu1 %v7253_v5  ;;  %v3373_v5 = vld [vmem:[#allocation10 + $0x278] sm:$0xff] }
 0x7f8   : > { %4453 = vmatprep.subr.bf16.mxu1 %v7262_v53  ;;  %6059 = vmatpush1.bf16.msra.mxu0 %v8169_v3  ;;  %v8177_v53 = vld [vmem:[#allocation11 + $0xb4] ss:$8 sps:$4 sm:$0xff]   ;;  %v7294_v36 = vcombine.high %v3369_v9, %v3373_v5  ;;  %v8178_v3 = vld [vmem:[#allocation11 + $0xc0] ss:$8 sps:$4 sm:$0xff]   ;;  %v7293_v32 = vcombine.low %v3369_v9, %v3373_v5 }
 0x7f9   : > { %6060 = vmatprep.subr.bf16.mxu0 %v8174_v6 }
 0x7fb   : > { %4454 = vmatpush1.bf16.msra.mxu1 %v7261_v38  ;;  %v3381_v38 = vld [vmem:[#allocation10 + $0x2b8] sm:$0xff] }
 0x7fc   : > { %4455 = vmatprep.subr.bf16.mxu1 %v7270_v12  ;;  %6061 = vmatpush1.bf16.msra.mxu0 %v8172_v42  ;;  %v8180_v12 = vld [vmem:[#allocation11 + $0xc4] ss:$8 sps:$4 sm:$0xff]   ;;  %v7302_v37 = vcombine.high %v3377_v29, %v3381_v38  ;;  %v7301_v6 = vcombine.low %v3377_v29, %v3381_v38  ;;  %v8181_v42 = vld [vmem:[#allocation11 + $0xd0] ss:$8 sps:$4 sm:$0xff]  }
 0x7fd   : > { %6062 = vmatprep.subr.bf16.mxu0 %v8177_v53  ;;  %v3401_v53 = vld [vmem:[#allocation10 + $0x358] sm:$0xff]  ;;  %v8186_v29 = vld [vmem:[#allocation11 + $0xe4] ss:$8 sps:$4 sm:$0xff]  }
 0x7fe   : > { %4280 = vmatmul.mubr.bf16.gmra.mrb[188].mxu1 %v10699_v28  ;;  %v3409_v38 = vld [vmem:[#allocation10 + $0x398] sm:$0xff] }
 0x7ff   : > { %4289 = vmatprep.mubr.bf16.mxu1 %v10727_v56  ;;  %4456 = vmatpush1.bf16.msra.mxu1 %v7269_v27  ;;  %v3385_v27 = vld [vmem:[#allocation10 + $0x2d8] sm:$0xff] }
 0x800   : > { %4457 = vmatprep.subr.bf16.mxu1 %v7278_v46  ;;  %6063 = vmatpush1.bf16.msra.mxu0 %v8175_v58  ;;  %v3389_v46 = vld [vmem:[#allocation10 + $0x2f8] sm:$0xff] }
 0x801   : > { %6064 = vmatprep.subr.bf16.mxu0 %v8180_v12  ;;  %v7310_v21 = vcombine.high %v3385_v27, %v3389_v46  ;;  %v7309_v9 = vcombine.low %v3385_v27, %v3389_v46  ;;  %v3405_v58 = vld [vmem:[#allocation10 + $0x378] sm:$0xff] }
 0x802   : > { %v3413_v12 = vld [vmem:[#allocation10 + $0x3b8] sm:$0xff] }
 0x803   : > { %4458 = vmatpush1.bf16.msra.mxu1 %v7277_v52  ;;  %v3393_v52 = vld [vmem:[#allocation10 + $0x318] sm:$0xff] }
 0x804   : > { %4459 = vmatprep.subr.bf16.mxu1 %v7286_v20  ;;  %6065 = vmatpush1.bf16.msra.mxu0 %v8178_v3  ;;  %v3397_v20 = vld [vmem:[#allocation10 + $0x338] sm:$0xff]  ;;  %v8184_v3 = vld [vmem:[#allocation11 + $0xe0] ss:$8 sps:$4 sm:$0xff]  }
 0x805   : > { %6066 = vmatprep.subr.bf16.mxu0 %v8183_v60  ;;  %v7318_v5 = vcombine.high %v3393_v52, %v3397_v20  ;;  %v3417_v27 = vld [vmem:[#allocation10 + $0x3d8] sm:$0xff]  ;;  %v7333_v60 = vcombine.low %v3409_v38, %v3413_v12 }
 0x806   : > { %4290 = vmatmul.mubr.bf16.gmra.mrb[192].mxu1 %v10731_v57  ;;  %v3421_v46 = vld [vmem:[#allocation10 + $0x3f8] sm:$0xff] }
 0x807   : > { %4299 = vmatprep.mubr.bf16.mxu1 %v10759_v59  ;;  %4460 = vmatpush1.bf16.msra.mxu1 %v7285_v8  ;;  %v7317_v8 = vcombine.low %v3393_v52, %v3397_v20  ;;  %v7341_v52 = vcombine.low %v3417_v27, %v3421_v46  ;;  %v8192_v20 = vld [vmem:[#allocation11 + $0x104] ss:$8 sps:$4 sm:$0xff]  }
 0x808   : > { %4461 = vmatprep.subr.bf16.mxu1 %v7294_v36  ;;  %6067 = vmatpush1.bf16.msra.mxu0 %v8181_v42  ;;  %v7326_v36 = vcombine.high %v3401_v53, %v3405_v58  ;;  %v7342_v42 = vcombine.high %v3417_v27, %v3421_v46 }
 0x809   : > { %6068 = vmatprep.subr.bf16.mxu0 %v8186_v29 }
 0x80b   : > { %4462 = vmatpush1.bf16.msra.mxu1 %v7293_v32  ;;  %v7325_v32 = vcombine.low %v3401_v53, %v3405_v58 }
 0x80c   : > { %4463 = vmatprep.subr.bf16.mxu1 %v7302_v37  ;;  %v7334_v37 = vcombine.high %v3409_v38, %v3413_v12  ;;  %6069 = vmatpush1.bf16.msra.mxu0 %v8184_v3 }
 0x80e   : > { %4300 = vmatmul.mubr.bf16.gmra.mrb[196].mxu1 %v10763_v54 }
 0x80f   : > { %4309 = vmatprep.mubr.bf16.mxu1 %v10791_v14  ;;  %4464 = vmatpush1.bf16.msra.mxu1 %v7301_v6  ;;  %v8189_v6 = vld [vmem:[#allocation11 + $0xf4] ss:$8 sps:$4 sm:$0xff]  }
 0x810   : > { %4465 = vmatprep.subr.bf16.mxu1 %v7310_v21  ;;  %v8187_v21 = vld [vmem:[#allocation11 + $0xf0] ss:$8 sps:$4 sm:$0xff]   ;;  %6070 = vmatprep.subr.bf16.mxu0 %v8189_v6 }
 0x811   : > { %6071 = vmatpush1.bf16.msra.mxu0 %v8187_v21 }
 0x812   : > { %6153 = vmatprep.subr.bf16.mxu0 %v8192_v20 }
 0x813   : > { %4466 = vmatpush1.bf16.msra.mxu1 %v7309_v9 }
 0x814   : > { %4467 = vmatprep.subr.bf16.mxu1 %v7318_v5 }
 0x816   : > { %4310 = vmatmul.mubr.bf16.gmra.mrb[200].mxu1 %v10795_v48 }
 0x817   : > { %4319 = vmatprep.mubr.bf16.mxu1 %v10821_v44  ;;  %4468 = vmatpush1.bf16.msra.mxu1 %v7317_v8 }
 0x818   : > { %4469 = vmatprep.subr.bf16.mxu1 %v7326_v36 }
 0x81b   : > { %4470 = vmatpush1.bf16.msra.mxu1 %v7325_v32 }
 0x81c   : > { %4471 = vmatprep.subr.bf16.mxu1 %v7334_v37 }
 0x81e   : > { %4320 = vmatmul.mubr.bf16.gmra.mrb[204].mxu1 %v10825_v2 }
 0x81f   : > { %4472 = vmatpush1.bf16.msra.mxu1 %v7333_v60  ;;  %4475 = vmatprep.mubr.bf16.mxu1 %v10596_v13  ;;  %v12840_v13 = vld [vmem:[#allocation23_spill] sm:$0xff] }
 0x820   : > { %4473 = vmatprep.subr.bf16.mxu1 %v7342_v42 }
 0x823   : > { %4474 = vmatpush1.bf16.msra.mxu1 %v7341_v52 }
 0x826   : > { %4476 = vmatmul.mubr.bf16.vlgmr.msra.gmra.mrb[208].mxu1 %v10600_v41  ;;  %v3442_v41 = vsub.s32 4, %v12840_v13 }
 0x827   : > { %4485 = vmatprep.mubr.bf16.mxu1 %v10631_v18  ;;  %v3422_v18 = vld [vmem:[%s12841_s24] sm:$0xff] }
 0x82e   : > { %4486 = vmatmul.mubr.bf16.gmra.mrb[212].mxu1 %v10635_v31  ;;  %v3446_v31 = vsub.s32 5, %v12840_v13 }
 0x82f   : > { %4495 = vmatprep.mubr.bf16.mxu1 %v10663_v16  ;;  %v10869_v16 = vrot.slane %v3422_v18, %v12805_v55 }
 0x836   : > { %4496 = vmatmul.mubr.bf16.gmra.mrb[216].mxu1 %v10667_v30  ;;  %v10871_v30 = vrot.slane %v3422_v18, %v3442_v41 }
 0x837   : > { %4505 = vmatprep.mubr.bf16.mxu1 %v10695_v61  ;;  %v10874_v61 = vrot.slane %v3422_v18, %v12806_v23 }
 0x83e   : > { %4506 = vmatmul.mubr.bf16.gmra.mrb[220].mxu1 %v10699_v28  ;;  %v10876_v28 = vrot.slane %v3422_v18, %v3446_v31 }
 0x83f   : > { %4515 = vmatprep.mubr.bf16.mxu1 %v10727_v56 }
 0x846   : > { %4516 = vmatmul.mubr.bf16.gmra.mrb[224].mxu1 %v10731_v57 }
 0x847   : > { %4525 = vmatprep.mubr.bf16.mxu1 %v10759_v59 }
 0x84e   : > { %4526 = vmatmul.mubr.bf16.gmra.mrb[228].mxu1 %v10763_v54 }
 0x84f   : > { %4535 = vmatprep.mubr.bf16.mxu1 %v10791_v14 }
 0x856   : > { %4536 = vmatmul.mubr.bf16.gmra.mrb[232].mxu1 %v10795_v48 }
 0x857   : > { %4545 = vmatprep.mubr.bf16.mxu1 %v10821_v44 }
 0x85e   : > { %4546 = vmatmul.mubr.bf16.gmra.mrb[236].mxu1 %v10825_v2 }
 0x879   : > { %v4138_v56 = vpop.f32.mrb[144].mxu1  ;;  %v4364_v57 = vpop.f32.mrb[80].mxu0 }
 0x87a   : > { %v4139_v59 = vadd.f32 %v4138_v56, %v10869_v16  ;;  %v4365_v54 = vadd.f32 %v4364_v57, %v10871_v30  ;;  %v4140_v14 = vpop.f32.mrb[145].mxu1  ;;  %v4366_v48 = vpop.f32.mrb[81].mxu0 }
 0x87b   : > { %v4141_v44 = vadd.f32 %v4140_v14, %v10874_v61  ;;  %v4367_v2 = vadd.f32 %v4366_v48, %v10876_v28  ;;  %v4142_v9 = vpop.f32.mrb[146].mxu1  ;;  %v4368_v5 = vpop.f32.mrb[82].mxu0 }
 0x87c   : > { %v4684_v53 = vmul.f32 0.70710677, %v4139_v59  ;;  %v4688_v58 = vmul.f32 0.70710677, %v4365_v54  ;;  %v4143_v29 = vadd.f32 %v4142_v9, %v10869_v16  ;;  %v4369_v38 = vadd.f32 %v4368_v5, %v10871_v30  ;;  %v4144_v12 = vpop.f32.mrb[147].mxu1  ;;  %v4370_v3 = vpop.f32.mrb[83].mxu0 }
 0x87d   : > { %v4685_v8 = vmul.f32 0.70710677, %v4141_v44  ;;  %v4689_v36 = vmul.f32 0.70710677, %v4367_v2  ;;  %v4145_v32 = vadd.f32 %v4144_v12, %v10874_v61  ;;  %v4371_v37 = vadd.f32 %v4370_v3, %v10876_v28 }
 0x87e   : > { %8494 = verf.f32 %v4684_v53  ;;  %v4692_v27 = vmul.f32 0.70710677, %v4143_v29  ;;  %v4696_v46 = vmul.f32 0.70710677, %v4369_v38  ;;  %v12842_v53 = vsub.s32 2, %v12840_v13 }
 0x87f   : > { %8496 = verf.f32 %v4688_v58  ;;  %v4693_v6 = vmul.f32 0.70710677, %v4145_v32  ;;  %v4697_v21 = vmul.f32 0.70710677, %v4371_v37  ;;  %v12844_v3 = vsub.s32 3, %v12840_v13 }
 0x880   : > { %8498 = verf.f32 %v4685_v8  ;;  %v10892_v58 = vrot.slane %v3422_v18, %v12842_v53  ;;  %v4556_v8 = vmul.f32 0.5, %v4139_v59  ;;  %v10901_v59 = vmul.f32 0.5, %v4141_v44 }
 0x881   : > { %8500 = verf.f32 %v4689_v36  ;;  %v4148_v60 = vpop.f32.mrb[148].mxu1  ;;  %v4374_v52 = vpop.f32.mrb[84].mxu0  ;;  %v4564_v10 = vmul.f32 0.5, %v4143_v29  ;;  %v10906_v63 = vmul.f32 0.5, %v4145_v32 }
 0x882   : > { %8502 = verf.f32 %v4692_v27  ;;  %v4149_v42 = vadd.f32 %v4148_v60, %v10869_v16  ;;  %v4150_v20 = vpop.f32.mrb[149].mxu1  ;;  %v4375_v41 = vadd.f32 %v4374_v52, %v10871_v30  ;;  %v4376_v56 = vpop.f32.mrb[85].mxu0  ;;  %12843 = vst [vmem:[#allocation58_spill] sm:$0xff] %v10892_v58  ;;  %v10896_v27 = vrot.slane %v3422_v18, %v12844_v3 }
 0x883   : > { %8504 = verf.f32 %v4696_v46  ;;  %v4151_v31 = vadd.f32 %v4150_v20, %v10874_v61  ;;  %v4152_v57 = vpop.f32.mrb[150].mxu1  ;;  %v4377_v48 = vadd.f32 %v4376_v56, %v10876_v28  ;;  %v4378_v9 = vpop.f32.mrb[86].mxu0  ;;  %v4560_v46 = vmul.f32 0.5, %v4365_v54 }
 0x884   : > { %8506 = verf.f32 %v4693_v6  ;;  %v4700_v14 = vmul.f32 0.70710677, %v4149_v42  ;;  %v4154_v5 = vpop.f32.mrb[151].mxu1  ;;  %v4704_v36 = vmul.f32 0.70710677, %v4375_v41  ;;  %v4380_v12 = vpop.f32.mrb[87].mxu0  ;;  %v4153_v52 = vadd.f32 %v4152_v57, %v10869_v16 }
 0x885   : > { %8508 = verf.f32 %v4697_v21  ;;  %12845 = vst [vmem:[#allocation59_spill] sm:$0xff] %v10896_v27  ;;  %v4701_v6 = vmul.f32 0.70710677, %v4151_v31  ;;  %v4705_v60 = vmul.f32 0.70710677, %v4377_v48  ;;  %v4379_v20 = vadd.f32 %v4378_v9, %v10871_v30 }
 0x886   : > { %8510 = verf.f32 %v4700_v14  ;;  %v4155_v56 = vadd.f32 %v4154_v5, %v10874_v61  ;;  %v10903_v21 = vmul.f32 0.5, %v4367_v2  ;;  %v4568_v54 = vmul.f32 0.5, %v4369_v38 }
 0x887   : > { %8512 = verf.f32 %v4704_v36  ;;  %v4708_v14 = vmul.f32 0.70710677, %v4153_v52  ;;  %v4381_v0 = vadd.f32 %v4380_v12, %v10876_v28  ;;  %v10908_v9 = vmul.f32 0.5, %v4371_v37 }
 0x888   : > { %v8495_v53 = vpop.eup %8494  ;;  %8514 = verf.f32 %v4701_v6  ;;  %v10910_v5 = vmul.f32 0.5, %v4149_v42  ;;  %v4712_v44 = vmul.f32 0.70710677, %v4379_v20  ;;  %v10912_v6 = vmul.f32 0.5, %v4375_v41 }
 0x889   : > { %v8497_v18 = vpop.eup %8496  ;;  %v4940_v3 = vadd.f32 1.0, %v8495_v53  ;;  %v4158_v36 = vpop.f32.mrb[152].mxu1  ;;  %8516 = verf.f32 %v4705_v60  ;;  %v4709_v38 = vmul.f32 0.70710677, %v4155_v56  ;;  %v10914_v43 = vmul.f32 0.5, %v4151_v31 }
 0x88a   : > { %v4384_v62 = vpop.f32.mrb[88].mxu0  ;;  %v8499_v57 = vpop.eup %8498  ;;  %v4944_v29 = vadd.f32 1.0, %v8497_v18  ;;  %v10916_v22 = vmul.f32 0.5, %v4377_v48  ;;  %v10918_v32 = vmul.f32 0.5, %v4153_v52  ;;  %8518 = verf.f32 %v4708_v14 }
 0x88b   : > { %v4160_v2 = vpop.f32.mrb[153].mxu1  ;;  %v8501_v15 = vpop.eup %8500  ;;  %v10922_v34 = vmul.f32 %v4940_v3, %v4556_v8  ;;  %8520 = verf.f32 %v4712_v44  ;;  %v4713_v60 = vmul.f32 0.70710677, %v4381_v0  ;;  %v4941_v47 = vadd.f32 1.0, %v8499_v57 }
 0x88c   : > { %v4386_v53 = vpop.f32.mrb[89].mxu0  ;;  %v4162_v11 = vpop.f32.mrb[154].mxu1  ;;  %8522 = verf.f32 %v4709_v38  ;;  %v4159_v48 = vadd.f32 %v4158_v36, %v10869_v16  ;;  %v10927_v33 = vmul.f32 %v4944_v29, %v4560_v46  ;;  %v4385_v8 = vadd.f32 %v4384_v62, %v10871_v30 }
 0x88d   : > { %v8503_v12 = vpop.eup %8502  ;;  %v4388_v37 = vpop.f32.mrb[90].mxu0  ;;  %8524 = verf.f32 %v4713_v60  ;;  %v4161_v19 = vadd.f32 %v4160_v2, %v10874_v61  ;;  %v10937_v38 = vmul.f32 0.5, %v4379_v20  ;;  %v10939_v46 = vmul.f32 0.5, %v4155_v56 }
 0x88e   : > { %v10920_v42 = vpop.f32.mrb[155].mxu1  ;;  %v8505_v1 = vpop.eup %8504  ;;  %v4948_v41 = vadd.f32 1.0, %v8503_v12  ;;  %12846 = vst [vmem:[#allocation60_spill] sm:$0xff] %v10927_v33  ;;  %v4945_v12 = vadd.f32 1.0, %v8501_v15  ;;  %v4716_v50 = vmul.f32 0.70710677, %v4159_v48  ;;  %v4389_v51 = vadd.f32 %v4388_v37, %v10871_v30 }
 0x88f   : > { %v10924_v18 = vpop.f32.mrb[91].mxu0  ;;  %v8507_v39 = vpop.eup %8506  ;;  %v4952_v31 = vadd.f32 1.0, %v8505_v1  ;;  %v10950_v20 = vmul.f32 0.5, %v4381_v0  ;;  %v4720_v56 = vmul.f32 0.70710677, %v4385_v8  ;;  %v10965_v0 = vmul.f32 0.5, %v4159_v48 }
 0x890   : > { %v8509_v52 = vpop.eup %8508  ;;  %v10929_v14 = vmul.f32 %v4948_v41, %v4564_v10  ;;  %v4949_v36 = vadd.f32 1.0, %v8507_v39  ;;  %8526 = verf.f32 %v4716_v50  ;;  %v10955_v4 = vmul.f32 %v4945_v12, %v10903_v21 }
 0x891   : > { %v8511_v3 = vpop.eup %8510  ;;  %v10932_v44 = vmul.f32 %v4952_v31, %v4568_v54  ;;  %v4168_v10 = vpop.f32.mrb[156].mxu1  ;;  %v4953_v54 = vadd.f32 1.0, %v8509_v52  ;;  %v10948_v31 = vmul.f32 %v4941_v47, %v10901_v59  ;;  %v4717_v52 = vmul.f32 0.70710677, %v4161_v19 }
 0x892   : > { %v8513_v57 = vpop.eup %8512  ;;  %v10941_v29 = vpop.f32.mrb[92].mxu0  ;;  %v4956_v41 = vadd.f32 1.0, %v8511_v3  ;;  %12848 = vst [vmem:[#allocation62_spill] sm:$0xff] %v10955_v4  ;;  %v4387_v50 = vadd.f32 %v4386_v53, %v10876_v28  ;;  %v10963_v59 = vmul.f32 %v4949_v36, %v10906_v63  ;;  %v10977_v40 = vmul.f32 0.5, %v4161_v19 }
 0x893   : > { %12847 = vst [vmem:[#allocation61_spill] sm:$0xff] %v10932_v44  ;;  %v8515_v62 = vpop.eup %8514  ;;  %v4170_v2 = vpop.f32.mrb[157].mxu1  ;;  %v4960_v39 = vadd.f32 1.0, %v8513_v57  ;;  %v4163_v57 = vadd.f32 %v4162_v11, %v10869_v16  ;;  %v10970_v12 = vmul.f32 %v4953_v54, %v10908_v9  ;;  %8528 = verf.f32 %v4720_v56 }
 0x894   : > { %v10945_v60 = vpop.f32.mrb[93].mxu0  ;;  %v4172_v1 = vpop.f32.mrb[158].mxu1  ;;  %v4957_v15 = vadd.f32 1.0, %v8515_v62  ;;  %v10973_v53 = vmul.f32 %v4956_v41, %v10910_v5  ;;  %v10975_v62 = vmul.f32 0.5, %v4385_v8  ;;  %v4721_v48 = vmul.f32 0.70710677, %v4387_v50 }
 0x895   : > { %v10952_v17 = vpop.f32.mrb[94].mxu0  ;;  %v10958_v3 = vpop.f32.mrb[159].mxu1  ;;  %12849 = vst [vmem:[#allocation63_spill] sm:$0xff] %v10970_v12  ;;  %v10980_v63 = vmul.f32 %v4960_v39, %v10912_v6  ;;  %v4724_v11 = vmul.f32 0.70710677, %v4163_v57  ;;  %8530 = verf.f32 %v4717_v52  ;;  %v4165_v19 = vadd.f32 %v10920_v42, %v10874_v61 }
 0x896   : > { %v10960_v49 = vpop.f32.mrb[95].mxu0  ;;  %v8517_v47 = vpop.eup %8516  ;;  %v10983_v37 = vmul.f32 %v4957_v15, %v10914_v43  ;;  %v4728_v54 = vmul.f32 0.70710677, %v4389_v51  ;;  %8532 = verf.f32 %v4721_v48  ;;  %v4391_v6 = vadd.f32 %v10924_v18, %v10876_v28 }
 0x897   : > { %v8519_v21 = vpop.eup %8518  ;;  %12850 = vst [vmem:[#allocation64_spill] sm:$0xff] %v10980_v63  ;;  %v4961_v9 = vadd.f32 1.0, %v8517_v47  ;;  %v10993_v35 = vmul.f32 0.5, %v4387_v50  ;;  %8534 = verf.f32 %v4724_v11  ;;  %v4169_v43 = vadd.f32 %v4168_v10, %v10869_v16 }
 0x898   : > { %v8521_v25 = vpop.eup %8520  ;;  %v4964_v41 = vadd.f32 1.0, %v8519_v21  ;;  %v11000_v21 = vmul.f32 0.5, %v4163_v57  ;;  %8536 = verf.f32 %v4728_v54  ;;  %v4725_v42 = vmul.f32 0.70710677, %v4165_v19 }
 0x899   : > { %v8523_v36 = vpop.eup %8522  ;;  %v10989_v8 = vpop.f32.mrb[160].mxu1  ;;  %v4968_v56 = vadd.f32 1.0, %v8521_v25  ;;  %v11007_v25 = vmul.f32 %v4961_v9, %v10916_v22  ;;  %v4729_v11 = vmul.f32 0.70710677, %v4391_v6  ;;  %v4732_v10 = vmul.f32 0.70710677, %v4169_v43 }
 0x89a   : > { %v8525_v5 = vpop.eup %8524  ;;  %v10991_v39 = vpop.f32.mrb[96].mxu0  ;;  %v4965_v47 = vadd.f32 1.0, %v8523_v36  ;;  %8538 = verf.f32 %v4725_v42  ;;  %v4395_v57 = vadd.f32 %v10941_v29, %v10871_v30  ;;  %v4171_v36 = vadd.f32 %v4170_v2, %v10874_v61  ;;  %v8195_v2 = vld [vmem:[#allocation11 + $0x114] ss:$8 sps:$4 sm:$0xff]  }
 0x89b   : > { %v10996_v15 = vpop.f32.mrb[161].mxu1  ;;  %v10998_v52 = vpop.f32.mrb[97].mxu0  ;;  %12851 = vst [vmem:[#allocation65_spill] sm:$0xff] %v11007_v25  ;;  %v4969_v50 = vadd.f32 1.0, %v8525_v5  ;;  %8540 = verf.f32 %v4729_v11  ;;  %v4397_v26 = vadd.f32 %v10945_v60, %v10876_v28  ;;  %v5197_v22 = vpack.c.bf16 %v10963_v59, %v10948_v31  ;;  %v8190_v5 = vld [vmem:[#allocation11 + $0x100] ss:$8 sps:$4 sm:$0xff]  }
 0x89c   : > { %v11002_v18 = vpop.f32.mrb[162].mxu1  ;;  %v11004_v48 = vpop.f32.mrb[98].mxu0  ;;  %v4173_v9 = vadd.f32 %v4172_v1, %v10869_v16  ;;  %v11024_v42 = vmul.f32 0.5, %v4389_v51  ;;  %8542 = verf.f32 %v4732_v10  ;;  %v4736_v29 = vmul.f32 0.70710677, %v4395_v57 }
 0x89d   : > { %v8527_v24 = vpop.eup %8526  ;;  %v11009_v45 = vpop.f32.mrb[163].mxu1  ;;  %v11027_v23 = vmul.f32 %v4968_v56, %v10937_v38  ;;  %v11030_v11 = vmul.f32 %v4965_v47, %v10939_v46  ;;  %v11032_v60 = vmul.f32 0.5, %v4165_v19  ;;  %v4733_v31 = vmul.f32 0.70710677, %v4171_v36  ;;  %6072 = vmatprep.mubr.bf16.mxu0 %v5197_v22  ;;  %v8193_v1 = vld [vmem:[#allocation11 + $0x110] ss:$8 sps:$4 sm:$0xff]  }
 0x89e   : > { %v4972_v7 = vadd.f32 1.0, %v8527_v24  ;;  %v11014_v54 = vpop.f32.mrb[99].mxu0  ;;  %v11022_v24 = vmul.f32 %v4964_v41, %v10918_v32  ;;  %v8529_v59 = vpop.eup %8528  ;;  %v11035_v32 = vmul.f32 %v4969_v50, %v10950_v20  ;;  %v11037_v51 = vmul.f32 0.5, %v4391_v6 }
 0x89f   : > { %12852 = vst [vmem:[#allocation66_spill] sm:$0xff] %v11027_v23  ;;  %8544 = verf.f32 %v4736_v29  ;;  %v4737_v41 = vmul.f32 0.70710677, %v4397_v26  ;;  %v12854_v38 = vpack.c.bf16 %v10929_v14, %v10922_v34  ;;  %v8531_v19 = vpop.eup %8530  ;;  %v11049_v10 = vmul.f32 0.5, %v4169_v43 }
 0x8a0   : > { %12853 = vst [vmem:[#allocation67_spill] sm:$0xff] %v11035_v32  ;;  %v11047_v47 = vmul.f32 %v4972_v7, %v10965_v0  ;;  %v4740_v20 = vmul.f32 0.70710677, %v4173_v9  ;;  %v4399_v6 = vadd.f32 %v10952_v17, %v10871_v30  ;;  %v8533_v34 = vpop.eup %8532  ;;  %v11057_v14 = vmul.f32 0.5, %v4395_v57  ;;  %v8198_v0 = vld [vmem:[#allocation11 + $0x124] ss:$8 sps:$4 sm:$0xff]  }
 0x8a1   : > { %6073 = vmatmul.mubr.bf16.vlgmr.msra.gmra.mrb[112].mxu0 %v12854_v38  ;;  %v11042_v56 = vpop.f32.mrb[164].mxu1  ;;  %v11044_v46 = vpop.f32.mrb[100].mxu0  ;;  %8546 = verf.f32 %v4733_v31  ;;  %v4175_v29 = vadd.f32 %v10958_v3, %v10874_v61  ;;  %v4401_v7 = vadd.f32 %v10960_v49, %v10876_v28  ;;  %v4976_v38 = vadd.f32 1.0, %v8529_v59 }
 0x8a2   : > { %6154 = vmatpush1.bf16.msra.mxu0 %v8190_v5  ;;  %v11053_v50 = vpop.f32.mrb[165].mxu1  ;;  %v11055_v22 = vpop.f32.mrb[101].mxu0  ;;  %v11067_v55 = vmul.f32 0.5, %v4171_v36  ;;  %8548 = verf.f32 %v4737_v41  ;;  %v4744_v57 = vmul.f32 0.70710677, %v4399_v6  ;;  %v4973_v44 = vadd.f32 1.0, %v8531_v19 }
 0x8a3   : > { %6155 = vmatprep.subr.bf16.mxu0 %v8195_v2  ;;  %v11063_v43 = vpop.f32.mrb[166].mxu1  ;;  %v11065_v17 = vpop.f32.mrb[102].mxu0  ;;  %v11073_v23 = vmul.f32 0.5, %v4397_v26  ;;  %8550 = verf.f32 %v4740_v20  ;;  %v4741_v49 = vmul.f32 0.70710677, %v4175_v29  ;;  %v4977_v2 = vadd.f32 1.0, %v8533_v34 }
 0x8a4   : > { %v8535_v5 = vpop.eup %8534  ;;  %v11069_v33 = vpop.f32.mrb[167].mxu1  ;;  %v11075_v63 = vmul.f32 0.5, %v4173_v9  ;;  %8552 = verf.f32 %v4744_v57  ;;  %v4745_v32 = vmul.f32 0.70710677, %v4401_v7  ;;  %v8196_v36 = vld [vmem:[#allocation11 + $0x120] ss:$8 sps:$4 sm:$0xff]   ;;  %v4179_v25 = vadd.f32 %v10989_v8, %v10869_v16 }
 0x8a5   : > { %v11071_v31 = vpop.f32.mrb[103].mxu0  ;;  %v8537_v3 = vpop.eup %8536  ;;  %v4980_v41 = vadd.f32 1.0, %v8535_v5  ;;  %8554 = verf.f32 %v4741_v49  ;;  %v4405_v19 = vadd.f32 %v10991_v39, %v10871_v30  ;;  %v8201_v26 = vld [vmem:[#allocation11 + $0x134] ss:$8 sps:$4 sm:$0xff]   ;;  %v11082_v34 = vmul.f32 %v4976_v38, %v10975_v62  ;;  %v8199_v57 = vld [vmem:[#allocation11 + $0x130] ss:$8 sps:$4 sm:$0xff]  }
 0x8a6   : > { %6156 = vmatpush1.bf16.msra.mxu0 %v8193_v1  ;;  %v8539_v59 = vpop.eup %8538  ;;  %v4984_v9 = vadd.f32 1.0, %v8537_v3  ;;  %8556 = verf.f32 %v4745_v32  ;;  %v4181_v1 = vadd.f32 %v10996_v15, %v10874_v61  ;;  %v11087_v49 = vmul.f32 %v4973_v44, %v10977_v40 }
 0x8a7   : > { %6157 = vmatprep.subr.bf16.mxu0 %v8198_v0  ;;  %v8541_v20 = vpop.eup %8540  ;;  %12855 = vst [vmem:[#allocation68_spill] sm:$0xff] %v11082_v34  ;;  %v11089_v8 = vmul.f32 0.5, %v4399_v6  ;;  %v11091_v12 = vmul.f32 0.5, %v4175_v29  ;;  %v4748_v39 = vmul.f32 0.70710677, %v4179_v25  ;;  %v11096_v62 = vmul.f32 %v4977_v2, %v10993_v35 }
 0x8a8   : > { %v8543_v5 = vpop.eup %8542  ;;  %v8204_v0 = vld [vmem:[#allocation11 + $0x144] ss:$8 sps:$4 sm:$0xff]   ;;  %v4981_v32 = vadd.f32 1.0, %v8539_v59  ;;  %v11098_v38 = vmul.f32 0.5, %v4401_v7  ;;  %v4752_v15 = vmul.f32 0.70710677, %v4405_v19  ;;  %v11105_v6 = vmul.f32 %v4980_v41, %v11000_v21 }
 0x8a9   : > { %v11093_v4 = vpop.f32.mrb[168].mxu1  ;;  %12856 = vst [vmem:[#allocation69_spill] sm:$0xff] %v11096_v62  ;;  %v11100_v3 = vpop.f32.mrb[104].mxu0  ;;  %v4985_v29 = vadd.f32 1.0, %v8541_v20  ;;  %v4749_v34 = vmul.f32 0.70710677, %v4181_v1  ;;  %v4407_v13 = vadd.f32 %v10998_v52, %v10876_v28  ;;  %v11114_v2 = vmul.f32 %v4984_v9, %v11024_v42 }
 0x8aa   : > { %6158 = vmatpush1.bf16.msra.mxu0 %v8196_v36  ;;  %v11102_v40 = vpop.f32.mrb[169].mxu1  ;;  %v8545_v44 = vpop.eup %8544  ;;  %v4988_v36 = vadd.f32 1.0, %v8543_v5  ;;  %8558 = verf.f32 %v4748_v39  ;;  %v5205_v59 = vpack.c.bf16 %v11030_v11, %v10983_v37  ;;  %v11122_v62 = vmul.f32 0.5, %v4179_v25  ;;  %v8202_v25 = vld [vmem:[#allocation11 + $0x140] ss:$8 sps:$4 sm:$0xff]  }
 0x8ab   : > { %6159 = vmatprep.subr.bf16.mxu0 %v8201_v26  ;;  %v11109_v35 = vpop.f32.mrb[105].mxu0  ;;  %v11111_v7 = vpop.f32.mrb[170].mxu1  ;;  %12857 = vst [vmem:[#allocation70_spill] sm:$0xff] %v11114_v2  ;;  %v11124_v52 = vmul.f32 0.5, %v4405_v19  ;;  %8560 = verf.f32 %v4752_v15  ;;  %v4753_v26 = vmul.f32 0.70710677, %v4407_v13  ;;  %v11129_v9 = vmul.f32 %v4981_v32, %v11032_v60 }
 0x8ac   : > { %v11118_v21 = vpop.f32.mrb[106].mxu0  ;;  %v11120_v41 = vpop.f32.mrb[171].mxu1  ;;  %v4992_v5 = vadd.f32 1.0, %v8545_v44  ;;  %6082 = vmatprep.mubr.bf16.mxu0 %v5205_v59  ;;  %v4183_v37 = vadd.f32 %v11002_v18, %v10869_v16  ;;  %v4409_v11 = vadd.f32 %v11004_v48, %v10871_v30  ;;  %v11136_v39 = vmul.f32 %v4985_v29, %v11037_v51  ;;  %v8207_v32 = vld [vmem:[#allocation11 + $0x154] ss:$8 sps:$4 sm:$0xff]  }
 0x8ad   : > { %v8547_v20 = vpop.eup %8546  ;;  %v11126_v27 = vpop.f32.mrb[107].mxu0  ;;  %v11138_v15 = vmul.f32 0.5, %v4181_v1  ;;  %8562 = verf.f32 %v4749_v34  ;;  %v5204_v60 = vpack.c.bf16 %v11022_v24, %v10973_v53  ;;  %v11143_v18 = vmul.f32 %v4988_v36, %v11049_v10  ;;  %v8205_v29 = vld [vmem:[#allocation11 + $0x150] ss:$8 sps:$4 sm:$0xff]   ;;  %v8210_v36 = vld [vmem:[#allocation11 + $0x164] ss:$8 sps:$4 sm:$0xff]  }
 0x8ae   : > { %v8549_v42 = vpop.eup %8548  ;;  %6160 = vmatpush1.bf16.msra.mxu0 %v8199_v57  ;;  %12858 = vst [vmem:[#allocation71_spill] sm:$0xff] %v11136_v39  ;;  %v4989_v59 = vadd.f32 1.0, %v8547_v20  ;;  %8564 = verf.f32 %v4753_v26  ;;  %v4756_v48 = vmul.f32 0.70710677, %v4183_v37  ;;  %v11145_v58 = vmul.f32 0.5, %v4407_v13 }
 0x8af   : > { %v8551_v19 = vpop.eup %8550  ;;  %6161 = vmatprep.subr.bf16.mxu0 %v8204_v0  ;;  %v4993_v2 = vadd.f32 1.0, %v8549_v42  ;;  %v4760_v51 = vmul.f32 0.70710677, %v4409_v11  ;;  %6083 = vmatmul.mubr.bf16.gmra.mrb[116].mxu0 %v5204_v60  ;;  %v4185_v34 = vadd.f32 %v11009_v45, %v10874_v61  ;;  %v11154_v10 = vmul.f32 %v4992_v5, %v11057_v14 }
 0x8b0   : > { %v8553_v44 = vpop.eup %8552  ;;  %8566 = verf.f32 %v4756_v48  ;;  %v4411_v0 = vadd.f32 %v11014_v54, %v10876_v28  ;;  %v4189_v13 = vadd.f32 %v11042_v56, %v10869_v16  ;;  %v4996_v26 = vadd.f32 1.0, %v8551_v19 }
 0x8b1   : > { %v8555_v57 = vpop.eup %8554  ;;  %v11149_v1 = vpop.f32.mrb[172].mxu1  ;;  %12859 = vst [vmem:[#allocation72_spill] sm:$0xff] %v11154_v10  ;;  %v5000_v42 = vadd.f32 1.0, %v8553_v44  ;;  %8568 = verf.f32 %v4760_v51  ;;  %v11169_v54 = vmul.f32 %v4989_v59, %v11067_v55  ;;  %v11174_v39 = vmul.f32 %v4993_v2, %v11073_v23  ;;  %v8208_v23 = vld [vmem:[#allocation11 + $0x160] ss:$8 sps:$4 sm:$0xff]  }
 0x8b2   : > { %v11151_v53 = vpop.f32.mrb[108].mxu0  ;;  %v8557_v24 = vpop.eup %8556  ;;  %6162 = vmatpush1.bf16.msra.mxu0 %v8202_v25  ;;  %v4997_v60 = vadd.f32 1.0, %v8555_v57  ;;  %v4757_v25 = vmul.f32 0.70710677, %v4185_v34  ;;  %v4761_v48 = vmul.f32 0.70710677, %v4411_v0  ;;  %v4191_v55 = vadd.f32 %v11053_v50, %v10874_v61 }
 0x8b3   : > { %v11160_v20 = vpop.f32.mrb[173].mxu1  ;;  %v11162_v45 = vpop.f32.mrb[109].mxu0  ;;  %6163 = vmatprep.subr.bf16.mxu0 %v8207_v32  ;;  %v5001_v56 = vadd.f32 1.0, %v8557_v24  ;;  %12861 = vst [vmem:[#allocation74_spill] sm:$0xff] %v11174_v39  ;;  %v11176_v19 = vmul.f32 0.5, %v4183_v37  ;;  %v4415_v32 = vadd.f32 %v11044_v46, %v10871_v30  ;;  %v4417_v59 = vadd.f32 %v11055_v22, %v10876_v28 }
 0x8b4   : > { %v11164_v14 = vpop.f32.mrb[174].mxu1  ;;  %v11166_v5 = vpop.f32.mrb[110].mxu0  ;;  %v4764_v44 = vmul.f32 0.70710677, %v4189_v13  ;;  %8570 = verf.f32 %v4757_v25  ;;  %v11189_v37 = vmul.f32 %v4996_v26, %v11075_v63  ;;  %v11192_v46 = vmul.f32 %v5000_v42, %v11089_v8  ;;  %v8213_v25 = vld [vmem:[#allocation11 + $0x174] ss:$8 sps:$4 sm:$0xff]  }
 0x8b5   : > { %12860 = vst [vmem:[#allocation73_spill] sm:$0xff] %v11166_v5  ;;  %v11171_v10 = vpop.f32.mrb[175].mxu1  ;;  %v11180_v57 = vpop.f32.mrb[111].mxu0  ;;  %v11182_v5 = vmul.f32 0.5, %v4409_v11  ;;  %v11194_v24 = vmul.f32 0.5, %v4185_v34  ;;  %v11197_v39 = vmul.f32 %v4997_v60, %v11091_v12  ;;  %v11200_v50 = vmul.f32 %v5001_v56, %v11098_v38 }
 0x8b6   : > { %v8559_v51 = vpop.eup %8558  ;;  %6164 = vmatpush1.bf16.msra.mxu0 %v8205_v29  ;;  %12862 = vst [vmem:[#allocation75_spill] sm:$0xff] %v11192_v46  ;;  %v4768_v11 = vmul.f32 0.70710677, %v4415_v32  ;;  %v11202_v22 = vmul.f32 0.5, %v4411_v0  ;;  %8572 = verf.f32 %v4761_v48  ;;  %v11204_v26 = vmul.f32 0.5, %v4189_v13 }
 0x8b7   : > { %v8561_v2 = vpop.eup %8560  ;;  %6165 = vmatprep.subr.bf16.mxu0 %v8210_v36  ;;  %12863 = vst [vmem:[#allocation76_spill] sm:$0xff] %v11200_v50  ;;  %v5004_v63 = vadd.f32 1.0, %v8559_v51  ;;  %8574 = verf.f32 %v4764_v44  ;;  %v4765_v8 = vmul.f32 0.70710677, %v4191_v55  ;;  %v4769_v46 = vmul.f32 0.70710677, %v4417_v59 }
 0x8b8   : > { %v8563_v29 = vpop.eup %8562  ;;  %v5008_v36 = vadd.f32 1.0, %v8561_v2  ;;  %8576 = verf.f32 %v4768_v11  ;;  %v5213_v12 = vpack.c.bf16 %v11129_v9, %v11087_v49  ;;  %v8211_v38 = vld [vmem:[#allocation11 + $0x170] ss:$8 sps:$4 sm:$0xff]   ;;  %v4193_v13 = vadd.f32 %v11063_v43, %v10869_v16  ;;  %v8216_v48 = vld [vmem:[#allocation11 + $0x184] ss:$8 sps:$4 sm:$0xff]  }
 0x8b9   : > { %v11206_v34 = vpop.f32.mrb[176].mxu1  ;;  %v8565_v42 = vpop.eup %8564  ;;  %8578 = verf.f32 %v4765_v8  ;;  %v4419_v60 = vadd.f32 %v11065_v17, %v10871_v30  ;;  %v5212_v56 = vpack.c.bf16 %v11105_v6, %v11047_v47  ;;  %v11220_v49 = vmul.f32 0.5, %v4415_v32  ;;  %v8214_v32 = vld [vmem:[#allocation11 + $0x180] ss:$8 sps:$4 sm:$0xff]  }
 0x8ba   : > { %6166 = vmatpush1.bf16.msra.mxu0 %v8208_v23  ;;  %v11210_v0 = vpop.f32.mrb[177].mxu1  ;;  %v8567_v51 = vpop.eup %8566  ;;  %8580 = verf.f32 %v4769_v46  ;;  %6092 = vmatprep.mubr.bf16.mxu0 %v5213_v12  ;;  %v4195_v9 = vadd.f32 %v11069_v33, %v10874_v61  ;;  %v4421_v43 = vadd.f32 %v11071_v31, %v10876_v28  ;;  %v11229_v47 = vmul.f32 %v5004_v63, %v11122_v62  ;;  %v8219_v62 = vld [vmem:[#allocation11 + $0x194] ss:$8 sps:$4 sm:$0xff]  }
 0x8bb   : > { %6167 = vmatprep.subr.bf16.mxu0 %v8213_v25  ;;  %v11218_v44 = vpop.f32.mrb[178].mxu1  ;;  %v8569_v17 = vpop.eup %8568  ;;  %v5005_v6 = vadd.f32 1.0, %v8563_v29  ;;  %v5009_v2 = vadd.f32 1.0, %v8565_v42  ;;  %v4772_v11 = vmul.f32 0.70710677, %v4193_v13  ;;  %6093 = vmatmul.mubr.bf16.gmra.mrb[120].mxu0 %v5212_v56  ;;  %v11232_v46 = vmul.f32 %v5008_v36, %v11124_v52 }
 0x8bc   : > { %v11226_v23 = vpop.f32.mrb[179].mxu1  ;;  %v11234_v25 = vmul.f32 0.5, %v4191_v55  ;;  %v4776_v33 = vmul.f32 0.70710677, %v4419_v60  ;;  %v4773_v8 = vmul.f32 0.70710677, %v4195_v9  ;;  %v4199_v42 = vadd.f32 %v11093_v4, %v10869_v16 }
 0x8bd   : > { %12864 = vst [vmem:[#allocation77_spill] sm:$0xff] %v11232_v46  ;;  %v5012_v31 = vadd.f32 1.0, %v8567_v51  ;;  %v11236_v12 = vmul.f32 0.5, %v4417_v59  ;;  %8582 = verf.f32 %v4772_v11  ;;  %v4777_v50 = vmul.f32 0.70710677, %v4421_v43 }
 0x8be   : > { %6168 = vmatpush1.bf16.msra.mxu0 %v8211_v38  ;;  %v8571_v29 = vpop.eup %8570  ;;  %v5016_v63 = vadd.f32 1.0, %v8569_v17  ;;  %8584 = verf.f32 %v4776_v33  ;;  %v4425_v52 = vadd.f32 %v11100_v3, %v10871_v30  ;;  %v11243_v55 = vmul.f32 %v5005_v6, %v11138_v15  ;;  %v8217_v38 = vld [vmem:[#allocation11 + $0x190] ss:$8 sps:$4 sm:$0xff]   ;;  %v8222_v15 = vld [vmem:[#allocation11 + $0x1a4] ss:$8 sps:$4 sm:$0xff]  }
 0x8bf   : > { %6169 = vmatprep.subr.bf16.mxu0 %v8216_v48  ;;  %v11246_v36 = vmul.f32 %v5009_v2, %v11145_v58  ;;  %8586 = verf.f32 %v4773_v8  ;;  %v4201_v59 = vadd.f32 %v11102_v40, %v10874_v61  ;;  %v5013_v51 = vadd.f32 1.0, %v8571_v29 }
 0x8c0   : > { %v8573_v48 = vpop.eup %8572  ;;  %8588 = verf.f32 %v4777_v50  ;;  %v4780_v4 = vmul.f32 0.70710677, %v4199_v42  ;;  %v4427_v3 = vadd.f32 %v11109_v35, %v10876_v28  ;;  %v11256_v6 = vmul.f32 0.5, %v4193_v13 }
 0x8c1   : > { %12865 = vst [vmem:[#allocation78_spill] sm:$0xff] %v11246_v36  ;;  %v11250_v56 = vpop.f32.mrb[180].mxu1  ;;  %v8575_v58 = vpop.eup %8574  ;;  %v11258_v2 = vmul.f32 0.5, %v4419_v60  ;;  %v11260_v40 = vmul.f32 0.5, %v4195_v9  ;;  %v4784_v11 = vmul.f32 0.70710677, %v4425_v52  ;;  %v11265_v8 = vmul.f32 %v5012_v31, %v11176_v19 }
 0x8c2   : > { %6170 = vmatpush1.bf16.msra.mxu0 %v8214_v32  ;;  %v11254_v17 = vpop.f32.mrb[181].mxu1  ;;  %v8577_v50 = vpop.eup %8576  ;;  %v11268_v35 = vmul.f32 %v5016_v63, %v11182_v5  ;;  %v11270_v32 = vmul.f32 0.5, %v4421_v43  ;;  %8590 = verf.f32 %v4780_v4  ;;  %v5017_v29 = vadd.f32 1.0, %v8573_v48  ;;  %v8220_v48 = vld [vmem:[#allocation11 + $0x1a0] ss:$8 sps:$4 sm:$0xff]  }
 0x8c3   : > { %6171 = vmatprep.subr.bf16.mxu0 %v8219_v62  ;;  %v11262_v33 = vpop.f32.mrb[182].mxu1  ;;  %v8579_v60 = vpop.eup %8578  ;;  %v11274_v9 = vmul.f32 0.5, %v4199_v42  ;;  %8592 = verf.f32 %v4784_v11  ;;  %v4781_v62 = vmul.f32 0.70710677, %v4201_v59  ;;  %v11277_v36 = vmul.f32 %v5013_v51, %v11194_v24 }
 0x8c4   : > { %12866 = vst [vmem:[#allocation79_spill] sm:$0xff] %v11268_v35  ;;  %v11272_v13 = vpop.f32.mrb[183].mxu1  ;;  %v8581_v46 = vpop.eup %8580  ;;  %v5020_v19 = vadd.f32 1.0, %v8575_v58  ;;  %v4785_v31 = vmul.f32 0.70710677, %v4427_v3  ;;  %v5221_v5 = vpack.c.bf16 %v11197_v39, %v11169_v54  ;;  %v5024_v43 = vadd.f32 1.0, %v8577_v50 }
 0x8c5   : > { %8594 = verf.f32 %v4781_v62  ;;  %v4203_v63 = vadd.f32 %v11111_v7, %v10869_v16  ;;  %v4429_v42 = vadd.f32 %v11118_v21, %v10871_v30  ;;  %v5021_v4 = vadd.f32 1.0, %v8579_v60  ;;  %v8225_v54 = vld [vmem:[#allocation11 + $0x1b4] ss:$8 sps:$4 sm:$0xff]  }
 0x8c6   : > { %6172 = vmatpush1.bf16.msra.mxu0 %v8217_v38  ;;  %v11285_v11 = vmul.f32 0.5, %v4425_v52  ;;  %6102 = vmatprep.mubr.bf16.mxu0 %v5221_v5  ;;  %v5220_v24 = vpack.c.bf16 %v11189_v37, %v11143_v18  ;;  %v4205_v39 = vadd.f32 %v11120_v41, %v10874_v61  ;;  %v11292_v51 = vmul.f32 %v5017_v29, %v11202_v22  ;;  %v8223_v29 = vld [vmem:[#allocation11 + $0x1b0] ss:$8 sps:$4 sm:$0xff]  }
 0x8c7   : > { %6173 = vmatprep.subr.bf16.mxu0 %v8222_v15  ;;  %v8583_v38 = vpop.eup %8582  ;;  %v5025_v7 = vadd.f32 1.0, %v8581_v46  ;;  %v11294_v58 = vmul.f32 0.5, %v4201_v59  ;;  %v4788_v21 = vmul.f32 0.70710677, %v4203_v63  ;;  %v11299_v50 = vmul.f32 %v5020_v19, %v11204_v26 }
 0x8c8   : > { %v8585_v52 = vpop.eup %8584  ;;  %8596 = verf.f32 %v4785_v31  ;;  %v4792_v18 = vmul.f32 0.70710677, %v4429_v42  ;;  %6103 = vmatmul.mubr.bf16.gmra.mrb[124].mxu0 %v5220_v24  ;;  %v4789_v37 = vmul.f32 0.70710677, %v4205_v39  ;;  %v11302_v60 = vmul.f32 %v5024_v43, %v11220_v49 }
 0x8c9   : > { %v11296_v15 = vpop.f32.mrb[184].mxu1  ;;  %v8587_v41 = vpop.eup %8586  ;;  %v11304_v22 = vmul.f32 0.5, %v4427_v3  ;;  %v4431_v46 = vadd.f32 %v11126_v27, %v10876_v28  ;;  %v4209_v59 = vadd.f32 %v11149_v1, %v10869_v16  ;;  %v11313_v19 = vmul.f32 %v5021_v4, %v11234_v25  ;;  %v8228_v3 = vld [vmem:[#allocation11 + $0x1c4] ss:$8 sps:$4 sm:$0xff]  }
 0x8ca   : > { %12867 = vst [vmem:[#allocation80_spill] sm:$0xff] %v11302_v60  ;;  %6174 = vmatpush1.bf16.msra.mxu0 %v8220_v48  ;;  %v11310_v26 = vpop.f32.mrb[185].mxu1  ;;  %v8589_v62 = vpop.eup %8588  ;;  %v5028_v31 = vadd.f32 1.0, %v8583_v38  ;;  %8598 = verf.f32 %v4788_v21  ;;  %v4435_v49 = vadd.f32 %v11151_v53, %v10871_v30  ;;  %v11320_v27 = vmul.f32 %v5025_v7, %v11236_v12  ;;  %v8226_v48 = vld [vmem:[#allocation11 + $0x1c0] ss:$8 sps:$4 sm:$0xff]  }
 0x8cb   : > { %6175 = vmatprep.subr.bf16.mxu0 %v8225_v54  ;;  %v11317_v5 = vpop.f32.mrb[186].mxu1  ;;  %v11322_v1 = vmul.f32 0.5, %v4203_v63  ;;  %v11324_v43 = vmul.f32 0.5, %v4429_v42  ;;  %8600 = verf.f32 %v4789_v37  ;;  %v5032_v24 = vadd.f32 1.0, %v8585_v52  ;;  %v8231_v52 = vld [vmem:[#allocation11 + $0x1d4] ss:$8 sps:$4 sm:$0xff]  }
 0x8cc   : > { %v11326_v25 = vpop.f32.mrb[187].mxu1  ;;  %v8591_v4 = vpop.eup %8590  ;;  %8602 = verf.f32 %v4792_v18  ;;  %v4793_v38 = vmul.f32 0.70710677, %v4431_v46  ;;  %v4796_v53 = vmul.f32 0.70710677, %v4209_v59  ;;  %v5029_v21 = vadd.f32 1.0, %v8587_v41 }
 0x8cd   : > { %v8593_v54 = vpop.eup %8592  ;;  %v5033_v60 = vadd.f32 1.0, %v8589_v62  ;;  %v11328_v35 = vmul.f32 0.5, %v4205_v39  ;;  %v4800_v12 = vmul.f32 0.70710677, %v4435_v49  ;;  %v11331_v63 = vmul.f32 %v5028_v31, %v11256_v6 }
 0x8ce   : > { %6176 = vmatpush1.bf16.msra.mxu0 %v8223_v29  ;;  %8604 = verf.f32 %v4793_v38  ;;  %v4211_v42 = vadd.f32 %v11160_v20, %v10874_v61  ;;  %v4437_v7 = vadd.f32 %v11162_v45, %v10876_v28  ;;  %v5036_v37 = vadd.f32 1.0, %v8591_v4 }
 0x8cf   : > { %6177 = vmatprep.subr.bf16.mxu0 %v8228_v3  ;;  %v8595_v18 = vpop.eup %8594  ;;  %8606 = verf.f32 %v4796_v53  ;;  %v5229_v39 = vpack.c.bf16 %v11277_v36, %v11243_v55  ;;  %v4213_v41 = vadd.f32 %v11164_v14, %v10869_v16  ;;  %v11344_v29 = vmul.f32 %v5032_v24, %v11258_v2  ;;  %v8229_v16 = vld [vmem:[#allocation11 + $0x1d0] ss:$8 sps:$4 sm:$0xff]  }
 0x8d0   : > { %v5040_v20 = vadd.f32 1.0, %v8593_v54  ;;  %v11346_v62 = vmul.f32 0.5, %v4431_v46  ;;  %8608 = verf.f32 %v4800_v12  ;;  %v5157_v31 = vmul.f32 %v5029_v21, %v11260_v40  ;;  %v12868_v46 = vld [vmem:[#allocation73_spill] sm:$0xff] }
 0x8d1   : > { %v11341_v6 = vpop.f32.mrb[188].mxu1  ;;  %v11352_v3 = vmul.f32 %v5033_v60, %v11270_v32  ;;  %v11354_v55 = vmul.f32 0.5, %v4209_v59  ;;  %v4797_v36 = vmul.f32 0.70710677, %v4211_v42  ;;  %6112 = vmatprep.mubr.bf16.mxu0 %v5229_v39  ;;  %v5037_v2 = vadd.f32 1.0, %v8595_v18  ;;  %v12869_v39 = vld [vmem:[#allocation58_spill] sm:$0xff] }
 0x8d2   : > { %v11348_v45 = vpop.f32.mrb[189].mxu1  ;;  %6178 = vmatpush1.bf16.msra.mxu0 %v8226_v48  ;;  %v8597_v14 = vpop.eup %8596  ;;  %v4801_v4 = vmul.f32 0.70710677, %v4437_v7  ;;  %v4804_v24 = vmul.f32 0.70710677, %v4213_v41  ;;  %v4439_v38 = vadd.f32 %v12868_v46, %v10871_v30  ;;  %v11361_v40 = vmul.f32 %v5036_v37, %v11274_v9 }
 0x8d3   : > { %6179 = vmatprep.subr.bf16.mxu0 %v8231_v52  ;;  %v11358_v53 = vpop.f32.mrb[190].mxu1  ;;  %v11363_v32 = vmul.f32 0.5, %v4435_v49  ;;  %v5228_v60 = vpack.c.bf16 %v11265_v8, %v11229_v47  ;;  %v4215_v59 = vadd.f32 %v11171_v10, %v10874_v61  ;;  %v8234_v48 = vld [vmem:[#allocation11 + $0x1e4] ss:$8 sps:$4 sm:$0xff]   ;;  %v11372_v30 = vmul.f32 %v5040_v20, %v11285_v11 }
 0x8d4   : > { %v11369_v54 = vpop.f32.mrb[191].mxu1  ;;  %v8599_v21 = vpop.eup %8598  ;;  %v11374_v12 = vmul.f32 0.5, %v4211_v42  ;;  %8610 = verf.f32 %v4797_v36  ;;  %v4808_v9 = vmul.f32 0.70710677, %v4439_v38  ;;  %v5041_v49 = vadd.f32 1.0, %v8597_v14  ;;  %v12870_v20 = vld [vmem:[#allocation59_spill] sm:$0xff] }
 0x8d5   : > { %v8601_v52 = vpop.eup %8600  ;;  %v11376_v18 = vmul.f32 0.5, %v4437_v7  ;;  %8612 = verf.f32 %v4804_v24  ;;  %6113 = vmatmul.mubr.bf16.gmra.mrb[128].mxu0 %v5228_v60  ;;  %v4805_v47 = vmul.f32 0.70710677, %v4215_v59  ;;  %v11379_v61 = vmul.f32 %v5037_v2, %v11294_v58  ;;  %v8232_v42 = vld [vmem:[#allocation11 + $0x1e0] ss:$8 sps:$4 sm:$0xff]  }
 0x8d6   : > { %v8603_v8 = vpop.eup %8602  ;;  %v5045_v10 = vadd.f32 1.0, %v8601_v52  ;;  %8614 = verf.f32 %v4801_v4  ;;  %v4441_v11 = vadd.f32 %v11180_v57, %v10876_v28  ;;  %6180 = vmatpush1.bf16.msra.mxu0 %v8229_v16  ;;  %v5044_v37 = vadd.f32 1.0, %v8599_v21  ;;  %v8237_v14 = vld [vmem:[#allocation11 + $0x1f4] ss:$8 sps:$4 sm:$0xff]  }
 0x8d7   : > { %8616 = verf.f32 %v4805_v47  ;;  %v4252_v7 = vadd.f32 %v11206_v34, %v12869_v39  ;;  %v4254_v36 = vadd.f32 %v11210_v0, %v12870_v20  ;;  %6181 = vmatprep.subr.bf16.mxu0 %v8234_v48  ;;  %v11389_v2 = vmul.f32 0.5, %v4213_v41  ;;  %v8240_v47 = vld [vmem:[#allocation11 + $0x204] ss:$8 sps:$4 sm:$0xff]  }
 0x8d8   : > { %v8605_v58 = vpop.eup %8604  ;;  %8618 = verf.f32 %v4808_v9  ;;  %v4809_v4 = vmul.f32 0.70710677, %v4441_v11  ;;  %v5237_v28 = vpack.c.bf16 %v5157_v31, %v11313_v19  ;;  %v11395_v46 = vmul.f32 %v5041_v49, %v11304_v22  ;;  %v8235_v31 = vld [vmem:[#allocation11 + $0x1f0] ss:$8 sps:$4 sm:$0xff]  }
 0x8d9   : > { %v11387_v24 = vpop.f32.mrb[192].mxu1  ;;  %v8607_v16 = vpop.eup %8606  ;;  %v5048_v34 = vadd.f32 1.0, %v8603_v8  ;;  %v11397_v60 = vmul.f32 0.5, %v4439_v38  ;;  %v4686_v0 = vmul.f32 0.70710677, %v4252_v7  ;;  %v5173_v41 = vmul.f32 %v5045_v10, %v11328_v35 }
 0x8da   : > { %v11392_v57 = vpop.f32.mrb[193].mxu1  ;;  %v8609_v21 = vpop.eup %8608  ;;  %8620 = verf.f32 %v4809_v4  ;;  %v4687_v9 = vmul.f32 0.70710677, %v4254_v36  ;;  %6122 = vmatprep.mubr.bf16.mxu0 %v5237_v28  ;;  %v4256_v19 = vadd.f32 %v11218_v44, %v12869_v39  ;;  %6182 = vmatpush1.bf16.msra.mxu0 %v8232_v42  ;;  %v5172_v22 = vmul.f32 %v5044_v37, %v11322_v1 }
 0x8db   : > { %v11399_v48 = vpop.f32.mrb[194].mxu1  ;;  %v4677_v38 = vmul.f32 0.5, %v4215_v59  ;;  %8622 = verf.f32 %v4686_v0  ;;  %v5236_v49 = vpack.c.bf16 %v11331_v63, %v11299_v50  ;;  %6183 = vmatprep.subr.bf16.mxu0 %v8237_v14  ;;  %v5049_v35 = vadd.f32 1.0, %v8605_v58 }
 0x8dc   : > { %v11404_v52 = vpop.f32.mrb[195].mxu1  ;;  %v5052_v8 = vadd.f32 1.0, %v8607_v16  ;;  %8624 = verf.f32 %v4687_v9  ;;  %v4694_v10 = vmul.f32 0.70710677, %v4256_v19  ;;  %v5056_v4 = vadd.f32 1.0, %v8609_v21 }
 0x8dd   : > { %6123 = vmatmul.mubr.bf16.gmra.mrb[132].mxu0 %v5236_v49  ;;  %v4258_v44 = vadd.f32 %v11226_v23, %v12870_v20  ;;  %v4262_v42 = vadd.f32 %v11250_v56, %v12869_v39  ;;  %v4264_v1 = vadd.f32 %v11254_v17, %v12870_v20  ;;  %v11416_v50 = vmul.f32 %v5048_v34, %v11324_v43 }
 0x8de   : > { %v8611_v59 = vpop.eup %8610  ;;  %v11418_v63 = vmul.f32 0.5, %v4441_v11  ;;  %8626 = verf.f32 %v4694_v10  ;;  %v5245_v37 = vpack.c.bf16 %v5173_v41, %v11379_v61  ;;  %6184 = vmatpush1.bf16.msra.mxu0 %v8235_v31  ;;  %v11421_v58 = vmul.f32 0.5, %v4252_v7 }
 0x8df   : > { %v8613_v14 = vpop.eup %8612  ;;  %v11423_v23 = vmul.f32 0.5, %v4254_v36  ;;  %v4695_v28 = vmul.f32 0.70710677, %v4258_v44  ;;  %v4266_v56 = vadd.f32 %v11262_v33, %v12869_v39  ;;  %6266 = vmatprep.subr.bf16.mxu0 %v8240_v47  ;;  %v11430_v11 = vmul.f32 %v5049_v35, %v11346_v62 }
 0x8e0   : > { %v8615_v43 = vpop.eup %8614  ;;  %v11433_v16 = vmul.f32 %v5052_v8, %v11354_v55  ;;  %v5060_v61 = vadd.f32 1.0, %v8613_v14  ;;  %v4702_v34 = vmul.f32 0.70710677, %v4262_v42  ;;  %6132 = vmatprep.mubr.bf16.mxu0 %v5245_v37  ;;  %v11438_v0 = vmul.f32 %v5056_v4, %v11363_v32 }
 0x8e1   : > { %v11427_v17 = vpop.f32.mrb[196].mxu1  ;;  %v8617_v36 = vpop.eup %8616  ;;  %v4566_v33 = vmul.f32 0.5, %v4256_v19  ;;  %8628 = verf.f32 %v4695_v28  ;;  %v4703_v21 = vmul.f32 0.70710677, %v4264_v1  ;;  %v5053_v62 = vadd.f32 1.0, %v8611_v59 }
 0x8e2   : > { %v11435_v7 = vpop.f32.mrb[197].mxu1  ;;  %12871 = vst [vmem:[#allocation73_spill] sm:$0xff] %v11438_v0  ;;  %v8619_v9 = vpop.eup %8618  ;;  %v5188_v31 = vmul.f32 %v5060_v61, %v11389_v2  ;;  %v5061_v55 = vadd.f32 1.0, %v8617_v36  ;;  %8630 = verf.f32 %v4702_v34  ;;  %v5057_v47 = vadd.f32 1.0, %v8615_v43 }
 0x8e3   : > { %v11440_v41 = vpop.f32.mrb[198].mxu1  ;;  %8632 = verf.f32 %v4703_v21  ;;  %v4710_v35 = vmul.f32 0.70710677, %v4266_v56  ;;  %v5244_v8 = vpack.c.bf16 %v5172_v22, %v11361_v40  ;;  %v4268_v19 = vadd.f32 %v11272_v13, %v12870_v20 }
 0x8e4   : > { %v11443_v49 = vpop.f32.mrb[199].mxu1  ;;  %v8621_v32 = vpop.eup %8620  ;;  %v5189_v10 = vmul.f32 %v5061_v55, %v4677_v38  ;;  %v4272_v4 = vadd.f32 %v11296_v15, %v12869_v39  ;;  %v4274_v2 = vadd.f32 %v11310_v26, %v12870_v20  ;;  %v5064_v37 = vadd.f32 1.0, %v8619_v9 }
 0x8e5   : > { %v8623_v59 = vpop.eup %8622  ;;  %v4567_v14 = vmul.f32 0.5, %v4258_v44  ;;  %8634 = verf.f32 %v4710_v35  ;;  %6133 = vmatmul.mubr.bf16.gmra.mrb[136].mxu0 %v5244_v8  ;;  %v5252_v28 = vpack.c.bf16 %v5188_v31, %v11433_v16  ;;  %v5181_v40 = vmul.f32 %v5053_v62, %v11374_v12 }
 0x8e6   : > { %v8625_v43 = vpop.eup %8624  ;;  %v11454_v22 = vmul.f32 0.5, %v4262_v42  ;;  %v4711_v38 = vmul.f32 0.70710677, %v4268_v19  ;;  %v4276_v13 = vadd.f32 %v11317_v5, %v12869_v39  ;;  %v11459_v15 = vmul.f32 %v5057_v47, %v11376_v18 }
 0x8e7   : > { %v4942_v26 = vadd.f32 1.0, %v8623_v59  ;;  %v11461_v61 = vmul.f32 0.5, %v4264_v1  ;;  %v4718_v44 = vmul.f32 0.70710677, %v4272_v4  ;;  %v4582_v16 = vmul.f32 0.5, %v4266_v56 }
 0x8e8   : > { %12872 = vst [vmem:[#allocation58_spill] sm:$0xff] %v11459_v15  ;;  %v8627_v36 = vpop.eup %8626  ;;  %8636 = verf.f32 %v4711_v38  ;;  %v4719_v21 = vmul.f32 0.70710677, %v4274_v2  ;;  %v5253_v12 = vpack.c.bf16 %v5189_v10, %v5181_v40  ;;  %v11468_v9 = vmul.f32 %v5064_v37, %v11397_v60 }
 0x8e9   : > { %v11463_v34 = vpop.f32.mrb[200].mxu1  ;;  %v4943_v5 = vadd.f32 1.0, %v8625_v43  ;;  %v4950_v62 = vadd.f32 1.0, %v8627_v36  ;;  %8638 = verf.f32 %v4718_v44  ;;  %v4726_v1 = vmul.f32 0.70710677, %v4276_v13 }
 0x8ea   : > { %v11465_v42 = vpop.f32.mrb[201].mxu1  ;;  %12873 = vst [vmem:[#allocation59_spill] sm:$0xff] %v11468_v9  ;;  %8640 = verf.f32 %v4719_v21  ;;  %6142 = vmatprep.mubr.bf16.mxu0 %v5253_v12  ;;  %v4278_v31 = vadd.f32 %v11326_v25, %v12870_v20  ;;  %v4282_v56 = vadd.f32 %v11341_v6, %v12869_v39  ;;  %v11478_v35 = vadd.f32 1.0, %v8621_v32 }
 0x8eb   : > { %v11470_v18 = vpop.f32.mrb[202].mxu1  ;;  %v8629_v47 = vpop.eup %8628  ;;  %v5070_v60 = vmul.f32 %v4942_v26, %v11421_v58  ;;  %v5078_v8 = vmul.f32 %v4950_v62, %v4566_v33  ;;  %v4284_v10 = vadd.f32 %v11348_v45, %v12870_v20  ;;  %8642 = verf.f32 %v4726_v1 }
 0x8ec   : > { %v11476_v55 = vpop.f32.mrb[203].mxu1  ;;  %v8631_v59 = vpop.eup %8630  ;;  %v4951_v37 = vadd.f32 1.0, %v8629_v47  ;;  %v4727_v43 = vmul.f32 0.70710677, %v4278_v31  ;;  %v11485_v25 = vadd.f32 %v11358_v53, %v12869_v39  ;;  %v4583_v38 = vmul.f32 0.5, %v4268_v19 }
 0x8ed   : > { %v8633_v6 = vpop.eup %8632  ;;  %v5198_v40 = vpack.c.bf16 %v5078_v8, %v5070_v60  ;;  %6143 = vmatmul.mubr.bf16.gmra.mrb[140].mxu0 %v5252_v28  ;;  %v4734_v32 = vmul.f32 0.70710677, %v4282_v56  ;;  %v11489_v58 = vadd.f32 %v11369_v54, %v12870_v20  ;;  %v5071_v33 = vmul.f32 %v4943_v5, %v11423_v23  ;;  %v8238_v47 = vld [vmem:[#allocation11 + $0x200] ss:$8 sps:$4 sm:$0xff]  }
 0x8ee   : > { %v5079_v45 = vmul.f32 %v4951_v37, %v4567_v14  ;;  %v11492_v26 = vmul.f32 0.5, %v4272_v4  ;;  %8644 = verf.f32 %v4727_v43  ;;  %v4958_v36 = vadd.f32 1.0, %v8631_v59 }
 0x8ef   : > { %v8635_v44 = vpop.eup %8634  ;;  %v11494_v21 = vmul.f32 0.5, %v4274_v2  ;;  %v4598_v53 = vmul.f32 0.5, %v4276_v13  ;;  %v4735_v12 = vmul.f32 0.70710677, %v4284_v10  ;;  %8646 = verf.f32 %v4734_v32 }
 0x8f0   : > { %v4966_v19 = vadd.f32 1.0, %v8635_v44  ;;  %v5199_v28 = vpack.c.bf16 %v5079_v45, %v5071_v33  ;;  %v4742_v54 = vmul.f32 0.70710677, %v11485_v25  ;;  %v4959_v23 = vadd.f32 1.0, %v8633_v6  ;;  %v8243_v6 = vld [vmem:[#allocation11 + $0x214] ss:$8 sps:$4 sm:$0xff]  }
 0x8f1   : > { %v11496_v62 = vpop.f32.mrb[204].mxu1  ;;  %8648 = verf.f32 %v4735_v12  ;;  %v4743_v4 = vmul.f32 0.70710677, %v11489_v58  ;;  %v4292_v14 = vadd.f32 %v11387_v24, %v12869_v39  ;;  %v4294_v60 = vadd.f32 %v11392_v57, %v12870_v20 }
 0x8f2   : > { %v11499_v1 = vpop.f32.mrb[205].mxu1  ;;  %v8637_v13 = vpop.eup %8636  ;;  %v11506_v5 = vmul.f32 %v4966_v19, %v4582_v16  ;;  %6185 = vmatprep.mubr.bf16.mxu0 %v5199_v28  ;;  %8650 = verf.f32 %v4742_v54  ;;  %v11512_v8 = vadd.f32 %v11399_v48, %v12869_v39  ;;  %v4599_v24 = vmul.f32 0.5, %v4278_v31  ;;  %v8241_v54 = vld [vmem:[#allocation11 + $0x210] ss:$8 sps:$4 sm:$0xff]  }
 0x8f3   : > { %v11504_v2 = vpop.f32.mrb[206].mxu1  ;;  %v8639_v37 = vpop.eup %8638  ;;  %v4967_v43 = vadd.f32 1.0, %v8637_v13  ;;  %8652 = verf.f32 %v4743_v4  ;;  %v4750_v32 = vmul.f32 0.70710677, %v4292_v14  ;;  %v5086_v33 = vmul.f32 %v4958_v36, %v11454_v22 }
 0x8f4   : > { %v11514_v59 = vpop.f32.mrb[207].mxu1  ;;  %v8641_v16 = vpop.eup %8640  ;;  %v11517_v45 = vmul.f32 0.5, %v4282_v56  ;;  %v11519_v44 = vmul.f32 0.5, %v4284_v10  ;;  %v4751_v57 = vmul.f32 0.70710677, %v4294_v60  ;;  %v5087_v12 = vmul.f32 %v4959_v23, %v11461_v61 }
 0x8f5   : > { %v5095_v48 = vmul.f32 %v4967_v43, %v4583_v38  ;;  %6186 = vmatmul.mubr.bf16.vlgmr.msra.gmra.mrb[112].mxu0 %v5198_v40  ;;  %8654 = verf.f32 %v4750_v32  ;;  %v4758_v19 = vmul.f32 0.70710677, %v11512_v8  ;;  %v8643_v28 = vpop.eup %8642  ;;  %v4974_v31 = vadd.f32 1.0, %v8639_v37  ;;  %v8246_v61 = vld [vmem:[#allocation11 + $0x224] ss:$8 sps:$4 sm:$0xff]  }
 0x8f6   : > { %6267 = vmatpush1.bf16.msra.mxu0 %v8238_v47  ;;  %8656 = verf.f32 %v4751_v57  ;;  %v5206_v4 = vpack.c.bf16 %v11506_v5, %v5086_v33  ;;  %v4298_v22 = vadd.f32 %v11404_v52, %v12870_v20  ;;  %v4975_v56 = vadd.f32 1.0, %v8641_v16  ;;  %v8244_v33 = vld [vmem:[#allocation11 + $0x220] ss:$8 sps:$4 sm:$0xff]  }
 0x8f7   : > { %v4982_v10 = vadd.f32 1.0, %v8643_v28  ;;  %6268 = vmatprep.subr.bf16.mxu0 %v8243_v6  ;;  %v5207_v36 = vpack.c.bf16 %v5095_v48, %v5087_v12  ;;  %8658 = verf.f32 %v4758_v19  ;;  %v4614_v23 = vmul.f32 0.5, %v11485_v25 }
 0x8f8   : > { %v8645_v38 = vpop.eup %8644  ;;  %v4759_v13 = vmul.f32 0.70710677, %v4298_v22  ;;  %v11531_v47 = vadd.f32 %v11427_v17, %v12869_v39  ;;  %v11535_v5 = vadd.f32 %v11435_v7, %v12870_v20  ;;  %v4615_v6 = vmul.f32 0.5, %v11489_v58 }
 0x8f9   : > { %v11526_v40 = vpop.f32.mrb[208].mxu1  ;;  %v11539_v37 = vmul.f32 %v4982_v10, %v4598_v53  ;;  %v4983_v43 = vadd.f32 1.0, %v8645_v38  ;;  %6195 = vmatprep.mubr.bf16.mxu0 %v5207_v36  ;;  %v11544_v25 = vadd.f32 %v11440_v41, %v12869_v39  ;;  %v8647_v17 = vpop.eup %8646  ;;  %v11549_v16 = vmul.f32 %v4974_v31, %v11492_v26  ;;  %v8249_v41 = vld [vmem:[#allocation11 + $0x234] ss:$8 sps:$4 sm:$0xff]   ;;  %v8247_v38 = vld [vmem:[#allocation11 + $0x230] ss:$8 sps:$4 sm:$0xff]  }
 0x8fa   : > { %v11537_v52 = vpop.f32.mrb[209].mxu1  ;;  %6269 = vmatpush1.bf16.msra.mxu0 %v8241_v54  ;;  %v4622_v7 = vmul.f32 0.5, %v4292_v14  ;;  %8660 = verf.f32 %v4759_v13  ;;  %v4766_v53 = vmul.f32 0.70710677, %v11531_v47  ;;  %v5103_v12 = vmul.f32 %v4975_v56, %v11494_v21 }
 0x8fb   : > { %v11546_v32 = vpop.f32.mrb[210].mxu1  ;;  %v8649_v58 = vpop.eup %8648  ;;  %v5111_v48 = vmul.f32 %v4983_v43, %v4599_v24  ;;  %6270 = vmatprep.subr.bf16.mxu0 %v8246_v61  ;;  %v4767_v19 = vmul.f32 0.70710677, %v11535_v5  ;;  %v11558_v26 = vadd.f32 %v11443_v49, %v12870_v20  ;;  %v11560_v31 = vmul.f32 0.5, %v4294_v60  ;;  %v8252_v43 = vld [vmem:[#allocation11 + $0x244] ss:$8 sps:$4 sm:$0xff]  }
 0x8fc   : > { %v11552_v57 = vpop.f32.mrb[211].mxu1  ;;  %v8651_v28 = vpop.eup %8650  ;;  %v4991_v14 = vadd.f32 1.0, %v8649_v58  ;;  %8662 = verf.f32 %v4766_v53  ;;  %v4774_v54 = vmul.f32 0.70710677, %v11544_v25  ;;  %v5214_v24 = vpack.c.bf16 %v11539_v37, %v11549_v16 }
 0x8fd   : > { %v8653_v10 = vpop.eup %8652  ;;  %v4998_v36 = vadd.f32 1.0, %v8651_v28  ;;  %6196 = vmatmul.mubr.bf16.gmra.mrb[116].mxu0 %v5206_v4  ;;  %8664 = verf.f32 %v4767_v19  ;;  %v5215_v21 = vpack.c.bf16 %v5111_v48, %v5103_v12  ;;  %v4990_v56 = vadd.f32 1.0, %v8647_v17 }
 0x8fe   : > { %v4999_v61 = vadd.f32 1.0, %v8653_v10  ;;  %v4630_v49 = vmul.f32 0.5, %v11512_v8  ;;  %6271 = vmatpush1.bf16.msra.mxu0 %v8244_v33  ;;  %8666 = verf.f32 %v4774_v54  ;;  %v4631_v13 = vmul.f32 0.5, %v4298_v22 }
 0x8ff   : > { %v8655_v60 = vpop.eup %8654  ;;  %6272 = vmatprep.subr.bf16.mxu0 %v8249_v41  ;;  %6205 = vmatprep.mubr.bf16.mxu0 %v5215_v21  ;;  %v4775_v53 = vmul.f32 0.70710677, %v11558_v26  ;;  %v4312_v4 = vadd.f32 %v11463_v34, %v12869_v39  ;;  %v11571_v37 = vadd.f32 %v11465_v42, %v12870_v20  ;;  %v11575_v16 = vmul.f32 %v4998_v36, %v4614_v23  ;;  %v8250_v41 = vld [vmem:[#allocation11 + $0x240] ss:$8 sps:$4 sm:$0xff]  }
 0x900   : > { %v8657_v8 = vpop.eup %8656  ;;  %v5127_v33 = vmul.f32 %v4999_v61, %v4615_v6  ;;  %v5006_v58 = vadd.f32 1.0, %v8655_v60  ;;  %v11579_v22 = vadd.f32 %v11470_v18, %v12869_v39  ;;  %v5119_v34 = vmul.f32 %v4991_v14, %v11519_v44 }
 0x901   : > { %v11573_v17 = vpop.f32.mrb[212].mxu1  ;;  %v8659_v48 = vpop.eup %8658  ;;  %8668 = verf.f32 %v4775_v53  ;;  %v4782_v42 = vmul.f32 0.70710677, %v4312_v4  ;;  %v11586_v19 = vadd.f32 %v11476_v55, %v12870_v20  ;;  %v11591_v6 = vmul.f32 %v4990_v56, %v11517_v45  ;;  %v8255_v55 = vld [vmem:[#allocation11 + $0x254] ss:$8 sps:$4 sm:$0xff]  }
 0x902   : > { %v11581_v12 = vpop.f32.mrb[213].mxu1  ;;  %v5014_v28 = vadd.f32 1.0, %v8659_v48  ;;  %6273 = vmatpush1.bf16.msra.mxu0 %v8247_v38  ;;  %v4638_v18 = vmul.f32 0.5, %v11531_v47  ;;  %v4783_v54 = vmul.f32 0.70710677, %v11571_v37  ;;  %v11597_v44 = vmul.f32 %v5006_v58, %v4622_v7 }
 0x903   : > { %v11588_v23 = vpop.f32.mrb[214].mxu1  ;;  %v5007_v14 = vadd.f32 1.0, %v8657_v8  ;;  %v11600_v36 = vmul.f32 0.5, %v11535_v5  ;;  %6274 = vmatprep.subr.bf16.mxu0 %v8252_v43  ;;  %v5223_v21 = vpack.c.bf16 %v5127_v33, %v5119_v34  ;;  %v4790_v56 = vmul.f32 0.70710677, %v11579_v22 }
 0x904   : > { %v11595_v10 = vpop.f32.mrb[215].mxu1  ;;  %v8661_v61 = vpop.eup %8660  ;;  %v11602_v45 = vmul.f32 %v5014_v28, %v4630_v49  ;;  %8670 = verf.f32 %v4783_v54  ;;  %v5222_v47 = vpack.c.bf16 %v11575_v16, %v11591_v6  ;;  %v4791_v7 = vmul.f32 0.70710677, %v11586_v19  ;;  %v8253_v43 = vld [vmem:[#allocation11 + $0x250] ss:$8 sps:$4 sm:$0xff]  }
 0x905   : > { %v5015_v38 = vadd.f32 1.0, %v8661_v61  ;;  %6206 = vmatmul.mubr.bf16.gmra.mrb[120].mxu0 %v5214_v24  ;;  %8672 = verf.f32 %v4782_v42  ;;  %v11610_v5 = vadd.f32 %v11496_v62, %v12869_v39  ;;  %v11614_v49 = vadd.f32 %v11499_v1, %v12870_v20  ;;  %v8258_v58 = vld [vmem:[#allocation11 + $0x264] ss:$8 sps:$4 sm:$0xff]   ;;  %v8267_v24 = vld [vmem:[#allocation11 + $0x294] ss:$8 sps:$4 sm:$0xff]  }
 0x906   : > { %v8663_v60 = vpop.eup %8662  ;;  %6275 = vmatpush1.bf16.msra.mxu0 %v8250_v41  ;;  %6215 = vmatprep.mubr.bf16.mxu0 %v5223_v21  ;;  %8674 = verf.f32 %v4790_v56  ;;  %v11618_v53 = vadd.f32 %v11504_v2, %v12869_v39  ;;  %v5135_v62 = vmul.f32 %v5007_v14, %v11560_v31  ;;  %v4646_v1 = vmul.f32 0.5, %v11544_v25  ;;  %v8256_v14 = vld [vmem:[#allocation11 + $0x260] ss:$8 sps:$4 sm:$0xff]  }
 0x907   : > { %v8665_v8 = vpop.eup %8664  ;;  %v5143_v16 = vmul.f32 %v5015_v38, %v4631_v13  ;;  %v5022_v33 = vadd.f32 1.0, %v8663_v60  ;;  %6276 = vmatprep.subr.bf16.mxu0 %v8255_v55  ;;  %8676 = verf.f32 %v4791_v7  ;;  %v4647_v41 = vmul.f32 0.5, %v11558_v26  ;;  %v12874_v56 = vld [vmem:[#allocation23_spill] sm:$0xff] }
 0x908   : > { %v8667_v34 = vpop.eup %8666  ;;  %v4798_v39 = vmul.f32 0.70710677, %v11610_v5  ;;  %v4799_v2 = vmul.f32 0.70710677, %v11614_v49  ;;  %v5023_v42 = vadd.f32 1.0, %v8665_v8  ;;  %v11629_v28 = vmul.f32 0.5, %v4312_v4 }
 0x909   : > { %v11623_v48 = vpop.f32.mrb[216].mxu1  ;;  %v5030_v6 = vadd.f32 1.0, %v8667_v34  ;;  %v5231_v31 = vpack.c.bf16 %v5143_v16, %v5135_v62  ;;  %v11633_v54 = vmul.f32 %v5022_v33, %v4638_v18  ;;  %v4806_v25 = vmul.f32 0.70710677, %v11618_v53  ;;  %v8261_v4 = vld [vmem:[#allocation11 + $0x274] ss:$8 sps:$4 sm:$0xff]  }
 0x90a   : > { %v11631_v13 = vpop.f32.mrb[217].mxu1  ;;  %6277 = vmatpush1.bf16.msra.mxu0 %v8253_v43  ;;  %8678 = verf.f32 %v4798_v39  ;;  %v4328_v26 = vadd.f32 %v11514_v59, %v12870_v20  ;;  %v3450_v38 = vsub.s32 6, %v12874_v56  ;;  %v3454_v18 = vsub.s32 7, %v12874_v56  ;;  %v8814_v20 = vld [vmem:[%s12841_s24] sm:$0xff]  ;;  %v12875_v33 = vld [vmem:[#allocation62_spill] sm:$0xff] }
 0x90b   : > { %v11638_v55 = vpop.f32.mrb[218].mxu1  ;;  %v8669_v21 = vpop.eup %8668  ;;  %v11640_v61 = vmul.f32 %v5030_v6, %v4646_v1  ;;  %6278 = vmatprep.subr.bf16.mxu0 %v8258_v58  ;;  %8680 = verf.f32 %v4799_v2  ;;  %v4655_v43 = vmul.f32 0.5, %v11571_v37  ;;  %v12876_v58 = vld [vmem:[#allocation63_spill] sm:$0xff]  ;;  %v5151_v37 = vmul.f32 %v5023_v42, %v11600_v36  ;;  %v12877_v2 = vld [vmem:[#allocation65_spill] sm:$0xff] }
 0x90c   : > { %v11644_v7 = vpop.f32.mrb[219].mxu1  ;;  %v5031_v60 = vadd.f32 1.0, %v8669_v21  ;;  %8682 = verf.f32 %v4806_v25  ;;  %v4807_v8 = vmul.f32 0.70710677, %v4328_v26  ;;  %v11650_v59 = vrot.slane %v8814_v20, %v3450_v38  ;;  %v12878_v6 = vld [vmem:[#allocation67_spill] sm:$0xff] }
 0x90d   : > { %6216 = vmatmul.mubr.bf16.gmra.mrb[124].mxu0 %v5222_v47  ;;  %v11652_v62 = vrot.slane %v8814_v20, %v3454_v18  ;;  %v8259_v47 = vld [vmem:[#allocation11 + $0x270] ss:$8 sps:$4 sm:$0xff]   ;;  %v4662_v56 = vmul.f32 0.5, %v11579_v22  ;;  %v8264_v38 = vld [vmem:[#allocation11 + $0x284] ss:$8 sps:$4 sm:$0xff]   ;;  %v11682_v25 = vmul.f32 0.5, %v11610_v5  ;;  %v12879_v15 = vpack.c.bf16 %v11602_v45, %v11597_v44 }
 0x90e   : > { %v8671_v1 = vpop.eup %8670  ;;  %v5159_v39 = vmul.f32 %v5031_v60, %v4647_v41  ;;  %6279 = vmatpush1.bf16.msra.mxu0 %v8256_v14  ;;  %6225 = vmatprep.mubr.bf16.mxu0 %v5231_v31  ;;  %8684 = verf.f32 %v4807_v8  ;;  %v4478_v18 = vadd.f32 %v11526_v40, %v11650_v59  ;;  %v11670_v36 = vadd.f32 %v11546_v32, %v11650_v59  ;;  %v8262_v22 = vld [vmem:[#allocation11 + $0x280] ss:$8 sps:$4 sm:$0xff]  }
 0x90f   : > { %v8673_v21 = vpop.eup %8672  ;;  %6280 = vmatprep.subr.bf16.mxu0 %v8261_v4  ;;  %v11666_v20 = vadd.f32 %v11537_v52, %v11652_v62  ;;  %v5039_v31 = vadd.f32 1.0, %v8671_v1  ;;  %v4663_v14 = vmul.f32 0.5, %v11586_v19  ;;  %v11677_v60 = vadd.f32 %v11552_v57, %v11652_v62 }
 0x910   : > { %v8675_v42 = vpop.eup %8674  ;;  %v5239_v4 = vpack.c.bf16 %v5159_v39, %v5151_v37  ;;  %v4690_v32 = vmul.f32 0.70710677, %v4478_v18  ;;  %v11686_v34 = vadd.f32 %v11573_v17, %v11650_v59  ;;  %v5038_v19 = vadd.f32 1.0, %v8673_v21 }
 0x911   : > { %v11672_v41 = vpop.f32.mrb[220].mxu1  ;;  %v8677_v52 = vpop.eup %8676  ;;  %v5046_v8 = vadd.f32 1.0, %v8675_v42  ;;  %v4671_v57 = vmul.f32 0.5, %v11614_v49  ;;  %v4691_v39 = vmul.f32 0.70710677, %v11666_v20  ;;  %v4678_v42 = vmul.f32 0.5, %v11618_v53 }
 0x912   : > { %v11679_v40 = vpop.f32.mrb[221].mxu1  ;;  %v5047_v37 = vadd.f32 1.0, %v8677_v52  ;;  %6281 = vmatpush1.bf16.msra.mxu0 %v8259_v47  ;;  %v4679_v5 = vmul.f32 0.5, %v4328_v26  ;;  %8686 = verf.f32 %v4690_v32  ;;  %v4698_v17 = vmul.f32 0.70710677, %v11670_v36 }
 0x913   : > { %v11688_v1 = vpop.f32.mrb[222].mxu1  ;;  %6282 = vmatprep.subr.bf16.mxu0 %v8264_v38  ;;  %v11696_v0 = vmul.f32 %v5039_v31, %v4655_v43  ;;  %8688 = verf.f32 %v4691_v39  ;;  %v4699_v47 = vmul.f32 0.70710677, %v11677_v60  ;;  %v11699_v52 = vmul.f32 %v5046_v8, %v4662_v56  ;;  %v8265_v31 = vld [vmem:[#allocation11 + $0x290] ss:$8 sps:$4 sm:$0xff]  }
 0x914   : > { %v11692_v16 = vpop.f32.mrb[223].mxu1  ;;  %v8679_v9 = vpop.eup %8678  ;;  %v5175_v21 = vmul.f32 %v5047_v37, %v4663_v14  ;;  %8690 = verf.f32 %v4698_v17  ;;  %v4706_v53 = vmul.f32 0.70710677, %v11686_v34  ;;  %v11707_v26 = vadd.f32 %v11581_v12, %v11652_v62  ;;  %v8270_v12 = vld [vmem:[#allocation11 + $0x2a4] ss:$8 sps:$4 sm:$0xff]  }
 0x915   : > { %v8681_v49 = vpop.eup %8680  ;;  %6226 = vmatmul.mubr.bf16.gmra.mrb[128].mxu0 %v12879_v15  ;;  %v11710_v38 = vmul.f32 %v5038_v19, %v11629_v28  ;;  %8692 = verf.f32 %v4699_v47  ;;  %v11715_v15 = vadd.f32 %v11588_v23, %v11650_v59  ;;  %v11717_v14 = vmul.f32 0.5, %v4478_v18 }
 0x916   : > { %v8683_v43 = vpop.eup %8682  ;;  %6283 = vmatpush1.bf16.msra.mxu0 %v8262_v22  ;;  %6235 = vmatprep.mubr.bf16.mxu0 %v5239_v4  ;;  %v5247_v56 = vpack.c.bf16 %v5175_v21, %v11696_v0  ;;  %v5055_v44 = vadd.f32 1.0, %v8681_v49  ;;  %8694 = verf.f32 %v4706_v53  ;;  %v11723_v22 = vmul.f32 %v11478_v35, %v11418_v63  ;;  %v8268_v63 = vld [vmem:[#allocation11 + $0x2a0] ss:$8 sps:$4 sm:$0xff]   ;;  %v8273_v49 = vld [vmem:[#allocation11 + $0x2b4] ss:$8 sps:$4 sm:$0xff]  }
 0x917   : > { %v5062_v45 = vadd.f32 1.0, %v8683_v43  ;;  %6284 = vmatprep.subr.bf16.mxu0 %v8267_v24  ;;  %v5054_v4 = vadd.f32 1.0, %v8679_v9  ;;  %v4707_v0 = vmul.f32 0.70710677, %v11707_v26  ;;  %v4714_v23 = vmul.f32 0.70710677, %v11715_v15 }
 0x918   : > { %v8685_v28 = vpop.eup %8684  ;;  %v5246_v18 = vpack.c.bf16 %v11699_v52, %v11710_v38  ;;  %v4494_v37 = vadd.f32 %v11595_v10, %v11652_v62  ;;  %v4498_v9 = vadd.f32 %v11623_v48, %v11650_v59  ;;  %v4500_v35 = vadd.f32 %v11631_v13, %v11652_v62  ;;  %v8282_v38 = vld [vmem:[#allocation11 + $0x2e4] ss:$8 sps:$4 sm:$0xff]  }
 0x919   : > { %v11719_v8 = vpop.f32.mrb[224].mxu1  ;;  %v11729_v19 = vmul.f32 %v5062_v45, %v4678_v42  ;;  %v5063_v24 = vadd.f32 1.0, %v8685_v28  ;;  %8696 = verf.f32 %v4707_v0  ;;  %v11743_v42 = vadd.f32 %v11638_v55, %v11650_v59  ;;  %v8276_v28 = vld [vmem:[#allocation11 + $0x2c4] ss:$8 sps:$4 sm:$0xff]  }
 0x91a   : > { %v11727_v32 = vpop.f32.mrb[225].mxu1  ;;  %6285 = vmatpush1.bf16.msra.mxu0 %v8265_v31  ;;  %v11747_v21 = vmul.f32 %v5055_v44, %v4671_v57  ;;  %v11752_v47 = vmul.f32 0.5, %v11666_v20  ;;  %v4715_v53 = vmul.f32 0.70710677, %v4494_v37  ;;  %v11755_v48 = vmul.f32 %v5054_v4, %v11682_v25  ;;  %v8271_v25 = vld [vmem:[#allocation11 + $0x2b0] ss:$8 sps:$4 sm:$0xff]  }
 0x91b   : > { %v11735_v39 = vpop.f32.mrb[226].mxu1  ;;  %v11749_v10 = vmul.f32 %v5063_v24, %v4679_v5  ;;  %6286 = vmatprep.subr.bf16.mxu0 %v8270_v12  ;;  %8698 = verf.f32 %v4714_v23  ;;  %v4722_v13 = vmul.f32 0.70710677, %v4498_v9  ;;  %v4723_v43 = vmul.f32 0.70710677, %v4500_v35 }
 0x91c   : > { %v11745_v17 = vpop.f32.mrb[227].mxu1  ;;  %v8687_v55 = vpop.eup %8686  ;;  %v4570_v31 = vmul.f32 0.5, %v11670_v36  ;;  %v12880_v57 = vpack.c.bf16 %v11640_v61, %v11633_v54  ;;  %8700 = verf.f32 %v4715_v53  ;;  %v4730_v5 = vmul.f32 0.70710677, %v11743_v42 }
 0x91d   : > { %v5255_v20 = vpack.c.bf16 %v11749_v10, %v11747_v21  ;;  %v8689_v44 = vpop.eup %8688  ;;  %v4946_v45 = vadd.f32 1.0, %v8687_v55  ;;  %8702 = verf.f32 %v4722_v13  ;;  %v4504_v36 = vadd.f32 %v11644_v7, %v11652_v62 }
 0x91e   : > { %6236 = vmatmul.mubr.bf16.gmra.mrb[132].mxu0 %v12880_v57  ;;  %v8691_v54 = vpop.eup %8690  ;;  %v4571_v61 = vmul.f32 0.5, %v11677_v60  ;;  %8704 = verf.f32 %v4723_v43  ;;  %v4508_v4 = vadd.f32 %v11672_v41, %v11650_v59  ;;  %v4510_v0 = vadd.f32 %v11679_v40, %v11652_v62 }
 0x91f   : > { %6287 = vmatpush1.bf16.msra.mxu0 %v8268_v63  ;;  %6245 = vmatprep.mubr.bf16.mxu0 %v5247_v56  ;;  %v8693_v23 = vpop.eup %8692  ;;  %v4954_v24 = vadd.f32 1.0, %v8691_v54  ;;  %v4578_v63 = vmul.f32 0.5, %v11686_v34  ;;  %v4579_v7 = vmul.f32 0.5, %v11707_v26  ;;  %8706 = verf.f32 %v4730_v5  ;;  %v8274_v26 = vld [vmem:[#allocation11 + $0x2c0] ss:$8 sps:$4 sm:$0xff]  }
 0x920   : > { %6288 = vmatprep.subr.bf16.mxu0 %v8273_v49  ;;  %v8695_v60 = vpop.eup %8694  ;;  %v11780_v10 = vmul.f32 0.5, %v11715_v15  ;;  %v11782_v49 = vmul.f32 0.5, %v4494_v37  ;;  %v11784_v41 = vmul.f32 0.5, %v4498_v9  ;;  %v4731_v40 = vmul.f32 0.70710677, %v4504_v36 }
 0x921   : > { %v11773_v56 = vpop.f32.mrb[228].mxu1  ;;  %v11789_v13 = vmul.f32 %v4946_v45, %v11717_v14  ;;  %v11791_v34 = vmul.f32 %v4954_v24, %v4570_v31  ;;  %v11793_v43 = vmul.f32 0.5, %v4500_v35  ;;  %v4738_v55 = vmul.f32 0.70710677, %v4508_v4  ;;  %v8279_v9 = vld [vmem:[#allocation11 + $0x2d4] ss:$8 sps:$4 sm:$0xff]  }
 0x922   : > { %v11777_v21 = vpop.f32.mrb[229].mxu1  ;;  %v4947_v15 = vadd.f32 1.0, %v8689_v44  ;;  %v4955_v37 = vadd.f32 1.0, %v8693_v23  ;;  %v4739_v5 = vmul.f32 0.70710677, %v4510_v0  ;;  %v4512_v54 = vadd.f32 %v11688_v1, %v11650_v59 }
 0x923   : > { %v11786_v53 = vpop.f32.mrb[230].mxu1  ;;  %12881 = vst [vmem:[#allocation23_spill] sm:$0xff] %v11789_v13  ;;  %12882 = vst [vmem:[#allocation62_spill] sm:$0xff] %v11791_v34  ;;  %6289 = vmatpush1.bf16.msra.mxu0 %v8271_v25  ;;  %v8697_v12 = vpop.eup %8696  ;;  %v4962_v31 = vadd.f32 1.0, %v8695_v60  ;;  %8708 = verf.f32 %v4731_v40  ;;  %v4514_v35 = vadd.f32 %v11692_v16, %v11652_v62  ;;  %v11807_v44 = vmul.f32 0.5, %v11743_v42 }
 0x924   : > { %v11795_v57 = vpop.f32.mrb[231].mxu1  ;;  %6290 = vmatprep.subr.bf16.mxu0 %v8276_v28  ;;  %v11809_v45 = vmul.f32 0.5, %v4504_v36  ;;  %8710 = verf.f32 %v4738_v55  ;;  %v4746_v1 = vmul.f32 0.70710677, %v4512_v54  ;;  %v4963_v28 = vadd.f32 1.0, %v8697_v12 }
 0x925   : > { %v8699_v25 = vpop.eup %8698  ;;  %v8277_v23 = vld [vmem:[#allocation11 + $0x2d0] ss:$8 sps:$4 sm:$0xff]   ;;  %8712 = verf.f32 %v4739_v5  ;;  %v4747_v24 = vmul.f32 0.70710677, %v4514_v35  ;;  %v4518_v16 = vadd.f32 %v11719_v8, %v11650_v59  ;;  %v11814_v52 = vmul.f32 %v4947_v15, %v11752_v47  ;;  %v8285_v14 = vld [vmem:[#allocation11 + $0x2f4] ss:$8 sps:$4 sm:$0xff]  }
 0x926   : > { %6246 = vmatmul.mubr.bf16.gmra.mrb[136].mxu0 %v5246_v18  ;;  %v8701_v60 = vpop.eup %8700  ;;  %8714 = verf.f32 %v4746_v1  ;;  %v4520_v18 = vadd.f32 %v11727_v32, %v11652_v62  ;;  %v4522_v42 = vadd.f32 %v11735_v39, %v11650_v59  ;;  %v11822_v36 = vmul.f32 %v4955_v37, %v4571_v61  ;;  %v8280_v61 = vld [vmem:[#allocation11 + $0x2e0] ss:$8 sps:$4 sm:$0xff]  }
 0x927   : > { %6291 = vmatpush1.bf16.msra.mxu0 %v8274_v26  ;;  %6255 = vmatprep.mubr.bf16.mxu0 %v5255_v20  ;;  %v8703_v20 = vpop.eup %8702  ;;  %v11824_v40 = vmul.f32 %v4962_v31, %v4578_v63  ;;  %v11826_v8 = vmul.f32 0.5, %v4508_v4  ;;  %v11828_v47 = vmul.f32 0.5, %v4510_v0  ;;  %v4970_v15 = vadd.f32 1.0, %v8699_v25  ;;  %v12885_v25 = vld [vmem:[#allocation64_spill] sm:$0xff] }
 0x928   : > { %6292 = vmatprep.subr.bf16.mxu0 %v8279_v9  ;;  %v8705_v55 = vpop.eup %8704  ;;  %v11832_v9 = vmul.f32 0.5, %v4512_v54  ;;  %v4754_v32 = vmul.f32 0.70710677, %v4518_v16  ;;  %v4755_v5 = vmul.f32 0.70710677, %v4520_v18  ;;  %v11834_v1 = vmul.f32 %v4963_v28, %v4579_v7  ;;  %v12886_v54 = vld [vmem:[#allocation66_spill] sm:$0xff] }
 0x929   : > { %v11820_v12 = vpop.f32.mrb[232].mxu1  ;;  %12883 = vst [vmem:[#allocation63_spill] sm:$0xff] %v11824_v40  ;;  %v8707_v39 = vpop.eup %8706  ;;  %v11836_v37 = vmul.f32 0.5, %v4514_v35  ;;  %8716 = verf.f32 %v4747_v24  ;;  %v4762_v4 = vmul.f32 0.70710677, %v4522_v42  ;;  %v4971_v0 = vadd.f32 1.0, %v8701_v60 }
 0x92a   : > { %v11830_v26 = vpop.f32.mrb[233].mxu1  ;;  %12884 = vst [vmem:[#allocation65_spill] sm:$0xff] %v11834_v1  ;;  %v4978_v31 = vadd.f32 1.0, %v8703_v20  ;;  %8718 = verf.f32 %v4754_v32  ;;  %v4979_v40 = vadd.f32 1.0, %v8705_v55  ;;  %v4524_v7 = vadd.f32 %v11745_v17, %v11652_v62  ;;  %v12887_v35 = vld [vmem:[#allocation69_spill] sm:$0xff]  ;;  %v12888_v28 = vld [vmem:[#allocation71_spill] sm:$0xff] }
 0x92b   : > { %6293 = vmatpush1.bf16.msra.mxu0 %v8277_v23  ;;  %v4541_v63 = vpop.f32.mrb[234].mxu1  ;;  %8720 = verf.f32 %v4755_v5  ;;  %v4986_v24 = vadd.f32 1.0, %v8707_v39  ;;  %v12889_v60 = vpack.c.bf16 %v11729_v19, %v11755_v48  ;;  %v4528_v20 = vadd.f32 %v11773_v56, %v11650_v59  ;;  %v8288_v39 = vld [vmem:[#allocation11 + $0x304] ss:$8 sps:$4 sm:$0xff]   ;;  %v8286_v13 = vld [vmem:[#allocation11 + $0x300] ss:$8 sps:$4 sm:$0xff]  }
 0x92c   : > { %6294 = vmatprep.subr.bf16.mxu0 %v8282_v38  ;;  %v11840_v34 = vpop.f32.mrb[235].mxu1  ;;  %v8283_v38 = vld [vmem:[#allocation11 + $0x2f0] ss:$8 sps:$4 sm:$0xff]   ;;  %8722 = verf.f32 %v4762_v4  ;;  %v4530_v55 = vadd.f32 %v11777_v21, %v11652_v62  ;;  %v11854_v5 = vmul.f32 %v4970_v15, %v11780_v10  ;;  %v12891_v17 = vpack.c.bf16 %v12876_v58, %v12875_v33 }
 0x92d   : > { %v8709_v32 = vpop.eup %8708  ;;  %v11859_v19 = vmul.f32 0.5, %v4518_v16  ;;  %v4763_v48 = vmul.f32 0.70710677, %v4524_v7  ;;  %v4532_v4 = vadd.f32 %v11786_v53, %v11650_v59  ;;  %v11866_v21 = vmul.f32 0.5, %v4520_v18 }
 0x92e   : > { %6256 = vmatmul.mubr.bf16.gmra.mrb[140].mxu0 %v12889_v60  ;;  %12890 = vst [vmem:[#allocation67_spill] sm:$0xff] %v11854_v5  ;;  %v8711_v56 = vpop.eup %8710  ;;  %v11864_v60 = vmul.f32 %v4971_v0, %v11782_v49  ;;  %v11868_v10 = vmul.f32 0.5, %v4522_v42  ;;  %v4770_v15 = vmul.f32 0.70710677, %v4528_v20  ;;  %v11873_v58 = vmul.f32 %v4978_v31, %v11784_v41 }
 0x92f   : > { %6295 = vmatpush1.bf16.msra.mxu0 %v8280_v61  ;;  %6298 = vmatprep.mubr.bf16.mxu0 %v12891_v17  ;;  %v8713_v33 = vpop.eup %8712  ;;  %v11876_v16 = vmul.f32 %v4979_v40, %v11793_v43  ;;  %8724 = verf.f32 %v4763_v48  ;;  %v4771_v53 = vmul.f32 0.70710677, %v4530_v55  ;;  %v4987_v18 = vadd.f32 1.0, %v8709_v32  ;;  %v12898_v40 = vld [vmem:[#allocation61_spill] sm:$0xff] }
 0x930   : > { %6296 = vmatprep.subr.bf16.mxu0 %v8285_v14  ;;  %12892 = vst [vmem:[#allocation64_spill] sm:$0xff] %v11873_v58  ;;  %v8715_v49 = vpop.eup %8714  ;;  %v11879_v14 = vmul.f32 %v4986_v24, %v11807_v44  ;;  %8726 = verf.f32 %v4770_v15  ;;  %v4778_v42 = vmul.f32 0.70710677, %v4532_v4  ;;  %v4994_v23 = vadd.f32 1.0, %v8711_v56  ;;  %v8291_v58 = vld [vmem:[#allocation11 + $0x314] ss:$8 sps:$4 sm:$0xff]  }
 0x931   : > { %v11870_v61 = vpop.f32.mrb[236].mxu1  ;;  %v11881_v5 = vmul.f32 0.5, %v4524_v7  ;;  %8728 = verf.f32 %v4771_v53  ;;  %v4995_v48 = vadd.f32 1.0, %v8713_v33  ;;  %v4534_v44 = vadd.f32 %v11795_v57, %v11652_v62  ;;  %v12902_v24 = vld [vmem:[#allocation75_spill] sm:$0xff] }
 0x932   : > { %v4549_v17 = vpop.f32.mrb[237].mxu1  ;;  %12893 = vst [vmem:[#allocation66_spill] sm:$0xff] %v11879_v14  ;;  %8730 = verf.f32 %v4778_v42  ;;  %v5002_v15 = vadd.f32 1.0, %v8715_v49  ;;  %v4538_v7 = vadd.f32 %v11820_v12, %v11650_v59  ;;  %v11895_v53 = vadd.f32 %v11830_v26, %v11652_v62  ;;  %v12899_v42 = vld [vmem:[#allocation60_spill] sm:$0xff] }
 0x933   : > { %v4551_v0 = vpop.f32.mrb[238].mxu1  ;;  %6297 = vmatpush1.bf16.msra.mxu0 %v8283_v38  ;;  %v8717_v56 = vpop.eup %8716  ;;  %v4542_v33 = vadd.f32 %v4541_v63, %v11650_v59  ;;  %v12900_v14 = vpack.c.bf16 %v12898_v40, %v12899_v42  ;;  %v11901_v57 = vmul.f32 0.5, %v4528_v20  ;;  %v11903_v41 = vmul.f32 0.5, %v4530_v55  ;;  %v12901_v49 = vld [vmem:[#allocation72_spill] sm:$0xff]  ;;  %v8289_v20 = vld [vmem:[#allocation11 + $0x310] ss:$8 sps:$4 sm:$0xff]  }
 0x934   : > { %v11885_v31 = vpop.f32.mrb[239].mxu1  ;;  %6379 = vmatprep.subr.bf16.mxu0 %v8288_v39  ;;  %v8719_v39 = vpop.eup %8718  ;;  %v4779_v38 = vmul.f32 0.70710677, %v4534_v44  ;;  %v11908_v43 = vmul.f32 %v4987_v18, %v11809_v45  ;;  %v11911_v26 = vmul.f32 %v4994_v23, %v11826_v8  ;;  %v12903_v63 = vpack.c.bf16 %v12878_v6, %v12877_v2  ;;  %v8294_v45 = vld [vmem:[#allocation11 + $0x324] ss:$8 sps:$4 sm:$0xff]  }
 0x935   : > { %v8721_v12 = vpop.eup %8720  ;;  %v4786_v55 = vmul.f32 0.70710677, %v4538_v7  ;;  %v11919_v42 = vmul.f32 %v4995_v48, %v11828_v47  ;;  %v5003_v32 = vadd.f32 1.0, %v8717_v56  ;;  %v4787_v8 = vmul.f32 0.70710677, %v11895_v53  ;;  %v12904_v47 = vld [vmem:[#allocation78_spill] sm:$0xff] }
 0x936   : > { %6299 = vmatmul.mubr.bf16.vlgmr.msra.gmra.mrb[112].mxu0 %v12900_v14  ;;  %v11916_v14 = vmul.f32 0.5, %v4532_v4  ;;  %v8723_v40 = vpop.eup %8722  ;;  %8732 = verf.f32 %v4779_v38  ;;  %v11923_v23 = vmul.f32 %v5002_v15, %v11832_v9  ;;  %v5010_v2 = vadd.f32 1.0, %v8719_v39  ;;  %v8292_v38 = vld [vmem:[#allocation11 + $0x320] ss:$8 sps:$4 sm:$0xff]  }
 0x937   : > { %6308 = vmatprep.mubr.bf16.mxu0 %v12903_v63  ;;  %6380 = vmatpush1.bf16.msra.mxu0 %v8286_v13  ;;  %8734 = verf.f32 %v4786_v55  ;;  %v4794_v6 = vmul.f32 0.70710677, %v4542_v33  ;;  %v5011_v13 = vadd.f32 1.0, %v8721_v12  ;;  %v11927_v4 = vadd.f32 %v11840_v34, %v11652_v62  ;;  %v8297_v12 = vld [vmem:[#allocation11 + $0x334] ss:$8 sps:$4 sm:$0xff]   ;;  %v12918_v1 = vld [vmem:[#allocation64_spill] sm:$0xff] }
 0x938   : > { %6381 = vmatprep.subr.bf16.mxu0 %v8291_v58  ;;  %8736 = verf.f32 %v4787_v8  ;;  %v5018_v48 = vadd.f32 1.0, %v8723_v40  ;;  %v11933_v9 = vadd.f32 %v11870_v61, %v11650_v59  ;;  %v11936_v56 = vadd.f32 %v4549_v17, %v11652_v62 }
 0x939   : > { %v8725_v58 = vpop.eup %8724  ;;  %8738 = verf.f32 %v4794_v6  ;;  %v11939_v39 = vmul.f32 %v5003_v32, %v11836_v37  ;;  %v4795_v63 = vmul.f32 0.70710677, %v11927_v4  ;;  %v4651_v40 = vmul.f32 0.5, %v4534_v44 }
 0x93a   : > { %v8727_v15 = vpop.eup %8726  ;;  %v5019_v34 = vadd.f32 1.0, %v8725_v58  ;;  %v4658_v8 = vmul.f32 0.5, %v4538_v7  ;;  %v11945_v61 = vmul.f32 0.5, %v4542_v33  ;;  %v4802_v17 = vmul.f32 0.70710677, %v11933_v9  ;;  %v12909_v58 = vld [vmem:[#allocation80_spill] sm:$0xff] }
 0x93b   : > { %6382 = vmatpush1.bf16.msra.mxu0 %v8289_v20  ;;  %v11943_v20 = vadd.f32 %v4551_v0, %v11650_v59  ;;  %v8729_v55 = vpop.eup %8728  ;;  %v11949_v18 = vmul.f32 %v5010_v2, %v11859_v19  ;;  %v11952_v37 = vmul.f32 %v5011_v13, %v11866_v21  ;;  %v12905_v32 = vpack.c.bf16 %v12886_v54, %v12885_v25  ;;  %v8295_v19 = vld [vmem:[#allocation11 + $0x330] ss:$8 sps:$4 sm:$0xff]   ;;  %v8300_v54 = vld [vmem:[#allocation11 + $0x344] ss:$8 sps:$4 sm:$0xff]  }
 0x93c   : > { %6383 = vmatprep.subr.bf16.mxu0 %v8294_v45  ;;  %v8731_v6 = vpop.eup %8730  ;;  %8740 = verf.f32 %v4795_v63  ;;  %v4803_v59 = vmul.f32 0.70710677, %v11936_v56  ;;  %v11959_v0 = vmul.f32 %v5018_v48, %v11868_v10  ;;  %v12906_v44 = vpack.c.bf16 %v12888_v28, %v12887_v35  ;;  %v12907_v2 = vld [vmem:[#allocation77_spill] sm:$0xff]  ;;  %v12908_v10 = vld [vmem:[#allocation79_spill] sm:$0xff] }
 0x93d   : > { %v5026_v7 = vadd.f32 1.0, %v8727_v15  ;;  %v5034_v33 = vadd.f32 1.0, %v8731_v6  ;;  %8742 = verf.f32 %v4802_v17  ;;  %v11965_v21 = vmul.f32 %v5019_v34, %v11881_v5  ;;  %v12910_v34 = vld [vmem:[#allocation58_spill] sm:$0xff]  ;;  %v12911_v6 = vld [vmem:[#allocation73_spill] sm:$0xff] }
 0x93e   : > { %6309 = vmatmul.mubr.bf16.gmra.mrb[116].mxu0 %v12905_v32  ;;  %v5027_v25 = vadd.f32 1.0, %v8729_v55  ;;  %v4810_v45 = vmul.f32 0.70710677, %v11943_v20  ;;  %8744 = verf.f32 %v4803_v59  ;;  %v11972_v35 = vadd.f32 %v11885_v31, %v11652_v62  ;;  %v8298_v31 = vld [vmem:[#allocation11 + $0x340] ss:$8 sps:$4 sm:$0xff]   ;;  %v12915_v15 = vld [vmem:[#allocation70_spill] sm:$0xff] }
 0x93f   : > { %6318 = vmatprep.mubr.bf16.mxu0 %v12906_v44  ;;  %6384 = vmatpush1.bf16.msra.mxu0 %v8292_v38  ;;  %v11985_v62 = vmul.f32 %v5034_v33, %v11916_v14  ;;  %v12912_v32 = vld [vmem:[#allocation59_spill] sm:$0xff]  ;;  %v12916_v59 = vld [vmem:[#allocation68_spill] sm:$0xff]  ;;  %v12919_v33 = vld [vmem:[#allocation66_spill] sm:$0xff] }
 0x940   : > { %6385 = vmatprep.subr.bf16.mxu0 %v8297_v12  ;;  %v8733_v48 = vpop.eup %8732  ;;  %8746 = verf.f32 %v4810_v45  ;;  %v4811_v17 = vmul.f32 0.70710677, %v11972_v35  ;;  %v8303_v45 = vld [vmem:[#allocation11 + $0x354] ss:$8 sps:$4 sm:$0xff]   ;;  %v12914_v14 = vld [vmem:[#allocation67_spill] sm:$0xff]  ;;  %v12917_v13 = vpack.c.bf16 %v12915_v15, %v12916_v59  ;;  %v5218_v12 = vpack.c.bf16 %v12919_v33, %v12918_v1 }
 0x941   : > { %v8735_v63 = vpop.eup %8734  ;;  %v5035_v55 = vadd.f32 1.0, %v8733_v48  ;;  %v11997_v48 = vmul.f32 %v5026_v7, %v11901_v57  ;;  %v12921_v7 = vld [vmem:[#allocation74_spill] sm:$0xff]  ;;  %v8306_v59 = vld [vmem:[#allocation11 + $0x364] ss:$8 sps:$4 sm:$0xff]   ;;  %v4674_v57 = vmul.f32 0.5, %v11933_v9 }
 0x942   : > { %v8737_v44 = vpop.eup %8736  ;;  %v5042_v38 = vadd.f32 1.0, %v8735_v63  ;;  %8748 = verf.f32 %v4811_v17  ;;  %v12004_v63 = vmul.f32 %v5027_v25, %v11903_v41  ;;  %v8301_v17 = vld [vmem:[#allocation11 + $0x350] ss:$8 sps:$4 sm:$0xff]  }
 0x943   : > { %6386 = vmatpush1.bf16.msra.mxu0 %v8295_v19  ;;  %v8739_v5 = vpop.eup %8738  ;;  %v11999_v28 = vmul.f32 %v5035_v55, %v4651_v40  ;;  %v12920_v40 = vld [vmem:[#allocation76_spill] sm:$0xff]  ;;  %v5043_v41 = vadd.f32 1.0, %v8737_v44  ;;  %v4659_v44 = vmul.f32 0.5, %v11895_v53  ;;  %v4682_v53 = vmul.f32 0.5, %v11943_v20 }
 0x944   : > { %6387 = vmatprep.subr.bf16.mxu0 %v8300_v54  ;;  %v5050_v19 = vadd.f32 1.0, %v8739_v5  ;;  %v12922_v55 = vpack.c.bf16 %v12920_v40, %v12921_v7  ;;  %v12016_v54 = vmul.f32 %v5042_v38, %v4658_v8  ;;  %v4667_v7 = vmul.f32 0.5, %v11927_v4  ;;  %v8304_v40 = vld [vmem:[#allocation11 + $0x360] ss:$8 sps:$4 sm:$0xff]   ;;  %v8309_v38 = vld [vmem:[#allocation11 + $0x374] ss:$8 sps:$4 sm:$0xff]  }
 0x945   : > { %v4675_v20 = vmul.f32 0.5, %v11936_v56  ;;  %v12926_v56 = vpack.c.bf16 %v11352_v3, %v11320_v27  ;;  %v8324_v27 = vld [vmem:[#allocation11 + $0x3c4] ss:$8 sps:$4 sm:$0xff]   ;;  %v8322_v3 = vld [vmem:[#allocation11 + $0x3c0] ss:$8 sps:$4 sm:$0xff]   ;;  %v12945_v1 = vpack.c.bf16 %v11999_v28, %v12004_v63 }
 0x946   : > { %6319 = vmatmul.mubr.bf16.gmra.mrb[120].mxu0 %v12917_v13  ;;  %v8741_v5 = vpop.eup %8740  ;;  %v12023_v15 = vmul.f32 %v5050_v19, %v11945_v61  ;;  %v12035_v19 = vmul.f32 %v5043_v41, %v4659_v44 }
 0x947   : > { %6328 = vmatprep.mubr.bf16.mxu0 %v12922_v55  ;;  %6388 = vmatpush1.bf16.msra.mxu0 %v8298_v31  ;;  %v8743_v31 = vpop.eup %8742  ;;  %v5051_v55 = vadd.f32 1.0, %v8741_v5 }
 0x948   : > { %6389 = vmatprep.subr.bf16.mxu0 %v8303_v45  ;;  %v5250_v61 = vpack.c.bf16 %v12023_v15, %v12016_v54  ;;  %v8745_v45 = vpop.eup %8744  ;;  %v5058_v8 = vadd.f32 1.0, %v8743_v31  ;;  %v12924_v31 = vpack.c.bf16 %v11292_v51, %v12904_v47  ;;  %v8310_v51 = vld [vmem:[#allocation11 + $0x380] ss:$8 sps:$4 sm:$0xff]   ;;  %v8315_v47 = vld [vmem:[#allocation11 + $0x394] ss:$8 sps:$4 sm:$0xff]  }
 0x949   : > { %v12037_v13 = vmul.f32 %v5051_v55, %v4667_v7  ;;  %v5059_v41 = vadd.f32 1.0, %v8745_v45  ;;  %v4683_v55 = vmul.f32 0.5, %v11972_v35  ;;  %v8313_v35 = vld [vmem:[#allocation11 + $0x390] ss:$8 sps:$4 sm:$0xff]  }
 0x94a   : > { %v8747_v25 = vpop.eup %8746  ;;  %v12049_v7 = vmul.f32 %v5058_v8, %v4674_v57  ;;  %v8318_v8 = vld [vmem:[#allocation11 + $0x3a4] ss:$8 sps:$4 sm:$0xff]   ;;  %v12951_v54 = vld [vmem:[#allocation26_spill] sm:$0xff]  ;;  %v12952_v15 = vld [vmem:[#allocation29_spill] sm:$0xff] }
 0x94b   : > { %6390 = vmatpush1.bf16.msra.mxu0 %v8301_v17  ;;  %v5066_v4 = vadd.f32 1.0, %v8747_v25  ;;  %v5251_v5 = vpack.c.bf16 %v12037_v13, %v12035_v19  ;;  %v12923_v17 = vpack.c.bf16 %v12902_v24, %v12901_v49  ;;  %v8312_v25 = vld [vmem:[#allocation11 + $0x384] ss:$8 sps:$4 sm:$0xff]   ;;  %v5187_v45 = vmul.f32 %v5059_v41, %v4675_v20  ;;  %v8327_v41 = vld [vmem:[#allocation11 + $0x3d4] ss:$8 sps:$4 sm:$0xff]  }
 0x94c   : > { %6391 = vmatprep.subr.bf16.mxu0 %v8306_v59  ;;  %v8749_v44 = vpop.eup %8748  ;;  %v8307_v59 = vld [vmem:[#allocation11 + $0x370] ss:$8 sps:$4 sm:$0xff]   ;;  %v12953_v19 = vld [vmem:[#allocation27_spill] sm:$0xff] }
 0x94d   : > { %v12051_v9 = vmul.f32 %v5066_v4, %v4682_v53  ;;  %v5067_v24 = vadd.f32 1.0, %v8749_v44  ;;  %v8321_v53 = vld [vmem:[#allocation11 + $0x3b4] ss:$8 sps:$4 sm:$0xff]   ;;  %v12927_v4 = vpack.c.bf16 %v11344_v29, %v12909_v58  ;;  %v12929_v44 = vpack.c.bf16 %v11416_v50, %v11372_v30  ;;  %v8325_v58 = vld [vmem:[#allocation11 + $0x3d0] ss:$8 sps:$4 sm:$0xff]  }
 0x94e   : > { %6329 = vmatmul.mubr.bf16.gmra.mrb[124].mxu0 %v12923_v17  ;;  %v12930_v29 = vpack.c.bf16 %v11723_v22, %v12910_v34  ;;  %v12932_v30 = vpack.c.bf16 %v11822_v36, %v11814_v52  ;;  %v8331_v50 = vld [vmem:[#allocation11 + $0x3f0] ss:$8 sps:$4 sm:$0xff]   ;;  %v12934_v34 = vld [vmem:[#allocation23_spill] sm:$0xff]  ;;  %v12941_v52 = vpack.c.bf16 %v11939_v39, %v11919_v42  ;;  %v12942_v36 = vpack.c.bf16 %v11923_v23, %v11911_v26  ;;  %v12948_v42 = vld [vmem:[#allocation24_spill] sm:$0xff] }
 0x94f   : > { %6338 = vmatprep.mubr.bf16.mxu0 %v12924_v31  ;;  %6392 = vmatpush1.bf16.msra.mxu0 %v8304_v40  ;;  %v5258_v49 = vpack.c.bf16 %v12051_v9, %v12049_v7  ;;  %v5195_v17 = vmul.f32 %v5067_v24, %v4683_v55  ;;  %v12925_v40 = vpack.c.bf16 %v12908_v10, %v12907_v2  ;;  %v8319_v10 = vld [vmem:[#allocation11 + $0x3b0] ss:$8 sps:$4 sm:$0xff]   ;;  %v8333_v31 = vld [vmem:[#allocation11 + $0x3f4] ss:$8 sps:$4 sm:$0xff]   ;;  %v5388_v26 = vld [vmem:[%s12947_s21] sm:$0x3] }
 0x950   : > { %6393 = vmatprep.subr.bf16.mxu0 %v8309_v38  ;;  %v8316_v38 = vld [vmem:[#allocation11 + $0x3a0] ss:$8 sps:$4 sm:$0xff]   ;;  %v12928_v2 = vpack.c.bf16 %v11430_v11, %v11395_v46  ;;  %v8330_v46 = vld [vmem:[#allocation11 + $0x3e4] ss:$8 sps:$4 sm:$0xff]   ;;  %v12933_v22 = vld [vmem:[#allocation62_spill] sm:$0xff]  ;;  %v12124_v23 = vrot.slane %v5388_v26, %v12948_v42  ;;  %s9102_s21 = smov [#allocation13]  }
 0x951   : > { %v5259_v57 = vpack.c.bf16 %v5195_v17, %v5187_v45  ;;  %v8328_v11 = vld [vmem:[#allocation11 + $0x3e0] ss:$8 sps:$4 sm:$0xff]   ;;  %v12935_v7 = vpack.c.bf16 %v12933_v22, %v12934_v34  ;;  %v12936_v9 = vld [vmem:[#allocation65_spill] sm:$0xff]  ;;  %v12959_v22 = vld [vmem:[#allocation34_spill] sm:$0xff]  ;;  %s8991_s14 = sshll.u32 %s9102_s21, 4  ;;  %s8992_s14 = int_to_ptr.vmem [resolvable:$false] %s8991_s14 }
 0x952   : > { %v12937_v20 = vpack.c.bf16 %v11864_v60, %v12936_v9  ;;  %v12943_v60 = vpack.c.bf16 %v11965_v21, %v11952_v37  ;;  %v12960_v9 = vld [vmem:[#allocation37_spill] sm:$0xff]  ;;  %s8993_s26 = scalar_lea.vmem %s8992_s14, 8192  ;;  %p8994_p3 = scmp.lt.s32.totalorder %s12599_s29, %s8992_s14 }
 0x953   : > { %6394 = vmatpush1.bf16.msra.mxu0 %v8307_v59  ;;  %v12931_v59 = vpack.c.bf16 %v12912_v32, %v12911_v6  ;;  %v12940_v32 = vpack.c.bf16 %v11908_v43, %v11876_v16  ;;  %v12944_v16 = vpack.c.bf16 %v11959_v0, %v11949_v18  ;;  %v12946_v43 = vpack.c.bf16 %v11985_v62, %v11997_v48  ;;  %v12949_v18 = vld [vmem:[#allocation25_spill] sm:$0xff]  ;;  %v12950_v62 = vld [vmem:[#allocation28_spill] sm:$0xff]  ;;  %p8995_p11 = scmp.lt.s32.totalorder %s8993_s26, %s8987_s19 }
 0x954   : > { %6395 = vmatprep.subr.bf16.mxu0 %v8312_v25  ;;  %v12938_v25 = vld [vmem:[#allocation63_spill] sm:$0xff]  ;;  %v12127_v39 = vrot.slane %v5388_v26, %v12949_v18  ;;  %v12962_v26 = vld [vmem:[#allocation40_spill] sm:$0xff] }
 0x955   : > { %v12939_v6 = vpack.c.bf16 %v12914_v14, %v12938_v25  ;;  %v12961_v25 = vld [vmem:[#allocation35_spill] sm:$0xff]  ;;  %p8996_p12 = por %p8995_p11, %p8994_p3 }
 0x956   : > { %6339 = vmatmul.mubr.bf16.gmra.mrb[128].mxu0 %v12925_v40 }
 0x957   : > { %6348 = vmatprep.mubr.bf16.mxu0 %v12926_v56  ;;  %6396 = vmatpush1.bf16.msra.mxu0 %v8310_v51  ;;  %p8997_p6 = pnand %p8996_p12, %p8990_p10 }
 0x958   : > { %6397 = vmatprep.subr.bf16.mxu0 %v8315_v47 }
 0x95b   : > { %6398 = vmatpush1.bf16.msra.mxu0 %v8313_v35 }
 0x95c   : > { %6399 = vmatprep.subr.bf16.mxu0 %v8318_v8  ;;  %v12955_v8 = vld [vmem:[#allocation30_spill] sm:$0xff] }
 0x95e   : > { %6349 = vmatmul.mubr.bf16.gmra.mrb[132].mxu0 %v12927_v4  ;;  %v12956_v4 = vld [vmem:[#allocation33_spill] sm:$0xff] }
 0x95f   : > { %6358 = vmatprep.mubr.bf16.mxu0 %v12928_v2  ;;  %6400 = vmatpush1.bf16.msra.mxu0 %v8316_v38 }
 0x960   : > { %6401 = vmatprep.subr.bf16.mxu0 %v8321_v53 }
 0x963   : > { %6402 = vmatpush1.bf16.msra.mxu0 %v8319_v10  ;;  %v12957_v10 = vld [vmem:[#allocation31_spill] sm:$0xff] }
 0x964   : > { %6403 = vmatprep.subr.bf16.mxu0 %v8324_v27 }
 0x966   : > { %6359 = vmatmul.mubr.bf16.gmra.mrb[136].mxu0 %v12929_v44 }
 0x967   : > { %6368 = vmatprep.mubr.bf16.mxu0 %v12930_v29  ;;  %6404 = vmatpush1.bf16.msra.mxu0 %v8322_v3 }
 0x968   : > { %6405 = vmatprep.subr.bf16.mxu0 %v8327_v41 }
 0x96b   : > { %6406 = vmatpush1.bf16.msra.mxu0 %v8325_v58 }
 0x96c   : > { %6407 = vmatprep.subr.bf16.mxu0 %v8330_v46 }
 0x96e   : > { %6369 = vmatmul.mubr.bf16.gmra.mrb[140].mxu0 %v12931_v59 }
 0x96f   : > { %6408 = vmatpush1.bf16.msra.mxu0 %v8328_v11  ;;  %6411 = vmatprep.mubr.bf16.mxu0 %v12932_v30 }
 0x970   : > { %6409 = vmatprep.subr.bf16.mxu0 %v8333_v31  ;;  %v12958_v31 = vld [vmem:[#allocation36_spill] sm:$0xff] }
 0x973   : > { %6410 = vmatpush1.bf16.msra.mxu0 %v8331_v50 }
 0x976   : > { %6412 = vmatmul.mubr.bf16.vlgmr.msra.gmra.mrb[112].mxu0 %v12935_v7 }
 0x977   : > { %6421 = vmatprep.mubr.bf16.mxu0 %v12937_v20 }
 0x97e   : > { %6422 = vmatmul.mubr.bf16.gmra.mrb[116].mxu0 %v12939_v6 }
 0x97f   : > { %6431 = vmatprep.mubr.bf16.mxu0 %v12940_v32 }
 0x986   : > { %6432 = vmatmul.mubr.bf16.gmra.mrb[120].mxu0 %v5218_v12 }
 0x987   : > { %6441 = vmatprep.mubr.bf16.mxu0 %v12941_v52 }
 0x98e   : > { %6442 = vmatmul.mubr.bf16.gmra.mrb[124].mxu0 %v12942_v36 }
 0x98f   : > { %6451 = vmatprep.mubr.bf16.mxu0 %v12943_v60 }
 0x996   : > { %6452 = vmatmul.mubr.bf16.gmra.mrb[128].mxu0 %v12944_v16 }
 0x997   : > { %6461 = vmatprep.mubr.bf16.mxu0 %v12945_v1 }
 0x99e   : > { %6462 = vmatmul.mubr.bf16.gmra.mrb[132].mxu0 %v12946_v43 }
 0x99f   : > { %6471 = vmatprep.mubr.bf16.mxu0 %v5251_v5 }
 0x9a6   : > { %6472 = vmatmul.mubr.bf16.gmra.mrb[136].mxu0 %v5250_v61 }
 0x9a7   : > { %6481 = vmatprep.mubr.bf16.mxu0 %v5259_v57  ;;  %v12954_v57 = vld [vmem:[#allocation32_spill] sm:$0xff] }
 0x9ae   : > { %6482 = vmatmul.mubr.bf16.gmra.mrb[140].mxu0 %v5258_v49 }
 0xa49   : > { %v6413_v37 = vpop.f32.mrb[112].mxu0 }
 0xa4a   : > { %v7703_v0 = vadd.f32 %v6413_v37, %v12124_v23  ;;  %v6415_v21 = vpop.f32.mrb[113].mxu0 }
 0xa4b   : > { %v7704_v28 = vadd.f32 %v6415_v21, %v12127_v39  ;;  %v6417_v12 = vpop.f32.mrb[114].mxu0 }
 0xa4c   : > { %v12132_v14 = vadd.f32 %v7703_v0, %v12950_v62  ;;  %v7705_v33 = vadd.f32 %v6417_v12, %v12124_v23  ;;  %v6419_v48 = vpop.f32.mrb[115].mxu0 }
 0xa4d   : > { %v12136_v63 = vadd.f32 %v7704_v28, %v12951_v54  ;;  %v7706_v13 = vadd.f32 %v6419_v48, %v12127_v39  ;;  %v12963_v28 = vld [vmem:[#allocation38_spill] sm:$0xff]  ;;  %v12965_v54 = vld [vmem:[#allocation39_spill] sm:$0xff] }
 0xa4e   : > { %v12140_v61 = vadd.f32 %v7705_v33, %v12952_v15  ;;  %v12964_v33 = vld [vmem:[#allocation41_spill] sm:$0xff] }
 0xa4f   : > { %v12143_v5 = vadd.f32 %v7706_v13, %v12953_v19  ;;  %v6524_v55 = vadd.f32 %v12136_v63, %v12132_v14 }
 0xa51   : > { %v6423_v24 = vpop.f32.mrb[116].mxu0  ;;  %6525 = vadd.xlane.f32.xlu0 %v6524_v55  ;;  %v6527_v49 = vadd.f32 %v12143_v5, %v12140_v61 }
 0xa52   : > { %v7707_v45 = vadd.f32 %v6423_v24, %v12124_v23  ;;  %v6425_v17 = vpop.f32.mrb[117].mxu0 }
 0xa53   : > { %v7708_v51 = vadd.f32 %v6425_v17, %v12127_v39  ;;  %v6427_v47 = vpop.f32.mrb[118].mxu0  ;;  %6528 = vadd.xlane.f32.xlu1 %v6527_v49 }
 0xa54   : > { %v12152_v40 = vadd.f32 %v7707_v45, %v12954_v57  ;;  %v7709_v56 = vadd.f32 %v6427_v47, %v12124_v23  ;;  %v6429_v35 = vpop.f32.mrb[119].mxu0 }
 0xa55   : > { %v12156_v38 = vadd.f32 %v7708_v51, %v12955_v8  ;;  %v7710_v53 = vadd.f32 %v6429_v35, %v12127_v39  ;;  %v12966_v51 = vld [vmem:[#allocation44_spill] sm:$0xff]  ;;  %v12967_v35 = vld [vmem:[#allocation42_spill] sm:$0xff] }
 0xa56   : > { %v12160_v2 = vadd.f32 %v7709_v56, %v12956_v4  ;;  %v12968_v4 = vld [vmem:[#allocation45_spill] sm:$0xff] }
 0xa57   : > { %v12163_v27 = vadd.f32 %v7710_v53, %v12957_v10  ;;  %v6530_v3 = vadd.f32 %v12156_v38, %v12152_v40 }
 0xa59   : > { %v6433_v41 = vpop.f32.mrb[120].mxu0  ;;  %6531 = vadd.xlane.f32.xlu0 %v6530_v3  ;;  %v6533_v44 = vadd.f32 %v12163_v27, %v12160_v2  ;;  %v12969_v3 = vld [vmem:[#allocation43_spill] sm:$0xff] }
 0xa5a   : > { %v7711_v29 = vadd.f32 %v6433_v41, %v12124_v23  ;;  %v6435_v58 = vpop.f32.mrb[121].mxu0 }
 0xa5b   : > { %v7712_v46 = vadd.f32 %v6435_v58, %v12127_v39  ;;  %v6437_v11 = vpop.f32.mrb[122].mxu0  ;;  %6534 = vadd.xlane.f32.xlu1 %v6533_v44 }
 0xa5c   : > { %v12172_v59 = vadd.f32 %v7711_v29, %v12958_v31  ;;  %v7713_v30 = vadd.f32 %v6437_v11, %v12124_v23  ;;  %v6439_v50 = vpop.f32.mrb[123].mxu0 }
 0xa5d   : > { %v12176_v34 = vadd.f32 %v7712_v46, %v12959_v22  ;;  %v7714_v7 = vadd.f32 %v6439_v50, %v12127_v39  ;;  %v12970_v50 = vld [vmem:[#allocation48_spill] sm:$0xff] }
 0xa5e   : > { %v12180_v20 = vadd.f32 %v7713_v30, %v12960_v9 }
 0xa5f   : > { %v12183_v6 = vadd.f32 %v7714_v7, %v12961_v25  ;;  %v6536_v32 = vadd.f32 %v12176_v34, %v12172_v59  ;;  %v12971_v25 = vld [vmem:[#allocation46_spill] sm:$0xff] }
 0xa61   : > { %v6443_v52 = vpop.f32.mrb[124].mxu0  ;;  %6537 = vadd.xlane.f32.xlu0 %v6536_v32  ;;  %v6539_v36 = vadd.f32 %v12183_v6, %v12180_v20 }
 0xa62   : > { %v7715_v60 = vadd.f32 %v6443_v52, %v12124_v23  ;;  %v6445_v16 = vpop.f32.mrb[125].mxu0 }
 0xa63   : > { %v7716_v1 = vadd.f32 %v6445_v16, %v12127_v39  ;;  %v6447_v43 = vpop.f32.mrb[126].mxu0  ;;  %6540 = vadd.xlane.f32.xlu1 %v6539_v36  ;;  %v12972_v36 = vld [vmem:[#allocation49_spill] sm:$0xff]  ;;  %v12973_v16 = vld [vmem:[#allocation47_spill] sm:$0xff] }
 0xa64   : > { %v12192_v37 = vadd.f32 %v7715_v60, %v12962_v26  ;;  %v7717_v0 = vadd.f32 %v6447_v43, %v12124_v23  ;;  %v6449_v21 = vpop.f32.mrb[127].mxu0 }
 0xa65   : > { %v12196_v12 = vadd.f32 %v7716_v1, %v12963_v28  ;;  %v7718_v62 = vadd.f32 %v6449_v21, %v12127_v39 }
 0xa66   : > { %v12200_v48 = vadd.f32 %v7717_v0, %v12964_v33 }
 0xa67   : > { %v12203_v13 = vadd.f32 %v7718_v62, %v12965_v54  ;;  %v6542_v15 = vadd.f32 %v12196_v12, %v12192_v37  ;;  %v12974_v54 = vld [vmem:[#allocation52_spill] sm:$0xff] }
 0xa69   : > { %v6453_v19 = vpop.f32.mrb[128].mxu0  ;;  %6543 = vadd.xlane.f32.xlu0 %v6542_v15  ;;  %v6545_v55 = vadd.f32 %v12203_v13, %v12200_v48 }
 0xa6a   : > { %v7719_v24 = vadd.f32 %v6453_v19, %v12124_v23  ;;  %v6455_v49 = vpop.f32.mrb[129].mxu0 }
 0xa6b   : > { %v7720_v45 = vadd.f32 %v6455_v49, %v12127_v39  ;;  %v6457_v17 = vpop.f32.mrb[130].mxu0  ;;  %6546 = vadd.xlane.f32.xlu1 %v6545_v55 }
 0xa6c   : > { %v12212_v47 = vadd.f32 %v7719_v24, %v12966_v51  ;;  %v7721_v57 = vadd.f32 %v6457_v17, %v12124_v23  ;;  %v6459_v56 = vpop.f32.mrb[131].mxu0  ;;  %v12975_v24 = vld [vmem:[#allocation50_spill] sm:$0xff]  ;;  %v12976_v17 = vld [vmem:[#allocation53_spill] sm:$0xff] }
 0xa6d   : > { %v12216_v8 = vadd.f32 %v7720_v45, %v12967_v35  ;;  %v7722_v53 = vadd.f32 %v6459_v56, %v12127_v39 }
 0xa6e   : > { %v12220_v10 = vadd.f32 %v7721_v57, %v12968_v4  ;;  %v12977_v57 = vld [vmem:[#allocation51_spill] sm:$0xff] }
 0xa6f   : > { %v12223_v41 = vadd.f32 %v7722_v53, %v12969_v3  ;;  %v6548_v44 = vadd.f32 %v12216_v8, %v12212_v47 }
 0xa71   : > { %v6463_v29 = vpop.f32.mrb[132].mxu0  ;;  %6549 = vadd.xlane.f32.xlu0 %v6548_v44  ;;  %v6551_v58 = vadd.f32 %v12223_v41, %v12220_v10 }
 0xa72   : > { %v7723_v46 = vadd.f32 %v6463_v29, %v12124_v23  ;;  %v6465_v11 = vpop.f32.mrb[133].mxu0 }
 0xa73   : > { %v7724_v31 = vadd.f32 %v6465_v11, %v12127_v39  ;;  %v6467_v30 = vpop.f32.mrb[134].mxu0  ;;  %6552 = vadd.xlane.f32.xlu1 %v6551_v58 }
 0xa74   : > { %v12232_v22 = vadd.f32 %v7723_v46, %v12970_v50  ;;  %v7725_v7 = vadd.f32 %v6467_v30, %v12124_v23  ;;  %v6469_v9 = vpop.f32.mrb[135].mxu0  ;;  %v12978_v46 = vld [vmem:[#allocation56_spill] sm:$0xff]  ;;  %v12979_v50 = vld [vmem:[#allocation54_spill] sm:$0xff] }
 0xa75   : > { %v12236_v32 = vadd.f32 %v7724_v31, %v12971_v25  ;;  %v7726_v52 = vadd.f32 %v6469_v9, %v12127_v39  ;;  %v12980_v25 = vld [vmem:[#allocation57_spill] sm:$0xff] }
 0xa76   : > { %v12240_v60 = vadd.f32 %v7725_v7, %v12972_v36  ;;  %v12981_v36 = vld [vmem:[#allocation55_spill] sm:$0xff] }
 0xa77   : > { %v12243_v1 = vadd.f32 %v7726_v52, %v12973_v16  ;;  %v6554_v43 = vadd.f32 %v12236_v32, %v12232_v22 }
 0xa79   : > { %v6473_v26 = vpop.f32.mrb[136].mxu0  ;;  %6555 = vadd.xlane.f32.xlu0 %v6554_v43  ;;  %v6557_v0 = vadd.f32 %v12243_v1, %v12240_v60 }
 0xa7a   : > { %v7727_v21 = vadd.f32 %v6473_v26, %v12124_v23  ;;  %v6475_v28 = vpop.f32.mrb[137].mxu0 }
 0xa7b   : > { %v7728_v62 = vadd.f32 %v6475_v28, %v12127_v39  ;;  %v6477_v33 = vpop.f32.mrb[138].mxu0  ;;  %6558 = vadd.xlane.f32.xlu1 %v6557_v0 }
 0xa7c   : > { %v12252_v15 = vadd.f32 %v7727_v21, %v12974_v54  ;;  %v7729_v19 = vadd.f32 %v6477_v33, %v12124_v23  ;;  %v6479_v55 = vpop.f32.mrb[139].mxu0 }
 0xa7d   : > { %v12256_v49 = vadd.f32 %v7728_v62, %v12975_v24  ;;  %v7730_v45 = vadd.f32 %v6479_v55, %v12127_v39 }
 0xa7e   : > { %v12260_v51 = vadd.f32 %v7729_v19, %v12976_v17 }
 0xa7f   : > { %v12263_v56 = vadd.f32 %v7730_v45, %v12977_v57  ;;  %v6560_v35 = vadd.f32 %v12256_v49, %v12252_v15 }
 0xa81   : > { %v6483_v53 = vpop.f32.mrb[140].mxu0  ;;  %6561 = vadd.xlane.f32.xlu0 %v6560_v35  ;;  %v6563_v4 = vadd.f32 %v12263_v56, %v12260_v51 }
 0xa82   : > { %v7731_v3 = vadd.f32 %v6483_v53, %v12124_v23  ;;  %v6485_v44 = vpop.f32.mrb[141].mxu0 }
 0xa83   : > { %v7732_v29 = vadd.f32 %v6485_v44, %v12127_v39  ;;  %v6487_v58 = vpop.f32.mrb[142].mxu0  ;;  %6564 = vadd.xlane.f32.xlu1 %v6563_v4 }
 0xa84   : > { %v12272_v11 = vadd.f32 %v7731_v3, %v12978_v46  ;;  %v7733_v31 = vadd.f32 %v6487_v58, %v12124_v23  ;;  %v6489_v30 = vpop.f32.mrb[143].mxu0 }
 0xa85   : > { %v12276_v7 = vadd.f32 %v7732_v29, %v12979_v50  ;;  %v7734_v9 = vadd.f32 %v6489_v30, %v12127_v39 }
 0xa86   : > { %v12280_v52 = vadd.f32 %v7733_v31, %v12980_v25 }
 0xa87   : > { %v12283_v16 = vadd.f32 %v7734_v9, %v12981_v36  ;;  %v6566_v43 = vadd.f32 %v12276_v7, %v12272_v11 }
 0xa89   : > { %6567 = vadd.xlane.f32.xlu0 %v6566_v43  ;;  %v6569_v26 = vadd.f32 %v12283_v16, %v12280_v52 }
 0xa8b   : > { %6570 = vadd.xlane.f32.xlu1 %v6569_v26 }
 0xade   : > { %v6526_v23 = vpop.xlane.xlu0 %6525 }
 0xadf   : > { %v6572_v0 = vmul.f32 0.00390625, %v6526_v23 }
 0xae0   : > { %v6529_v21 = vpop.xlane.xlu1 %6528 }
 0xae1   : > { %v12290_v28 = vsub.f32 %v12132_v14, %v6572_v0  ;;  %v12293_v39 = vsub.f32 %v12136_v63, %v6572_v0  ;;  %v6573_v62 = vmul.f32 0.00390625, %v6529_v21 }
 0xae3   : > { %v6620_v33 = vmul.f32 %v12290_v28, %v12290_v28  ;;  %v6621_v54 = vmul.f32 %v12293_v39, %v12293_v39  ;;  %v12300_v19 = vsub.f32 %v12140_v61, %v6573_v62  ;;  %v12303_v55 = vsub.f32 %v12143_v5, %v6573_v62 }
 0xae5   : > { %v6622_v14 = vmul.f32 %v12300_v19, %v12300_v19  ;;  %v6623_v63 = vmul.f32 %v12303_v55, %v12303_v55  ;;  %v6652_v24 = vadd.f32 %v6621_v54, %v6620_v33 }
 0xae6   : > { %v6532_v45 = vpop.xlane.xlu0 %6531 }
 0xae7   : > { %v6574_v17 = vmul.f32 0.00390625, %v6532_v45  ;;  %6653 = vadd.xlane.f32.xlu0 %v6652_v24  ;;  %v6655_v57 = vadd.f32 %v6623_v63, %v6622_v14 }
 0xae8   : > { %v6535_v35 = vpop.xlane.xlu1 %6534 }
 0xae9   : > { %v12310_v53 = vsub.f32 %v12152_v40, %v6574_v17  ;;  %v12313_v61 = vsub.f32 %v12156_v38, %v6574_v17  ;;  %v6575_v5 = vmul.f32 0.00390625, %v6535_v35  ;;  %6656 = vadd.xlane.f32.xlu1 %v6655_v57 }
 0xaeb   : > { %v6624_v4 = vmul.f32 %v12310_v53, %v12310_v53  ;;  %v6625_v3 = vmul.f32 %v12313_v61, %v12313_v61  ;;  %v12320_v44 = vsub.f32 %v12160_v2, %v6575_v5  ;;  %v12323_v29 = vsub.f32 %v12163_v27, %v6575_v5 }
 0xaed   : > { %v6626_v40 = vmul.f32 %v12320_v44, %v12320_v44  ;;  %v6627_v38 = vmul.f32 %v12323_v29, %v12323_v29  ;;  %v6658_v58 = vadd.f32 %v6625_v3, %v6624_v4 }
 0xaee   : > { %v6538_v46 = vpop.xlane.xlu0 %6537 }
 0xaef   : > { %v6576_v31 = vmul.f32 0.00390625, %v6538_v46  ;;  %6659 = vadd.xlane.f32.xlu0 %v6658_v58  ;;  %v6661_v30 = vadd.f32 %v6627_v38, %v6626_v40 }
 0xaf0   : > { %v6541_v50 = vpop.xlane.xlu1 %6540 }
 0xaf1   : > { %v12330_v9 = vsub.f32 %v12172_v59, %v6576_v31  ;;  %v12333_v2 = vsub.f32 %v12176_v34, %v6576_v31  ;;  %v6577_v27 = vmul.f32 0.00390625, %v6541_v50  ;;  %6662 = vadd.xlane.f32.xlu1 %v6661_v30 }
 0xaf3   : > { %v6628_v25 = vmul.f32 %v12330_v9, %v12330_v9  ;;  %v6629_v36 = vmul.f32 %v12333_v2, %v12333_v2  ;;  %v12340_v43 = vsub.f32 %v12180_v20, %v6577_v27  ;;  %v12343_v26 = vsub.f32 %v12183_v6, %v6577_v27 }
 0xaf5   : > { %v6630_v59 = vmul.f32 %v12340_v43, %v12340_v43  ;;  %v6631_v34 = vmul.f32 %v12343_v26, %v12343_v26  ;;  %v6664_v23 = vadd.f32 %v6629_v36, %v6628_v25 }
 0xaf6   : > { %v6544_v0 = vpop.xlane.xlu0 %6543 }
 0xaf7   : > { %v6578_v21 = vmul.f32 0.00390625, %v6544_v0  ;;  %6665 = vadd.xlane.f32.xlu0 %v6664_v23  ;;  %v6667_v62 = vadd.f32 %v6631_v34, %v6630_v59 }
 0xaf8   : > { %v6547_v33 = vpop.xlane.xlu1 %6546 }
 0xaf9   : > { %v12350_v54 = vsub.f32 %v12192_v37, %v6578_v21  ;;  %v12353_v20 = vsub.f32 %v12196_v12, %v6578_v21  ;;  %v6579_v6 = vmul.f32 0.00390625, %v6547_v33  ;;  %6668 = vadd.xlane.f32.xlu1 %v6667_v62 }
 0xafb   : > { %v6632_v14 = vmul.f32 %v12350_v54, %v12350_v54  ;;  %v6633_v63 = vmul.f32 %v12353_v20, %v12353_v20  ;;  %v12360_v24 = vsub.f32 %v12200_v48, %v6579_v6  ;;  %v12363_v45 = vsub.f32 %v12203_v13, %v6579_v6 }
 0xafd   : > { %v6634_v37 = vmul.f32 %v12360_v24, %v12360_v24  ;;  %v6635_v12 = vmul.f32 %v12363_v45, %v12363_v45  ;;  %v6670_v17 = vadd.f32 %v6633_v63, %v6632_v14 }
 0xafe   : > { %v6550_v57 = vpop.xlane.xlu0 %6549 }
 0xaff   : > { %v6580_v35 = vmul.f32 0.00390625, %v6550_v57  ;;  %6671 = vadd.xlane.f32.xlu0 %v6670_v17  ;;  %v6673_v5 = vadd.f32 %v6635_v12, %v6634_v37 }
 0xb00   : > { %v6553_v4 = vpop.xlane.xlu1 %6552 }
 0xb01   : > { %v12370_v3 = vsub.f32 %v12212_v47, %v6580_v35  ;;  %v12373_v48 = vsub.f32 %v12216_v8, %v6580_v35  ;;  %v6581_v13 = vmul.f32 0.00390625, %v6553_v4  ;;  %6674 = vadd.xlane.f32.xlu1 %v6673_v5 }
 0xb03   : > { %v6636_v40 = vmul.f32 %v12370_v3, %v12370_v3  ;;  %v6637_v38 = vmul.f32 %v12373_v48, %v12373_v48  ;;  %v12380_v58 = vsub.f32 %v12220_v10, %v6581_v13  ;;  %v12383_v46 = vsub.f32 %v12223_v41, %v6581_v13 }
 0xb05   : > { %v6638_v47 = vmul.f32 %v12380_v58, %v12380_v58  ;;  %v6639_v8 = vmul.f32 %v12383_v46, %v12383_v46  ;;  %v6676_v31 = vadd.f32 %v6637_v38, %v6636_v40 }
 0xb06   : > { %v6556_v30 = vpop.xlane.xlu0 %6555 }
 0xb07   : > { %v6582_v50 = vmul.f32 0.00390625, %v6556_v30  ;;  %6677 = vadd.xlane.f32.xlu0 %v6676_v31  ;;  %v6679_v27 = vadd.f32 %v6639_v8, %v6638_v47 }
 0xb08   : > { %v6559_v25 = vpop.xlane.xlu1 %6558 }
 0xb09   : > { %v12390_v36 = vsub.f32 %v12232_v22, %v6582_v50  ;;  %v12393_v10 = vsub.f32 %v12236_v32, %v6582_v50  ;;  %v6583_v41 = vmul.f32 0.00390625, %v6559_v25  ;;  %6680 = vadd.xlane.f32.xlu1 %v6679_v27 }
 0xb0b   : > { %v6640_v59 = vmul.f32 %v12390_v36, %v12390_v36  ;;  %v6641_v34 = vmul.f32 %v12393_v10, %v12393_v10  ;;  %v12400_v23 = vsub.f32 %v12240_v60, %v6583_v41  ;;  %v12403_v0 = vsub.f32 %v12243_v1, %v6583_v41 }
 0xb0d   : > { %v6642_v22 = vmul.f32 %v12400_v23, %v12400_v23  ;;  %v6643_v32 = vmul.f32 %v12403_v0, %v12403_v0  ;;  %v6682_v21 = vadd.f32 %v6641_v34, %v6640_v59 }
 0xb0e   : > { %v6562_v62 = vpop.xlane.xlu0 %6561 }
 0xb0f   : > { %v6584_v33 = vmul.f32 0.00390625, %v6562_v62  ;;  %6683 = vadd.xlane.f32.xlu0 %v6682_v21  ;;  %v6685_v6 = vadd.f32 %v6643_v32, %v6642_v22  ;;  %v6780_v62 = vld [vmem:[%s12982_s25] sm:$0x3] }
 0xb10   : > { %v6565_v14 = vpop.xlane.xlu1 %6564 }
 0xb11   : > { %v12410_v63 = vsub.f32 %v12252_v15, %v6584_v33  ;;  %v12413_v60 = vsub.f32 %v12256_v49, %v6584_v33  ;;  %v6585_v1 = vmul.f32 0.00390625, %v6565_v14  ;;  %6686 = vadd.xlane.f32.xlu1 %v6685_v6  ;;  %v6824_v14 = vld [vmem:[%s12983_s13] sm:$0x3] }
 0xb13   : > { %v6644_v37 = vmul.f32 %v12410_v63, %v12410_v63  ;;  %v6645_v12 = vmul.f32 %v12413_v60, %v12413_v60  ;;  %v12420_v17 = vsub.f32 %v12260_v51, %v6585_v1  ;;  %v12423_v57 = vsub.f32 %v12263_v56, %v6585_v1 }
 0xb15   : > { %v6646_v15 = vmul.f32 %v12420_v17, %v12420_v17  ;;  %v6647_v49 = vmul.f32 %v12423_v57, %v12423_v57  ;;  %v6688_v35 = vadd.f32 %v6645_v12, %v6644_v37  ;;  %v12456_v37 = vrot.slane %v6780_v62, %v12948_v42 }
 0xb16   : > { %v6568_v5 = vpop.xlane.xlu0 %6567  ;;  %v12459_v12 = vrot.slane %v6780_v62, %v12949_v18 }
 0xb17   : > { %v6586_v4 = vmul.f32 0.00390625, %v6568_v5  ;;  %6689 = vadd.xlane.f32.xlu0 %v6688_v35  ;;  %v6691_v13 = vadd.f32 %v6647_v49, %v6646_v15  ;;  %v12462_v49 = vrot.slane %v6824_v14, %v12948_v42  ;;  %v12465_v35 = vrot.slane %v6824_v14, %v12949_v18 }
 0xb18   : > { %v6571_v40 = vpop.xlane.xlu1 %6570 }
 0xb19   : > { %v12430_v38 = vsub.f32 %v12272_v11, %v6586_v4  ;;  %v12433_v51 = vsub.f32 %v12276_v7, %v6586_v4  ;;  %v6587_v56 = vmul.f32 0.00390625, %v6571_v40  ;;  %6692 = vadd.xlane.f32.xlu1 %v6691_v13 }
 0xb1b   : > { %v6648_v47 = vmul.f32 %v12430_v38, %v12430_v38  ;;  %v6649_v8 = vmul.f32 %v12433_v51, %v12433_v51  ;;  %v12440_v31 = vsub.f32 %v12280_v52, %v6587_v56  ;;  %v12443_v30 = vsub.f32 %v12283_v16, %v6587_v56 }
 0xb1d   : > { %v6650_v11 = vmul.f32 %v12440_v31, %v12440_v31  ;;  %v6651_v7 = vmul.f32 %v12443_v30, %v12443_v30  ;;  %v6694_v50 = vadd.f32 %v6649_v8, %v6648_v47 }
 0xb1f   : > { %6695 = vadd.xlane.f32.xlu0 %v6694_v50  ;;  %v6697_v27 = vadd.f32 %v6651_v7, %v6650_v11 }
 0xb21   : > { %6698 = vadd.xlane.f32.xlu1 %v6697_v27 }
 0xb74   : > { %v6654_v25 = vpop.xlane.xlu0 %6653 }
 0xb75   : > { %v6700_v41 = vmul.f32 0.00390625, %v6654_v25 }
 0xb76   : > { %v6657_v59 = vpop.xlane.xlu1 %6656 }
 0xb77   : > { %v6716_v34 = vadd.f32 1e-05, %v6700_v41  ;;  %v6701_v22 = vmul.f32 0.00390625, %v6657_v59 }
 0xb79   : > { %8750 = vrsqrt.f32 %v6716_v34  ;;  %v6717_v52 = vadd.f32 1e-05, %v6701_v22 }
 0xb7b   : > { %8752 = vrsqrt.f32 %v6717_v52 }
 0xb7c   : > { %v6660_v16 = vpop.xlane.xlu0 %6659 }
 0xb7d   : > { %v6702_v32 = vmul.f32 0.00390625, %v6660_v16 }
 0xb7e   : > { %v6663_v21 = vpop.xlane.xlu1 %6662 }
 0xb7f   : > { %v6718_v33 = vadd.f32 1e-05, %v6702_v32  ;;  %v6703_v6 = vmul.f32 0.00390625, %v6663_v21 }
 0xb81   : > { %8754 = vrsqrt.f32 %v6718_v33  ;;  %v6719_v1 = vadd.f32 1e-05, %v6703_v6 }
 0xb83   : > { %v8751_v15 = vpop.eup %8750  ;;  %8756 = vrsqrt.f32 %v6719_v1 }
 0xb84   : > { %v6748_v5 = vmul.f32 %v8751_v15, %v12290_v28  ;;  %v6749_v4 = vmul.f32 %v8751_v15, %v12293_v39  ;;  %v6666_v13 = vpop.xlane.xlu0 %6665 }
 0xb85   : > { %v8753_v40 = vpop.eup %8752  ;;  %v6704_v56 = vmul.f32 0.00390625, %v6666_v13 }
 0xb86   : > { %v6792_v47 = vmul.f32 %v12456_v37, %v6748_v5  ;;  %v6793_v8 = vmul.f32 %v12459_v12, %v6749_v4  ;;  %v6750_v11 = vmul.f32 %v8753_v40, %v12300_v19  ;;  %v6751_v42 = vmul.f32 %v8753_v40, %v12303_v55  ;;  %v6669_v7 = vpop.xlane.xlu1 %6668 }
 0xb87   : > { %v6720_v50 = vadd.f32 1e-05, %v6704_v56  ;;  %v6705_v18 = vmul.f32 0.00390625, %v6669_v7 }
 0xb88   : > { %v6836_v27 = vadd.f32 %v12462_v49, %v6792_v47  ;;  %v6837_v28 = vadd.f32 %v12465_v35, %v6793_v8  ;;  %v6794_v39 = vmul.f32 %v12456_v37, %v6750_v11  ;;  %v6795_v25 = vmul.f32 %v12459_v12, %v6751_v42 }
 0xb89   : > { %8758 = vrsqrt.f32 %v6720_v50  ;;  %v6721_v41 = vadd.f32 1e-05, %v6705_v18 }
 0xb8a   : > { %6868 = vst [vmem:[%s12478_s0] sm:$0xff] %v6836_v27  ;;  %6869 = vst [vmem:[%s12478_s0 + $0x8] sm:$0xff] %v6837_v28  ;;  %v6838_v19 = vadd.f32 %v12462_v49, %v6794_v39  ;;  %v6839_v55 = vadd.f32 %v12465_v35, %v6795_v25 }
 0xb8b   : > { %v8755_v59 = vpop.eup %8754  ;;  %8760 = vrsqrt.f32 %v6721_v41 }
 0xb8c   : > { %6870 = vst [vmem:[%s12478_s0 + $0x10] sm:$0xff] %v6838_v19  ;;  %6871 = vst [vmem:[%s12478_s0 + $0x18] sm:$0xff] %v6839_v55  ;;  %v6752_v34 = vmul.f32 %v8755_v59, %v12310_v53  ;;  %v6753_v22 = vmul.f32 %v8755_v59, %v12313_v61  ;;  %v6672_v52 = vpop.xlane.xlu0 %6671 }
 0xb8d   : > { %v8757_v16 = vpop.eup %8756  ;;  %v6706_v32 = vmul.f32 0.00390625, %v6672_v52 }
 0xb8e   : > { %v6796_v21 = vmul.f32 %v12456_v37, %v6752_v34  ;;  %v6797_v62 = vmul.f32 %v12459_v12, %v6753_v22  ;;  %v6754_v33 = vmul.f32 %v8757_v16, %v12320_v44  ;;  %v6755_v6 = vmul.f32 %v8757_v16, %v12323_v29  ;;  %v6675_v14 = vpop.xlane.xlu1 %6674 }
 0xb8f   : > { %v6722_v1 = vadd.f32 1e-05, %v6706_v32  ;;  %v6707_v53 = vmul.f32 0.00390625, %v6675_v14 }
 0xb90   : > { %v6840_v61 = vadd.f32 %v12462_v49, %v6796_v21  ;;  %v6841_v15 = vadd.f32 %v12465_v35, %v6797_v62  ;;  %v6798_v5 = vmul.f32 %v12456_v37, %v6754_v33  ;;  %v6799_v4 = vmul.f32 %v12459_v12, %v6755_v6 }
 0xb91   : > { %8762 = vrsqrt.f32 %v6722_v1  ;;  %v6723_v13 = vadd.f32 1e-05, %v6707_v53 }
 0xb92   : > { %6872 = vst [vmem:[%s12478_s0 + $0x20] sm:$0xff] %v6840_v61  ;;  %6873 = vst [vmem:[%s12478_s0 + $0x28] sm:$0xff] %v6841_v15  ;;  %v6842_v44 = vadd.f32 %v12462_v49, %v6798_v5  ;;  %v6843_v29 = vadd.f32 %v12465_v35, %v6799_v4 }
 0xb93   : > { %v8759_v40 = vpop.eup %8758  ;;  %8764 = vrsqrt.f32 %v6723_v13 }
 0xb94   : > { %6874 = vst [vmem:[%s12478_s0 + $0x30] sm:$0xff] %v6842_v44  ;;  %6875 = vst [vmem:[%s12478_s0 + $0x38] sm:$0xff] %v6843_v29  ;;  %v6756_v56 = vmul.f32 %v8759_v40, %v12330_v9  ;;  %v6757_v47 = vmul.f32 %v8759_v40, %v12333_v2  ;;  %v6678_v8 = vpop.xlane.xlu0 %6677 }
 0xb95   : > { %v8761_v11 = vpop.eup %8760  ;;  %v6708_v42 = vmul.f32 0.00390625, %v6678_v8 }
 0xb96   : > { %v6800_v7 = vmul.f32 %v12456_v37, %v6756_v56  ;;  %v6801_v50 = vmul.f32 %v12459_v12, %v6757_v47  ;;  %v6758_v18 = vmul.f32 %v8761_v11, %v12340_v43  ;;  %v6759_v27 = vmul.f32 %v8761_v11, %v12343_v26  ;;  %v6681_v28 = vpop.xlane.xlu1 %6680 }
 0xb97   : > { %v6724_v39 = vadd.f32 1e-05, %v6708_v42  ;;  %v6709_v9 = vmul.f32 0.00390625, %v6681_v28 }
 0xb98   : > { %v6844_v2 = vadd.f32 %v12462_v49, %v6800_v7  ;;  %v6845_v25 = vadd.f32 %v12465_v35, %v6801_v50  ;;  %v6802_v41 = vmul.f32 %v12456_v37, %v6758_v18  ;;  %v6803_v19 = vmul.f32 %v12459_v12, %v6759_v27 }
 0xb99   : > { %8766 = vrsqrt.f32 %v6724_v39  ;;  %v6725_v55 = vadd.f32 1e-05, %v6709_v9 }
 0xb9a   : > { %6876 = vst [vmem:[%s12478_s0 + $0x40] sm:$0xff] %v6844_v2  ;;  %6877 = vst [vmem:[%s12478_s0 + $0x48] sm:$0xff] %v6845_v25  ;;  %v6846_v43 = vadd.f32 %v12462_v49, %v6802_v41  ;;  %v6847_v26 = vadd.f32 %v12465_v35, %v6803_v19 }
 0xb9b   : > { %v8763_v59 = vpop.eup %8762  ;;  %8768 = vrsqrt.f32 %v6725_v55 }
 0xb9c   : > { %6878 = vst [vmem:[%s12478_s0 + $0x50] sm:$0xff] %v6846_v43  ;;  %6879 = vst [vmem:[%s12478_s0 + $0x58] sm:$0xff] %v6847_v26  ;;  %v6760_v34 = vmul.f32 %v8763_v59, %v12350_v54  ;;  %v6761_v22 = vmul.f32 %v8763_v59, %v12353_v20  ;;  %v6684_v52 = vpop.xlane.xlu0 %6683 }
 0xb9d   : > { %v8765_v16 = vpop.eup %8764  ;;  %v6710_v32 = vmul.f32 0.00390625, %v6684_v52 }
 0xb9e   : > { %v6804_v21 = vmul.f32 %v12456_v37, %v6760_v34  ;;  %v6805_v62 = vmul.f32 %v12459_v12, %v6761_v22  ;;  %v6762_v33 = vmul.f32 %v8765_v16, %v12360_v24  ;;  %v6763_v6 = vmul.f32 %v8765_v16, %v12363_v45  ;;  %v6687_v14 = vpop.xlane.xlu1 %6686 }
 0xb9f   : > { %v6726_v1 = vadd.f32 1e-05, %v6710_v32  ;;  %v6711_v54 = vmul.f32 0.00390625, %v6687_v14 }
 0xba0   : > { %v6848_v20 = vadd.f32 %v12462_v49, %v6804_v21  ;;  %v6849_v53 = vadd.f32 %v12465_v35, %v6805_v62  ;;  %v6806_v61 = vmul.f32 %v12456_v37, %v6762_v33  ;;  %v6807_v15 = vmul.f32 %v12459_v12, %v6763_v6 }
 0xba1   : > { %8770 = vrsqrt.f32 %v6726_v1  ;;  %v6727_v5 = vadd.f32 1e-05, %v6711_v54 }
 0xba2   : > { %6880 = vst [vmem:[%s12478_s0 + $0x60] sm:$0xff] %v6848_v20  ;;  %6881 = vst [vmem:[%s12478_s0 + $0x68] sm:$0xff] %v6849_v53  ;;  %v6850_v24 = vadd.f32 %v12462_v49, %v6806_v61  ;;  %v6851_v45 = vadd.f32 %v12465_v35, %v6807_v15 }
 0xba3   : > { %v8767_v4 = vpop.eup %8766  ;;  %8772 = vrsqrt.f32 %v6727_v5 }
 0xba4   : > { %6882 = vst [vmem:[%s12478_s0 + $0x70] sm:$0xff] %v6850_v24  ;;  %6883 = vst [vmem:[%s12478_s0 + $0x78] sm:$0xff] %v6851_v45  ;;  %v6764_v13 = vmul.f32 %v8767_v4, %v12370_v3  ;;  %v6765_v44 = vmul.f32 %v8767_v4, %v12373_v48  ;;  %v6690_v29 = vpop.xlane.xlu0 %6689 }
 0xba5   : > { %v8769_v40 = vpop.eup %8768  ;;  %v6712_v56 = vmul.f32 0.00390625, %v6690_v29 }
 0xba6   : > { %v6808_v47 = vmul.f32 %v12456_v37, %v6764_v13  ;;  %v6809_v8 = vmul.f32 %v12459_v12, %v6765_v44  ;;  %v6766_v11 = vmul.f32 %v8769_v40, %v12380_v58  ;;  %v6767_v42 = vmul.f32 %v8769_v40, %v12383_v46  ;;  %v6693_v7 = vpop.xlane.xlu1 %6692 }
 0xba7   : > { %v6728_v50 = vadd.f32 1e-05, %v6712_v56  ;;  %v6713_v3 = vmul.f32 0.00390625, %v6693_v7 }
 0xba8   : > { %v6852_v48 = vadd.f32 %v12462_v49, %v6808_v47  ;;  %v6853_v18 = vadd.f32 %v12465_v35, %v6809_v8  ;;  %v6810_v27 = vmul.f32 %v12456_v37, %v6766_v11  ;;  %v6811_v28 = vmul.f32 %v12459_v12, %v6767_v42 }
 0xba9   : > { %8774 = vrsqrt.f32 %v6728_v50  ;;  %v6729_v39 = vadd.f32 1e-05, %v6713_v3 }
 0xbaa   : > { %6884 = vst [vmem:[%s12478_s0 + $0x80] sm:$0xff] %v6852_v48  ;;  %6885 = vst [vmem:[%s12478_s0 + $0x88] sm:$0xff] %v6853_v18  ;;  %v6854_v58 = vadd.f32 %v12462_v49, %v6810_v27  ;;  %v6855_v46 = vadd.f32 %v12465_v35, %v6811_v28 }
 0xbab   : > { %v8771_v9 = vpop.eup %8770  ;;  %8776 = vrsqrt.f32 %v6729_v39 }
 0xbac   : > { %6886 = vst [vmem:[%s12478_s0 + $0x90] sm:$0xff] %v6854_v58  ;;  %6887 = vst [vmem:[%s12478_s0 + $0x98] sm:$0xff] %v6855_v46  ;;  %v6768_v2 = vmul.f32 %v8771_v9, %v12390_v36  ;;  %v6769_v25 = vmul.f32 %v8771_v9, %v12393_v10  ;;  %v6696_v41 = vpop.xlane.xlu0 %6695 }
 0xbad   : > { %v8773_v19 = vpop.eup %8772  ;;  %v6714_v55 = vmul.f32 0.00390625, %v6696_v41 }
 0xbae   : > { %v6812_v43 = vmul.f32 %v12456_v37, %v6768_v2  ;;  %v6813_v26 = vmul.f32 %v12459_v12, %v6769_v25  ;;  %v6770_v59 = vmul.f32 %v8773_v19, %v12400_v23  ;;  %v6771_v34 = vmul.f32 %v8773_v19, %v12403_v0  ;;  %v6699_v22 = vpop.xlane.xlu1 %6698 }
 0xbaf   : > { %v6730_v52 = vadd.f32 1e-05, %v6714_v55  ;;  %v6715_v36 = vmul.f32 0.00390625, %v6699_v22 }
 0xbb0   : > { %v6856_v10 = vadd.f32 %v12462_v49, %v6812_v43  ;;  %v6857_v16 = vadd.f32 %v12465_v35, %v6813_v26  ;;  %v6814_v32 = vmul.f32 %v12456_v37, %v6770_v59  ;;  %v6815_v21 = vmul.f32 %v12459_v12, %v6771_v34 }
 0xbb1   : > { %8778 = vrsqrt.f32 %v6730_v52  ;;  %v6731_v62 = vadd.f32 1e-05, %v6715_v36 }
 0xbb2   : > { %6888 = vst [vmem:[%s12478_s0 + $0xa0] sm:$0xff] %v6856_v10  ;;  %6889 = vst [vmem:[%s12478_s0 + $0xa8] sm:$0xff] %v6857_v16  ;;  %v6858_v23 = vadd.f32 %v12462_v49, %v6814_v32  ;;  %v6859_v0 = vadd.f32 %v12465_v35, %v6815_v21 }
 0xbb3   : > { %v8775_v33 = vpop.eup %8774  ;;  %8780 = vrsqrt.f32 %v6731_v62 }
 0xbb4   : > { %6890 = vst [vmem:[%s12478_s0 + $0xb0] sm:$0xff] %v6858_v23  ;;  %6891 = vst [vmem:[%s12478_s0 + $0xb8] sm:$0xff] %v6859_v0  ;;  %v6772_v6 = vmul.f32 %v8775_v33, %v12410_v63  ;;  %v6773_v14 = vmul.f32 %v8775_v33, %v12413_v60 }
 0xbb5   : > { %v8777_v1 = vpop.eup %8776 }
 0xbb6   : > { %v6816_v54 = vmul.f32 %v12456_v37, %v6772_v6  ;;  %v6817_v20 = vmul.f32 %v12459_v12, %v6773_v14  ;;  %v6774_v53 = vmul.f32 %v8777_v1, %v12420_v17  ;;  %v6775_v61 = vmul.f32 %v8777_v1, %v12423_v57 }
 0xbb8   : > { %v6860_v15 = vadd.f32 %v12462_v49, %v6816_v54  ;;  %v6861_v5 = vadd.f32 %v12465_v35, %v6817_v20  ;;  %v6818_v24 = vmul.f32 %v12456_v37, %v6774_v53  ;;  %v6819_v63 = vmul.f32 %v12459_v12, %v6775_v61 }
 0xbba   : > { %6892 = vst [vmem:[%s12478_s0 + $0xc0] sm:$0xff] %v6860_v15  ;;  %6893 = vst [vmem:[%s12478_s0 + $0xc8] sm:$0xff] %v6861_v5  ;;  %v6862_v60 = vadd.f32 %v12462_v49, %v6818_v24  ;;  %v6863_v45 = vadd.f32 %v12465_v35, %v6819_v63 }
 0xbbb   : > { %v8779_v4 = vpop.eup %8778 }
 0xbbc   : > { %6894 = vst [vmem:[%s12478_s0 + $0xd0] sm:$0xff] %v6862_v60  ;;  %6895 = vst [vmem:[%s12478_s0 + $0xd8] sm:$0xff] %v6863_v45  ;;  %v6776_v17 = vmul.f32 %v8779_v4, %v12430_v38  ;;  %v6777_v57 = vmul.f32 %v8779_v4, %v12433_v51 }
 0xbbd   : > { %v8781_v13 = vpop.eup %8780 }
 0xbbe   : > { %v6820_v44 = vmul.f32 %v12456_v37, %v6776_v17  ;;  %v6821_v29 = vmul.f32 %v12459_v12, %v6777_v57  ;;  %v6778_v40 = vmul.f32 %v8781_v13, %v12440_v31  ;;  %v6779_v56 = vmul.f32 %v8781_v13, %v12443_v30 }
 0xbc0   : > { %v6864_v38 = vadd.f32 %v12462_v49, %v6820_v44  ;;  %v6865_v47 = vadd.f32 %v12465_v35, %v6821_v29  ;;  %v6822_v51 = vmul.f32 %v12456_v37, %v6778_v40  ;;  %v6823_v8 = vmul.f32 %v12459_v12, %v6779_v56 }
 0xbc2   : > { %6896 = vst [vmem:[%s12478_s0 + $0xe0] sm:$0xff] %v6864_v38  ;;  %6897 = vst [vmem:[%s12478_s0 + $0xe8] sm:$0xff] %v6865_v47  ;;  %v6866_v31 = vadd.f32 %v12462_v49, %v6822_v51  ;;  %v6867_v30 = vadd.f32 %v12465_v35, %v6823_v8 }
 0xbc4   : > { %6898 = vst [vmem:[%s12478_s0 + $0xf0] sm:$0xff] %v6866_v31  ;;  %6899 = vst [vmem:[%s12478_s0 + $0xf8] sm:$0xff] %v6867_v30 }
 0xbc5   : > { %9000 = shalt.err (!%p8997_p6)
}
 0xbc6   : > { %s9001_s25 = scalar_lea.hbm %s12597_s23, 4096  ;;  %s9005_s13 = scalar_lea.hbm %s12985_s4, 8192 }
 0xbc7   : > { %p9002_p7 = scmp.ne.s32.totalorder %s12597_s23, %s9001_s25  ;;  %p9006_p1 = scmp.lt.u32.totalorder %s12597_s23, %s12985_s4 }
 0xbc8   : > { %p9007_p13 = scmp.lt.u32.totalorder %s9005_s13, %s9001_s25  ;;  %p9009_p2 = scmp.lt.u32.totalorder %s9001_s25, %s12597_s23 }
 0xbc9   : > { %p9003_p9 = pnand %p9002_p7, %p9351_p5 }
 0xbca   : > { %p9008_p4 = por %p9007_p13, %p9006_p1 }
 0xbcb   : > { %p9004_p0 = pneg %p9003_p9 }
 0xbcc   : > { %p9010_p8 = por %p9009_p2, %p9008_p4 }
 0xbce   : > { %p9011_p10 = pnand %p9010_p8, %p9004_p0 }
 0xbd0   : > { %9014 = shalt.err (!%p9011_p10)
}
 0xbd1   : > { %s9103_s20 = smov 256   ;;  %s9104_s22 = smov 16  }
 0xbd2   : > { %7851 = dma.vmem_to_hbm [thread:$0]  (%p9351_p5), %s12599_s29, 4096, %s12597_s23, %s6901_s9, %s9103_s20, %s9103_s20, %s9104_s22  }
 0xbd3 PF: > { %s12986_s12 = sld [smem:[#allocation20_spill]]  ;;  %s12987_s19 = sld [smem:[#allocation22_spill]] }
 0xbd4   : > { %p12989_p11 = scmp.ge.s32.totalorder %s9085_s18, 2 }
 0xbd9   : > { %s6932_s21 = sand.u32 1, %s12986_s12   ;;  %p12988_p3 = scmp.ne.s32.totalorder %s12987_s19, 0 }
 0xbda   : > { %s6933_s14 = scalar_lea.sflag [#allocation4], %s6932_s21 }
 0xbdb   : > { %p7874_p12 = pnand %p12989_p11, %p12988_p3 }
 0xbdd   : > { %9060 = dma.done.wait (!%p7874_p12), %s6933_s14, 4096  }
 0xbde   : > { %9062 = vsyncadd (!%p7874_p12), %s6933_s14, 4294963200  ;;  %s35_s18 = sadd.s32 1, %s9085_s18   ;;  %s12990_s2 = smov %s12997_s16 }
 0xbdf   : > { %p32_p6 = scmp.ge.s32.totalorder %s35_s18, 4   ;;  %s12991_s29 = smov %s9069_s30 }
 0xbe0   : > { %s12992_s30 = smov %s9073_s15  ;;  %s12993_s15 = smov %s9362_s27 }
 0xbe1   : > { %s12994_s16 = smov %s9081_s17  ;;  %s12995_s17 = smov %s12990_s2 }
 0xbe2   :  { %34 = sbr.rel (!%p32_p6) target bundleno = 21 (0x15), region = 150 }
 0xbe9   :  { %6938 = vsyncpa [#allocation3], 1 }
 0xbea   :  { %6940 = vsyncpa [#allocation3 + $0x1], 1 }
 0xbeb   :  { %6941 = vsyncpa [#allocation6], 1 }
 0xbec   :  { %6943 = vsyncpa [#allocation6 + $0x1], 1 }
 0xbed   :  { %6944 = vsyncpa [#allocation9], 1 }
 0xbee   :  { %6945 = vsyncpa [#allocation12], 1 }
 0xbef   :  { %6946 = vsyncpa [#allocation4], 1 }
 0xbf0   :  { %6948 = vsyncpa [#allocation4 + $0x1], 1 }

</bundles_post_ra>
